<compile_context>
chip_gen: v6e
topology: v6e:2x2x1
jax: 0.10.0
libtpu: 0.0.40
codegen_flags: <defaults>
</compile_context>

<pallas_src>
import numpy as np
import jax
import jax.numpy as jnp
from jax.experimental import pallas as pl
from jax.experimental.pallas import tpu as pltpu

# -------------------- configuration (small but consistent with the module) -------------
B, C, H, W = 2, 32, 16, 16
RED = 16
HID = C // RED                 # GAM bottleneck width          (= 2)
SA_HID = C // RED              # spatial-attention bottleneck  (= 2)
C2 = 2 * C                     # BasicLearningBlock expansion  (= 64)
CP = 128                       # stage-1 output width padded to a full lane group
HW = H * W                     # 256 real pixels
WP = W + 2                     # padded width                  (= 18)
MR = H * WP                    # rows of the flat layout       (= 288, incl. 2 junk cols/row)
PF = (H + 2) * WP + 4          # flat padded rows (+4 slack so every tap slice stays in-bounds)
K1 = 9 * C                     # im2col K for stage 1          (= 288)
K2 = 9 * CP                    # im2col K for stage 2          (= 1152)
PS_R = 56                      # rows of the packed small-parameter array
BN_EPS = 1e-5
HIGH = jax.lax.Precision.HIGHEST      # used by the pure-JAX reference only


def _elu(x):
    return jnp.where(x > 0, x, jnp.exp(jnp.minimum(x, 0.0)) - 1.0)


# ============================== Pallas kernel ==========================================
def urasc_kernel(xp_ref, vmask_ref, w1f_ref, w2f_ref, ps_ref,   # inputs
                 out_ref, mask_ref,                             # outputs (flat layout)
                 xcol_ref, f1p_ref, fcol_ref):                  # VMEM scratch (bf16)
    # ---- stage-1 im2col: 9 contiguous sublane slices of the flat padded feature -------
    for dy in range(3):
        for dx in range(3):
            t = 3 * dy + dx
            s = dy * WP + dx
            xcol_ref[:, t * C:(t + 1) * C] = xp_ref[s:s + MR, :].astype(jnp.bfloat16)

    xf = xp_ref[W + 3:W + 3 + MR, :]      # centre tap == raw feature (junk rows are exactly 0)
    vmask = vmask_ref[...]                # (MR, 1): 1.0 on real pixels, 0.0 on the junk columns

    # ---- global (channel) attention gates ----------------------------------------------
    avg = jnp.sum(xf, axis=0, keepdims=True) * (1.0 / HW)                    # (1, C)
    mxp = jnp.max(jnp.where(vmask > 0.5, xf, -1e30), axis=0, keepdims=True)  # (1, C)
    # packed GAM MLP: rows 0:6 of ps = [w1_avg | w1_max | b1] for (bg, mx, sp)
    h_all = jnp.maximum(
        jnp.sum(avg * ps_ref[0:6, 0:C], axis=1, keepdims=True)
        + jnp.sum(mxp * ps_ref[0:6, C:2 * C], axis=1, keepdims=True)
        + ps_ref[0:6, 2 * C:2 * C + 1], 0.0)                                 # (6, 1)
    y_bg = jax.nn.sigmoid(jnp.sum(h_all[0:2] * ps_ref[6:8, 0:C], axis=0, keepdims=True)
                          + ps_ref[10:11, 0:C])                              # (1, C)
    y_mix = jax.nn.sigmoid(jnp.sum(h_all[2:4] * ps_ref[8:10, 0:C], axis=0, keepdims=True)
                           + ps_ref[11:12, 0:C])                             # (1, C)
    # spliced-attention gate in column orientation (folds into the weight K rows)
    y_spl = jax.nn.sigmoid(ps_ref[12:12 + C, HID:HID + 1]
                           + ps_ref[12:12 + C, 0:1] * h_all[4:5, 0:1]
                           + ps_ref[12:12 + C, 1:2] * h_all[5:6, 0:1])       # (C, 1)
    gate_col = jnp.concatenate([y_spl] * 9, axis=0)                          # (K1, 1)

    scale1 = ps_ref[44:45, :]             # (1, CP)  [BN scale | 1 | 1...]
    shift1 = ps_ref[45:46, :]             # (1, CP)  [BN shift | sa bias | 0...]
    sel = ps_ref[46:47, :]                # (1, CP)  1.0 on LB columns, 0.0 elsewhere
    scale2 = ps_ref[47:48, 0:C + 1]       # (1, C+1) [BN scale | 1]
    shift2 = ps_ref[48:49, 0:C + 1]       # (1, C+1) [BN shift | sa bias]

    # ---- stage 1: one fused matmul (LB conv1 + SA conv1), gate folded into LB columns --
    w1 = (w1f_ref[...] * jnp.where(sel > 0.5, gate_col, 1.0)).astype(jnp.bfloat16)
    r1 = jnp.dot(xcol_ref[...], w1, preferred_element_type=jnp.float32)      # (MR, CP)
    r1 = r1 * scale1 + shift1
    # ELU on LB columns (sel=1), ReLU on SA / padding columns (sel=0)
    h1 = jnp.where(r1 > 0.0, r1, sel * (jnp.exp(jnp.minimum(r1, 0.0)) - 1.0))

    # shared padded (h1 | a1 | 0) scratch in the same flat layout: the masked junk rows
    # are exactly the column-border positions, so only top/bottom rows need zeroing.
    f1p_ref[0:W + 3, :] = jnp.zeros((W + 3, CP), jnp.bfloat16)
    f1p_ref[W + 3 + MR:PF, :] = jnp.zeros((PF - (W + 3 + MR), CP), jnp.bfloat16)
    f1p_ref[W + 3:W + 3 + MR, :] = (h1 * vmask).astype(jnp.bfloat16)

    # ---- stage-2 im2col: contiguous sublane slices, lane-aligned 128-wide chunks -------
    for dy in range(3):
        for dx in range(3):
            t = 3 * dy + dx
            s = dy * WP + dx
            fcol_ref[:, t * CP:(t + 1) * CP] = f1p_ref[s:s + MR, :]

    # fused LB conv2 (+BN+ELU) and SA conv2 (+bias+sigmoid) in one matmul
    r2 = jnp.dot(fcol_ref[...], w2f_ref[...], preferred_element_type=jnp.float32)  # (MR, C+1)
    r2 = r2 * scale2 + shift2
    lb = _elu(r2[:, 0:C])                                                    # (MR, C)
    maskv = jax.nn.sigmoid(r2[:, C:C + 1])                                   # (MR, 1)

    # ---- URASC blend (junk rows carry garbage; the wrapper slices them away) -----------
    out_ref[...] = (xf * y_bg) * (1.0 - maskv) + (lb + xf * y_mix) * maskv
    mask_ref[...] = maskv


# ============================== wrapper ================================================
def masked_urasc_pallas(feature_nchw, _m, kp):
    """feature_nchw: (B, C, H, W) like PyTorch; `_m` is ignored (as in the module)."""
    x = jnp.transpose(feature_nchw, (0, 2, 3, 1)).astype(jnp.float32)        # NCHW -> NHWC
    xp = jnp.pad(x, ((0, 0), (1, 1), (1, 1), (0, 0))).reshape(B, (H + 2) * WP, C)
    xp = jnp.pad(xp, ((0, 0), (0, PF - (H + 2) * WP), (0, 0)))               # flat + slack rows

    out_flat, mask_flat = pl.pallas_call(
        urasc_kernel,
        grid=(B,),
        in_specs=[
            pl.BlockSpec((None, PF, C), lambda b: (b, 0, 0)),       # feature (flat, padded)
            pl.BlockSpec((MR, 1), lambda b: (0, 0)),                # row-validity mask
            pl.BlockSpec((K1, CP), lambda b: (0, 0)),               # fused stage-1 weight (f32)
            pl.BlockSpec((K2, C + 1), lambda b: (0, 0)),            # fused stage-2 weight (bf16)
            pl.BlockSpec((PS_R, 128), lambda b: (0, 0)),            # packed small params
        ],
        out_specs=[
            pl.BlockSpec((None, MR, C), lambda b: (b, 0, 0)),
            pl.BlockSpec((None, MR, 1), lambda b: (b, 0, 0)),
        ],
        out_shape=(jax.ShapeDtypeStruct((B, MR, C), jnp.float32),
                   jax.ShapeDtypeStruct((B, MR, 1), jnp.float32)),
        scratch_shapes=[pltpu.VMEM((MR, K1), jnp.bfloat16),         # im2col of the feature
                        pltpu.VMEM((PF, CP), jnp.bfloat16),         # padded (h1 | a1 | 0)
                        pltpu.VMEM((MR, K2), jnp.bfloat16)],        # im2col of (h1 | a1 | 0)
        compiler_params=pltpu.CompilerParams(dimension_semantics=("parallel",)),
    )(xp, kp['vmask'], kp['w1f'], kp['w2f'], kp['psmall'])

    # flat -> (H, W+2) -> drop the two junk columns -> PyTorch NCHW convention
    out = out_flat.reshape(B, H, WP, C)[:, :, :W, :]
    mask = mask_flat.reshape(B, H, WP, 1)[:, :, :W, :]
    return jnp.transpose(out, (0, 3, 1, 2)), jnp.transpose(mask, (0, 3, 1, 2))


# ============================== deterministic parameters ===============================
def init_params(key):
    ks = iter(jax.random.split(key, 32))

    def nrm(shape, scale):
        return jax.random.normal(next(ks), shape, jnp.float32) * scale

    tp = {'gam': {}}
    for name in ('bg', 'mx', 'sp'):
        tp['gam'][name] = dict(w1=nrm((HID, 2 * C), 0.2), b1=nrm((HID,), 0.1),
                               w2=nrm((C, HID), 0.2), b2=nrm((C,), 0.1))
    tp['sa_w1'] = nrm((SA_HID, C, 3, 3), 0.1)
    tp['sa_b1'] = nrm((SA_HID,), 0.1)
    tp['sa_w2'] = nrm((1, SA_HID, 3, 3), 0.3)
    tp['sa_b2'] = nrm((1,), 0.1)
    tp['lb_w1'] = nrm((C2, C, 3, 3), 0.05)
    tp['lb_w2'] = nrm((C, C2, 3, 3), 0.05)
    for i, ch in ((1, C2), (2, C)):
        tp[f'lb_g{i}'] = 1.0 + nrm((ch,), 0.1)
        tp[f'lb_be{i}'] = nrm((ch,), 0.1)
        tp[f'lb_m{i}'] = nrm((ch,), 0.1)
        tp[f'lb_v{i}'] = 1.0 + jnp.abs(nrm((ch,), 0.1))
    return tp


def to_kernel_params(tp):
    def conv_taps(w_oihw):
        # (O, I, 3, 3) -> (9, I, O), tap index t = 3*ky + kx (cross-correlation, pad=1)
        o, i = w_oihw.shape[0], w_oihw.shape[1]
        return jnp.transpose(w_oihw, (2, 3, 1, 0)).reshape(9, i, o)

    def bn_fold(g, be, m, v):
        s = g / jnp.sqrt(v + BN_EPS)
        return s, be - m * s

    s1, t1 = bn_fold(tp['lb_g1'], tp['lb_be1'], tp['lb_m1'], tp['lb_v1'])    # (C2,)
    s2, t2 = bn_fold(tp['lb_g2'], tp['lb_be2'], tp['lb_m2'], tp['lb_v2'])    # (C,)

    # stage-1 fused weight: cols [0,C2)=LB conv1, [C2,C2+SA_HID)=SA conv1, rest zero pad
    w1 = jnp.zeros((9, C, CP), jnp.float32)
    w1 = w1.at[:, :, :C2].set(conv_taps(tp['lb_w1']))
    w1 = w1.at[:, :, C2:C2 + SA_HID].set(conv_taps(tp['sa_w1']))
    w1f = w1.reshape(K1, CP)                                                 # f32 (gate folded in-kernel)

    # stage-2 fused weight over the padded (h1 | a1 | 0) channel layout; col C = mask logit
    w2 = jnp.zeros((9, CP, C + 1), jnp.float32)
    w2 = w2.at[:, :C2, :C].set(conv_taps(tp['lb_w2']))
    w2 = w2.at[:, C2:C2 + SA_HID, C].set(conv_taps(tp['sa_w2'])[:, :, 0])
    w2f = w2.reshape(K2, C + 1).astype(jnp.bfloat16)

    # all small params packed into one (PS_R, 128) array
    ps = jnp.zeros((PS_R, 128), jnp.float32)
    for i, name in enumerate(('bg', 'mx', 'sp')):
        g = tp['gam'][name]
        ps = ps.at[2 * i:2 * i + 2, 0:2 * C].set(g['w1'])
        ps = ps.at[2 * i:2 * i + 2, 2 * C:2 * C + 1].set(g['b1'].reshape(HID, 1))
    ps = ps.at[6:8, 0:C].set(tp['gam']['bg']['w2'].T)
    ps = ps.at[8:10, 0:C].set(tp['gam']['mx']['w2'].T)
    ps = ps.at[10, 0:C].set(tp['gam']['bg']['b2'])
    ps = ps.at[11, 0:C].set(tp['gam']['mx']['b2'])
    ps = ps.at[12:12 + C, 0:HID].set(tp['gam']['sp']['w2'])
    ps = ps.at[12:12 + C, HID].set(tp['gam']['sp']['b2'])
    scale1 = jnp.ones((CP,), jnp.float32).at[:C2].set(s1)
    shift1 = jnp.zeros((CP,), jnp.float32).at[:C2].set(t1).at[C2:C2 + SA_HID].set(tp['sa_b1'])
    selrow = jnp.zeros((CP,), jnp.float32).at[:C2].set(1.0)
    scale2 = jnp.zeros((128,), jnp.float32).at[:C].set(s2).at[C].set(1.0)
    shift2 = jnp.zeros((128,), jnp.float32).at[:C].set(t2).at[C].set(tp['sa_b2'][0])
    ps = ps.at[44].set(scale1)
    ps = ps.at[45].set(shift1)
    ps = ps.at[46].set(selrow)
    ps = ps.at[47].set(scale2)
    ps = ps.at[48].set(shift2)

    # 1.0 on real pixels, 0.0 on the two junk columns per row of the flat layout
    vmask = (jnp.arange(MR) % WP < W).astype(jnp.float32).reshape(MR, 1)

    return dict(vmask=vmask, w1f=w1f, w2f=w2f, psmall=ps)


# ============================== pure-JAX reference (NCHW, PyTorch semantics) ===========
def reference_forward(x, tp):
    def conv3(inp, w, b=None):
        o = jax.lax.conv_general_dilated(inp, w, (1, 1), ((1, 1), (1, 1)),
                                         dimension_numbers=('NCHW', 'OIHW', 'NCHW'),
                                         precision=HIGH)
        return o if b is None else o + b[None, :, None, None]

    def gam(inp, p):
        avg = inp.mean(axis=(2, 3))
        mx = inp.max(axis=(2, 3))
        z = jnp.concatenate([avg, mx], axis=1)
        h = jax.nn.relu(jnp.dot(z, p['w1'].T, precision=HIGH) + p['b1'])
        y = jax.nn.sigmoid(jnp.dot(h, p['w2'].T, precision=HIGH) + p['b2'])
        return inp * y[:, :, None, None]

    def bn(inp, g, be, m, v):
        return (inp - m[None, :, None, None]) / jnp.sqrt(v[None, :, None, None] + BN_EPS) \
               * g[None, :, None, None] + be[None, :, None, None]

    a1 = jax.nn.relu(conv3(x, tp['sa_w1'], tp['sa_b1']))
    mask = jax.nn.sigmoid(conv3(a1, tp['sa_w2'], tp['sa_b2']))
    rmask = 1.0 - mask

    background = gam(x, tp['gam']['bg']) * rmask
    selected = gam(x, tp['gam']['mx'])
    spliced_feat = gam(x, tp['gam']['sp'])
    h1 = _elu(bn(conv3(spliced_feat, tp['lb_w1']),
                 tp['lb_g1'], tp['lb_be1'], tp['lb_m1'], tp['lb_v1']))
    lb = _elu(bn(conv3(h1, tp['lb_w2']),
                 tp['lb_g2'], tp['lb_be2'], tp['lb_m2'], tp['lb_v2']))
    spliced = (lb + selected) * mask
    return background + spliced, mask


# ============================== main ===================================================
if __name__ == "__main__":
    key = jax.random.PRNGKey(0)
    p_key, x_key = jax.random.split(key)
    tp = init_params(p_key)
    kp = to_kernel_params(tp)

    feature = jax.random.normal(x_key, (B, C, H, W), jnp.float32)   # PyTorch NCHW input
    _m = jnp.zeros((B, 1, H, W), jnp.float32)                       # ignored by the forward

    out, mask = masked_urasc_pallas(feature, _m, kp)
    out, mask = jax.block_until_ready((out, mask))

    ref_out, ref_mask = reference_forward(feature, tp)
    # Kernel runs bf16 MXU matmuls AND bf16 im2col/activation scratches (per the perf
    # review), so the comparison against the f32 (HIGHEST) reference uses tolerances
    # sized for bf16 rounding accumulated through the two fused convolutions.
    np.testing.assert_allclose(np.asarray(mask), np.asarray(ref_mask), rtol=2e-2, atol=3e-2)
    np.testing.assert_allclose(np.asarray(out), np.asarray(ref_out), rtol=2e-2, atol=8e-2)
    print("KERNEL_OK")
</pallas_src>

<mosaic_0001>
module attributes {stable_mosaic.version = 11 : i64} {
  func.func @urasc_kernel(%arg0: i32, %arg1: memref<1x328x32xf32, #tpu.memory_space<vmem>>, %arg2: memref<288x1xf32, #tpu.memory_space<vmem>>, %arg3: memref<288x128xf32, #tpu.memory_space<vmem>>, %arg4: memref<1152x33xbf16, #tpu.memory_space<vmem>>, %arg5: memref<56x128xf32, #tpu.memory_space<vmem>>, %arg6: memref<1x288x32xf32, #tpu.memory_space<vmem>>, %arg7: memref<1x288x1xf32, #tpu.memory_space<vmem>>, %arg8: memref<288x288xbf16, #tpu.memory_space<vmem>>, %arg9: memref<328x128xbf16, #tpu.memory_space<vmem>>, %arg10: memref<288x1152xbf16, #tpu.memory_space<vmem>>) attributes {dimension_semantics = [#tpu.dimension_semantics<parallel>], iteration_bounds = array<i64: 2>, scalar_prefetch = 0 : i64, scratch_operands = 3 : i64, tpu.core_type = #tpu.core_type<tc>, window_params = [{transform_indices = @transform_0, window_bounds = array<i64: 1, 328, 32>}, {pipeline_mode = #tpu.pipeline_mode<synchronous>, transform_indices = @transform_1, window_bounds = array<i64: 288, 1>}, {pipeline_mode = #tpu.pipeline_mode<synchronous>, transform_indices = @transform_2, window_bounds = array<i64: 288, 128>}, {pipeline_mode = #tpu.pipeline_mode<synchronous>, transform_indices = @transform_3, window_bounds = array<i64: 1152, 33>}, {pipeline_mode = #tpu.pipeline_mode<synchronous>, transform_indices = @transform_4, window_bounds = array<i64: 56, 128>}, {transform_indices = @transform_5, window_bounds = array<i64: 1, 288, 32>}, {transform_indices = @transform_6, window_bounds = array<i64: 1, 288, 1>}]} {
    %c0 = arith.constant 0 : index
    %c0_0 = arith.constant 0 : index
    %c0_1 = arith.constant 0 : index
    %0 = vector.load %arg1[%c0, %c0_0, %c0_1] : memref<1x328x32xf32, #tpu.memory_space<vmem>>, vector<1x288x32xf32>
    %1 = vector.shape_cast %0 : vector<1x288x32xf32> to vector<288x32xf32>
    %2 = arith.truncf %1 : vector<288x32xf32> to vector<288x32xbf16>
    %c0_2 = arith.constant 0 : index
    %c0_3 = arith.constant 0 : index
    %3 = vector.load %arg8[%c0_2, %c0_3] : memref<288x288xbf16, #tpu.memory_space<vmem>>, vector<288x32xbf16>
    tpu.vector_store %arg8[%c0_2, %c0_3], %2 {strides = array<i32>} : memref<288x288xbf16, #tpu.memory_space<vmem>>, vector<288x32xbf16>,
    %c0_4 = arith.constant 0 : index
    %c1 = arith.constant 1 : index
    %c0_5 = arith.constant 0 : index
    %4 = vector.load %arg1[%c0_4, %c1, %c0_5] : memref<1x328x32xf32, #tpu.memory_space<vmem>>, vector<1x288x32xf32>
    %5 = vector.shape_cast %4 : vector<1x288x32xf32> to vector<288x32xf32>
    %6 = arith.truncf %5 : vector<288x32xf32> to vector<288x32xbf16>
    %c0_6 = arith.constant 0 : index
    %c32 = arith.constant 32 : index
    %7 = vector.load %arg8[%c0_6, %c32] : memref<288x288xbf16, #tpu.memory_space<vmem>>, vector<288x32xbf16>
    tpu.vector_store %arg8[%c0_6, %c32], %6 {strides = array<i32>} : memref<288x288xbf16, #tpu.memory_space<vmem>>, vector<288x32xbf16>,
    %c0_7 = arith.constant 0 : index
    %c2 = arith.constant 2 : index
    %c0_8 = arith.constant 0 : index
    %8 = vector.load %arg1[%c0_7, %c2, %c0_8] : memref<1x328x32xf32, #tpu.memory_space<vmem>>, vector<1x288x32xf32>
    %9 = vector.shape_cast %8 : vector<1x288x32xf32> to vector<288x32xf32>
    %10 = arith.truncf %9 : vector<288x32xf32> to vector<288x32xbf16>
    %c0_9 = arith.constant 0 : index
    %c64 = arith.constant 64 : index
    %11 = vector.load %arg8[%c0_9, %c64] : memref<288x288xbf16, #tpu.memory_space<vmem>>, vector<288x32xbf16>
    tpu.vector_store %arg8[%c0_9, %c64], %10 {strides = array<i32>} : memref<288x288xbf16, #tpu.memory_space<vmem>>, vector<288x32xbf16>,
    %c0_10 = arith.constant 0 : index
    %c18 = arith.constant 18 : index
    %c0_11 = arith.constant 0 : index
    %12 = vector.load %arg1[%c0_10, %c18, %c0_11] : memref<1x328x32xf32, #tpu.memory_space<vmem>>, vector<1x288x32xf32>
    %13 = vector.shape_cast %12 : vector<1x288x32xf32> to vector<288x32xf32>
    %14 = arith.truncf %13 : vector<288x32xf32> to vector<288x32xbf16>
    %c0_12 = arith.constant 0 : index
    %c96 = arith.constant 96 : index
    %15 = vector.load %arg8[%c0_12, %c96] : memref<288x288xbf16, #tpu.memory_space<vmem>>, vector<288x32xbf16>
    tpu.vector_store %arg8[%c0_12, %c96], %14 {strides = array<i32>} : memref<288x288xbf16, #tpu.memory_space<vmem>>, vector<288x32xbf16>,
    %c0_13 = arith.constant 0 : index
    %c19 = arith.constant 19 : index
    %c0_14 = arith.constant 0 : index
    %16 = vector.load %arg1[%c0_13, %c19, %c0_14] : memref<1x328x32xf32, #tpu.memory_space<vmem>>, vector<1x288x32xf32>
    %17 = vector.shape_cast %16 : vector<1x288x32xf32> to vector<288x32xf32>
    %18 = arith.truncf %17 : vector<288x32xf32> to vector<288x32xbf16>
    %c0_15 = arith.constant 0 : index
    %c128 = arith.constant 128 : index
    %19 = vector.load %arg8[%c0_15, %c128] : memref<288x288xbf16, #tpu.memory_space<vmem>>, vector<288x32xbf16>
    tpu.vector_store %arg8[%c0_15, %c128], %18 {strides = array<i32>} : memref<288x288xbf16, #tpu.memory_space<vmem>>, vector<288x32xbf16>,
    %c0_16 = arith.constant 0 : index
    %c20 = arith.constant 20 : index
    %c0_17 = arith.constant 0 : index
    %20 = vector.load %arg1[%c0_16, %c20, %c0_17] : memref<1x328x32xf32, #tpu.memory_space<vmem>>, vector<1x288x32xf32>
    %21 = vector.shape_cast %20 : vector<1x288x32xf32> to vector<288x32xf32>
    %22 = arith.truncf %21 : vector<288x32xf32> to vector<288x32xbf16>
    %c0_18 = arith.constant 0 : index
    %c160 = arith.constant 160 : index
    %23 = vector.load %arg8[%c0_18, %c160] : memref<288x288xbf16, #tpu.memory_space<vmem>>, vector<288x32xbf16>
    tpu.vector_store %arg8[%c0_18, %c160], %22 {strides = array<i32>} : memref<288x288xbf16, #tpu.memory_space<vmem>>, vector<288x32xbf16>,
    %c0_19 = arith.constant 0 : index
    %c36 = arith.constant 36 : index
    %c0_20 = arith.constant 0 : index
    %24 = vector.load %arg1[%c0_19, %c36, %c0_20] : memref<1x328x32xf32, #tpu.memory_space<vmem>>, vector<1x288x32xf32>
    %25 = vector.shape_cast %24 : vector<1x288x32xf32> to vector<288x32xf32>
    %26 = arith.truncf %25 : vector<288x32xf32> to vector<288x32xbf16>
    %c0_21 = arith.constant 0 : index
    %c192 = arith.constant 192 : index
    %27 = vector.load %arg8[%c0_21, %c192] : memref<288x288xbf16, #tpu.memory_space<vmem>>, vector<288x32xbf16>
    tpu.vector_store %arg8[%c0_21, %c192], %26 {strides = array<i32>} : memref<288x288xbf16, #tpu.memory_space<vmem>>, vector<288x32xbf16>,
    %c0_22 = arith.constant 0 : index
    %c37 = arith.constant 37 : index
    %c0_23 = arith.constant 0 : index
    %28 = vector.load %arg1[%c0_22, %c37, %c0_23] : memref<1x328x32xf32, #tpu.memory_space<vmem>>, vector<1x288x32xf32>
    %29 = vector.shape_cast %28 : vector<1x288x32xf32> to vector<288x32xf32>
    %30 = arith.truncf %29 : vector<288x32xf32> to vector<288x32xbf16>
    %c0_24 = arith.constant 0 : index
    %c224 = arith.constant 224 : index
    %31 = vector.load %arg8[%c0_24, %c224] : memref<288x288xbf16, #tpu.memory_space<vmem>>, vector<288x32xbf16>
    tpu.vector_store %arg8[%c0_24, %c224], %30 {strides = array<i32>} : memref<288x288xbf16, #tpu.memory_space<vmem>>, vector<288x32xbf16>,
    %c0_25 = arith.constant 0 : index
    %c38 = arith.constant 38 : index
    %c0_26 = arith.constant 0 : index
    %32 = vector.load %arg1[%c0_25, %c38, %c0_26] : memref<1x328x32xf32, #tpu.memory_space<vmem>>, vector<1x288x32xf32>
    %33 = vector.shape_cast %32 : vector<1x288x32xf32> to vector<288x32xf32>
    %34 = arith.truncf %33 : vector<288x32xf32> to vector<288x32xbf16>
    %c0_27 = arith.constant 0 : index
    %c256 = arith.constant 256 : index
    %35 = vector.load %arg8[%c0_27, %c256] : memref<288x288xbf16, #tpu.memory_space<vmem>>, vector<288x32xbf16>
    tpu.vector_store %arg8[%c0_27, %c256], %34 {strides = array<i32>} : memref<288x288xbf16, #tpu.memory_space<vmem>>, vector<288x32xbf16>,
    %c0_28 = arith.constant 0 : index
    %c19_29 = arith.constant 19 : index
    %c0_30 = arith.constant 0 : index
    %36 = vector.load %arg1[%c0_28, %c19_29, %c0_30] : memref<1x328x32xf32, #tpu.memory_space<vmem>>, vector<1x288x32xf32>
    %37 = vector.shape_cast %36 : vector<1x288x32xf32> to vector<288x32xf32>
    %c0_31 = arith.constant 0 : index
    %c0_32 = arith.constant 0 : index
    %38 = vector.load %arg2[%c0_31, %c0_32] : memref<288x1xf32, #tpu.memory_space<vmem>>, vector<288x1xf32>
    %cst = arith.constant dense<0.000000e+00> : vector<32xf32>
    %39 = vector.multi_reduction <add>, %37, %cst [0] : vector<288x32xf32> to vector<32xf32>
    %40 = vector.shape_cast %39 : vector<32xf32> to vector<1x32xf32>
    %cst_33 = arith.constant 3.906250e-03 : f32
    %41 = vector.broadcast %cst_33 : f32 to vector<1x32xf32>
    %42 = arith.mulf %40, %41 : vector<1x32xf32>
    %cst_34 = arith.constant 5.000000e-01 : f32
    %43 = vector.broadcast %cst_34 : f32 to vector<288x1xf32>
    %44 = arith.cmpf ogt, %38, %43 : vector<288x1xf32>
    %cst_35 = arith.constant -1.000000e+30 : f32
    %45 = vector.shape_cast %44 : vector<288x1xi1> to vector<288x1xi1>
    %46 = vector.broadcast %45 : vector<288x1xi1> to vector<288x32xi1>
    %47 = vector.broadcast %cst_35 : f32 to vector<288x32xf32>
    %48 = arith.select %46, %37, %47 : vector<288x32xi1>, vector<288x32xf32>
    %cst_36 = arith.constant dense<0xFF800000> : vector<32xf32>
    %49 = vector.multi_reduction <maximumf>, %48, %cst_36 [0] : vector<288x32xf32> to vector<32xf32>
    %50 = vector.shape_cast %49 : vector<32xf32> to vector<1x32xf32>
    %c0_37 = arith.constant 0 : index
    %c0_38 = arith.constant 0 : index
    %51 = vector.load %arg5[%c0_37, %c0_38] : memref<56x128xf32, #tpu.memory_space<vmem>>, vector<6x32xf32>
    %52 = vector.broadcast %42 : vector<1x32xf32> to vector<6x32xf32>
    %53 = arith.mulf %52, %51 : vector<6x32xf32>
    %cst_39 = arith.constant dense<0.000000e+00> : vector<6xf32>
    %54 = vector.multi_reduction <add>, %53, %cst_39 [1] : vector<6x32xf32> to vector<6xf32>
    %55 = vector.shape_cast %54 : vector<6xf32> to vector<6x1xf32>
    %c0_40 = arith.constant 0 : index
    %c32_41 = arith.constant 32 : index
    %56 = vector.load %arg5[%c0_40, %c32_41] : memref<56x128xf32, #tpu.memory_space<vmem>>, vector<6x32xf32>
    %57 = vector.broadcast %50 : vector<1x32xf32> to vector<6x32xf32>
    %58 = arith.mulf %57, %56 : vector<6x32xf32>
    %cst_42 = arith.constant dense<0.000000e+00> : vector<6xf32>
    %59 = vector.multi_reduction <add>, %58, %cst_42 [1] : vector<6x32xf32> to vector<6xf32>
    %60 = vector.shape_cast %59 : vector<6xf32> to vector<6x1xf32>
    %61 = arith.addf %55, %60 : vector<6x1xf32>
    %c0_43 = arith.constant 0 : index
    %c64_44 = arith.constant 64 : index
    %62 = vector.load %arg5[%c0_43, %c64_44] : memref<56x128xf32, #tpu.memory_space<vmem>>, vector<6x1xf32>
    %63 = arith.addf %61, %62 : vector<6x1xf32>
    %cst_45 = arith.constant 0.000000e+00 : f32
    %64 = vector.broadcast %cst_45 : f32 to vector<6x1xf32>
    %65 = arith.maximumf %63, %64 : vector<6x1xf32>
    %66 = vector.extract_strided_slice %65 {offsets = [0, 0], sizes = [2, 1], strides = [1, 1]} : vector<6x1xf32> to vector<2x1xf32>
    %c6 = arith.constant 6 : index
    %c0_46 = arith.constant 0 : index
    %67 = vector.load %arg5[%c6, %c0_46] : memref<56x128xf32, #tpu.memory_space<vmem>>, vector<2x32xf32>
    %68 = vector.broadcast %66 : vector<2x1xf32> to vector<2x32xf32>
    %69 = arith.mulf %68, %67 : vector<2x32xf32>
    %cst_47 = arith.constant dense<0.000000e+00> : vector<32xf32>
    %70 = vector.multi_reduction <add>, %69, %cst_47 [0] : vector<2x32xf32> to vector<32xf32>
    %71 = vector.shape_cast %70 : vector<32xf32> to vector<1x32xf32>
    %c10 = arith.constant 10 : index
    %c0_48 = arith.constant 0 : index
    %72 = vector.load %arg5[%c10, %c0_48] : memref<56x128xf32, #tpu.memory_space<vmem>>, vector<1x32xf32>
    %73 = arith.addf %71, %72 : vector<1x32xf32>
    %74 = arith.negf %73 : vector<1x32xf32>
    %75 = math.exp %74 : vector<1x32xf32>
    %cst_49 = arith.constant 1.000000e+00 : f32
    %76 = vector.broadcast %cst_49 : f32 to vector<1x32xf32>
    %77 = arith.addf %76, %75 : vector<1x32xf32>
    %78 = arith.divf %76, %77 : vector<1x32xf32>
    %79 = vector.extract_strided_slice %65 {offsets = [2, 0], sizes = [2, 1], strides = [1, 1]} : vector<6x1xf32> to vector<2x1xf32>
    %c8 = arith.constant 8 : index
    %c0_50 = arith.constant 0 : index
    %80 = vector.load %arg5[%c8, %c0_50] : memref<56x128xf32, #tpu.memory_space<vmem>>, vector<2x32xf32>
    %81 = vector.broadcast %79 : vector<2x1xf32> to vector<2x32xf32>
    %82 = arith.mulf %81, %80 : vector<2x32xf32>
    %cst_51 = arith.constant dense<0.000000e+00> : vector<32xf32>
    %83 = vector.multi_reduction <add>, %82, %cst_51 [0] : vector<2x32xf32> to vector<32xf32>
    %84 = vector.shape_cast %83 : vector<32xf32> to vector<1x32xf32>
    %c11 = arith.constant 11 : index
    %c0_52 = arith.constant 0 : index
    %85 = vector.load %arg5[%c11, %c0_52] : memref<56x128xf32, #tpu.memory_space<vmem>>, vector<1x32xf32>
    %86 = arith.addf %84, %85 : vector<1x32xf32>
    %87 = arith.negf %86 : vector<1x32xf32>
    %88 = math.exp %87 : vector<1x32xf32>
    %cst_53 = arith.constant 1.000000e+00 : f32
    %89 = vector.broadcast %cst_53 : f32 to vector<1x32xf32>
    %90 = arith.addf %89, %88 : vector<1x32xf32>
    %91 = arith.divf %89, %90 : vector<1x32xf32>
    %c12 = arith.constant 12 : index
    %c2_54 = arith.constant 2 : index
    %92 = vector.load %arg5[%c12, %c2_54] : memref<56x128xf32, #tpu.memory_space<vmem>>, vector<32x1xf32>
    %c12_55 = arith.constant 12 : index
    %c0_56 = arith.constant 0 : index
    %93 = vector.load %arg5[%c12_55, %c0_56] : memref<56x128xf32, #tpu.memory_space<vmem>>, vector<32x1xf32>
    %94 = vector.extract_strided_slice %65 {offsets = [4, 0], sizes = [1, 1], strides = [1, 1]} : vector<6x1xf32> to vector<1x1xf32>
    %95 = vector.broadcast %94 : vector<1x1xf32> to vector<32x1xf32>
    %96 = arith.mulf %93, %95 : vector<32x1xf32>
    %97 = arith.addf %92, %96 : vector<32x1xf32>
    %c12_57 = arith.constant 12 : index
    %c1_58 = arith.constant 1 : index
    %98 = vector.load %arg5[%c12_57, %c1_58] : memref<56x128xf32, #tpu.memory_space<vmem>>, vector<32x1xf32>
    %99 = vector.extract_strided_slice %65 {offsets = [5, 0], sizes = [1, 1], strides = [1, 1]} : vector<6x1xf32> to vector<1x1xf32>
    %100 = vector.broadcast %99 : vector<1x1xf32> to vector<32x1xf32>
    %101 = arith.mulf %98, %100 : vector<32x1xf32>
    %102 = arith.addf %97, %101 : vector<32x1xf32>
    %103 = arith.negf %102 : vector<32x1xf32>
    %104 = math.exp %103 : vector<32x1xf32>
    %cst_59 = arith.constant 1.000000e+00 : f32
    %105 = vector.broadcast %cst_59 : f32 to vector<32x1xf32>
    %106 = arith.addf %105, %104 : vector<32x1xf32>
    %107 = arith.divf %105, %106 : vector<32x1xf32>
    %108 = tpu.concatenate %107, %107, %107, %107, %107, %107, %107, %107, %107 in 0 : vector<32x1xf32>, vector<32x1xf32>, vector<32x1xf32>, vector<32x1xf32>, vector<32x1xf32>, vector<32x1xf32>, vector<32x1xf32>, vector<32x1xf32>, vector<32x1xf32> -> vector<288x1xf32>
    %c44 = arith.constant 44 : index
    %c0_60 = arith.constant 0 : index
    %109 = vector.load %arg5[%c44, %c0_60] : memref<56x128xf32, #tpu.memory_space<vmem>>, vector<1x128xf32>
    %c45 = arith.constant 45 : index
    %c0_61 = arith.constant 0 : index
    %110 = vector.load %arg5[%c45, %c0_61] : memref<56x128xf32, #tpu.memory_space<vmem>>, vector<1x128xf32>
    %c46 = arith.constant 46 : index
    %c0_62 = arith.constant 0 : index
    %111 = vector.load %arg5[%c46, %c0_62] : memref<56x128xf32, #tpu.memory_space<vmem>>, vector<1x128xf32>
    %c47 = arith.constant 47 : index
    %c0_63 = arith.constant 0 : index
    %112 = vector.load %arg5[%c47, %c0_63] : memref<56x128xf32, #tpu.memory_space<vmem>>, vector<1x33xf32>
    %c48 = arith.constant 48 : index
    %c0_64 = arith.constant 0 : index
    %113 = vector.load %arg5[%c48, %c0_64] : memref<56x128xf32, #tpu.memory_space<vmem>>, vector<1x33xf32>
    %c0_65 = arith.constant 0 : index
    %c0_66 = arith.constant 0 : index
    %114 = vector.load %arg3[%c0_65, %c0_66] : memref<288x128xf32, #tpu.memory_space<vmem>>, vector<288x128xf32>
    %cst_67 = arith.constant 5.000000e-01 : f32
    %115 = vector.broadcast %cst_67 : f32 to vector<1x128xf32>
    %116 = arith.cmpf ogt, %111, %115 : vector<1x128xf32>
    %cst_68 = arith.constant 1.000000e+00 : f32
    %117 = vector.shape_cast %116 : vector<1x128xi1> to vector<1x128xi1>
    %118 = vector.broadcast %117 : vector<1x128xi1> to vector<288x128xi1>
    %119 = vector.shape_cast %108 : vector<288x1xf32> to vector<288x1xf32>
    %120 = vector.broadcast %119 : vector<288x1xf32> to vector<288x128xf32>
    %121 = vector.broadcast %cst_68 : f32 to vector<288x128xf32>
    %122 = arith.select %118, %120, %121 : vector<288x128xi1>, vector<288x128xf32>
    %123 = arith.mulf %114, %122 : vector<288x128xf32>
    %124 = arith.truncf %123 : vector<288x128xf32> to vector<288x128xbf16>
    %c0_69 = arith.constant 0 : index
    %c0_70 = arith.constant 0 : index
    %125 = vector.load %arg8[%c0_69, %c0_70] : memref<288x288xbf16, #tpu.memory_space<vmem>>, vector<288x288xbf16>
    %cst_71 = arith.constant dense<0.000000e+00> : vector<288x128xf32>
    %126 = tpu.matmul %125, %124, %cst_71 {dimension_numbers = #tpu.dot_dimension_numbers<[1], [0], [0], [1], [0, 0, 1, 1], [], []>} : vector<288x288xbf16>, vector<288x128xbf16>, vector<288x128xf32> -> vector<288x128xf32>
    %127 = vector.broadcast %109 : vector<1x128xf32> to vector<288x128xf32>
    %128 = arith.mulf %126, %127 : vector<288x128xf32>
    %129 = vector.broadcast %110 : vector<1x128xf32> to vector<288x128xf32>
    %130 = arith.addf %128, %129 : vector<288x128xf32>
    %cst_72 = arith.constant 0.000000e+00 : f32
    %131 = vector.broadcast %cst_72 : f32 to vector<288x128xf32>
    %132 = arith.cmpf ogt, %130, %131 : vector<288x128xf32>
    %cst_73 = arith.constant 0.000000e+00 : f32
    %133 = vector.broadcast %cst_73 : f32 to vector<288x128xf32>
    %134 = arith.minimumf %130, %133 : vector<288x128xf32>
    %135 = math.exp %134 : vector<288x128xf32>
    %cst_74 = arith.constant 1.000000e+00 : f32
    %136 = vector.broadcast %cst_74 : f32 to vector<288x128xf32>
    %137 = arith.subf %135, %136 : vector<288x128xf32>
    %138 = vector.broadcast %111 : vector<1x128xf32> to vector<288x128xf32>
    %139 = arith.mulf %138, %137 : vector<288x128xf32>
    %140 = arith.select %132, %130, %139 : vector<288x128xi1>, vector<288x128xf32>
    %cst_75 = arith.constant 0.000000e+00 : bf16
    %141 = vector.broadcast %cst_75 : bf16 to vector<19x128xbf16>
    %c0_76 = arith.constant 0 : index
    %c0_77 = arith.constant 0 : index
    %142 = vector.load %arg9[%c0_76, %c0_77] : memref<328x128xbf16, #tpu.memory_space<vmem>>, vector<19x128xbf16>
    tpu.vector_store %arg9[%c0_76, %c0_77], %141 {strides = array<i32>} : memref<328x128xbf16, #tpu.memory_space<vmem>>, vector<19x128xbf16>,
    %cst_78 = arith.constant 0.000000e+00 : bf16
    %143 = vector.broadcast %cst_78 : bf16 to vector<21x128xbf16>
    %c307 = arith.constant 307 : index
    %c0_79 = arith.constant 0 : index
    %144 = vector.load %arg9[%c307, %c0_79] : memref<328x128xbf16, #tpu.memory_space<vmem>>, vector<21x128xbf16>
    tpu.vector_store %arg9[%c307, %c0_79], %143 {strides = array<i32>} : memref<328x128xbf16, #tpu.memory_space<vmem>>, vector<21x128xbf16>,
    %145 = vector.broadcast %38 : vector<288x1xf32> to vector<288x128xf32>
    %146 = arith.mulf %140, %145 : vector<288x128xf32>
    %147 = arith.truncf %146 : vector<288x128xf32> to vector<288x128xbf16>
    %c19_80 = arith.constant 19 : index
    %c0_81 = arith.constant 0 : index
    %148 = vector.load %arg9[%c19_80, %c0_81] : memref<328x128xbf16, #tpu.memory_space<vmem>>, vector<288x128xbf16>
    tpu.vector_store %arg9[%c19_80, %c0_81], %147 {strides = array<i32>} : memref<328x128xbf16, #tpu.memory_space<vmem>>, vector<288x128xbf16>,
    %c0_82 = arith.constant 0 : index
    %c0_83 = arith.constant 0 : index
    %149 = vector.load %arg9[%c0_82, %c0_83] : memref<328x128xbf16, #tpu.memory_space<vmem>>, vector<288x128xbf16>
    %c0_84 = arith.constant 0 : index
    %c0_85 = arith.constant 0 : index
    %150 = vector.load %arg10[%c0_84, %c0_85] : memref<288x1152xbf16, #tpu.memory_space<vmem>>, vector<288x128xbf16>
    tpu.vector_store %arg10[%c0_84, %c0_85], %149 {strides = array<i32>} : memref<288x1152xbf16, #tpu.memory_space<vmem>>, vector<288x128xbf16>,
    %c1_86 = arith.constant 1 : index
    %c0_87 = arith.constant 0 : index
    %151 = vector.load %arg9[%c1_86, %c0_87] : memref<328x128xbf16, #tpu.memory_space<vmem>>, vector<288x128xbf16>
    %c0_88 = arith.constant 0 : index
    %c128_89 = arith.constant 128 : index
    %152 = vector.load %arg10[%c0_88, %c128_89] : memref<288x1152xbf16, #tpu.memory_space<vmem>>, vector<288x128xbf16>
    tpu.vector_store %arg10[%c0_88, %c128_89], %151 {strides = array<i32>} : memref<288x1152xbf16, #tpu.memory_space<vmem>>, vector<288x128xbf16>,
    %c2_90 = arith.constant 2 : index
    %c0_91 = arith.constant 0 : index
    %153 = vector.load %arg9[%c2_90, %c0_91] : memref<328x128xbf16, #tpu.memory_space<vmem>>, vector<288x128xbf16>
    %c0_92 = arith.constant 0 : index
    %c256_93 = arith.constant 256 : index
    %154 = vector.load %arg10[%c0_92, %c256_93] : memref<288x1152xbf16, #tpu.memory_space<vmem>>, vector<288x128xbf16>
    tpu.vector_store %arg10[%c0_92, %c256_93], %153 {strides = array<i32>} : memref<288x1152xbf16, #tpu.memory_space<vmem>>, vector<288x128xbf16>,
    %c18_94 = arith.constant 18 : index
    %c0_95 = arith.constant 0 : index
    %155 = vector.load %arg9[%c18_94, %c0_95] : memref<328x128xbf16, #tpu.memory_space<vmem>>, vector<288x128xbf16>
    %c0_96 = arith.constant 0 : index
    %c384 = arith.constant 384 : index
    %156 = vector.load %arg10[%c0_96, %c384] : memref<288x1152xbf16, #tpu.memory_space<vmem>>, vector<288x128xbf16>
    tpu.vector_store %arg10[%c0_96, %c384], %155 {strides = array<i32>} : memref<288x1152xbf16, #tpu.memory_space<vmem>>, vector<288x128xbf16>,
    %c19_97 = arith.constant 19 : index
    %c0_98 = arith.constant 0 : index
    %157 = vector.load %arg9[%c19_97, %c0_98] : memref<328x128xbf16, #tpu.memory_space<vmem>>, vector<288x128xbf16>
    %c0_99 = arith.constant 0 : index
    %c512 = arith.constant 512 : index
    %158 = vector.load %arg10[%c0_99, %c512] : memref<288x1152xbf16, #tpu.memory_space<vmem>>, vector<288x128xbf16>
    tpu.vector_store %arg10[%c0_99, %c512], %157 {strides = array<i32>} : memref<288x1152xbf16, #tpu.memory_space<vmem>>, vector<288x128xbf16>,
    %c20_100 = arith.constant 20 : index
    %c0_101 = arith.constant 0 : index
    %159 = vector.load %arg9[%c20_100, %c0_101] : memref<328x128xbf16, #tpu.memory_space<vmem>>, vector<288x128xbf16>
    %c0_102 = arith.constant 0 : index
    %c640 = arith.constant 640 : index
    %160 = vector.load %arg10[%c0_102, %c640] : memref<288x1152xbf16, #tpu.memory_space<vmem>>, vector<288x128xbf16>
    tpu.vector_store %arg10[%c0_102, %c640], %159 {strides = array<i32>} : memref<288x1152xbf16, #tpu.memory_space<vmem>>, vector<288x128xbf16>,
    %c36_103 = arith.constant 36 : index
    %c0_104 = arith.constant 0 : index
    %161 = vector.load %arg9[%c36_103, %c0_104] : memref<328x128xbf16, #tpu.memory_space<vmem>>, vector<288x128xbf16>
    %c0_105 = arith.constant 0 : index
    %c768 = arith.constant 768 : index
    %162 = vector.load %arg10[%c0_105, %c768] : memref<288x1152xbf16, #tpu.memory_space<vmem>>, vector<288x128xbf16>
    tpu.vector_store %arg10[%c0_105, %c768], %161 {strides = array<i32>} : memref<288x1152xbf16, #tpu.memory_space<vmem>>, vector<288x128xbf16>,
    %c37_106 = arith.constant 37 : index
    %c0_107 = arith.constant 0 : index
    %163 = vector.load %arg9[%c37_106, %c0_107] : memref<328x128xbf16, #tpu.memory_space<vmem>>, vector<288x128xbf16>
    %c0_108 = arith.constant 0 : index
    %c896 = arith.constant 896 : index
    %164 = vector.load %arg10[%c0_108, %c896] : memref<288x1152xbf16, #tpu.memory_space<vmem>>, vector<288x128xbf16>
    tpu.vector_store %arg10[%c0_108, %c896], %163 {strides = array<i32>} : memref<288x1152xbf16, #tpu.memory_space<vmem>>, vector<288x128xbf16>,
    %c38_109 = arith.constant 38 : index
    %c0_110 = arith.constant 0 : index
    %165 = vector.load %arg9[%c38_109, %c0_110] : memref<328x128xbf16, #tpu.memory_space<vmem>>, vector<288x128xbf16>
    %c0_111 = arith.constant 0 : index
    %c1024 = arith.constant 1024 : index
    %166 = vector.load %arg10[%c0_111, %c1024] : memref<288x1152xbf16, #tpu.memory_space<vmem>>, vector<288x128xbf16>
    tpu.vector_store %arg10[%c0_111, %c1024], %165 {strides = array<i32>} : memref<288x1152xbf16, #tpu.memory_space<vmem>>, vector<288x128xbf16>,
    %c0_112 = arith.constant 0 : index
    %c0_113 = arith.constant 0 : index
    %167 = vector.load %arg10[%c0_112, %c0_113] : memref<288x1152xbf16, #tpu.memory_space<vmem>>, vector<288x1152xbf16>
    %c0_114 = arith.constant 0 : index
    %c0_115 = arith.constant 0 : index
    %168 = vector.load %arg4[%c0_114, %c0_115] : memref<1152x33xbf16, #tpu.memory_space<vmem>>, vector<1152x33xbf16>
    %cst_116 = arith.constant dense<0.000000e+00> : vector<288x33xf32>
    %169 = tpu.matmul %167, %168, %cst_116 {dimension_numbers = #tpu.dot_dimension_numbers<[1], [0], [0], [1], [0, 0, 1, 1], [], []>} : vector<288x1152xbf16>, vector<1152x33xbf16>, vector<288x33xf32> -> vector<288x33xf32>
    %170 = vector.broadcast %112 : vector<1x33xf32> to vector<288x33xf32>
    %171 = arith.mulf %169, %170 : vector<288x33xf32>
    %172 = vector.broadcast %113 : vector<1x33xf32> to vector<288x33xf32>
    %173 = arith.addf %171, %172 : vector<288x33xf32>
    %174 = vector.extract_strided_slice %173 {offsets = [0, 0], sizes = [288, 32], strides = [1, 1]} : vector<288x33xf32> to vector<288x32xf32>
    %cst_117 = arith.constant 0.000000e+00 : f32
    %175 = vector.broadcast %cst_117 : f32 to vector<288x32xf32>
    %176 = arith.cmpf ogt, %174, %175 : vector<288x32xf32>
    %cst_118 = arith.constant 0.000000e+00 : f32
    %177 = vector.broadcast %cst_118 : f32 to vector<288x32xf32>
    %178 = arith.minimumf %174, %177 : vector<288x32xf32>
    %179 = math.exp %178 : vector<288x32xf32>
    %cst_119 = arith.constant 1.000000e+00 : f32
    %180 = vector.broadcast %cst_119 : f32 to vector<288x32xf32>
    %181 = arith.subf %179, %180 : vector<288x32xf32>
    %182 = arith.select %176, %174, %181 : vector<288x32xi1>, vector<288x32xf32>
    %183 = vector.extract_strided_slice %173 {offsets = [0, 32], sizes = [288, 1], strides = [1, 1]} : vector<288x33xf32> to vector<288x1xf32>
    %184 = arith.negf %183 : vector<288x1xf32>
    %185 = math.exp %184 : vector<288x1xf32>
    %cst_120 = arith.constant 1.000000e+00 : f32
    %186 = vector.broadcast %cst_120 : f32 to vector<288x1xf32>
    %187 = arith.addf %186, %185 : vector<288x1xf32>
    %188 = arith.divf %186, %187 : vector<288x1xf32>
    %189 = vector.broadcast %78 : vector<1x32xf32> to vector<288x32xf32>
    %190 = arith.mulf %37, %189 : vector<288x32xf32>
    %cst_121 = arith.constant 1.000000e+00 : f32
    %191 = vector.broadcast %cst_121 : f32 to vector<288x1xf32>
    %192 = arith.subf %191, %188 : vector<288x1xf32>
    %193 = vector.broadcast %192 : vector<288x1xf32> to vector<288x32xf32>
    %194 = arith.mulf %190, %193 : vector<288x32xf32>
    %195 = vector.broadcast %91 : vector<1x32xf32> to vector<288x32xf32>
    %196 = arith.mulf %37, %195 : vector<288x32xf32>
    %197 = arith.addf %182, %196 : vector<288x32xf32>
    %198 = vector.broadcast %188 : vector<288x1xf32> to vector<288x32xf32>
    %199 = arith.mulf %197, %198 : vector<288x32xf32>
    %200 = arith.addf %194, %199 : vector<288x32xf32>
    %c0_122 = arith.constant 0 : index
    %c0_123 = arith.constant 0 : index
    %c0_124 = arith.constant 0 : index
    %201 = vector.load %arg6[%c0_122, %c0_123, %c0_124] : memref<1x288x32xf32, #tpu.memory_space<vmem>>, vector<1x288x32xf32>
    %202 = vector.shape_cast %201 : vector<1x288x32xf32> to vector<288x32xf32>
    %203 = vector.shape_cast %200 : vector<288x32xf32> to vector<1x288x32xf32>
    tpu.vector_store %arg6[%c0_122, %c0_123, %c0_124], %203 {strides = array<i32>} : memref<1x288x32xf32, #tpu.memory_space<vmem>>, vector<1x288x32xf32>,
    %c0_125 = arith.constant 0 : index
    %c0_126 = arith.constant 0 : index
    %c0_127 = arith.constant 0 : index
    %204 = vector.load %arg7[%c0_125, %c0_126, %c0_127] : memref<1x288x1xf32, #tpu.memory_space<vmem>>, vector<1x288x1xf32>
    %205 = vector.shape_cast %204 : vector<1x288x1xf32> to vector<288x1xf32>
    %206 = vector.shape_cast %188 : vector<288x1xf32> to vector<1x288x1xf32>
    tpu.vector_store %arg7[%c0_125, %c0_126, %c0_127], %206 {strides = array<i32>} : memref<1x288x1xf32, #tpu.memory_space<vmem>>, vector<1x288x1xf32>,
    return
  }
  func.func @transform_0(%arg0: i32) -> (i32, i32, i32) {
    %c0_i32 = arith.constant 0 : i32
    %c0_i32_0 = arith.constant 0 : i32
    %c0_i32_1 = arith.constant 0 : i32
    return %arg0, %c0_i32, %c0_i32_0 : i32, i32, i32
  }
  func.func @transform_1(%arg0: i32) -> (i32, i32) {
    %c0_i32 = arith.constant 0 : i32
    %c0_i32_0 = arith.constant 0 : i32
    %c0_i32_1 = arith.constant 0 : i32
    return %c0_i32, %c0_i32_0 : i32, i32
  }
  func.func @transform_2(%arg0: i32) -> (i32, i32) {
    %c0_i32 = arith.constant 0 : i32
    %c0_i32_0 = arith.constant 0 : i32
    %c0_i32_1 = arith.constant 0 : i32
    return %c0_i32, %c0_i32_0 : i32, i32
  }
  func.func @transform_3(%arg0: i32) -> (i32, i32) {
    %c0_i32 = arith.constant 0 : i32
    %c0_i32_0 = arith.constant 0 : i32
    %c0_i32_1 = arith.constant 0 : i32
    return %c0_i32, %c0_i32_0 : i32, i32
  }
  func.func @transform_4(%arg0: i32) -> (i32, i32) {
    %c0_i32 = arith.constant 0 : i32
    %c0_i32_0 = arith.constant 0 : i32
    %c0_i32_1 = arith.constant 0 : i32
    return %c0_i32, %c0_i32_0 : i32, i32
  }
  func.func @transform_5(%arg0: i32) -> (i32, i32, i32) {
    %c0_i32 = arith.constant 0 : i32
    %c0_i32_0 = arith.constant 0 : i32
    %c0_i32_1 = arith.constant 0 : i32
    return %arg0, %c0_i32, %c0_i32_0 : i32, i32, i32
  }
  func.func @transform_6(%arg0: i32) -> (i32, i32, i32) {
    %c0_i32 = arith.constant 0 : i32
    %c0_i32_0 = arith.constant 0 : i32
    %c0_i32_1 = arith.constant 0 : i32
    return %arg0, %c0_i32, %c0_i32_0 : i32, i32, i32
  }
}

</mosaic_0001>

<bundles_post_ra>
// kernel: tpu_custom_call.1
= control target key start
LH: loop header
LB: loop body
LE: loop exit
PB: predicated region body
PF: predicated region fallthrough
CT: control target
= control target key end

     0   :  { %s14065_s21 = smov 0   ;;  %s18992_s0 = inlined_call_operand.vmem [shape: f32[2,328,32], index: 0, kind: input, shape index: {}]   ;;  %s18993_s1 = inlined_call_operand.vmem [shape: f32[288,1], index: 1, kind: input, shape index: {}]   ;;  %s18994_s2 = inlined_call_operand.vmem [shape: f32[288,128], index: 2, kind: input, shape index: {}]   ;;  %s18995_s3 = inlined_call_operand.vmem [shape: bf16[1152,33], index: 3, kind: input, shape index: {}]   ;;  %s18996_s4 = inlined_call_operand.vmem [shape: f32[56,128], index: 4, kind: input, shape index: {}]   ;;  %s18997_s5 = inlined_call_operand.vmem [shape: f32[2,288,32], index: 5, kind: output, shape index: {0}]   ;;  %s18998_s6 = inlined_call_operand.vmem [shape: f32[2,288,1], index: 6, kind: output, shape index: {1}]  }
   0x1 LB: > { %s11930_s22 = sadd.s32 4294967295, %s14018_s21   ;;  %p11934_p0 = scmp.ge.s32.totalorder %s14018_s21, 1  ;;  %s14018_s21 = sphi %s14065_s21, %s17_s21  }
   0x2   : > { %p215_p1 = scmp.lt.s32.totalorder %s14018_s21, 3 }
   0x4   : > { %p216_p2 = pnand %p11934_p0, %p215_p1 }
   0x6   : > { %219 = sbr.rel (%p216_p2) target bundleno = 2168 (0x878), region = 40 }
   0xb   : > { %v2684_v0 = vld [vmem:[%s18993_s1 + $0x10] sm:$0xff]  ;;  %v2682_v1 = vld [vmem:[%s18993_s1] sm:$0xff]  ;;  %v2685_v2 = vld [vmem:[%s18993_s1 + $0x18] sm:$0xff]  ;;  %v18999_v3 = vmov 0   ;;  %p14144_p3 = scmp.lt.s32.totalorder %s11930_s22, 1  ;;  %s14021_s12 = smov 96  }
   0xc   : > { %13248 = vset.pattern.permute.xlu1 %v18999_v3  ;;  %4493 = vst [vmem:[#allocation3] sm:$0xf] %v18999_v3  ;;  %4494 = vst [vmem:[#allocation3 + $0x4] sm:$0xf] %v18999_v3  ;;  %13247 = vset.pattern.permute.xlu0 %v18999_v3  ;;  %vm2799_vm0 = vcmp.gt.f32.partialorder %v2684_v0, 0.5  ;;  %vm2797_vm1 = vcmp.gt.f32.partialorder %v2682_v1, 0.5 }
   0xd   : > { %4507 = vst [vmem:[#allocation3 + $0x9c] sm:$0xf] %v18999_v3  ;;  %4508 = vst [vmem:[#allocation3 + $0xa0] sm:$0xf] %v18999_v3  ;;  %vm2800_vm2 = vcmp.gt.f32.partialorder %v2685_v2, 0.5  ;;  %v2683_v4 = vld [vmem:[%s18993_s1 + $0x8] sm:$0xff]  ;;  %3803 = vmatprep.subr.bf16.mxu0 %v18999_v3 }
   0xe   : > { %v2835_v5 = vsel %vm2799_vm0, 1, %v18999_v3  ;;  %v2833_v6 = vsel %vm2797_vm1, 1, %v18999_v3  ;;  %vm2798_vm3 = vcmp.gt.f32.partialorder %v2683_v4, 0.5  ;;  %v2687_v7 = vld [vmem:[%s18993_s1 + $0x28] sm:$0xff]  ;;  %v2686_v8 = vld [vmem:[%s18993_s1 + $0x20] sm:$0xff]  ;;  %v2836_v9 = vsel %vm2800_vm2, 1, %v18999_v3 }
   0xf   : > { %2876 = vperm.xlu1 %13248, %v2835_v5   ;;  %2870 = vperm.xlu0 %13247, %v2833_v6   ;;  %v2834_v10 = vsel %vm2798_vm3, 1, %v18999_v3  ;;  %vm2802_vm4 = vcmp.gt.f32.partialorder %v2687_v7, 0.5  ;;  %vm2801_vm5 = vcmp.gt.f32.partialorder %v2686_v8, 0.5  ;;  %v2689_v11 = vld [vmem:[%s18993_s1 + $0x38] sm:$0xff]  ;;  %v2688_v12 = vld [vmem:[%s18993_s1 + $0x30] sm:$0xff]  ;;  %v2691_v15 = vld [vmem:[%s18993_s1 + $0x48] sm:$0xff] }
  0x10   : > { %v2838_v13 = vsel %vm2802_vm4, 1, %v18999_v3  ;;  %v2837_v14 = vsel %vm2801_vm5, 1, %v18999_v3  ;;  %vm2804_vm6 = vcmp.gt.f32.partialorder %v2689_v11, 0.5  ;;  %vm2803_vm7 = vcmp.gt.f32.partialorder %v2688_v12, 0.5  ;;  %v2690_v16 = vld [vmem:[%s18993_s1 + $0x40] sm:$0xff]  ;;  %v2693_v17 = vld [vmem:[%s18993_s1 + $0x58] sm:$0xff] }
  0x11   : > { %v2692_v18 = vld [vmem:[%s18993_s1 + $0x50] sm:$0xff]  ;;  %v2695_v19 = vld [vmem:[%s18993_s1 + $0x68] sm:$0xff]  ;;  %v2840_v20 = vsel %vm2804_vm6, 1, %v18999_v3  ;;  %v2839_v21 = vsel %vm2803_vm7, 1, %v18999_v3  ;;  %v2694_v22 = vld [vmem:[%s18993_s1 + $0x60] sm:$0xff]  ;;  %vm2806_vm8 = vcmp.gt.f32.partialorder %v2691_v15, 0.5 }
  0x12   : > { %v2697_v23 = vld [vmem:[%s18993_s1 + $0x78] sm:$0xff]  ;;  %v2696_v24 = vld [vmem:[%s18993_s1 + $0x70] sm:$0xff]  ;;  %vm2805_vm9 = vcmp.gt.f32.partialorder %v2690_v16, 0.5  ;;  %v2699_v25 = vld [vmem:[%s18993_s1 + $0x88] sm:$0xff]  ;;  %vm2808_vm10 = vcmp.gt.f32.partialorder %v2693_v17, 0.5  ;;  %vm2807_vm11 = vcmp.gt.f32.partialorder %v2692_v18, 0.5 }
  0x13   : > { %2879 = vperm.xlu1 %13248, %v2836_v9   ;;  %2873 = vperm.xlu0 %13247, %v2834_v10   ;;  %v2698_v26 = vld [vmem:[%s18993_s1 + $0x80] sm:$0xff]  ;;  %vm2810_vm12 = vcmp.gt.f32.partialorder %v2695_v19, 0.5  ;;  %vm2809_vm13 = vcmp.gt.f32.partialorder %v2694_v22, 0.5  ;;  %vm2812_vm14 = vcmp.gt.f32.partialorder %v2697_v23, 0.5  ;;  %vm2811_vm15 = vcmp.gt.f32.partialorder %v2696_v24, 0.5  ;;  %v2701_v29 = vld [vmem:[%s18993_s1 + $0x98] sm:$0xff] }
  0x14   : > { %v2842_v27 = vsel %vm2806_vm8, 1, %v18999_v3  ;;  %v2841_v28 = vsel %vm2805_vm9, 1, %v18999_v3  ;;  %vm2814_vm0 = vcmp.gt.f32.partialorder %v2699_v25, 0.5  ;;  %vm2813_vm1 = vcmp.gt.f32.partialorder %v2698_v26, 0.5  ;;  %v2700_v36 = vld [vmem:[%s18993_s1 + $0x90] sm:$0xff]  ;;  %s19046_s22 = smov (!%p14144_p3, %s11930_s22), 1 }
  0x15   : > { %v2844_v30 = vsel %vm2808_vm10, 1, %v18999_v3  ;;  %v2843_v31 = vsel %vm2807_vm11, 1, %v18999_v3  ;;  %v2846_v32 = vsel %vm2810_vm12, 1, %v18999_v3  ;;  %v2845_v33 = vsel %vm2809_vm13, 1, %v18999_v3  ;;  %v2703_v39 = vld [vmem:[%s18993_s1 + $0xa8] sm:$0xff]  ;;  %v2702_v40 = vld [vmem:[%s18993_s1 + $0xa0] sm:$0xff] }
  0x16   : > { %v14158_v34 = vsel %vm2812_vm14, 1, %v18999_v3  ;;  %v14161_v35 = vsel %vm2811_vm15, 1, %v18999_v3  ;;  %v14173_v37 = vsel %vm2814_vm0, 1, %v18999_v3  ;;  %v14176_v38 = vsel %vm2813_vm1, 1, %v18999_v3  ;;  %v2705_v41 = vld [vmem:[%s18993_s1 + $0xb8] sm:$0xff]  ;;  %v2704_v42 = vld [vmem:[%s18993_s1 + $0xb0] sm:$0xff] }
  0x17   : > { %2885 = vperm.xlu1 %13248, %v2838_v13   ;;  %2882 = vperm.xlu0 %13247, %v2837_v14   ;;  %vm2816_vm2 = vcmp.gt.f32.partialorder %v2701_v29, 0.5  ;;  %v2707_v43 = vld [vmem:[%s18993_s1 + $0xc8] sm:$0xff]  ;;  %s13227_s30 = smul.u32 328, %s19046_s22  ;;  %vm2718_vm3 = vcmask 261120   ;;  %v2706_v44 = vld [vmem:[%s18993_s1 + $0xc0] sm:$0xff]  ;;  %v2709_v45 = vld [vmem:[%s18993_s1 + $0xd8] sm:$0xff] }
  0x18   : > { %vm2815_vm4 = vcmp.gt.f32.partialorder %v2700_v36, 0.5  ;;  %vm2818_vm5 = vcmp.gt.f32.partialorder %v2703_v39, 0.5  ;;  %vm2817_vm6 = vcmp.gt.f32.partialorder %v2702_v40, 0.5  ;;  %vm2820_vm7 = vcmp.gt.f32.partialorder %v2705_v41, 0.5  ;;  %v2708_v54 = vld [vmem:[%s18993_s1 + $0xd0] sm:$0xff]  ;;  %v2711_v58 = vld [vmem:[%s18993_s1 + $0xe8] sm:$0xff] }
  0x19   : > { %s14203_s13 = scalar_lea.vmem %s18992_s0, %s13227_s30  ;;  %v14225_v53 = vsel %vm2816_vm2, 1, %v18999_v3  ;;  %vm2819_vm8 = vcmp.gt.f32.partialorder %v2704_v42, 0.5  ;;  %vm2822_vm9 = vcmp.gt.f32.partialorder %v2707_v43, 0.5  ;;  %v14235_v57 = vsel %vm2815_vm4, 1, %v18999_v3  ;;  %v2710_v59 = vld [vmem:[%s18993_s1 + $0xe0] sm:$0xff]  ;;  %v2713_v0 = vld [vmem:[%s18993_s1 + $0xf8] sm:$0xff] }
  0x1a   : > { %v14206_v46 = vld [vmem:[%s14203_s13 + $0x13] sm:$0xff]  ;;  %v14209_v47 = vld [vmem:[%s14203_s13 + $0x1b] sm:$0xff]  ;;  %v14212_v48 = vld [vmem:[%s14203_s13 + $0x23] sm:$0xff]  ;;  %vm2821_vm10 = vcmp.gt.f32.partialorder %v2706_v44, 0.5  ;;  %vm2824_vm11 = vcmp.gt.f32.partialorder %v2709_v45, 0.5  ;;  %v14247_v61 = vsel %vm2818_vm5, 1, %v18999_v3 }
  0x1b   : > { %2891 = vperm.xlu1 %13248, %v2840_v20   ;;  %2888 = vperm.xlu0 %13247, %v2839_v21   ;;  %v14215_v49 = vld [vmem:[%s14203_s13 + $0x2b] sm:$0xff]  ;;  %v2719_v50 = vsel %vm2718_vm3, %v14206_v46, 0.0  ;;  %v2720_v51 = vsel %vm2718_vm3, %v14209_v47, 0.0  ;;  %v2722_v52 = vsel %vm2718_vm3, %v14212_v48, 0.0  ;;  %v14231_v55 = vld [vmem:[%s14203_s13 + $0x33] sm:$0xff]  ;;  %v14251_v62 = vsel %vm2817_vm6, 1, %v18999_v3 }
  0x1c   : > { %v2721_v56 = vadd.f32 %v2720_v51, %v2719_v50  ;;  %v2724_v60 = vsel %vm2718_vm3, %v14215_v49, 0.0  ;;  %v14255_v63 = vsel %vm2820_vm7, 1, %v18999_v3  ;;  %v2712_v1 = vld [vmem:[%s18993_s1 + $0xf0] sm:$0xff]  ;;  %v14264_v2 = vld [vmem:[%s14203_s13 + $0x3b] sm:$0xff]  ;;  %v14268_v5 = vsel %vm2819_vm8, 1, %v18999_v3  ;;  %v2715_v7 = vld [vmem:[%s18993_s1 + $0x108] sm:$0xff] }
  0x1d   : > { %v14272_v6 = vsel %vm2822_vm9, 1, %v18999_v3  ;;  %vm2823_vm12 = vcmp.gt.f32.partialorder %v2708_v54, 0.5  ;;  %v2714_v8 = vld [vmem:[%s18993_s1 + $0x100] sm:$0xff]  ;;  %v2726_v9 = vsel %vm2718_vm3, %v14231_v55, 0.0  ;;  %v14284_v10 = vsel %vm2821_vm10, 1, %v18999_v3  ;;  %v2717_v12 = vld [vmem:[%s18993_s1 + $0x118] sm:$0xff] }
  0x1e   : > { %v2723_v4 = vadd.f32 %v2722_v52, %v2721_v56  ;;  %v14288_v11 = vsel %vm2824_vm11, 1, %v18999_v3  ;;  %vm2826_vm13 = vcmp.gt.f32.partialorder %v2711_v58, 0.5  ;;  %v2716_v13 = vld [vmem:[%s18993_s1 + $0x110] sm:$0xff]  ;;  %v14297_v14 = vld [vmem:[%s14203_s13 + $0x43] sm:$0xff]  ;;  %vm2825_vm14 = vcmp.gt.f32.partialorder %v2710_v59, 0.5  ;;  %v14318_v22 = vld [vmem:[%s14203_s13 + $0x5b] sm:$0xff] }
  0x1f   : > { %2897 = vperm.xlu1 %13248, %v2842_v27   ;;  %2894 = vperm.xlu0 %13247, %v2841_v28   ;;  %vm2828_vm15 = vcmp.gt.f32.partialorder %v2713_v0, 0.5  ;;  %vm2827_vm0 = vcmp.gt.f32.partialorder %v2712_v1, 0.5  ;;  %v2728_v16 = vsel %vm2718_vm3, %v14264_v2, 0.0  ;;  %v14305_v17 = vsel %vm2823_vm12, 1, %v18999_v3  ;;  %v14308_v18 = vld [vmem:[%s14203_s13 + $0x4b] sm:$0xff]  ;;  %v14315_v21 = vld [vmem:[%s14203_s13 + $0x53] sm:$0xff] }
  0x20   : > { %v2725_v15 = vadd.f32 %v2724_v60, %v2723_v4  ;;  %vm2830_vm1 = vcmp.gt.f32.partialorder %v2715_v7, 0.5  ;;  %vm2829_vm2 = vcmp.gt.f32.partialorder %v2714_v8, 0.5  ;;  %v14312_v20 = vsel %vm2826_vm13, 1, %v18999_v3  ;;  %v14335_v27 = vld [vmem:[%s14203_s13 + $0x63] sm:$0xff]  ;;  %v14338_v28 = vld [vmem:[%s14203_s13 + $0x6b] sm:$0xff]  ;;  %v14341_v29 = vld [vmem:[%s14203_s13 + $0x73] sm:$0xff] }
  0x21   : > { %vm2832_vm4 = vcmp.gt.f32.partialorder %v2717_v12, 0.5  ;;  %vm2831_vm5 = vcmp.gt.f32.partialorder %v2716_v13, 0.5  ;;  %v2730_v23 = vsel %vm2718_vm3, %v14297_v14, 0.0  ;;  %v14324_v24 = vsel %vm2825_vm14, 1, %v18999_v3  ;;  %v14373_v41 = vld [vmem:[%s14203_s13 + $0x93] sm:$0xff]  ;;  %v14376_v42 = vld [vmem:[%s14203_s13 + $0x9b] sm:$0xff] }
  0x22   : > { %v2727_v19 = vadd.f32 %v2726_v9, %v2725_v15  ;;  %v14328_v25 = vsel %vm2828_vm15, 1, %v18999_v3  ;;  %v14332_v26 = vsel %vm2827_vm0, 1, %v18999_v3  ;;  %v2732_v36 = vsel %vm2718_vm3, %v14308_v18, 0.0  ;;  %v14379_v43 = vld [vmem:[%s14203_s13 + $0xa3] sm:$0xff]  ;;  %v14387_v45 = vld [vmem:[%s14203_s13 + $0xb3] sm:$0xff]  ;;  %v14390_v50 = vld [vmem:[%s14203_s13 + $0xbb] sm:$0xff] }
  0x23   : > { %2903 = vperm.xlu1 %13248, %v2844_v30   ;;  %2900 = vperm.xlu0 %13247, %v2843_v31   ;;  %v14345_v31 = vsel %vm2830_vm1, 1, %v18999_v3  ;;  %v14366_v39 = vsel %vm2832_vm4, 1, %v18999_v3  ;;  %v14370_v40 = vsel %vm2831_vm5, 1, %v18999_v3  ;;  %v2736_v51 = vsel %vm2718_vm3, %v14318_v22, 0.0  ;;  %v14405_v0 = vld [vmem:[%s14203_s13 + $0xc3] sm:$0xff]  ;;  %v14408_v1 = vld [vmem:[%s14203_s13 + $0xcb] sm:$0xff] }
  0x24   : > { %v2729_v30 = vadd.f32 %v2728_v16, %v2727_v19  ;;  %v2738_v52 = vsel %vm2718_vm3, %v14335_v27, 0.0  ;;  %v2740_v54 = vsel %vm2718_vm3, %v14338_v28, 0.0  ;;  %v2742_v58 = vsel %vm2718_vm3, %v14341_v29, 0.0  ;;  %19009 = vst [vmem:[#allocation5_spill] sm:$0xff] %v14405_v0  ;;  %v14421_v12 = vld [vmem:[%s14203_s13 + $0xd3] sm:$0xff]  ;;  %s14022_s14 = smov 32  }
  0x25   : > { %v2750_v7 = vsel %vm2718_vm3, %v14373_v41, 0.0  ;;  %v2752_v8 = vsel %vm2718_vm3, %v14376_v42, 0.0  ;;  %v2754_v9 = vsel %vm2718_vm3, %v14379_v43, 0.0  ;;  %19010 = vst [vmem:[#allocation6_spill] sm:$0xff] %v14421_v12  ;;  %v2758_v16 = vsel %vm2718_vm3, %v14387_v45, 0.0  ;;  %s14023_s15 = smov 64  }
  0x26   : > { %v2731_v44 = vadd.f32 %v2730_v23, %v2729_v30  ;;  %v2760_v19 = vsel %vm2718_vm3, %v14390_v50, 0.0  ;;  %v14430_v23 = vld [vmem:[%s14203_s13 + $0xdb] sm:$0xff]  ;;  %v14433_v30 = vld [vmem:[%s14203_s13 + $0xe3] sm:$0xff]  ;;  %vm3128_vm6 = vcmask 259072   ;;  %vm446_vm7 = vcmask 257024   ;;  %s14024_s18 = smov 65  }
  0x27   : > { %2909 = vperm.xlu1 %13248, %v2846_v32   ;;  %2906 = vperm.xlu0 %13247, %v2845_v33   ;;  %v14349_v32 = vsel %vm2829_vm2, 1, %v18999_v3  ;;  %v14352_v33 = vld [vmem:[%s14203_s13 + $0x7b] sm:$0xff]  ;;  %19011 = vst [vmem:[#allocation7_spill] sm:$0xff] %v14433_v30  ;;  %v14447_v3 = vld [vmem:[%s14203_s13 + $0xf3] sm:$0xff]  ;;  %s14025_s25 = smov 2   ;;  %s14026_s30 = smov 1  }
  0x28   : > { %v2733_v56 = vadd.f32 %v2732_v36, %v2731_v44  ;;  %v2744_v59 = vsel %vm2718_vm3, %v14352_v33, 0.0  ;;  %v2764_v36 = vsel %vm2718_vm3, %v14408_v1, 0.0  ;;  %19012 = vst [vmem:[#allocation8_spill] sm:$0xff] %v14447_v3  ;;  %s13228_s11 = smul.u32 288, %s19046_s22 }
  0x2a   : > { %s18575_s23 = scalar_lea.vmem %s18997_s5, %s13228_s11 }
  0x2b   : > { %2915 = vperm.xlu1 %13248, %v14158_v34   ;;  %2912 = vperm.xlu0 %13247, %v14161_v35   ;;  %v14355_v34 = vld [vmem:[%s14203_s13 + $0x83] sm:$0xff]  ;;  %v14358_v35 = vld [vmem:[%s14203_s13 + $0x8b] sm:$0xff] }
  0x2c   : > { %v2746_v60 = vsel %vm2718_vm3, %v14355_v34, 0.0  ;;  %v2748_v4 = vsel %vm2718_vm3, %v14358_v35, 0.0 }
  0x2f   : > { %2921 = vperm.xlu1 %13248, %v14173_v37   ;;  %2918 = vperm.xlu0 %13247, %v14176_v38   ;;  %v2734_v37 = vsel %vm2718_vm3, %v14315_v21, 0.0  ;;  %v14384_v38 = vld [vmem:[%s14203_s13 + $0xab] sm:$0xff] }
  0x30   : > { %v2735_v13 = vadd.f32 %v2734_v37, %v2733_v56  ;;  %v2756_v15 = vsel %vm2718_vm3, %v14384_v38, 0.0  ;;  %v14442_v37 = vld [vmem:[%s14203_s13 + $0xeb] sm:$0xff]  ;;  %v2766_v56 = vsel %vm2718_vm3, %v14421_v12, 0.0  ;;  %v2774_v12 = vsel %vm2718_vm3, %v14447_v3, 0.0 }
  0x33   : > { %2927 = vperm.xlu1 %13248, %v14225_v53   ;;  %2924 = vperm.xlu0 %13247, %v14235_v57   ;;  %v2737_v53 = vadd.f32 %v2736_v51, %v2735_v13  ;;  %v2762_v57 = vsel %vm2718_vm3, %v14405_v0, 0.0  ;;  %v14450_v51 = vld [vmem:[%s14203_s13 + $0xfb] sm:$0xff]  ;;  %v2768_v0 = vsel %vm2718_vm3, %v14430_v23, 0.0 }
  0x35   : > { %v2739_v44 = vadd.f32 %v2738_v52, %v2737_v53  ;;  %v14462_v53 = vld [vmem:[%s14203_s13 + $0x10b] sm:$0xff] }
  0x37   : > { %2933 = vperm.xlu1 %13248, %v14247_v61   ;;  %2930 = vperm.xlu0 %13247, %v14251_v62   ;;  %v2741_v13 = vadd.f32 %v2740_v54, %v2739_v44  ;;  %v2770_v61 = vsel %vm2718_vm3, %v14433_v30, 0.0  ;;  %v14459_v62 = vld [vmem:[%s14203_s13 + $0x103] sm:$0xff]  ;;  %v2772_v54 = vsel %vm2718_vm3, %v14442_v37, 0.0  ;;  %v2776_v30 = vsel %vm2718_vm3, %v14450_v51, 0.0 }
  0x39   : > { %v2743_v52 = vadd.f32 %v2742_v58, %v2741_v13  ;;  %v2780_v58 = vsel %vm2718_vm3, %v14462_v53, 0.0  ;;  %v14477_v13 = vld [vmem:[%s14203_s13 + $0x113] sm:$0xff] }
  0x3b   : > { %2939 = vperm.xlu1 %13248, %v14255_v63   ;;  %2936 = vperm.xlu0 %13247, %v14268_v5   ;;  %v2745_v44 = vadd.f32 %v2744_v59, %v2743_v52  ;;  %v2778_v5 = vsel %vm2718_vm3, %v14459_v62, 0.0  ;;  %v14480_v59 = vld [vmem:[%s14203_s13 + $0x11b] sm:$0xff] }
  0x3d   : > { %v2747_v63 = vadd.f32 %v2746_v60, %v2745_v44  ;;  %v2784_v60 = vsel %vm2718_vm3, %v14480_v59, 0.0 }
  0x3f   : > { %2945 = vperm.xlu1 %13248, %v14272_v6   ;;  %2942 = vperm.xlu0 %13247, %v14284_v10   ;;  %v2749_v52 = vadd.f32 %v2748_v4, %v2747_v63  ;;  %v2782_v10 = vsel %vm2718_vm3, %v14477_v13, 0.0  ;;  %v1061_v63 = vld [vmem:[%s14203_s13 + $0x12] sm:$0xff] }
  0x41   : > { %v2751_v3 = vadd.f32 %v2750_v7, %v2749_v52 }
  0x43   : > { %2951 = vperm.xlu1 %13248, %v14288_v11   ;;  %2948 = vperm.xlu0 %13247, %v14305_v17   ;;  %v2753_v6 = vadd.f32 %v2752_v8, %v2751_v3  ;;  %v1566_v8 = vld [vmem:[%s14203_s13 + $0x14] sm:$0xff] }
  0x45   : > { %v2755_v44 = vadd.f32 %v2754_v9, %v2753_v6 }
  0x47   : > { %2957 = vperm.xlu1 %13248, %v14312_v20   ;;  %2954 = vperm.xlu0 %13247, %v14324_v24   ;;  %v2757_v4 = vadd.f32 %v2756_v15, %v2755_v44  ;;  %v3126_v20 = vld [vmem:[%s18996_s4] sm:$0x3f] }
  0x48   : > { %v483_v24 = vld [vmem:[%s14203_s13 + $0x1] sm:$0xff] }
  0x49   : > { %v2759_v11 = vadd.f32 %v2758_v16, %v2757_v4  ;;  %v772_v15 = vld [vmem:[%s14203_s13 + $0x2] sm:$0xff] }
  0x4a   : > { %v2142_v44 = vld [vmem:[%s14203_s13 + $0x25] sm:$0xff] }
  0x4b   : > { %2963 = vperm.xlu1 %13248, %v14328_v25   ;;  %2960 = vperm.xlu0 %13247, %v14332_v26   ;;  %v2761_v3 = vadd.f32 %v2760_v19, %v2759_v11  ;;  %v12981_v11 = vpack.c.bf16 %v2142_v44, %v2142_v44  ;;  %v12874_v44 = vpack.c.bf16 %v14209_v47, %v14209_v47 }
  0x4d   : > { %v2763_v17 = vadd.f32 %v2762_v57, %v2761_v3  ;;  %v14506_v57 = vld [vmem:[%s14203_s13 + $0x123] sm:$0xff]  ;;  %v485_v3 = vld [vmem:[%s14203_s13 + $0x11] sm:$0xff]  ;;  %1531 = vst.msk [vmem:[#allocation2 + $0x10] sm:$0xf] %vm446_vm7, %v12874_v44  ;;  %v12876_v44 = vpack.c.bf16 %v14215_v49, %v14215_v49 }
  0x4f   : > { %2969 = vperm.xlu1 %13248, %v14345_v31   ;;  %2966 = vperm.xlu0 %13247, %v14349_v32   ;;  %v2765_v7 = vadd.f32 %v2764_v36, %v2763_v17  ;;  %v12765_v32 = vpack.c.bf16 %v483_v24, %v483_v24  ;;  %v12801_v36 = vpack.c.bf16 %v772_v15, %v772_v15 }
  0x50   : > { %1533 = vst.msk [vmem:[#allocation2 + $0x28] sm:$0xf] %vm446_vm7, %v12876_v44 }
  0x51   : > { %v2767_v25 = vadd.f32 %v2766_v56, %v2765_v7 }
  0x53   : > { %2975 = vperm.xlu1 %13248, %v14366_v39   ;;  %2972 = vperm.xlu0 %13247, %v14370_v40   ;;  %v2769_v26 = vadd.f32 %v2768_v0, %v2767_v25  ;;  %v12909_v39 = vpack.c.bf16 %v1566_v8, %v1566_v8  ;;  %v1854_v40 = vld [vmem:[%s14203_s13 + $0x24] sm:$0xff] }
  0x55   : > { %v2771_v31 = vadd.f32 %v2770_v61, %v2769_v26  ;;  %v14510_v61 = vld [vmem:[%s14203_s13 + $0x12b] sm:$0xff] }
  0x57   : > { %3133 = vrot.lane.b32.xlu0 %v3126_v20, %s14021_s12  ;;  %v2773_v9 = vadd.f32 %v2772_v54, %v2771_v31  ;;  %v1856_v31 = vld [vmem:[%s14203_s13 + $0x34] sm:$0xff] }
  0x58   : > { %v12947_v15 = vpack.c.bf16 %v1856_v31, %v1856_v31  ;;  %v1062_v31 = vld [vmem:[%s14203_s13 + $0x1a] sm:$0xff] }
  0x59   : > { %v2775_v16 = vadd.f32 %v2774_v12, %v2773_v9  ;;  %v12945_v12 = vpack.c.bf16 %v1854_v40, %v1854_v40 }
  0x5b   : > { %627 = vrot.lane.b32.xlu0 %v12765_v32, %s14022_s14  ;;  %v2777_v19 = vadd.f32 %v2776_v30, %v2775_v16  ;;  %v2786_v30 = vsel %vm2718_vm3, %v14506_v57, 0.0  ;;  %v1063_v16 = vld [vmem:[%s14203_s13 + $0x22] sm:$0xff] }
  0x5d   : > { %v2779_v0 = vadd.f32 %v2778_v5, %v2777_v19  ;;  %v2788_v5 = vsel %vm2718_vm3, %v14510_v61, 0.0  ;;  %v2144_v19 = vld [vmem:[%s14203_s13 + $0x35] sm:$0xff] }
  0x5e   : > { %v12983_v40 = vpack.c.bf16 %v2144_v19, %v2144_v19 }
  0x5f   : > { %1710 = vrot.lane.b32.xlu0 %v12909_v39, %s14022_s14  ;;  %v2781_v56 = vadd.f32 %v2780_v58, %v2779_v0  ;;  %v12837_v58 = vpack.c.bf16 %v1061_v63, %v1061_v63  ;;  %v14530_v39 = vpack.c.bf16 %v1063_v16, %v1063_v16  ;;  %v487_v0 = vld [vmem:[%s14203_s13 + $0x21] sm:$0xff]  ;;  %v2143_v16 = vld [vmem:[%s14203_s13 + $0x2d] sm:$0xff] }
  0x60   : > { %v12982_v19 = vpack.c.bf16 %v2143_v16, %v2143_v16 }
  0x61   : > { %v2783_v54 = vadd.f32 %v2782_v10, %v2781_v56 }
  0x63   : > { %916 = vrot.lane.b32.xlu0 %v12801_v36, %s14023_s15  ;;  %v2785_v52 = vadd.f32 %v2784_v60, %v2783_v54  ;;  %v12767_v60 = vpack.c.bf16 %v485_v3, %v485_v3  ;;  %v484_v36 = vld [vmem:[%s14203_s13 + $0x9] sm:$0xff]  ;;  %v12769_v54 = vpack.c.bf16 %v487_v0, %v487_v0 }
  0x64   : > { %v773_v3 = vld [vmem:[%s14203_s13 + $0xa] sm:$0xff] }
  0x65   : > { %v2787_v6 = vadd.f32 %v2786_v30, %v2785_v52  ;;  %v267_v30 = vld [vmem:[%s14203_s13 + $0x8] sm:$0xff] }
  0x67   : > { %1998 = vrot.lane.b32.xlu0 %v12945_v12, %s14023_s15  ;;  %v2789_v4 = vadd.f32 %v2788_v5, %v2787_v6  ;;  %v1567_v5 = vld [vmem:[%s14203_s13 + $0x1c] sm:$0xff]  ;;  %v12730_v6 = vpack.c.bf16 %v267_v30, %v267_v30 }
  0x69   : > { %v2790_v10 = vrot.slane %v2789_v4, 4  ;;  %448 = vst.msk [vmem:[#allocation2 + $0xc] sm:$0xf] %vm446_vm7, %v12730_v6 }
  0x6b   : > { %1205 = vrot.lane.b32.xlu0 %v12837_v58, %s14021_s12  ;;  %v2791_v17 = vadd.f32 %v2790_v10, %v2789_v4  ;;  %v12910_v4 = vpack.c.bf16 %v1567_v5, %v1567_v5 }
  0x6d   : > { %v2792_v7 = vrot.slane %v2791_v17, 2 }
  0x6f   : > { %2286 = vrot.lane.b32.xlu0 %v12981_v11, %s14021_s12  ;;  %v2793_v24 = vadd.f32 %v2792_v7, %v2791_v17  ;;  %v12802_v17 = vpack.c.bf16 %v773_v3, %v773_v3 }
  0x71   : > { %v2794_v25 = vrot.slane %v2793_v24, 1 }
  0x73   : > { %631 = vrot.lane.b32.xlu0 %v12767_v60, %s14022_s14  ;;  %v2795_v26 = vadd.f32 %v2794_v25, %v2793_v24  ;;  %v1855_v24 = vld [vmem:[%s14203_s13 + $0x2c] sm:$0xff] }
  0x74   : > { %v12946_v25 = vpack.c.bf16 %v1855_v24, %v1855_v24 }
  0x75   : > { %v2796_v8 = vmul.f32 0.00390625, %v2795_v26 }
  0x77   : > { %1714 = vrot.lane.b32.xlu0 %v12945_v12, %s14022_s14  ;;  %v3127_v32 = vmul.f32 %v3126_v20, %v2796_v8  ;;  %v266_v20 = vld [vmem:[%s14203_s13] sm:$0xff]  ;;  %v12766_v12 = vpack.c.bf16 %v484_v36, %v484_v36  ;;  %v268_v36 = vld [vmem:[%s14203_s13 + $0x10] sm:$0xff] }
  0x78   : > { %v12729_v56 = vpack.c.bf16 %v266_v20, %v266_v20  ;;  %v486_v20 = vld [vmem:[%s14203_s13 + $0x19] sm:$0xff] }
  0x79   : > { %v3129_v9 = vsel %vm3128_vm6, %v3127_v32, 0.0  ;;  %v12838_v32 = vpack.c.bf16 %v1062_v31, %v1062_v31  ;;  %v1857_v31 = vld [vmem:[%s14203_s13 + $0x3c] sm:$0xff] }
  0x7a   : > { %3130 = vadd.xlane.f32.xlu1 %v3129_v9  ;;  %447 = vst.msk [vmem:[#allocation2] sm:$0xf] %vm446_vm7, %v12729_v56  ;;  %v12731_v56 = vpack.c.bf16 %v268_v36, %v268_v36  ;;  %v14603_v16 = vpack.c.bf16 %v1857_v31, %v1857_v31 }
  0x7b   : > { %920 = vrot.lane.b32.xlu0 %v12837_v58, %s14023_s15  ;;  %v12873_v58 = vpack.c.bf16 %v14206_v46, %v14206_v46 }
  0x7c   : > { %449 = vst.msk [vmem:[#allocation2 + $0x18] sm:$0xf] %vm446_vm7, %v12731_v56 }
  0x7d   : > { %1530 = vst.msk [vmem:[#allocation2 + $0x4] sm:$0xf] %vm446_vm7, %v12873_v58  ;;  %v12875_v58 = vpack.c.bf16 %v14212_v48, %v14212_v48 }
  0x7f   : > { %2002 = vrot.lane.b32.xlu0 %v12947_v15, %s14023_s15  ;;  %1532 = vst.msk [vmem:[#allocation2 + $0x1c] sm:$0xf] %vm446_vm7, %v12875_v58 }
  0x83   : > { %1209 = vrot.lane.b32.xlu0 %v14530_v39, %s14021_s12 }
  0x87   : > { %2290 = vrot.lane.b32.xlu0 %v12983_v40, %s14021_s12 }
  0x8a   : > { %v14541_v63 = vpop.permute.xlu1 %2876  ;;  %v14543_v52 = vpop.permute.xlu0 %2870 }
  0x8b   : > { %635 = vrot.lane.b32.xlu0 %v12769_v54, %s14022_s14  ;;  %629 = vrot.lane.b32.xlu1 %v12766_v12, %s14022_s14  ;;  %v12768_v54 = vpack.c.bf16 %v486_v20, %v486_v20  ;;  %v269_v12 = vld [vmem:[%s14203_s13 + $0x18] sm:$0xff]  ;;  %vm2979_vm8 = vcmp.eq.s32.totalorder %v14541_v63, 1  ;;  %vm2977_vm9 = vcmp.eq.s32.totalorder %v14543_v52, 1 }
  0x8c   : > { %v12732_v6 = vpack.c.bf16 %v269_v12, %v269_v12  ;;  %v3013_v20 = vsel %vm2977_vm9, %v14206_v46, -1e+30 }
  0x8e   : > { %v14555_v10 = vpop.permute.xlu1 %2879  ;;  %v14557_v11 = vpop.permute.xlu0 %2873  ;;  %450 = vst.msk [vmem:[#allocation2 + $0x24] sm:$0xf] %vm446_vm7, %v12732_v6 }
  0x8f   : > { %1718 = vrot.lane.b32.xlu0 %v12947_v15, %s14022_s14  ;;  %1712 = vrot.lane.b32.xlu1 %v12910_v4, %s14022_s14  ;;  %vm2980_vm12 = vcmp.eq.s32.totalorder %v14555_v10, 1  ;;  %vm2978_vm15 = vcmp.eq.s32.totalorder %v14557_v11, 1 }
  0x92   : > { %v2886_v7 = vpop.permute.xlu1 %2885  ;;  %v2883_v60 = vpop.permute.xlu0 %2882 }
  0x93   : > { %918 = vrot.lane.b32.xlu1 %v12802_v17, %s14023_s15  ;;  %vm2982_vm10 = vcmp.eq.s32.totalorder %v2886_v7, 1  ;;  %vm2981_vm11 = vcmp.eq.s32.totalorder %v2883_v60, 1  ;;  %v2145_v7 = vld [vmem:[%s14203_s13 + $0x3d] sm:$0xff] }
  0x94   : > { %v3018_v60 = vsel %vm2982_vm10, %v14264_v2, -1e+30  ;;  %v3017_v36 = vsel %vm2981_vm11, %v14231_v55, -1e+30  ;;  %v3049_v2 = vsel %vm2718_vm3, %v3013_v20, -inf }
  0x95   : > { %v3053_v10 = vsel %vm2718_vm3, %v3017_v36, -inf  ;;  %v488_v36 = vld [vmem:[%s14203_s13 + $0x29] sm:$0xff] }
  0x96   : > { %v2892_v26 = vpop.permute.xlu1 %2891  ;;  %v2889_v8 = vpop.permute.xlu0 %2888 }
  0x97   : > { %2000 = vrot.lane.b32.xlu1 %v12946_v25, %s14023_s15  ;;  %vm2984_vm13 = vcmp.eq.s32.totalorder %v2892_v26, 1  ;;  %vm2983_vm14 = vcmp.eq.s32.totalorder %v2889_v8, 1 }
  0x98   : > { %v3020_v46 = vsel %vm2984_vm13, %v14308_v18, -1e+30 }
  0x99   : > { %v3059_v12 = vsel %vm2718_vm3, %v3020_v46, -inf }
  0x9a   : > { %v2898_v9 = vpop.permute.xlu1 %2897  ;;  %v2895_v15 = vpop.permute.xlu0 %2894 }
  0x9b   : > { %1207 = vrot.lane.b32.xlu1 %v12838_v32, %s14021_s12  ;;  %vm2986_vm0 = vcmp.eq.s32.totalorder %v2898_v9, 1  ;;  %vm2985_vm1 = vcmp.eq.s32.totalorder %v2895_v15, 1  ;;  %v12984_v9 = vpack.c.bf16 %v2145_v7, %v2145_v7  ;;  %v270_v7 = vld [vmem:[%s14203_s13 + $0x20] sm:$0xff] }
  0x9c   : > { %v3022_v18 = vsel %vm2986_vm0, %v14318_v22, -1e+30  ;;  %v3054_v22 = vmax.f32 %v3049_v2, %v3053_v10 }
  0x9d   : > { %v3063_v58 = vsel %vm2718_vm3, %v3022_v18, -inf }
  0x9e   : > { %v14568_v40 = vpop.permute.xlu1 %2903  ;;  %v14570_v0 = vpop.permute.xlu0 %2900 }
  0x9f   : > { %2288 = vrot.lane.b32.xlu1 %v12982_v19, %s14021_s12  ;;  %v3015_v19 = vsel %vm2979_vm8, %v14212_v48, -1e+30  ;;  %v3019_v48 = vsel %vm2983_vm14, %v14297_v14, -1e+30  ;;  %v3021_v14 = vsel %vm2985_vm1, %v14315_v21, -1e+30 }
  0xa0   : > { %v3051_v56 = vsel %vm2718_vm3, %v3015_v19, -inf  ;;  %vm2988_vm2 = vcmp.eq.s32.totalorder %v14568_v40, 1  ;;  %vm2987_vm4 = vcmp.eq.s32.totalorder %v14570_v0, 1  ;;  %v3061_v44 = vsel %vm2718_vm3, %v3021_v14, -inf }
  0xa1   : > { %v3062_v2 = vmax.f32 %v3054_v22, %v3061_v44  ;;  %v1859_v44 = vld [vmem:[%s14203_s13 + $0x4c] sm:$0xff] }
  0xa2   : > { %v14577_v30 = vpop.permute.xlu1 %2909  ;;  %v14579_v5 = vpop.permute.xlu0 %2906 }
  0xa3   : > { %633 = vrot.lane.b32.xlu1 %v12768_v54, %s14022_s14  ;;  %v3014_v54 = vsel %vm2978_vm15, %v14209_v47, -1e+30  ;;  %v3057_v47 = vsel %vm2718_vm3, %v3019_v48, -inf  ;;  %vm2990_vm5 = vcmp.eq.s32.totalorder %v14577_v30, 1  ;;  %vm2989_vm8 = vcmp.eq.s32.totalorder %v14579_v5, 1 }
  0xa4   : > { %v3050_v6 = vsel %vm2718_vm3, %v3014_v54, -inf  ;;  %v3058_v40 = vmax.f32 %v3051_v56, %v3057_v47  ;;  %v3026_v46 = vsel %vm2990_vm5, %v14352_v33, -1e+30  ;;  %v12733_v48 = vpack.c.bf16 %v270_v7, %v270_v7  ;;  %v19014_v7 = vld [vmem:[#allocation6_spill] sm:$0xff] }
  0xa5   : > { %v3071_v33 = vsel %vm2718_vm3, %v3026_v46, -inf }
  0xa6   : > { %v14589_v4 = vpop.permute.xlu1 %2915  ;;  %v14591_v3 = vpop.permute.xlu0 %2912  ;;  %451 = vst.msk [vmem:[#allocation2 + $0x30] sm:$0xf] %vm446_vm7, %v12733_v48 }
  0xa7   : > { %1716 = vrot.lane.b32.xlu1 %v12946_v25, %s14022_s14  ;;  %v1064_v25 = vld [vmem:[%s14203_s13 + $0x2a] sm:$0xff]  ;;  %vm2992_vm9 = vcmp.eq.s32.totalorder %v14589_v4, 1  ;;  %vm2991_vm10 = vcmp.eq.s32.totalorder %v14591_v3, 1 }
  0xa8   : > { %v14623_v11 = vpack.c.bf16 %v1064_v25, %v1064_v25  ;;  %v3024_v25 = vsel %vm2988_vm2, %v14338_v28, -1e+30  ;;  %v3025_v28 = vsel %vm2989_vm8, %v14341_v29, -1e+30  ;;  %v3028_v4 = vsel %vm2992_vm9, %v14358_v35, -1e+30 }
  0xa9   : > { %v3069_v0 = vsel %vm2718_vm3, %v3025_v28, -inf  ;;  %v3027_v3 = vsel %vm2991_vm10, %v14355_v34, -1e+30  ;;  %v3075_v34 = vsel %vm2718_vm3, %v3028_v4, -inf }
  0xaa   : > { %v14594_v17 = vpop.permute.xlu1 %2921  ;;  %v14596_v24 = vpop.permute.xlu0 %2918  ;;  %v3070_v18 = vmax.f32 %v3062_v2, %v3069_v0 }
  0xab   : > { %922 = vrot.lane.b32.xlu1 %v12838_v32, %s14023_s15  ;;  %v3016_v32 = vsel %vm2980_vm12, %v14215_v49, -1e+30  ;;  %v3055_v49 = vsel %vm2718_vm3, %v3018_v60, -inf  ;;  %v12877_v60 = vpack.c.bf16 %v14231_v55, %v14231_v55  ;;  %v3067_v55 = vsel %vm2718_vm3, %v3024_v25, -inf }
  0xac   : > { %v3052_v15 = vsel %vm2718_vm3, %v3016_v32, -inf  ;;  %v3056_v21 = vmax.f32 %v3050_v6, %v3055_v49  ;;  %v3023_v32 = vsel %vm2987_vm4, %v14335_v27, -1e+30  ;;  %vm2994_vm11 = vcmp.eq.s32.totalorder %v14594_v17, 1 }
  0xad   : > { %v3060_v31 = vmax.f32 %v3052_v15, %v3059_v12  ;;  %1534 = vst.msk [vmem:[#allocation2 + $0x34] sm:$0xf] %vm446_vm7, %v12877_v60  ;;  %vm2993_vm12 = vcmp.eq.s32.totalorder %v14596_v24, 1  ;;  %v12770_v27 = vpack.c.bf16 %v488_v36, %v488_v36  ;;  %v3065_v29 = vsel %vm2718_vm3, %v3023_v32, -inf  ;;  %v1066_v32 = vld [vmem:[%s14203_s13 + $0x3a] sm:$0xff] }
  0xae   : > { %v14609_v63 = vpop.permute.xlu1 %2927  ;;  %v14611_v52 = vpop.permute.xlu0 %2924  ;;  %v3064_v56 = vmax.f32 %v3056_v21, %v3063_v58  ;;  %v3029_v49 = vsel %vm2993_vm12, %v14373_v41, -1e+30  ;;  %v12842_v4 = vpack.c.bf16 %v1066_v32, %v1066_v32 }
  0xaf   : > { %2004 = vrot.lane.b32.xlu1 %v14603_v16, %s14023_s15  ;;  %vm2996_vm13 = vcmp.eq.s32.totalorder %v14609_v63, 1  ;;  %vm2995_vm14 = vcmp.eq.s32.totalorder %v14611_v52, 1  ;;  %v3068_v54 = vmax.f32 %v3060_v31, %v3067_v55  ;;  %v3066_v63 = vmax.f32 %v3058_v40, %v3065_v29  ;;  %v19013_v40 = vld [vmem:[#allocation5_spill] sm:$0xff]  ;;  %v2147_v55 = vld [vmem:[%s14203_s13 + $0x4d] sm:$0xff] }
  0xb0   : > { %v3072_v10 = vmax.f32 %v3064_v56, %v3071_v33  ;;  %v3032_v35 = vsel %vm2996_vm13, %v14384_v38, -1e+30  ;;  %v3073_v52 = vsel %vm2718_vm3, %v3027_v3, -inf  ;;  %v3031_v17 = vsel %vm2995_vm14, %v14379_v43, -1e+30  ;;  %v19015_v29 = vld [vmem:[#allocation7_spill] sm:$0xff] }
  0xb1   : > { %v3083_v38 = vsel %vm2718_vm3, %v3032_v35, -inf  ;;  %v3076_v15 = vmax.f32 %v3068_v54, %v3075_v34  ;;  %v3074_v43 = vmax.f32 %v3066_v63, %v3073_v52 }
  0xb2   : > { %v2934_v26 = vpop.permute.xlu1 %2933  ;;  %v14634_v8 = vpop.permute.xlu0 %2930 }
  0xb3   : > { %1211 = vrot.lane.b32.xlu1 %v14623_v11, %s14021_s12  ;;  %vm2998_vm15 = vcmp.eq.s32.totalorder %v2934_v26, 1  ;;  %vm2997_vm0 = vcmp.eq.s32.totalorder %v14634_v8, 1  ;;  %v3077_v26 = vsel %vm2718_vm3, %v3029_v49, -inf  ;;  %v3084_v31 = vmax.f32 %v3076_v15, %v3083_v38 }
  0xb4   : > { %v3033_v8 = vsel %vm2997_vm0, %v14387_v45, -1e+30  ;;  %v3078_v6 = vmax.f32 %v3070_v18, %v3077_v26 }
  0xb5   : > { %v3085_v45 = vsel %vm2718_vm3, %v3033_v8, -inf }
  0xb6   : > { %v2940_v19 = vpop.permute.xlu1 %2939  ;;  %v14649_v20 = vpop.permute.xlu0 %2936  ;;  %v3086_v46 = vmax.f32 %v3078_v6, %v3085_v45 }
  0xb7   : > { %2292 = vrot.lane.b32.xlu1 %v12984_v9, %s14021_s12  ;;  %v3030_v9 = vsel %vm2994_vm11, %v14376_v42, -1e+30  ;;  %v3034_v42 = vsel %vm2998_vm15, %v14390_v50, -1e+30  ;;  %vm3000_vm1 = vcmp.eq.s32.totalorder %v2940_v19, 1  ;;  %vm2999_vm2 = vcmp.eq.s32.totalorder %v14649_v20, 1 }
  0xb8   : > { %v3079_v41 = vsel %vm2718_vm3, %v3030_v9, -inf  ;;  %v3081_v50 = vsel %vm2718_vm3, %v3031_v17, -inf  ;;  %v3087_v12 = vsel %vm2718_vm3, %v3034_v42, -inf  ;;  %v3036_v21 = vsel %vm3000_vm1, %v14408_v1, -1e+30 }
  0xb9   : > { %v3080_v47 = vmax.f32 %v3072_v10, %v3079_v41  ;;  %v3035_v25 = vsel %vm2999_vm2, %v19013_v40, -1e+30  ;;  %v3082_v60 = vmax.f32 %v3074_v43, %v3081_v50  ;;  %v3091_v1 = vsel %vm2718_vm3, %v3036_v21, -inf  ;;  %v490_v50 = vld [vmem:[%s14203_s13 + $0x39] sm:$0xff] }
  0xba   : > { %v2946_v30 = vpop.permute.xlu1 %2945  ;;  %v2943_v5 = vpop.permute.xlu0 %2942  ;;  %v14714_v20 = vpack.c.bf16 %v1859_v44, %v1859_v44  ;;  %vm735_vm2 = vcmask 519424  }
  0xbb   : > { %637 = vrot.lane.b32.xlu1 %v12770_v27, %s14022_s14  ;;  %vm3002_vm4 = vcmp.eq.s32.totalorder %v2946_v30, 1  ;;  %vm3001_vm5 = vcmp.eq.s32.totalorder %v2943_v5, 1  ;;  %v3088_v36 = vmax.f32 %v3080_v47, %v3087_v12  ;;  %v19016_v30 = vld [vmem:[#allocation8_spill] sm:$0xff] }
  0xbc   : > { %v3038_v19 = vsel %vm3002_vm4, %v14430_v23, -1e+30  ;;  %v3089_v23 = vsel %vm2718_vm3, %v3035_v25, -inf  ;;  %vm1024_vm4 = vcmask 781824  }
  0xbd   : > { %v3095_v28 = vsel %vm2718_vm3, %v3038_v19, -inf  ;;  %v3090_v3 = vmax.f32 %v3082_v60, %v3089_v23 }
  0xbe   : > { %v2952_v14 = vpop.permute.xlu1 %2951  ;;  %v2949_v24 = vpop.permute.xlu0 %2948  ;;  %v3096_v49 = vmax.f32 %v3088_v36, %v3095_v28  ;;  %v1861_v36 = vld [vmem:[%s14203_s13 + $0x5c] sm:$0xff]  ;;  %v1068_v28 = vld [vmem:[%s14203_s13 + $0x4a] sm:$0xff] }
  0xbf   : > { %1720 = vrot.lane.b32.xlu1 %v14603_v16, %s14022_s14  ;;  %v3037_v16 = vsel %vm3001_vm5, %v19014_v7, -1e+30  ;;  %vm3004_vm8 = vcmp.eq.s32.totalorder %v2952_v14, 1  ;;  %vm3003_vm9 = vcmp.eq.s32.totalorder %v2949_v24, 1  ;;  %v12952_v32 = vpack.c.bf16 %v1861_v36, %v1861_v36  ;;  %v274_v36 = vld [vmem:[%s14203_s13 + $0x40] sm:$0xff] }
  0xc0   : > { %v3093_v48 = vsel %vm2718_vm3, %v3037_v16, -inf  ;;  %v3040_v27 = vsel %vm3004_vm8, %v14442_v37, -1e+30  ;;  %v3039_v33 = vsel %vm3003_vm9, %v19015_v29, -1e+30  ;;  %v12986_v37 = vpack.c.bf16 %v2147_v55, %v2147_v55  ;;  %v2149_v55 = vld [vmem:[%s14203_s13 + $0x5d] sm:$0xff] }
  0xc1   : > { %v3094_v63 = vmax.f32 %v3086_v46, %v3093_v48  ;;  %v3099_v10 = vsel %vm2718_vm3, %v3040_v27, -inf  ;;  %v3097_v18 = vsel %vm2718_vm3, %v3039_v33, -inf  ;;  %vm1313_vm5 = vcmask 1044224  }
  0xc2   : > { %v2958_v22 = vpop.permute.xlu1 %2957  ;;  %v2955_v58 = vpop.permute.xlu0 %2954  ;;  %v3098_v24 = vmax.f32 %v3090_v3, %v3097_v18  ;;  %v12988_v29 = vpack.c.bf16 %v2149_v55, %v2149_v55  ;;  %vm4496_vm9 = vsmask.f32 1280 }
  0xc3   : > { %vm3006_vm10 = vcmp.eq.s32.totalorder %v2958_v22, 1  ;;  %vm3005_vm11 = vcmp.eq.s32.totalorder %v2955_v58, 1  ;;  %926 = vrot.lane.b32.xlu1 %v14623_v11, %s14023_s15  ;;  %v3092_v11 = vmax.f32 %v3084_v31, %v3091_v1  ;;  %v12772_v58 = vpack.c.bf16 %v490_v50, %v490_v50 }
  0xc4   : > { %v3042_v0 = vsel %vm3006_vm10, %v14450_v51, -1e+30  ;;  %v3041_v5 = vsel %vm3005_vm11, %v19016_v30, -1e+30  ;;  %vm4501_vm10 = vcmask 1043457  }
  0xc5   : > { %v3103_v34 = vsel %vm2718_vm3, %v3042_v0, -inf  ;;  %v3101_v52 = vsel %vm2718_vm3, %v3041_v5, -inf  ;;  %v3100_v14 = vmax.f32 %v3092_v11, %v3099_v10  ;;  %v492_v0 = vld [vmem:[%s14203_s13 + $0x49] sm:$0xff] }
  0xc6   : > { %v2964_v56 = vpop.permute.xlu1 %2963  ;;  %v2961_v2 = vpop.permute.xlu0 %2960  ;;  %v3104_v8 = vmax.f32 %v3096_v49, %v3103_v34  ;;  %v3102_v38 = vmax.f32 %v3094_v63, %v3101_v52  ;;  %v12774_v30 = vpack.c.bf16 %v492_v0, %v492_v0  ;;  %v1858_v63 = vld [vmem:[%s14203_s13 + $0x44] sm:$0xff]  ;;  %v1065_v34 = vld [vmem:[%s14203_s13 + $0x32] sm:$0xff] }
  0xc7   : > { %vm3008_vm12 = vcmp.eq.s32.totalorder %v2964_v56, 1  ;;  %vm3007_vm13 = vcmp.eq.s32.totalorder %v2961_v2, 1  ;;  %2008 = vrot.lane.b32.xlu1 %v14714_v20, %s14023_s15  ;;  %v12841_v52 = vpack.c.bf16 %v1065_v34, %v1065_v34 }
  0xc8   : > { %v3044_v54 = vsel %vm3008_vm12, %v14462_v53, -1e+30  ;;  %v3043_v9 = vsel %vm3007_vm13, %v14459_v62, -1e+30  ;;  %vm4502_vm12 = vsmask.f32 7942 }
  0xc9   : > { %v3107_v62 = vsel %vm2718_vm3, %v3044_v54, -inf  ;;  %v3105_v53 = vsel %vm2718_vm3, %v3043_v9, -inf  ;;  %v271_v9 = vld [vmem:[%s14203_s13 + $0x28] sm:$0xff]  ;;  %vm15944_vm13 = vmand %vm4501_vm10, %vm4502_vm12  ;;  %vm4833_vm10 = vsmask.f32 5392 }
  0xca   : > { %v2970_v51 = vpop.permute.xlu1 %2969  ;;  %v2967_v35 = vpop.permute.xlu0 %2966  ;;  %v3108_v12 = vmax.f32 %v3100_v14, %v3107_v62  ;;  %v3106_v47 = vmax.f32 %v3098_v24, %v3105_v53  ;;  %v12734_v10 = vpack.c.bf16 %v271_v9, %v271_v9  ;;  %v2146_v53 = vld [vmem:[%s14203_s13 + $0x45] sm:$0xff]  ;;  %v489_v14 = vld [vmem:[%s14203_s13 + $0x31] sm:$0xff] }
  0xcb   : > { %vm3010_vm14 = vcmp.eq.s32.totalorder %v2970_v51, 1  ;;  %vm3009_vm15 = vcmp.eq.s32.totalorder %v2967_v35, 1  ;;  %1215 = vrot.lane.b32.xlu1 %v12842_v4, %s14021_s12  ;;  %v12949_v51 = vpack.c.bf16 %v1858_v63, %v1858_v63 }
  0xcc   : > { %v3046_v17 = vsel %vm3010_vm14, %v14480_v59, -1e+30  ;;  %v3045_v42 = vsel %vm3009_vm15, %v14477_v13, -1e+30  ;;  %452 = vst.msk [vmem:[#allocation2 + $0x3c] sm:$0xf] %vm446_vm7, %v12734_v10  ;;  %v3193_v10 = vlaneseq }
  0xcd   : > { %v3111_v41 = vsel %vm2718_vm3, %v3046_v17, -inf  ;;  %v3109_v26 = vsel %vm2718_vm3, %v3045_v42, -inf  ;;  %v12985_v42 = vpack.c.bf16 %v2146_v53, %v2146_v53  ;;  %vm5381_vm14 = vsmask.f32 3328 }
  0xce   : > { %v2976_v15 = vpop.permute.xlu1 %2975  ;;  %v2973_v43 = vpop.permute.xlu0 %2972  ;;  %v3112_v59 = vmax.f32 %v3104_v8, %v3111_v41  ;;  %v3110_v6 = vmax.f32 %v3102_v38, %v3109_v26  ;;  %v12771_v41 = vpack.c.bf16 %v489_v14, %v489_v14  ;;  %v273_v26 = vld [vmem:[%s14203_s13 + $0x38] sm:$0xff]  ;;  %v272_v8 = vld [vmem:[%s14203_s13 + $0x30] sm:$0xff]  ;;  %vm5382_vm15 = vsmask.f32 7440 }
  0xcf   : > { %vm3012_vm0 = vcmp.eq.s32.totalorder %v2976_v15, 1  ;;  %vm3011_vm1 = vcmp.eq.s32.totalorder %v2973_v43, 1  ;;  %2296 = vrot.lane.b32.xlu1 %v12986_v37, %s14021_s12  ;;  %v1355_v37 = vld [vmem:[%s14203_s13 + $0x3b] sm:$0xff]  ;;  %v12736_v15 = vpack.c.bf16 %v273_v26, %v273_v26  ;;  %v12735_v43 = vpack.c.bf16 %v272_v8, %v272_v8 }
  0xd0   : > { %v3048_v13 = vsel %vm3012_vm0, %v14510_v61, -1e+30  ;;  %v3047_v45 = vsel %vm3011_vm1, %v14506_v57, -1e+30  ;;  %v3117_v25 = vmax.f32 %v3110_v6, %v3112_v59  ;;  %v12878_v18 = vpack.c.bf16 %v1355_v37, %v1355_v37  ;;  %vm16032_vm0 = vmor %vm5381_vm14, %vm5382_vm15 }
  0xd1   : > { %v3115_v21 = vsel %vm2718_vm3, %v3048_v13, -inf  ;;  %v3113_v22 = vsel %vm2718_vm3, %v3047_v45, -inf  ;;  %454 = vst.msk [vmem:[#allocation2 + $0x54] sm:$0xf] %vm446_vm7, %v12736_v15  ;;  %453 = vst.msk [vmem:[#allocation2 + $0x48] sm:$0xf] %vm446_vm7, %v12735_v43 }
  0xd2   : > { %v3116_v44 = vmax.f32 %v3108_v12, %v3115_v21  ;;  %v3114_v31 = vmax.f32 %v3106_v47, %v3113_v22  ;;  %v3134_v40 = vpop.permute.xlu0 %3133  ;;  %1535 = vst.msk [vmem:[#allocation2 + $0x40] sm:$0xf] %vm446_vm7, %v12878_v18  ;;  %v1357_v12 = vld [vmem:[%s14203_s13 + $0x4b] sm:$0xff]  ;;  %v1356_v47 = vld [vmem:[%s14203_s13 + $0x43] sm:$0xff]  ;;  %v1860_v45 = vld [vmem:[%s14203_s13 + $0x54] sm:$0xff]  ;;  %vm5894_vm1 = vcmask 1042432  }
  0xd3   : > { %641 = vrot.lane.b32.xlu1 %v12772_v58, %s14022_s14  ;;  %v12880_v59 = vpack.c.bf16 %v1357_v12, %v1357_v12  ;;  %v12879_v6 = vpack.c.bf16 %v1356_v47, %v1356_v47  ;;  %v12951_v22 = vpack.c.bf16 %v1860_v45, %v1860_v45  ;;  %v1067_v58 = vld [vmem:[%s14203_s13 + $0x42] sm:$0xff]  ;;  %v1070_v43 = vld [vmem:[%s14203_s13 + $0x5a] sm:$0xff]  ;;  %vm16147_vm14 = vmor %vm4496_vm9, %vm4833_vm10 }
  0xd4   : > { %v3118_v19 = vmax.f32 %v3114_v31, %v3116_v44  ;;  %v14810_v31 = vpack.c.bf16 %v1067_v58, %v1067_v58  ;;  %v1862_v15 = vld [vmem:[%s14203_s13 + $0x64] sm:$0xff]  ;;  %v12846_v47 = vpack.c.bf16 %v1070_v43, %v1070_v43  ;;  %v494_v58 = vld [vmem:[%s14203_s13 + $0x59] sm:$0xff] }
  0xd5   : > { %1537 = vst.msk [vmem:[#allocation2 + $0x58] sm:$0xf] %vm446_vm7, %v12880_v59  ;;  %1536 = vst.msk [vmem:[#allocation2 + $0x4c] sm:$0xf] %vm446_vm7, %v12879_v6  ;;  %v12953_v12 = vpack.c.bf16 %v1862_v15, %v1862_v15  ;;  %v1069_v59 = vld [vmem:[%s14203_s13 + $0x52] sm:$0xff] }
  0xd6   : > { %v3119_v61 = vmax.f32 %v3117_v25, %v3118_v19  ;;  %v628_v7 = vpop.permute.xlu0 %627  ;;  %v2151_v6 = vld [vmem:[%s14203_s13 + $0x6d] sm:$0xff]  ;;  %v12845_v45 = vpack.c.bf16 %v1069_v59, %v1069_v59 }
  0xd7   : > { %736 = vst.msk [vmem:[#allocation2] sm:$0xf] %vm735_vm2, %v628_v7  ;;  %1724 = vrot.lane.b32.xlu1 %v14714_v20, %s14022_s14  ;;  %v12844_v20 = vpack.c.bf16 %v1068_v28, %v1068_v28  ;;  %v14961_v59 = vld [vmem:[%s18996_s4 + $0xc] sm:$0xff] }
  0xd8   : > { %v3120_v57 = vrot.slane %v3119_v61, 4 }
  0xda   : > { %v3121_v16 = vmax.f32 %v3119_v61, %v3120_v57  ;;  %v1711_v60 = vpop.permute.xlu0 %1710  ;;  %v491_v61 = vld [vmem:[%s14203_s13 + $0x41] sm:$0xff] }
  0xdb   : > { %1818 = vst.msk [vmem:[#allocation2 + $0x4] sm:$0xf] %vm735_vm2, %v1711_v60  ;;  %930 = vrot.lane.b32.xlu1 %v12842_v4, %s14023_s15  ;;  %v12773_v57 = vpack.c.bf16 %v491_v61, %v491_v61  ;;  %v1359_v60 = vld [vmem:[%s14203_s13 + $0x5b] sm:$0xff]  ;;  %v276_v61 = vld [vmem:[%s14203_s13 + $0x50] sm:$0xff] }
  0xdc   : > { %v3122_v1 = vrot.slane %v3121_v16, 2 }
  0xde   : > { %v3123_v46 = vmax.f32 %v3121_v16, %v3122_v1  ;;  %v917_v23 = vpop.permute.xlu0 %916  ;;  %v275_v16 = vld [vmem:[%s14203_s13 + $0x48] sm:$0xff] }
  0xdf   : > { %1025 = vst.msk [vmem:[#allocation2] sm:$0xf] %vm1024_vm4, %v917_v23  ;;  %2012 = vrot.lane.b32.xlu1 %v12952_v32, %s14023_s15  ;;  %v12738_v1 = vpack.c.bf16 %v275_v16, %v275_v16 }
  0xe0   : > { %v3124_v48 = vrot.slane %v3123_v46, 1 }
  0xe1   : > { %456 = vst.msk [vmem:[#allocation2 + $0x6c] sm:$0xf] %vm446_vm7, %v12738_v1  ;;  %v1360_v1 = vld [vmem:[%s14203_s13 + $0x63] sm:$0xff] }
  0xe2   : > { %v3125_v56 = vmax.f32 %v3123_v46, %v3124_v48  ;;  %v1999_v2 = vpop.permute.xlu0 %1998  ;;  %v12737_v46 = vpack.c.bf16 %v274_v36, %v274_v36  ;;  %v1358_v48 = vld [vmem:[%s14203_s13 + $0x53] sm:$0xff]  ;;  %v1361_v36 = vld [vmem:[%s14203_s13 + $0x6b] sm:$0xff] }
  0xe3   : > { %2106 = vst.msk [vmem:[#allocation2 + $0x4] sm:$0xf] %vm1024_vm4, %v1999_v2  ;;  %1219 = vrot.lane.b32.xlu1 %v12844_v20, %s14021_s12 }
  0xe4   : > { %v3136_v27 = vmul.f32 %v3134_v40, %v3125_v56  ;;  %v2148_v40 = vld [vmem:[%s14203_s13 + $0x55] sm:$0xff]  ;;  %455 = vst.msk [vmem:[#allocation2 + $0x60] sm:$0xf] %vm446_vm7, %v12737_v46  ;;  %v12883_v46 = vpack.c.bf16 %v1360_v1, %v1360_v1 }
  0xe5   : > { %v12987_v19 = vpack.c.bf16 %v2148_v40, %v2148_v40  ;;  %v12776_v40 = vpack.c.bf16 %v494_v58, %v494_v58 }
  0xe6   : > { %v3137_v33 = vsel %vm3128_vm6, %v3136_v27, 0.0  ;;  %v1206_v11 = vpop.permute.xlu0 %1205  ;;  %1540 = vst.msk [vmem:[#allocation2 + $0x7c] sm:$0xf] %vm446_vm7, %v12883_v46 }
  0xe7   : > { %3138 = vadd.xlane.f32.xlu0 %v3137_v33  ;;  %1314 = vst.msk [vmem:[#allocation2] sm:$0xf] %vm1313_vm5, %v1206_v11  ;;  %2300 = vrot.lane.b32.xlu1 %v12988_v29, %s14021_s12 }
  0xea   : > { %v2287_v5 = vpop.permute.xlu0 %2286 }
  0xeb   : > { %2394 = vst.msk [vmem:[#allocation2 + $0x4] sm:$0xf] %vm1313_vm5, %v2287_v5  ;;  %645 = vrot.lane.b32.xlu1 %v12774_v30, %s14022_s14 }
  0xee   : > { %v632_v4 = vpop.permute.xlu0 %631 }
  0xef   : > { %738 = vst.msk [vmem:[#allocation2 + $0x18] sm:$0xf] %vm735_vm2, %v632_v4  ;;  %1728 = vrot.lane.b32.xlu1 %v12952_v32, %s14022_s14  ;;  %v12882_v32 = vpack.c.bf16 %v1359_v60, %v1359_v60 }
  0xf1   : > { %1539 = vst.msk [vmem:[#allocation2 + $0x70] sm:$0xf] %vm446_vm7, %v12882_v32  ;;  %v12884_v32 = vpack.c.bf16 %v1361_v36, %v1361_v36 }
  0xf2   : > { %v1715_v3 = vpop.permute.xlu0 %1714 }
  0xf3   : > { %1820 = vst.msk [vmem:[#allocation2 + $0x1c] sm:$0xf] %vm735_vm2, %v1715_v3  ;;  %934 = vrot.lane.b32.xlu1 %v12844_v20, %s14023_s15  ;;  %v12881_v20 = vpack.c.bf16 %v1358_v48, %v1358_v48 }
  0xf4   : > { %1541 = vst.msk [vmem:[#allocation2 + $0x88] sm:$0xf] %vm446_vm7, %v12884_v32 }
  0xf5   : > { %1538 = vst.msk [vmem:[#allocation2 + $0x64] sm:$0xf] %vm446_vm7, %v12881_v20 }
  0xf6   : > { %v921_v54 = vpop.permute.xlu0 %920 }
  0xf7   : > { %1027 = vst.msk [vmem:[#allocation2 + $0x18] sm:$0xf] %vm1024_vm4, %v921_v54 }
  0xfa   : > { %v2003_v49 = vpop.permute.xlu0 %2002 }
  0xfb   : > { %2108 = vst.msk [vmem:[#allocation2 + $0x1c] sm:$0xf] %vm1024_vm4, %v2003_v49 }
  0xfd   : > { %924 = vrot.lane.b32.xlu0 %v14530_v39, %s14023_s15 }
  0xfe   : > { %v1210_v35 = vpop.permute.xlu0 %1209 }
  0xff   : > { %1316 = vst.msk [vmem:[#allocation2 + $0x18] sm:$0xf] %vm1313_vm5, %v1210_v35 }
 0x101   : > { %2006 = vrot.lane.b32.xlu0 %v12949_v51, %s14023_s15 }
 0x102   : > { %v2291_v62 = vpop.permute.xlu0 %2290 }
 0x103   : > { %2396 = vst.msk [vmem:[#allocation2 + $0x1c] sm:$0xf] %vm1313_vm5, %v2291_v62  ;;  %v14785_v17 = vpop.xlane.xlu1 %3130  ;;  %v13930_v62 = vld [vmem:[%s18996_s4] sm:$0x3f] }
 0x105   : > { %1213 = vrot.lane.b32.xlu0 %v12841_v52, %s14021_s12 }
 0x106   : > { %v636_v39 = vpop.permute.xlu0 %635 }
 0x107   : > { %740 = vst.msk [vmem:[#allocation2 + $0x30] sm:$0xf] %vm735_vm2, %v636_v39  ;;  %v630_v24 = vpop.permute.xlu1 %629 }
 0x108   : > { %737 = vst.msk [vmem:[#allocation2 + $0xc] sm:$0xf] %vm735_vm2, %v630_v24 }
 0x109   : > { %2294 = vrot.lane.b32.xlu0 %v12985_v42, %s14021_s12 }
 0x10a   : > { %v1719_v38 = vpop.permute.xlu0 %1718 }
 0x10b   : > { %1822 = vst.msk [vmem:[#allocation2 + $0x34] sm:$0xf] %vm735_vm2, %v1719_v38  ;;  %v1713_v50 = vpop.permute.xlu1 %1712 }
 0x10c   : > { %1819 = vst.msk [vmem:[#allocation2 + $0x10] sm:$0xf] %vm735_vm2, %v1713_v50 }
 0x10d   : > { %639 = vrot.lane.b32.xlu0 %v12771_v41, %s14022_s14 }
 0x10f   : > { %v919_v13 = vpop.permute.xlu1 %918 }
 0x110   : > { %1026 = vst.msk [vmem:[#allocation2 + $0xc] sm:$0xf] %vm1024_vm4, %v919_v13 }
 0x111   : > { %1722 = vrot.lane.b32.xlu0 %v12949_v51, %s14022_s14  ;;  %v14849_v51 = vshrl.u32 %v3193_v10, 7 }
 0x113   : > { %v2001_v21 = vpop.permute.xlu1 %2000  ;;  %v3227_v42 = vsub.s32 5, %v14849_v51  ;;  %v3195_v39 = vsub.s32 4, %v14849_v51 }
 0x114   : > { %2107 = vst.msk [vmem:[#allocation2 + $0x10] sm:$0xf] %vm1024_vm4, %v2001_v21  ;;  %v12990_v21 = vpack.c.bf16 %v2151_v6, %v2151_v6 }
 0x115   : > { %928 = vrot.lane.b32.xlu0 %v12841_v52, %s14023_s15 }
 0x117   : > { %v1208_v44 = vpop.permute.xlu1 %1207 }
 0x118   : > { %1315 = vst.msk [vmem:[#allocation2 + $0xc] sm:$0xf] %vm1313_vm5, %v1208_v44 }
 0x119   : > { %2010 = vrot.lane.b32.xlu0 %v12951_v22, %s14023_s15 }
 0x11b   : > { %v2289_v25 = vpop.permute.xlu1 %2288 }
 0x11c   : > { %2395 = vst.msk [vmem:[#allocation2 + $0x10] sm:$0xf] %vm1313_vm5, %v2289_v25  ;;  %v493_v25 = vld [vmem:[%s14203_s13 + $0x51] sm:$0xff] }
 0x11d   : > { %1217 = vrot.lane.b32.xlu0 %v14810_v31, %s14021_s12  ;;  %v12775_v60 = vpack.c.bf16 %v493_v25, %v493_v25  ;;  %v1867_v25 = vld [vmem:[%s14203_s13 + $0x8c] sm:$0xff] }
 0x11f   : > { %v634_v7 = vpop.permute.xlu1 %633 }
 0x120   : > { %739 = vst.msk [vmem:[#allocation2 + $0x24] sm:$0xf] %vm735_vm2, %v634_v7 }
 0x121   : > { %2298 = vrot.lane.b32.xlu0 %v12987_v19, %s14021_s12  ;;  %v277_v19 = vld [vmem:[%s14203_s13 + $0x58] sm:$0xff] }
 0x122   : > { %v12740_v7 = vpack.c.bf16 %v277_v19, %v277_v19 }
 0x123   : > { %v1717_v23 = vpop.permute.xlu1 %1716  ;;  %v13258_v28 = vld [vmem:[#allocation2 + $0x4] ss:$12 sps:$4 sm:$0xff]  }
 0x124   : > { %1821 = vst.msk [vmem:[#allocation2 + $0x28] sm:$0xf] %vm735_vm2, %v1717_v23  ;;  %3835 = vmatprep.mubr.bf16.mxu0 %v13258_v28  ;;  %v1865_v28 = vld [vmem:[%s14203_s13 + $0x7c] sm:$0xff] }
 0x125   : > { %643 = vrot.lane.b32.xlu0 %v12773_v57, %s14022_s14  ;;  %v12739_v57 = vpack.c.bf16 %v276_v61, %v276_v61  ;;  %458 = vst.msk [vmem:[#allocation2 + $0x84] sm:$0xf] %vm446_vm7, %v12740_v7  ;;  %v12956_v20 = vpack.c.bf16 %v1865_v28, %v1865_v28  ;;  %v2155_v28 = vld [vmem:[%s14203_s13 + $0x8d] sm:$0xff] }
 0x127   : > { %v923_v56 = vpop.permute.xlu1 %922  ;;  %457 = vst.msk [vmem:[#allocation2 + $0x78] sm:$0xf] %vm446_vm7, %v12739_v57  ;;  %v12958_v57 = vpack.c.bf16 %v1867_v25, %v1867_v25  ;;  %v2159_v25 = vld [vmem:[%s14203_s13 + $0xad] sm:$0xff] }
 0x128   : > { %1028 = vst.msk [vmem:[#allocation2 + $0x24] sm:$0xf] %vm1024_vm4, %v923_v56  ;;  %v1864_v56 = vld [vmem:[%s14203_s13 + $0x74] sm:$0xff] }
 0x129   : > { %1726 = vrot.lane.b32.xlu0 %v12951_v22, %s14022_s14  ;;  %v2150_v22 = vld [vmem:[%s14203_s13 + $0x65] sm:$0xff] }
 0x12b   : > { %v2005_v2 = vpop.permute.xlu1 %2004 }
 0x12c   : > { %2109 = vst.msk [vmem:[#allocation2 + $0x28] sm:$0xf] %vm1024_vm4, %v2005_v2  ;;  %v1072_v2 = vld [vmem:[%s14203_s13 + $0x6a] sm:$0xff] }
 0x12f   : > { %v1212_v55 = vpop.permute.xlu1 %1211 }
 0x130   : > { %1317 = vst.msk [vmem:[#allocation2 + $0x24] sm:$0xf] %vm1313_vm5, %v1212_v55 }
 0x133   : > { %v2293_v27 = vpop.permute.xlu1 %2292 }
 0x134   : > { %2397 = vst.msk [vmem:[#allocation2 + $0x28] sm:$0xf] %vm1313_vm5, %v2293_v27  ;;  %v12955_v27 = vpack.c.bf16 %v1864_v56, %v1864_v56  ;;  %v14027_v56 = vmov 2  }
 0x135   : > { %13249 = vset.pattern.permute.xlu1 %v14027_v56  ;;  %13250 = vset.pattern.permute.xlu0 %v14027_v56  ;;  %v1872_v56 = vld [vmem:[%s14203_s13 + $0xb4] sm:$0xff] }
 0x137   : > { %v638_v29 = vpop.permute.xlu1 %637 }
 0x138   : > { %741 = vst.msk [vmem:[#allocation2 + $0x3c] sm:$0xf] %vm735_vm2, %v638_v29  ;;  %v14906_v29 = vpack.c.bf16 %v1072_v2, %v1072_v2 }
 0x13b   : > { %v1721_v33 = vpop.permute.xlu1 %1720 }
 0x13c   : > { %1823 = vst.msk [vmem:[#allocation2 + $0x40] sm:$0xf] %vm735_vm2, %v1721_v33  ;;  %v1071_v33 = vld [vmem:[%s14203_s13 + $0x62] sm:$0xff] }
 0x13f   : > { %v927_v11 = vpop.permute.xlu1 %926 }
 0x140   : > { %1030 = vst.msk [vmem:[#allocation2 + $0x3c] sm:$0xf] %vm1024_vm4, %v927_v11  ;;  %v2153_v11 = vld [vmem:[%s14203_s13 + $0x7d] sm:$0xff] }
 0x143   : > { %v2009_v0 = vpop.permute.xlu1 %2008 }
 0x144   : > { %2111 = vst.msk [vmem:[#allocation2 + $0x40] sm:$0xf] %vm1024_vm4, %v2009_v0 }
 0x147   : > { %v1216_v30 = vpop.permute.xlu1 %1215 }
 0x148   : > { %1319 = vst.msk [vmem:[#allocation2 + $0x3c] sm:$0xf] %vm1313_vm5, %v1216_v30  ;;  %v14913_v30 = vpack.c.bf16 %v1071_v33, %v1071_v33 }
 0x14b   : > { %v2297_v5 = vpop.permute.xlu1 %2296 }
 0x14c   : > { %2399 = vst.msk [vmem:[#allocation2 + $0x40] sm:$0xf] %vm1313_vm5, %v2297_v5  ;;  %v12992_v5 = vpack.c.bf16 %v2153_v11, %v2153_v11 }
 0x14f   : > { %v642_v4 = vpop.permute.xlu1 %641 }
 0x150   : > { %743 = vst.msk [vmem:[#allocation2 + $0x54] sm:$0xf] %vm735_vm2, %v642_v4  ;;  %v2152_v4 = vld [vmem:[%s14203_s13 + $0x75] sm:$0xff] }
 0x153   : > { %v1725_v3 = vpop.permute.xlu1 %1724 }
 0x154   : > { %1825 = vst.msk [vmem:[#allocation2 + $0x58] sm:$0xf] %vm735_vm2, %v1725_v3  ;;  %v496_v3 = vld [vmem:[%s14203_s13 + $0x69] sm:$0xff] }
 0x157   : > { %v931_v54 = vpop.permute.xlu1 %930 }
 0x158   : > { %1032 = vst.msk [vmem:[#allocation2 + $0x54] sm:$0xf] %vm1024_vm4, %v931_v54 }
 0x15b   : > { %v2013_v9 = vpop.permute.xlu1 %2012 }
 0x15c   : > { %2113 = vst.msk [vmem:[#allocation2 + $0x58] sm:$0xf] %vm1024_vm4, %v2013_v9  ;;  %v12991_v9 = vpack.c.bf16 %v2152_v4, %v2152_v4 }
 0x15f   : > { %v1220_v37 = vpop.permute.xlu1 %1219 }
 0x160   : > { %1321 = vst.msk [vmem:[#allocation2 + $0x54] sm:$0xf] %vm1313_vm5, %v1220_v37  ;;  %v12778_v37 = vpack.c.bf16 %v496_v3, %v496_v3 }
 0x163   : > { %v2301_v49 = vpop.permute.xlu1 %2300 }
 0x164   : > { %2401 = vst.msk [vmem:[#allocation2 + $0x58] sm:$0xf] %vm1313_vm5, %v2301_v49  ;;  %v495_v49 = vld [vmem:[%s14203_s13 + $0x61] sm:$0xff] }
 0x165   : > { %v12777_v10 = vpack.c.bf16 %v495_v49, %v495_v49 }
 0x167   : > { %v646_v63 = vpop.permute.xlu1 %645 }
 0x168   : > { %745 = vst.msk [vmem:[#allocation2 + $0x6c] sm:$0xf] %vm735_vm2, %v646_v63 }
 0x16b   : > { %v1729_v18 = vpop.permute.xlu1 %1728 }
 0x16c   : > { %1827 = vst.msk [vmem:[#allocation2 + $0x70] sm:$0xf] %vm735_vm2, %v1729_v18  ;;  %v279_v18 = vld [vmem:[%s14203_s13 + $0x68] sm:$0xff] }
 0x16f   : > { %v935_v52 = vpop.permute.xlu1 %934 }
 0x170   : > { %v3139_v35 = vpop.xlane.xlu0 %3138  ;;  %1034 = vst.msk [vmem:[#allocation2 + $0x6c] sm:$0xf] %vm1024_vm4, %v935_v52 }
 0x171   : > { %v3140_v34 = vadd.f32 %v3139_v35, %v14785_v17  ;;  %v1863_v17 = vld [vmem:[%s14203_s13 + $0x6c] sm:$0xff]  ;;  %v278_v35 = vld [vmem:[%s14203_s13 + $0x60] sm:$0xff] }
 0x172   : > { %v12954_v38 = vpack.c.bf16 %v1863_v17, %v1863_v17  ;;  %v12741_v52 = vpack.c.bf16 %v278_v35, %v278_v35  ;;  %v14945_v17 = vld [vmem:[%s18996_s4 + $0x1c] sm:$0xff] }
 0x173   : > { %v3141_v53 = vadd.f32 %v13930_v62, %v3140_v34  ;;  %v12742_v34 = vpack.c.bf16 %v279_v18, %v279_v18  ;;  %v1363_v62 = vld [vmem:[%s14203_s13 + $0x7b] sm:$0xff] }
 0x174   : > { %v925_v14 = vpop.permute.xlu0 %924  ;;  %459 = vst.msk [vmem:[#allocation2 + $0x90] sm:$0xf] %vm446_vm7, %v12741_v52  ;;  %v1075_v35 = vld [vmem:[%s14203_s13 + $0x82] sm:$0xff] }
 0x175   : > { %v14858_v24 = vmax.f32 %v3141_v53, 0.0  ;;  %1029 = vst.msk [vmem:[#allocation2 + $0x30] sm:$0xf] %vm1024_vm4, %v925_v14  ;;  %v1362_v53 = vld [vmem:[%s14203_s13 + $0x73] sm:$0xff]  ;;  %v14940_v14 = vld [vmem:[%s18996_s4 + $0x24] sm:$0xff] }
 0x176   : > { %460 = vst.msk [vmem:[#allocation2 + $0x9c] sm:$0xf] %vm446_vm7, %v12742_v34  ;;  %v1076_v34 = vld [vmem:[%s14203_s13 + $0x8a] sm:$0xff] }
 0x177   : > { %v3228_v41 = vrot.slane %v14858_v24, %v3227_v42  ;;  %v3196_v26 = vrot.slane %v14858_v24, %v3195_v39  ;;  %v12886_v42 = vpack.c.bf16 %v1363_v62, %v1363_v62  ;;  %v12885_v39 = vpack.c.bf16 %v1362_v53, %v1362_v53 }
 0x178   : > { %v2007_v8 = vpop.permute.xlu0 %2006  ;;  %v12851_v53 = vpack.c.bf16 %v1075_v35, %v1075_v35 }
 0x179   : > { %3230 = vrot.lane.b32.xlu1 %v3228_v41, %s14024_s18  ;;  %3198 = vrot.lane.b32.xlu0 %v3196_v26, %s14023_s15  ;;  %2110 = vst.msk [vmem:[#allocation2 + $0x34] sm:$0xf] %vm1024_vm4, %v2007_v8  ;;  %s18545_s18 = scalar_lea.vmem %s18998_s6, %s13228_s11 }
 0x17a   : > { %1543 = vst.msk [vmem:[#allocation2 + $0xa0] sm:$0xf] %vm446_vm7, %v12886_v42  ;;  %1542 = vst.msk [vmem:[#allocation2 + $0x94] sm:$0xf] %vm446_vm7, %v12885_v39  ;;  %v12852_v42 = vpack.c.bf16 %v1076_v34, %v1076_v34  ;;  %v2156_v39 = vld [vmem:[%s14203_s13 + $0x95] sm:$0xff] }
 0x17c   : > { %v1214_v50 = vpop.permute.xlu0 %1213 }
 0x17d   : > { %932 = vrot.lane.b32.xlu0 %v14810_v31, %s14023_s15  ;;  %2016 = vrot.lane.b32.xlu1 %v12954_v38, %s14023_s15  ;;  %1318 = vst.msk [vmem:[#allocation2 + $0x30] sm:$0xf] %vm1313_vm5, %v1214_v50  ;;  %v12989_v31 = vpack.c.bf16 %v2150_v22, %v2150_v22 }
 0x180   : > { %v2295_v13 = vpop.permute.xlu0 %2294 }
 0x181   : > { %2014 = vrot.lane.b32.xlu0 %v12953_v12, %s14023_s15  ;;  %1223 = vrot.lane.b32.xlu1 %v12846_v47, %s14021_s12  ;;  %2398 = vst.msk [vmem:[#allocation2 + $0x34] sm:$0xf] %vm1313_vm5, %v2295_v13 }
 0x184   : > { %v640_v44 = vpop.permute.xlu0 %639 }
 0x185   : > { %1221 = vrot.lane.b32.xlu0 %v12845_v45, %s14021_s12  ;;  %2304 = vrot.lane.b32.xlu1 %v12990_v21, %s14021_s12  ;;  %742 = vst.msk [vmem:[#allocation2 + $0x48] sm:$0xf] %vm735_vm2, %v640_v44 }
 0x188   : > { %v1723_v16 = vpop.permute.xlu0 %1722 }
 0x189   : > { %2302 = vrot.lane.b32.xlu0 %v12989_v31, %s14021_s12  ;;  %649 = vrot.lane.b32.xlu1 %v12776_v40, %s14022_s14  ;;  %1824 = vst.msk [vmem:[#allocation2 + $0x4c] sm:$0xf] %vm735_vm2, %v1723_v16  ;;  %v1866_v40 = vld [vmem:[%s14203_s13 + $0x84] sm:$0xff]  ;;  %v1073_v16 = vld [vmem:[%s14203_s13 + $0x72] sm:$0xff] }
 0x18a   : > { %v12957_v7 = vpack.c.bf16 %v1866_v40, %v1866_v40  ;;  %v12849_v32 = vpack.c.bf16 %v1073_v16, %v1073_v16  ;;  %v2158_v40 = vld [vmem:[%s14203_s13 + $0xa5] sm:$0xff] }
 0x18b   : > { %v12997_v16 = vpack.c.bf16 %v2158_v40, %v2158_v40 }
 0x18c   : > { %v929_v23 = vpop.permute.xlu0 %928 }
 0x18d   : > { %647 = vrot.lane.b32.xlu0 %v12775_v60, %s14022_s14  ;;  %1732 = vrot.lane.b32.xlu1 %v12954_v38, %s14022_s14  ;;  %1031 = vst.msk [vmem:[#allocation2 + $0x48] sm:$0xf] %vm1024_vm4, %v929_v23  ;;  %v1074_v60 = vld [vmem:[%s14203_s13 + $0x7a] sm:$0xff]  ;;  %v2154_v23 = vld [vmem:[%s14203_s13 + $0x85] sm:$0xff] }
 0x18e   : > { %v12850_v46 = vpack.c.bf16 %v1074_v60, %v1074_v60  ;;  %v12993_v2 = vpack.c.bf16 %v2154_v23, %v2154_v23  ;;  %v12998_v60 = vpack.c.bf16 %v2159_v25, %v2159_v25 }
 0x190   : > { %v2011_v48 = vpop.permute.xlu0 %2010 }
 0x191   : > { %1730 = vrot.lane.b32.xlu0 %v12953_v12, %s14022_s14  ;;  %938 = vrot.lane.b32.xlu1 %v12846_v47, %s14023_s15  ;;  %2112 = vst.msk [vmem:[#allocation2 + $0x4c] sm:$0xf] %vm1024_vm4, %v2011_v48  ;;  %v14956_v47 = vld [vmem:[%s18996_s4 + $0x14] sm:$0xff] }
 0x194   : > { %v1218_v55 = vpop.permute.xlu0 %1217 }
 0x195   : > { %936 = vrot.lane.b32.xlu0 %v12845_v45, %s14023_s15  ;;  %2020 = vrot.lane.b32.xlu1 %v12956_v20, %s14023_s15  ;;  %1320 = vst.msk [vmem:[#allocation2 + $0x48] sm:$0xf] %vm1313_vm5, %v1218_v55  ;;  %v12994_v55 = vpack.c.bf16 %v2155_v28, %v2155_v28 }
 0x198   : > { %v2299_v0 = vpop.permute.xlu0 %2298 }
 0x199   : > { %2018 = vrot.lane.b32.xlu0 %v12955_v27, %s14023_s15  ;;  %1227 = vrot.lane.b32.xlu1 %v14906_v29, %s14021_s12  ;;  %2400 = vst.msk [vmem:[#allocation2 + $0x4c] sm:$0xf] %vm1313_vm5, %v2299_v0 }
 0x19c   : > { %v644_v54 = vpop.permute.xlu0 %643 }
 0x19d   : > { %1225 = vrot.lane.b32.xlu0 %v14913_v30, %s14021_s12  ;;  %2308 = vrot.lane.b32.xlu1 %v12992_v5, %s14021_s12  ;;  %744 = vst.msk [vmem:[#allocation2 + $0x60] sm:$0xf] %vm735_vm2, %v644_v54 }
 0x1a0   : > { %v1727_v63 = vpop.permute.xlu0 %1726 }
 0x1a1   : > { %2306 = vrot.lane.b32.xlu0 %v12991_v9, %s14021_s12  ;;  %653 = vrot.lane.b32.xlu1 %v12778_v37, %s14022_s14  ;;  %1826 = vst.msk [vmem:[#allocation2 + $0x64] sm:$0xf] %vm735_vm2, %v1727_v63  ;;  %v1868_v9 = vld [vmem:[%s14203_s13 + $0x94] sm:$0xff]  ;;  %v1869_v37 = vld [vmem:[%s14203_s13 + $0x9c] sm:$0xff] }
 0x1a2   : > { %v12960_v18 = vpack.c.bf16 %v1869_v37, %v1869_v37 }
 0x1a5   : > { %651 = vrot.lane.b32.xlu0 %v12777_v10, %s14022_s14  ;;  %1736 = vrot.lane.b32.xlu1 %v12956_v20, %s14022_s14  ;;  %v12959_v10 = vpack.c.bf16 %v1868_v9, %v1868_v9  ;;  %v1366_v9 = vld [vmem:[%s14203_s13 + $0x93] sm:$0xff] }
 0x1a9   : > { %1734 = vrot.lane.b32.xlu0 %v12955_v27, %s14022_s14  ;;  %v497_v27 = vld [vmem:[%s14203_s13 + $0x71] sm:$0xff] }
 0x1aa   : > { %v12779_v0 = vpack.c.bf16 %v497_v27, %v497_v27 }
 0x1eb   : > { %v3231_v41 = vpop.permute.xlu1 %3230  ;;  %v3199_v26 = vpop.permute.xlu0 %3198 }
 0x1ec   : > { %v3204_v8 = vmul.f32 %v3199_v26, %v14940_v14  ;;  %v3203_v38 = vmul.f32 %v3199_v26, %v14945_v17  ;;  %v3236_v50 = vmul.f32 %v3231_v41, %v14940_v14  ;;  %v3235_v12 = vmul.f32 %v3231_v41, %v14945_v17 }
 0x1ed   : > { %v3202_v45 = vmul.f32 %v3199_v26, %v14956_v47  ;;  %v3201_v21 = vmul.f32 %v3199_v26, %v14961_v59  ;;  %v3234_v44 = vmul.f32 %v3231_v41, %v14956_v47  ;;  %v3233_v31 = vmul.f32 %v3231_v41, %v14961_v59  ;;  %v2157_v41 = vld [vmem:[%s14203_s13 + $0x9d] sm:$0xff] }
 0x1ee   : > { %3215 = vrot.lane.b32.xlu0 %v3204_v8, %s14025_s25  ;;  %3213 = vrot.lane.b32.xlu1 %v3203_v38, %s14025_s25  ;;  %v12995_v8 = vpack.c.bf16 %v2156_v39, %v2156_v39  ;;  %v12996_v38 = vpack.c.bf16 %v2157_v41, %v2157_v41  ;;  %v285_v41 = vld [vmem:[%s14203_s13 + $0x98] sm:$0xff] }
 0x1ef   : > { %v933_v15 = vpop.permute.xlu0 %932  ;;  %v2017_v43 = vpop.permute.xlu1 %2016 }
 0x1f0   : > { %1033 = vst.msk [vmem:[#allocation2 + $0x60] sm:$0xf] %vm1024_vm4, %v933_v15  ;;  %2115 = vst.msk [vmem:[#allocation2 + $0x70] sm:$0xf] %vm1024_vm4, %v2017_v43  ;;  %v499_v15 = vld [vmem:[%s14203_s13 + $0x81] sm:$0xff]  ;;  %v500_v43 = vld [vmem:[%s14203_s13 + $0x89] sm:$0xff] }
 0x1f2   : > { %3247 = vrot.lane.b32.xlu0 %v3236_v50, %s14026_s30  ;;  %3245 = vrot.lane.b32.xlu1 %v3235_v12, %s14026_s30  ;;  %v12781_v50 = vpack.c.bf16 %v499_v15, %v499_v15  ;;  %v12782_v12 = vpack.c.bf16 %v500_v43, %v500_v43  ;;  %v1369_v15 = vld [vmem:[%s14203_s13 + $0xab] sm:$0xff] }
 0x1f3   : > { %v2015_v6 = vpop.permute.xlu0 %2014  ;;  %v1224_v13 = vpop.permute.xlu1 %1223  ;;  %v284_v43 = vld [vmem:[%s14203_s13 + $0x90] sm:$0xff] }
 0x1f4   : > { %2114 = vst.msk [vmem:[#allocation2 + $0x64] sm:$0xf] %vm1024_vm4, %v2015_v6  ;;  %v1870_v6 = vld [vmem:[%s14203_s13 + $0xa4] sm:$0xff] }
 0x1f5   : > { %1323 = vst.msk [vmem:[#allocation2 + $0x6c] sm:$0xf] %vm1313_vm5, %v1224_v13  ;;  %v1871_v13 = vld [vmem:[%s14203_s13 + $0xac] sm:$0xff] }
 0x1f6   : > { %3211 = vrot.lane.b32.xlu0 %v3202_v45, %s14025_s25  ;;  %3209 = vrot.lane.b32.xlu1 %v3201_v21, %s14025_s25  ;;  %v12961_v45 = vpack.c.bf16 %v1870_v6, %v1870_v6  ;;  %v12962_v21 = vpack.c.bf16 %v1871_v13, %v1871_v13  ;;  %v12892_v6 = vpack.c.bf16 %v1369_v15, %v1369_v15  ;;  %v1370_v15 = vld [vmem:[%s14203_s13 + $0xb3] sm:$0xff] }
 0x1f7   : > { %v1222_v22 = vpop.permute.xlu0 %1221  ;;  %v2305_v58 = vpop.permute.xlu1 %2304  ;;  %v12747_v13 = vpack.c.bf16 %v284_v43, %v284_v43 }
 0x1f8   : > { %1322 = vst.msk [vmem:[#allocation2 + $0x60] sm:$0xf] %vm1313_vm5, %v1222_v22  ;;  %2403 = vst.msk [vmem:[#allocation2 + $0x70] sm:$0xf] %vm1313_vm5, %v2305_v58  ;;  %v1077_v22 = vld [vmem:[%s14203_s13 + $0x92] sm:$0xff]  ;;  %v1078_v58 = vld [vmem:[%s14203_s13 + $0x9a] sm:$0xff] }
 0x1f9   : > { %1549 = vst.msk [vmem:[#allocation2 + $0xe8] sm:$0xf] %vm446_vm7, %v12892_v6  ;;  %465 = vst.msk [vmem:[#allocation2 + $0xd8] sm:$0xf] %vm446_vm7, %v12747_v13  ;;  %v1371_v6 = vld [vmem:[%s14203_s13 + $0xbb] sm:$0xff]  ;;  %v1081_v13 = vld [vmem:[%s14203_s13 + $0xb2] sm:$0xff] }
 0x1fa   : > { %3243 = vrot.lane.b32.xlu0 %v3234_v44, %s14026_s30  ;;  %3241 = vrot.lane.b32.xlu1 %v3233_v31, %s14026_s30  ;;  %v12853_v44 = vpack.c.bf16 %v1077_v22, %v1077_v22  ;;  %v12854_v31 = vpack.c.bf16 %v1078_v58, %v1078_v58 }
 0x1fb   : > { %v2303_v19 = vpop.permute.xlu0 %2302  ;;  %v650_v61 = vpop.permute.xlu1 %649 }
 0x1fc   : > { %2402 = vst.msk [vmem:[#allocation2 + $0x64] sm:$0xf] %vm1313_vm5, %v2303_v19  ;;  %v281_v19 = vld [vmem:[%s14203_s13 + $0x78] sm:$0xff] }
 0x1fd   : > { %747 = vst.msk [vmem:[#allocation2 + $0x84] sm:$0xf] %vm735_vm2, %v650_v61  ;;  %v280_v61 = vld [vmem:[%s14203_s13 + $0x70] sm:$0xff] }
 0x1fe   : > { %940 = vrot.lane.b32.xlu0 %v14913_v30, %s14023_s15  ;;  %942 = vrot.lane.b32.xlu1 %v14906_v29, %s14023_s15  ;;  %v498_v29 = vld [vmem:[%s14203_s13 + $0x79] sm:$0xff] }
 0x1ff   : > { %v648_v36 = vpop.permute.xlu0 %647  ;;  %v1733_v1 = vpop.permute.xlu1 %1732  ;;  %v12780_v30 = vpack.c.bf16 %v498_v29, %v498_v29  ;;  %v1079_v29 = vld [vmem:[%s14203_s13 + $0xa2] sm:$0xff] }
 0x200   : > { %746 = vst.msk [vmem:[#allocation2 + $0x78] sm:$0xf] %vm735_vm2, %v648_v36  ;;  %1829 = vst.msk [vmem:[#allocation2 + $0x88] sm:$0xf] %vm735_vm2, %v1733_v1  ;;  %v501_v36 = vld [vmem:[%s14203_s13 + $0x91] sm:$0xff]  ;;  %v502_v1 = vld [vmem:[%s14203_s13 + $0x99] sm:$0xff] }
 0x202   : > { %2022 = vrot.lane.b32.xlu0 %v12957_v7, %s14023_s15  ;;  %2024 = vrot.lane.b32.xlu1 %v12958_v57, %s14023_s15 }
 0x203   : > { %v1731_v48 = vpop.permute.xlu0 %1730  ;;  %v939_v20 = vpop.permute.xlu1 %938 }
 0x204   : > { %1828 = vst.msk [vmem:[#allocation2 + $0x7c] sm:$0xf] %vm735_vm2, %v1731_v48  ;;  %v12783_v48 = vpack.c.bf16 %v501_v36, %v501_v36 }
 0x205   : > { %1036 = vst.msk [vmem:[#allocation2 + $0x84] sm:$0xf] %vm1024_vm4, %v939_v20  ;;  %v12784_v20 = vpack.c.bf16 %v502_v1, %v502_v1 }
 0x206   : > { %1229 = vrot.lane.b32.xlu0 %v12849_v32, %s14021_s12  ;;  %1231 = vrot.lane.b32.xlu1 %v12850_v46, %s14021_s12 }
 0x207   : > { %v937_v33 = vpop.permute.xlu0 %936  ;;  %v2021_v11 = vpop.permute.xlu1 %2020 }
 0x208   : > { %1035 = vst.msk [vmem:[#allocation2 + $0x78] sm:$0xf] %vm1024_vm4, %v937_v33  ;;  %2117 = vst.msk [vmem:[#allocation2 + $0x88] sm:$0xf] %vm1024_vm4, %v2021_v11  ;;  %v1080_v33 = vld [vmem:[%s14203_s13 + $0xaa] sm:$0xff]  ;;  %v15072_v11 = vpack.c.bf16 %v1079_v29, %v1079_v29  ;;  %v2160_v29 = vld [vmem:[%s14203_s13 + $0xb5] sm:$0xff] }
 0x20a   : > { %2310 = vrot.lane.b32.xlu0 %v12993_v2, %s14021_s12  ;;  %2312 = vrot.lane.b32.xlu1 %v12994_v55, %s14021_s12  ;;  %v1873_v2 = vld [vmem:[%s14203_s13 + $0xbc] sm:$0xff]  ;;  %v15062_v55 = vpack.c.bf16 %v1872_v56, %v1872_v56 }
 0x20b   : > { %v2019_v5 = vpop.permute.xlu0 %2018  ;;  %v1228_v4 = vpop.permute.xlu1 %1227  ;;  %v15064_v27 = vpack.c.bf16 %v1873_v2, %v1873_v2 }
 0x20c   : > { %2116 = vst.msk [vmem:[#allocation2 + $0x7c] sm:$0xf] %vm1024_vm4, %v2019_v5  ;;  %v282_v5 = vld [vmem:[%s14203_s13 + $0x80] sm:$0xff] }
 0x20d   : > { %1325 = vst.msk [vmem:[#allocation2 + $0x84] sm:$0xf] %vm1313_vm5, %v1228_v4 }
 0x20e   : > { %655 = vrot.lane.b32.xlu0 %v12779_v0, %s14022_s14  ;;  %657 = vrot.lane.b32.xlu1 %v12780_v30, %s14022_s14  ;;  %v15074_v0 = vpack.c.bf16 %v1080_v33, %v1080_v33  ;;  %v283_v30 = vld [vmem:[%s14203_s13 + $0x88] sm:$0xff] }
 0x20f   : > { %v1226_v3 = vpop.permute.xlu0 %1225  ;;  %v2309_v54 = vpop.permute.xlu1 %2308  ;;  %v12746_v4 = vpack.c.bf16 %v283_v30, %v283_v30 }
 0x210   : > { %1324 = vst.msk [vmem:[#allocation2 + $0x78] sm:$0xf] %vm1313_vm5, %v1226_v3  ;;  %2405 = vst.msk [vmem:[#allocation2 + $0x88] sm:$0xf] %vm1313_vm5, %v2309_v54  ;;  %v12745_v3 = vpack.c.bf16 %v282_v5, %v282_v5  ;;  %v1367_v54 = vld [vmem:[%s14203_s13 + $0x9b] sm:$0xff]  ;;  %v12999_v5 = vpack.c.bf16 %v2160_v29, %v2160_v29  ;;  %v1372_v29 = vld [vmem:[%s14203_s13 + $0xc3] sm:$0xff] }
 0x211   : > { %464 = vst.msk [vmem:[#allocation2 + $0xcc] sm:$0xf] %vm446_vm7, %v12746_v4  ;;  %v12890_v37 = vpack.c.bf16 %v1367_v54, %v1367_v54  ;;  %v503_v54 = vld [vmem:[%s14203_s13 + $0xa1] sm:$0xff] }
 0x212   : > { %1738 = vrot.lane.b32.xlu0 %v12957_v7, %s14022_s14  ;;  %1740 = vrot.lane.b32.xlu1 %v12958_v57, %s14022_s14  ;;  %v12744_v7 = vpack.c.bf16 %v281_v19, %v281_v19  ;;  %v12743_v57 = vpack.c.bf16 %v280_v61, %v280_v61  ;;  %463 = vst.msk [vmem:[#allocation2 + $0xc0] sm:$0xf] %vm446_vm7, %v12745_v3 }
 0x213   : > { %v2307_v49 = vpop.permute.xlu0 %2306  ;;  %v654_v63 = vpop.permute.xlu1 %653  ;;  %1547 = vst.msk [vmem:[#allocation2 + $0xd0] sm:$0xf] %vm446_vm7, %v12890_v37 }
 0x214   : > { %2404 = vst.msk [vmem:[#allocation2 + $0x7c] sm:$0xf] %vm1313_vm5, %v2307_v49  ;;  %v12889_v49 = vpack.c.bf16 %v1366_v9, %v1366_v9  ;;  %v12785_v9 = vpack.c.bf16 %v503_v54, %v503_v54  ;;  %v1083_v54 = vld [vmem:[%s14203_s13 + $0xc2] sm:$0xff] }
 0x215   : > { %749 = vst.msk [vmem:[#allocation2 + $0x9c] sm:$0xf] %vm735_vm2, %v654_v63 }
 0x216   : > { %944 = vrot.lane.b32.xlu0 %v12849_v32, %s14023_s15  ;;  %946 = vrot.lane.b32.xlu1 %v12850_v46, %s14023_s15  ;;  %462 = vst.msk [vmem:[#allocation2 + $0xb4] sm:$0xf] %vm446_vm7, %v12744_v7  ;;  %461 = vst.msk [vmem:[#allocation2 + $0xa8] sm:$0xf] %vm446_vm7, %v12743_v57  ;;  %v1365_v32 = vld [vmem:[%s14203_s13 + $0x8b] sm:$0xff]  ;;  %v1364_v46 = vld [vmem:[%s14203_s13 + $0x83] sm:$0xff] }
 0x217   : > { %v652_v52 = vpop.permute.xlu0 %651  ;;  %v1737_v62 = vpop.permute.xlu1 %1736  ;;  %v12888_v23 = vpack.c.bf16 %v1365_v32, %v1365_v32  ;;  %v12887_v28 = vpack.c.bf16 %v1364_v46, %v1364_v46  ;;  %1546 = vst.msk [vmem:[#allocation2 + $0xc4] sm:$0xf] %vm446_vm7, %v12889_v49 }
 0x218   : > { %748 = vst.msk [vmem:[#allocation2 + $0x90] sm:$0xf] %vm735_vm2, %v652_v52  ;;  %1831 = vst.msk [vmem:[#allocation2 + $0xa0] sm:$0xf] %vm735_vm2, %v1737_v62 }
 0x219   : > { %1545 = vst.msk [vmem:[#allocation2 + $0xb8] sm:$0xf] %vm446_vm7, %v12888_v23  ;;  %1544 = vst.msk [vmem:[#allocation2 + $0xac] sm:$0xf] %vm446_vm7, %v12887_v28 }
 0x21a   : > { %2026 = vrot.lane.b32.xlu0 %v12959_v10, %s14023_s15  ;;  %2028 = vrot.lane.b32.xlu1 %v12960_v18, %s14023_s15 }
 0x21b   : > { %v1735_v26 = vpop.permute.xlu0 %1734 }
 0x21c   : > { %1830 = vst.msk [vmem:[#allocation2 + $0x94] sm:$0xf] %vm735_vm2, %v1735_v26 }
 0x21e   : > { %1233 = vrot.lane.b32.xlu0 %v12851_v53, %s14021_s12  ;;  %1235 = vrot.lane.b32.xlu1 %v12852_v42, %s14021_s12 }
 0x222   : > { %2314 = vrot.lane.b32.xlu0 %v12995_v8, %s14021_s12  ;;  %2316 = vrot.lane.b32.xlu1 %v12996_v38, %s14021_s12  ;;  %v12748_v38 = vpack.c.bf16 %v285_v41, %v285_v41 }
 0x224   : > { %466 = vst.msk [vmem:[#allocation2 + $0xe4] sm:$0xf] %vm446_vm7, %v12748_v38  ;;  %v287_v38 = vld [vmem:[%s14203_s13 + $0xa8] sm:$0xff] }
 0x226   : > { %659 = vrot.lane.b32.xlu0 %v12781_v50, %s14022_s14  ;;  %661 = vrot.lane.b32.xlu1 %v12782_v12, %s14022_s14 }
 0x22a   : > { %1742 = vrot.lane.b32.xlu0 %v12959_v10, %s14022_s14  ;;  %1744 = vrot.lane.b32.xlu1 %v12960_v18, %s14022_s14 }
 0x22e   : > { %948 = vrot.lane.b32.xlu0 %v12851_v53, %s14023_s15  ;;  %950 = vrot.lane.b32.xlu1 %v12852_v42, %s14023_s15 }
 0x232   : > { %2030 = vrot.lane.b32.xlu0 %v12961_v45, %s14023_s15  ;;  %2032 = vrot.lane.b32.xlu1 %v12962_v21, %s14023_s15 }
 0x236   : > { %1237 = vrot.lane.b32.xlu0 %v12853_v44, %s14021_s12  ;;  %1239 = vrot.lane.b32.xlu1 %v12854_v31, %s14021_s12 }
 0x23a   : > { %2318 = vrot.lane.b32.xlu0 %v12997_v16, %s14021_s12  ;;  %2320 = vrot.lane.b32.xlu1 %v12998_v60, %s14021_s12 }
 0x23e   : > { %663 = vrot.lane.b32.xlu0 %v12783_v48, %s14022_s14  ;;  %665 = vrot.lane.b32.xlu1 %v12784_v20, %s14022_s14 }
 0x242   : > { %1746 = vrot.lane.b32.xlu0 %v12961_v45, %s14022_s14  ;;  %1748 = vrot.lane.b32.xlu1 %v12962_v21, %s14022_s14 }
 0x246   : > { %952 = vrot.lane.b32.xlu0 %v12853_v44, %s14023_s15  ;;  %954 = vrot.lane.b32.xlu1 %v12854_v31, %s14023_s15  ;;  %v1368_v44 = vld [vmem:[%s14203_s13 + $0xa3] sm:$0xff] }
 0x24a   : > { %2034 = vrot.lane.b32.xlu0 %v15062_v55, %s14023_s15  ;;  %2036 = vrot.lane.b32.xlu1 %v15064_v27, %s14023_s15 }
 0x24e   : > { %1241 = vrot.lane.b32.xlu0 %v15072_v11, %s14021_s12  ;;  %1243 = vrot.lane.b32.xlu1 %v15074_v0, %s14021_s12 }
 0x260   : > { %v3214_v63 = vpop.permute.xlu1 %3213  ;;  %v3216_v10 = vpop.permute.xlu0 %3215 }
 0x261   : > { %v3223_v18 = vadd.f32 %v3214_v63, %v14945_v17  ;;  %v3224_v35 = vadd.f32 %v3216_v10, %v14940_v14  ;;  %v19017_v63 = vmov 0  }
 0x264   : > { %v3246_v34 = vpop.permute.xlu1 %3245  ;;  %v3248_v52 = vpop.permute.xlu0 %3247 }
 0x265   : > { %v3255_v62 = vadd.f32 %v3246_v34, %v3223_v18  ;;  %v3256_v53 = vadd.f32 %v3248_v52, %v3224_v35  ;;  %v2161_v18 = vld [vmem:[%s14203_s13 + $0xbd] sm:$0xff] }
 0x267   : > { %v12266_v42 = vmul.f32 -1.442695, %v3255_v62  ;;  %v12267_v39 = vmul.f32 -1.442695, %v3256_v53  ;;  %v13000_v62 = vpack.c.bf16 %v2161_v18, %v2161_v18  ;;  %v286_v53 = vld [vmem:[%s14203_s13 + $0xa0] sm:$0xff]  ;;  %v2164_v18 = vld [vmem:[%s14203_s13 + $0xd5] sm:$0xff] }
 0x268   : > { %v3210_v26 = vpop.permute.xlu1 %3209  ;;  %v3212_v8 = vpop.permute.xlu0 %3211 }
 0x269   : > { %13618 = vpow2.f32 %v12266_v42  ;;  %v3221_v17 = vadd.f32 %v3210_v26, %v14961_v59  ;;  %v3222_v14 = vadd.f32 %v3212_v8, %v14956_v47  ;;  %v12891_v59 = vpack.c.bf16 %v1368_v44, %v1368_v44  ;;  %v504_v42 = vld [vmem:[%s14203_s13 + $0xa9] sm:$0xff] }
 0x26a   : > { %13620 = vpow2.f32 %v12267_v39  ;;  %v12749_v26 = vpack.c.bf16 %v286_v53, %v286_v53  ;;  %v1874_v8 = vld [vmem:[%s14203_s13 + $0xc4] sm:$0xff]  ;;  %v1875_v44 = vld [vmem:[%s14203_s13 + $0xcc] sm:$0xff] }
 0x26b   : > { %1548 = vst.msk [vmem:[#allocation2 + $0xdc] sm:$0xf] %vm446_vm7, %v12891_v59  ;;  %v507_v53 = vld [vmem:[%s14203_s13 + $0xc1] sm:$0xff] }
 0x26c   : > { %v3242_v50 = vpop.permute.xlu1 %3241  ;;  %v3244_v12 = vpop.permute.xlu0 %3243  ;;  %467 = vst.msk [vmem:[#allocation2 + $0xf0] sm:$0xf] %vm446_vm7, %v12749_v26 }
 0x26d   : > { %v3253_v45 = vadd.f32 %v3242_v50, %v3221_v17  ;;  %v3254_v21 = vadd.f32 %v3244_v12, %v3222_v14  ;;  %v12786_v17 = vpack.c.bf16 %v504_v42, %v504_v42  ;;  %v12750_v14 = vpack.c.bf16 %v287_v38, %v287_v38 }
 0x26e   : > { %v12893_v12 = vpack.c.bf16 %v1370_v15, %v1370_v15 }
 0x26f   : > { %v12264_v22 = vmul.f32 -1.442695, %v3253_v45  ;;  %v12265_v58 = vmul.f32 -1.442695, %v3254_v21  ;;  %468 = vst.msk [vmem:[#allocation2 + $0xfc] sm:$0xf] %vm446_vm7, %v12750_v14  ;;  %v12894_v45 = vpack.c.bf16 %v1371_v6, %v1371_v6 }
 0x270   : > { %v943_v31 = vpop.permute.xlu1 %942  ;;  %v941_v40 = vpop.permute.xlu0 %940  ;;  %1550 = vst.msk [vmem:[#allocation2 + $0xf4] sm:$0xf] %vm446_vm7, %v12893_v12  ;;  %v1878_v6 = vld [vmem:[%s14203_s13 + $0xe4] sm:$0xff] }
 0x271   : > { %13622 = vpow2.f32 %v12264_v22  ;;  %1038 = vst.msk [vmem:[#allocation2 + $0x9c] sm:$0xf] %vm1024_vm4, %v943_v31  ;;  %1037 = vst.msk [vmem:[#allocation2 + $0x90] sm:$0xf] %vm1024_vm4, %v941_v40 }
 0x272   : > { %13624 = vpow2.f32 %v12265_v58  ;;  %1551 = vst.msk [vmem:[#allocation2 + $0x100] sm:$0xf] %vm446_vm7, %v12894_v45  ;;  %v2162_v58 = vld [vmem:[%s14203_s13 + $0xc5] sm:$0xff] }
 0x273   : > { %v13001_v31 = vpack.c.bf16 %v2162_v58, %v2162_v58 }
 0x274   : > { %v2025_v47 = vpop.permute.xlu1 %2024  ;;  %v2023_v25 = vpop.permute.xlu0 %2022 }
 0x275   : > { %2119 = vst.msk [vmem:[#allocation2 + $0xa0] sm:$0xf] %vm1024_vm4, %v2025_v47  ;;  %2118 = vst.msk [vmem:[#allocation2 + $0x94] sm:$0xf] %vm1024_vm4, %v2023_v25  ;;  %v505_v47 = vld [vmem:[%s14203_s13 + $0xb1] sm:$0xff]  ;;  %v12966_v25 = vpack.c.bf16 %v1875_v44, %v1875_v44  ;;  %v1375_v44 = vld [vmem:[%s14203_s13 + $0xdb] sm:$0xff] }
 0x276   : > { %v13619_v19 = vpop.eup %13618 }
 0x277   : > { %v13621_v61 = vpop.eup %13620  ;;  %v3271_v7 = vadd.f32 1.0, %v13619_v19  ;;  %v1082_v19 = vld [vmem:[%s14203_s13 + $0xba] sm:$0xff] }
 0x278   : > { %v3272_v57 = vadd.f32 1.0, %v13621_v61  ;;  %v1232_v16 = vpop.permute.xlu1 %1231  ;;  %v1230_v60 = vpop.permute.xlu0 %1229 }
 0x279   : > { %13626 = vrcp.f32 %v3271_v7  ;;  %1327 = vst.msk [vmem:[#allocation2 + $0x9c] sm:$0xf] %vm1313_vm5, %v1232_v16  ;;  %1326 = vst.msk [vmem:[#allocation2 + $0x90] sm:$0xf] %vm1313_vm5, %v1230_v60  ;;  %v2163_v16 = vld [vmem:[%s14203_s13 + $0xcd] sm:$0xff] }
 0x27a   : > { %13628 = vrcp.f32 %v3272_v57  ;;  %v12858_v57 = vpack.c.bf16 %v1082_v19, %v1082_v19 }
 0x27c   : > { %v2313_v36 = vpop.permute.xlu1 %2312  ;;  %v2311_v1 = vpop.permute.xlu0 %2310 }
 0x27d   : > { %2407 = vst.msk [vmem:[#allocation2 + $0xa0] sm:$0xf] %vm1313_vm5, %v2313_v36  ;;  %2406 = vst.msk [vmem:[#allocation2 + $0x94] sm:$0xf] %vm1313_vm5, %v2311_v1  ;;  %v13002_v36 = vpack.c.bf16 %v2163_v16, %v2163_v16  ;;  %v288_v1 = vld [vmem:[%s14203_s13 + $0xb0] sm:$0xff] }
 0x27e   : > { %v13623_v32 = vpop.eup %13622 }
 0x27f   : > { %v13625_v46 = vpop.eup %13624  ;;  %v3269_v23 = vadd.f32 1.0, %v13623_v32  ;;  %v506_v32 = vld [vmem:[%s14203_s13 + $0xb9] sm:$0xff] }
 0x280   : > { %v658_v28 = vpop.permute.xlu1 %657  ;;  %v656_v48 = vpop.permute.xlu0 %655  ;;  %v3270_v20 = vadd.f32 1.0, %v13625_v46 }
 0x281   : > { %13630 = vrcp.f32 %v3269_v23  ;;  %751 = vst.msk [vmem:[#allocation2 + $0xb4] sm:$0xf] %vm735_vm2, %v658_v28  ;;  %750 = vst.msk [vmem:[#allocation2 + $0xa8] sm:$0xf] %vm735_vm2, %v656_v48  ;;  %v12751_v28 = vpack.c.bf16 %v288_v1, %v288_v1  ;;  %v1876_v48 = vld [vmem:[%s14203_s13 + $0xd4] sm:$0xff] }
 0x282   : > { %13632 = vrcp.f32 %v3270_v20  ;;  %v289_v20 = vld [vmem:[%s14203_s13 + $0xb8] sm:$0xff] }
 0x283   : > { %469 = vst.msk [vmem:[#allocation2 + $0x108] sm:$0xf] %vm446_vm7, %v12751_v28  ;;  %v509_v1 = vld [vmem:[%s14203_s13 + $0xd1] sm:$0xff] }
 0x284   : > { %v1741_v56 = vpop.permute.xlu1 %1740  ;;  %v1739_v2 = vpop.permute.xlu0 %1738  ;;  %v12791_v28 = vpack.c.bf16 %v509_v1, %v509_v1  ;;  %v2442_v1 = vld [vmem:[%s14203_s13 + $0x86] sm:$0xff] }
 0x285   : > { %1833 = vst.msk [vmem:[#allocation2 + $0xb8] sm:$0xf] %vm735_vm2, %v1741_v56  ;;  %1832 = vst.msk [vmem:[#allocation2 + $0xac] sm:$0xf] %vm735_vm2, %v1739_v2  ;;  %v12788_v56 = vpack.c.bf16 %v506_v32, %v506_v32  ;;  %v12752_v2 = vpack.c.bf16 %v289_v20, %v289_v20  ;;  %v2167_v20 = vld [vmem:[%s14203_s13 + $0xed] sm:$0xff] }
 0x286   : > { %v13627_v33 = vpop.eup %13626 }
 0x287   : > { %v13629_v30 = vpop.eup %13628  ;;  %3341 = vperm.xlu1 %13249, %v13627_v33   ;;  %v12967_v33 = vpack.c.bf16 %v1876_v48, %v1876_v48  ;;  %470 = vst.msk [vmem:[#allocation2 + $0x114] sm:$0xf] %vm446_vm7, %v12752_v2  ;;  %v2435_v2 = vld [vmem:[%s14203_s13 + $0x4e] sm:$0xff] }
 0x288   : > { %3346 = vperm.xlu0 %13250, %v13629_v30   ;;  %v947_v4 = vpop.permute.xlu1 %946  ;;  %v945_v3 = vpop.permute.xlu0 %944 }
 0x289   : > { %1040 = vst.msk [vmem:[#allocation2 + $0xb4] sm:$0xf] %vm1024_vm4, %v947_v4  ;;  %1039 = vst.msk [vmem:[#allocation2 + $0xa8] sm:$0xf] %vm1024_vm4, %v945_v3  ;;  %v12895_v4 = vpack.c.bf16 %v1372_v29, %v1372_v29  ;;  %v1373_v3 = vld [vmem:[%s14203_s13 + $0xcb] sm:$0xff] }
 0x28b   : > { %1552 = vst.msk [vmem:[#allocation2 + $0x10c] sm:$0xf] %vm446_vm7, %v12895_v4 }
 0x28c   : > { %2322 = vrot.lane.b32.xlu0 %v12999_v5, %s14021_s12  ;;  %v2029_v37 = vpop.permute.xlu1 %2028  ;;  %v2027_v49 = vpop.permute.xlu0 %2026 }
 0x28d   : > { %2121 = vst.msk [vmem:[#allocation2 + $0xb8] sm:$0xf] %vm1024_vm4, %v2029_v37  ;;  %2120 = vst.msk [vmem:[#allocation2 + $0xac] sm:$0xf] %vm1024_vm4, %v2027_v49  ;;  %13251 = vset.pattern.permute.xlu0 %v19017_v63  ;;  %v12859_v37 = vpack.c.bf16 %v1083_v54, %v1083_v54  ;;  %v13006_v54 = vpack.c.bf16 %v2167_v20, %v2167_v20 }
 0x28e   : > { %v13631_v10 = vpop.eup %13630 }
 0x28f   : > { %3331 = vperm.xlu1 %13249, %v13631_v10   ;;  %v13633_v52 = vpop.eup %13632 }
 0x290   : > { %667 = vrot.lane.b32.xlu0 %v12785_v9, %s14022_s14  ;;  %v1236_v35 = vpop.permute.xlu1 %1235  ;;  %v1234_v34 = vpop.permute.xlu0 %1233  ;;  %v12896_v9 = vpack.c.bf16 %v1373_v3, %v1373_v3 }
 0x291   : > { %1329 = vst.msk [vmem:[#allocation2 + $0xb4] sm:$0xf] %vm1313_vm5, %v1236_v35  ;;  %1328 = vst.msk [vmem:[#allocation2 + $0xa8] sm:$0xf] %vm1313_vm5, %v1234_v34  ;;  %v1877_v35 = vld [vmem:[%s14203_s13 + $0xdc] sm:$0xff]  ;;  %v13003_v34 = vpack.c.bf16 %v2164_v18, %v2164_v18 }
 0x292   : > { %1553 = vst.msk [vmem:[#allocation2 + $0x118] sm:$0xf] %vm446_vm7, %v12896_v9  ;;  %v12968_v42 = vpack.c.bf16 %v1877_v35, %v1877_v35  ;;  %v292_v9 = vld [vmem:[%s14203_s13 + $0xd0] sm:$0xff]  ;;  %v293_v18 = vld [vmem:[%s14203_s13 + $0xd8] sm:$0xff] }
 0x293   : > { %3336 = vperm.xlu1 %13249, %v13633_v52  }
 0x294   : > { %1750 = vrot.lane.b32.xlu0 %v15062_v55, %s14022_s14  ;;  %v2317_v39 = vpop.permute.xlu1 %2316  ;;  %v2315_v41 = vpop.permute.xlu0 %2314  ;;  %v12965_v55 = vpack.c.bf16 %v1874_v8, %v1874_v8 }
 0x295   : > { %2409 = vst.msk [vmem:[#allocation2 + $0xb8] sm:$0xf] %vm1313_vm5, %v2317_v39  ;;  %2408 = vst.msk [vmem:[#allocation2 + $0xac] sm:$0xf] %vm1313_vm5, %v2315_v41  ;;  %v1084_v39 = vld [vmem:[%s14203_s13 + $0xca] sm:$0xff]  ;;  %v12789_v41 = vpack.c.bf16 %v507_v53, %v507_v53 }
 0x296   : > { %v12860_v38 = vpack.c.bf16 %v1084_v39, %v1084_v39  ;;  %v1087_v39 = vld [vmem:[%s14203_s13 + $0xe2] sm:$0xff] }
 0x297   : > { %2324 = vrot.lane.b32.xlu1 %v13000_v62, %s14021_s12 }
 0x298   : > { %956 = vrot.lane.b32.xlu0 %v15072_v11, %s14023_s15  ;;  %v662_v43 = vpop.permute.xlu1 %661  ;;  %v660_v50 = vpop.permute.xlu0 %659  ;;  %13252 = vset.pattern.permute.xlu1 %v19017_v63  ;;  %v12857_v11 = vpack.c.bf16 %v1081_v13, %v1081_v13  ;;  %v291_v13 = vld [vmem:[%s14203_s13 + $0xc8] sm:$0xff] }
 0x299   : > { %753 = vst.msk [vmem:[#allocation2 + $0xcc] sm:$0xf] %vm735_vm2, %v662_v43  ;;  %752 = vst.msk [vmem:[#allocation2 + $0xc0] sm:$0xf] %vm735_vm2, %v660_v50  ;;  %v290_v43 = vld [vmem:[%s14203_s13 + $0xc0] sm:$0xff]  ;;  %v508_v50 = vld [vmem:[%s14203_s13 + $0xc9] sm:$0xff] }
 0x29a   : > { %v12753_v12 = vpack.c.bf16 %v290_v43, %v290_v43  ;;  %v12790_v45 = vpack.c.bf16 %v508_v50, %v508_v50 }
 0x29b   : > { %669 = vrot.lane.b32.xlu1 %v12786_v17, %s14022_s14  ;;  %v2165_v17 = vld [vmem:[%s14203_s13 + $0xdd] sm:$0xff] }
 0x29c   : > { %2038 = vrot.lane.b32.xlu0 %v12965_v55, %s14023_s15  ;;  %v1745_v21 = vpop.permute.xlu1 %1744  ;;  %v1743_v22 = vpop.permute.xlu0 %1742  ;;  %471 = vst.msk [vmem:[#allocation2 + $0x120] sm:$0xf] %vm446_vm7, %v12753_v12  ;;  %v2440_v12 = vld [vmem:[%s14203_s13 + $0x76] sm:$0xff] }
 0x29d   : > { %1835 = vst.msk [vmem:[#allocation2 + $0xd0] sm:$0xf] %vm735_vm2, %v1745_v21  ;;  %1834 = vst.msk [vmem:[#allocation2 + $0xc4] sm:$0xf] %vm735_vm2, %v1743_v22  ;;  %v1374_v21 = vld [vmem:[%s14203_s13 + $0xd3] sm:$0xff]  ;;  %v12969_v22 = vpack.c.bf16 %v1878_v6, %v1878_v6  ;;  %v2441_v6 = vld [vmem:[%s14203_s13 + $0x7e] sm:$0xff] }
 0x29e   : > { %v12897_v58 = vpack.c.bf16 %v1374_v21, %v1374_v21  ;;  %v1088_v21 = vld [vmem:[%s14203_s13 + $0xea] sm:$0xff] }
 0x29f   : > { %1752 = vrot.lane.b32.xlu1 %v15064_v27, %s14022_s14  ;;  %v12787_v27 = vpack.c.bf16 %v505_v47, %v505_v47  ;;  %v12898_v47 = vpack.c.bf16 %v1375_v44, %v1375_v44  ;;  %v2169_v44 = vld [vmem:[%s14203_s13 + $0xfd] sm:$0xff] }
 0x2a0   : > { %1245 = vrot.lane.b32.xlu0 %v12857_v11, %s14021_s12  ;;  %v951_v40 = vpop.permute.xlu1 %950  ;;  %v949_v59 = vpop.permute.xlu0 %948  ;;  %1554 = vst.msk [vmem:[#allocation2 + $0x124] sm:$0xf] %vm446_vm7, %v12897_v58  ;;  %v12864_v58 = vpack.c.bf16 %v1088_v21, %v1088_v21 }
 0x2a1   : > { %1042 = vst.msk [vmem:[#allocation2 + $0xcc] sm:$0xf] %vm1024_vm4, %v951_v40  ;;  %1041 = vst.msk [vmem:[#allocation2 + $0xc0] sm:$0xf] %vm1024_vm4, %v949_v59  ;;  %v2431_v40 = vld [vmem:[%s14203_s13 + $0x2e] sm:$0xff] }
 0x2a2   : > { %v1085_v59 = vld [vmem:[%s14203_s13 + $0xd2] sm:$0xff]  ;;  %v13018_v19 = vpack.c.bf16 %v2431_v40, %v2431_v40  ;;  %1555 = vst.msk [vmem:[#allocation2 + $0x130] sm:$0xf] %vm446_vm7, %v12898_v47  ;;  %v3283_v40 = vld [vmem:[%s18996_s4 + $0x2e] sm:$0x1]  ;;  %v294_v47 = vld [vmem:[%s14203_s13 + $0xe0] sm:$0xff] }
 0x2a3   : > { %958 = vrot.lane.b32.xlu1 %v15074_v0, %s14023_s15  ;;  %v12861_v16 = vpack.c.bf16 %v1085_v59, %v1085_v59  ;;  %v512_v59 = vld [vmem:[%s14203_s13 + $0xe9] sm:$0xff]  ;;  %vm3322_vm6 = vcmp.gt.f32.partialorder %v3283_v40, 0.5  ;;  %v2449_v40 = vld [vmem:[%s14203_s13 + $0xbe] sm:$0xff] }
 0x2a4   : > { %2326 = vrot.lane.b32.xlu0 %v13001_v31, %s14021_s12  ;;  %v2033_v61 = vpop.permute.xlu1 %2032  ;;  %v2031_v7 = vpop.permute.xlu0 %2030  ;;  %v2430_v31 = vld [vmem:[%s14203_s13 + $0x26] sm:$0xff]  ;;  %2611 = vst.msk [vmem:[#allocation2 + $0x14] sm:$0xf] %vm446_vm7, %v13018_v19  ;;  %v12757_v19 = vpack.c.bf16 %v294_v47, %v294_v47 }
 0x2a5   : > { %2123 = vst.msk [vmem:[#allocation2 + $0xd0] sm:$0xf] %vm1024_vm4, %v2033_v61  ;;  %2122 = vst.msk [vmem:[#allocation2 + $0xc4] sm:$0xf] %vm1024_vm4, %v2031_v7  ;;  %v2433_v61 = vld [vmem:[%s14203_s13 + $0x3e] sm:$0xff]  ;;  %v3299_v47 = vld [vmem:[%s18994_s2 + $0x68] sm:$0xff] }
 0x2a6   : > { %475 = vst.msk [vmem:[#allocation2 + $0x150] sm:$0xf] %vm446_vm7, %v12757_v19  ;;  %v3319_v19 = vld [vmem:[%s18994_s2 + $0x108] sm:$0xff] }
 0x2a7   : > { %2040 = vrot.lane.b32.xlu1 %v12966_v25, %s14023_s15 }
 0x2a8   : > { %671 = vrot.lane.b32.xlu0 %v12787_v27, %s14022_s14  ;;  %v1240_v0 = vpop.permute.xlu1 %1239  ;;  %v1238_v60 = vpop.permute.xlu0 %1237  ;;  %v2432_v27 = vld [vmem:[%s14203_s13 + $0x36] sm:$0xff] }
 0x2a9   : > { %1331 = vst.msk [vmem:[#allocation2 + $0xcc] sm:$0xf] %vm1313_vm5, %v1240_v0  ;;  %1330 = vst.msk [vmem:[#allocation2 + $0xc0] sm:$0xf] %vm1313_vm5, %v1238_v60  ;;  %v13019_v7 = vpack.c.bf16 %v2432_v27, %v2432_v27  ;;  %v2166_v0 = vld [vmem:[%s14203_s13 + $0xe5] sm:$0xff] }
 0x2aa   : > { %v1879_v60 = vld [vmem:[%s14203_s13 + $0xec] sm:$0xff] }
 0x2ab   : > { %1247 = vrot.lane.b32.xlu1 %v12858_v57, %s14021_s12  ;;  %2612 = vst.msk [vmem:[#allocation2 + $0x20] sm:$0xf] %vm446_vm7, %v13019_v7  ;;  %v295_v27 = vld [vmem:[%s14203_s13 + $0xe8] sm:$0xff] }
 0x2ac   : > { %1754 = vrot.lane.b32.xlu0 %v12965_v55, %s14022_s14  ;;  %v2321_v46 = vpop.permute.xlu1 %2320  ;;  %v2319_v23 = vpop.permute.xlu0 %2318  ;;  %v13004_v55 = vpack.c.bf16 %v2165_v17, %v2165_v17  ;;  %v12758_v7 = vpack.c.bf16 %v295_v27, %v295_v27 }
 0x2ad   : > { %2411 = vst.msk [vmem:[#allocation2 + $0xd0] sm:$0xf] %vm1313_vm5, %v2321_v46  ;;  %2410 = vst.msk [vmem:[#allocation2 + $0xc4] sm:$0xf] %vm1313_vm5, %v2319_v23  ;;  %v12970_v46 = vpack.c.bf16 %v1879_v60, %v1879_v60  ;;  %v1086_v23 = vld [vmem:[%s14203_s13 + $0xda] sm:$0xff] }
 0x2ae   : > { %v12862_v48 = vpack.c.bf16 %v1086_v23, %v1086_v23  ;;  %v1089_v23 = vld [vmem:[%s14203_s13 + $0xf2] sm:$0xff]  ;;  %476 = vst.msk [vmem:[#allocation2 + $0x15c] sm:$0xf] %vm446_vm7, %v12758_v7 }
 0x2af   : > { %2328 = vrot.lane.b32.xlu1 %v13002_v36, %s14021_s12  ;;  %v13005_v36 = vpack.c.bf16 %v2166_v0, %v2166_v0 }
 0x2b0   : > { %960 = vrot.lane.b32.xlu0 %v12857_v11, %s14023_s15  ;;  %v666_v30 = vpop.permute.xlu1 %665  ;;  %v664_v5 = vpop.permute.xlu0 %663  ;;  %v12754_v11 = vpack.c.bf16 %v291_v13, %v291_v13  ;;  %v13027_v13 = vpack.c.bf16 %v2440_v12, %v2440_v12  ;;  %v2447_v12 = vld [vmem:[%s14203_s13 + $0xae] sm:$0xff] }
 0x2b1   : > { %755 = vst.msk [vmem:[#allocation2 + $0xe4] sm:$0xf] %vm735_vm2, %v666_v30  ;;  %754 = vst.msk [vmem:[#allocation2 + $0xd8] sm:$0xf] %vm735_vm2, %v664_v5  ;;  %v2436_v30 = vld [vmem:[%s14203_s13 + $0x56] sm:$0xff]  ;;  %v2437_v5 = vld [vmem:[%s14203_s13 + $0x5e] sm:$0xff] }
 0x2b2   : > { %472 = vst.msk [vmem:[#allocation2 + $0x12c] sm:$0xf] %vm446_vm7, %v12754_v11  ;;  %v13023_v4 = vpack.c.bf16 %v2436_v30, %v2436_v30  ;;  %v13024_v3 = vpack.c.bf16 %v2437_v5, %v2437_v5  ;;  %2620 = vst.msk [vmem:[#allocation2 + $0x80] sm:$0xf] %vm446_vm7, %v13027_v13  ;;  %v15323_v30 = vpack.c.bf16 %v1089_v23, %v1089_v23  ;;  %v2170_v5 = vld [vmem:[%s14203_s13 + $0x105] sm:$0xff] }
 0x2b3   : > { %673 = vrot.lane.b32.xlu1 %v12788_v56, %s14022_s14  ;;  %v2434_v56 = vld [vmem:[%s14203_s13 + $0x46] sm:$0xff]  ;;  %v13036_v23 = vpack.c.bf16 %v2449_v40, %v2449_v40 }
 0x2b4   : > { %2042 = vrot.lane.b32.xlu0 %v12967_v33, %s14023_s15  ;;  %v1749_v49 = vpop.permute.xlu1 %1748  ;;  %v1747_v10 = vpop.permute.xlu0 %1746  ;;  %v13021_v29 = vpack.c.bf16 %v2434_v56, %v2434_v56  ;;  %2616 = vst.msk [vmem:[#allocation2 + $0x50] sm:$0xf] %vm446_vm7, %v13023_v4  ;;  %2617 = vst.msk [vmem:[#allocation2 + $0x5c] sm:$0xf] %vm446_vm7, %v13024_v3  ;;  %v2444_v56 = vld [vmem:[%s14203_s13 + $0x96] sm:$0xff]  ;;  %v1883_v3 = vld [vmem:[%s14203_s13 + $0x10c] sm:$0xff] }
 0x2b5   : > { %1837 = vst.msk [vmem:[#allocation2 + $0xe8] sm:$0xf] %vm735_vm2, %v1749_v49  ;;  %1836 = vst.msk [vmem:[#allocation2 + $0xdc] sm:$0xf] %vm735_vm2, %v1747_v10  ;;  %v12755_v49 = vpack.c.bf16 %v292_v9, %v292_v9  ;;  %v1880_v10 = vld [vmem:[%s14203_s13 + $0xf4] sm:$0xff]  ;;  %v13009_v9 = vpack.c.bf16 %v2170_v5, %v2170_v5 }
 0x2b6   : > { %2614 = vst.msk [vmem:[#allocation2 + $0x38] sm:$0xf] %vm446_vm7, %v13021_v29  ;;  %2629 = vst.msk [vmem:[#allocation2 + $0xec] sm:$0xf] %vm446_vm7, %v13036_v23 }
 0x2b7   : > { %1756 = vrot.lane.b32.xlu1 %v12966_v25, %s14022_s14  ;;  %v13017_v25 = vpack.c.bf16 %v2430_v31, %v2430_v31  ;;  %473 = vst.msk [vmem:[#allocation2 + $0x138] sm:$0xf] %vm446_vm7, %v12755_v49  ;;  %v13008_v31 = vpack.c.bf16 %v2169_v44, %v2169_v44  ;;  %v3320_v49 = vld [vmem:[%s18994_s2 + $0x110] sm:$0xff]  ;;  %v514_v44 = vld [vmem:[%s14203_s13 + $0xf9] sm:$0xff] }
 0x2b8   : > { %1249 = vrot.lane.b32.xlu0 %v12859_v37, %s14021_s12  ;;  %v955_v52 = vpop.permute.xlu1 %954  ;;  %v953_v62 = vpop.permute.xlu0 %952 }
 0x2b9   : > { %1044 = vst.msk [vmem:[#allocation2 + $0xe4] sm:$0xf] %vm1024_vm4, %v955_v52  ;;  %1043 = vst.msk [vmem:[#allocation2 + $0xd8] sm:$0xf] %vm1024_vm4, %v953_v62  ;;  %v1376_v52 = vld [vmem:[%s14203_s13 + $0xe3] sm:$0xff]  ;;  %v12971_v62 = vpack.c.bf16 %v1880_v10, %v1880_v10  ;;  %v513_v10 = vld [vmem:[%s14203_s13 + $0xf1] sm:$0xff] }
 0x2ba   : > { %2610 = vst.msk [vmem:[#allocation2 + $0x8] sm:$0xf] %vm446_vm7, %v13017_v25  ;;  %v12899_v53 = vpack.c.bf16 %v1376_v52, %v1376_v52  ;;  %v1882_v25 = vld [vmem:[%s14203_s13 + $0x104] sm:$0xff] }
 0x2bb   : > { %962 = vrot.lane.b32.xlu1 %v12858_v57, %s14023_s15  ;;  %v13020_v57 = vpack.c.bf16 %v2433_v61, %v2433_v61  ;;  %v12794_v61 = vpack.c.bf16 %v512_v59, %v512_v59  ;;  %v15305_v0 = vpack.c.bf16 %v1882_v25, %v1882_v25  ;;  %v3318_v25 = vld [vmem:[%s18994_s2 + $0x100] sm:$0xff] }
 0x2bc   : > { %2330 = vrot.lane.b32.xlu0 %v13003_v34, %s14021_s12  ;;  %v2037_v26 = vpop.permute.xlu1 %2036  ;;  %v2035_v8 = vpop.permute.xlu0 %2034  ;;  %v12756_v34 = vpack.c.bf16 %v293_v18, %v293_v18  ;;  %1556 = vst.msk [vmem:[#allocation2 + $0x13c] sm:$0xf] %vm446_vm7, %v12899_v53 }
 0x2bd   : > { %2125 = vst.msk [vmem:[#allocation2 + $0xe8] sm:$0xf] %vm1024_vm4, %v2037_v26  ;;  %2124 = vst.msk [vmem:[#allocation2 + $0xdc] sm:$0xf] %vm1024_vm4, %v2035_v8  ;;  %v12863_v26 = vpack.c.bf16 %v1087_v39, %v1087_v39  ;;  %v2168_v8 = vld [vmem:[%s14203_s13 + $0xf5] sm:$0xff] }
 0x2be   : > { %2613 = vst.msk [vmem:[#allocation2 + $0x2c] sm:$0xf] %vm446_vm7, %v13020_v57  ;;  %474 = vst.msk [vmem:[#allocation2 + $0x144] sm:$0xf] %vm446_vm7, %v12756_v34  ;;  %v13007_v17 = vpack.c.bf16 %v2168_v8, %v2168_v8  ;;  %v1378_v57 = vld [vmem:[%s14203_s13 + $0xf3] sm:$0xff] }
 0x2bf   : > { %2044 = vrot.lane.b32.xlu1 %v12968_v42, %s14023_s15  ;;  %v12901_v60 = vpack.c.bf16 %v1378_v57, %v1378_v57 }
 0x2c0   : > { %675 = vrot.lane.b32.xlu0 %v12789_v41, %s14022_s14  ;;  %v1244_v14 = vpop.permute.xlu1 %1243  ;;  %v1242_v15 = vpop.permute.xlu0 %1241 }
 0x2c1   : > { %1333 = vst.msk [vmem:[#allocation2 + $0xe4] sm:$0xf] %vm1313_vm5, %v1244_v14  ;;  %1332 = vst.msk [vmem:[#allocation2 + $0xd8] sm:$0xf] %vm1313_vm5, %v1242_v15  ;;  %v13259_v32 = vld [vmem:[#allocation2 + $0x8] ss:$12 sps:$4 sm:$0xff]  }
 0x2c2   : > { %13139 = vmatprep.mubr.msk.bf16.mxu1 %vm2718_vm3, %v13259_v32  ;;  %v2438_v14 = vld [vmem:[%s14203_s13 + $0x66] sm:$0xff]  ;;  %v2439_v15 = vld [vmem:[%s14203_s13 + $0x6e] sm:$0xff]  ;;  %1558 = vst.msk [vmem:[#allocation2 + $0x154] sm:$0xf] %vm446_vm7, %v12901_v60 }
 0x2c3   : > { %1251 = vrot.lane.b32.xlu1 %v12860_v38, %s14021_s12  ;;  %v13025_v43 = vpack.c.bf16 %v2438_v14, %v2438_v14  ;;  %v13026_v50 = vpack.c.bf16 %v2439_v15, %v2439_v15  ;;  %v2443_v32 = vld [vmem:[%s14203_s13 + $0x8e] sm:$0xff] }
 0x2c4   : > { %1758 = vrot.lane.b32.xlu0 %v12967_v33, %s14022_s14  ;;  %v13022_v33 = vpack.c.bf16 %v2435_v2, %v2435_v2  ;;  %v13030_v20 = vpack.c.bf16 %v2443_v32, %v2443_v32  ;;  %v13031_v2 = vpack.c.bf16 %v2444_v56, %v2444_v56  ;;  %v3296_v32 = vld [vmem:[%s18994_s2 + $0x50] sm:$0xff] }
 0x2c5   : > { %2618 = vst.msk [vmem:[#allocation2 + $0x68] sm:$0xf] %vm446_vm7, %v13025_v43  ;;  %2619 = vst.msk [vmem:[#allocation2 + $0x74] sm:$0xf] %vm446_vm7, %v13026_v50  ;;  %v2171_v43 = vld [vmem:[%s14203_s13 + $0x10d] sm:$0xff] }
 0x2c6   : > { %2615 = vst.msk [vmem:[#allocation2 + $0x44] sm:$0xf] %vm446_vm7, %v13022_v33  ;;  %2623 = vst.msk [vmem:[#allocation2 + $0xa4] sm:$0xf] %vm446_vm7, %v13030_v20  ;;  %v2446_v50 = vld [vmem:[%s14203_s13 + $0xa6] sm:$0xff]  ;;  %v13010_v13 = vpack.c.bf16 %v2171_v43, %v2171_v43 }
 0x2c7   : > { %2332 = vrot.lane.b32.xlu1 %v13004_v55, %s14021_s12  ;;  %v511_v55 = vld [vmem:[%s14203_s13 + $0xe1] sm:$0xff]  ;;  %2624 = vst.msk [vmem:[#allocation2 + $0xb0] sm:$0xf] %vm446_vm7, %v13031_v2  ;;  %v13033_v21 = vpack.c.bf16 %v2446_v50, %v2446_v50 }
 0x2c8   : > { %964 = vrot.lane.b32.xlu0 %v12859_v37, %s14023_s15  ;;  %v510_v37 = vld [vmem:[%s14203_s13 + $0xd9] sm:$0xff] }
 0x2c9   : > { %v12792_v35 = vpack.c.bf16 %v510_v37, %v510_v37  ;;  %v3301_v37 = vld [vmem:[%s18994_s2 + $0x78] sm:$0xff]  ;;  %2626 = vst.msk [vmem:[#allocation2 + $0xc8] sm:$0xf] %vm446_vm7, %v13033_v21 }
 0x2ca   : > { %v1885_v50 = vld [vmem:[%s14203_s13 + $0x11c] sm:$0xff] }
 0x2cb   : > { %677 = vrot.lane.b32.xlu1 %v12790_v45, %s14022_s14  ;;  %v13028_v45 = vpack.c.bf16 %v2441_v6, %v2441_v6  ;;  %v2452_v21 = vld [vmem:[%s14203_s13 + $0xd6] sm:$0xff] }
 0x2cc   : > { %2046 = vrot.lane.b32.xlu0 %v12969_v22, %s14023_s15  ;;  %v13039_v40 = vpack.c.bf16 %v2452_v21, %v2452_v21 }
 0x2cd   : > { %2621 = vst.msk [vmem:[#allocation2 + $0x8c] sm:$0xf] %vm446_vm7, %v13028_v45 }
 0x2ce   : > { %2632 = vst.msk [vmem:[#allocation2 + $0x110] sm:$0xf] %vm446_vm7, %v13039_v40 }
 0x2cf   : > { %1760 = vrot.lane.b32.xlu1 %v12968_v42, %s14022_s14  ;;  %v1377_v42 = vld [vmem:[%s14203_s13 + $0xeb] sm:$0xff] }
 0x2d0   : > { %1253 = vrot.lane.b32.xlu0 %v12861_v16, %s14021_s12  ;;  %v12900_v41 = vpack.c.bf16 %v1377_v42, %v1377_v42 }
 0x2d2   : > { %1557 = vst.msk [vmem:[#allocation2 + $0x148] sm:$0xf] %vm446_vm7, %v12900_v41  ;;  %v1090_v41 = vld [vmem:[%s14203_s13 + $0xfa] sm:$0xff] }
 0x2d3   : > { %966 = vrot.lane.b32.xlu1 %v12860_v38, %s14023_s15  ;;  %v1881_v38 = vld [vmem:[%s14203_s13 + $0xfc] sm:$0xff] }
 0x2d4   : > { %2334 = vrot.lane.b32.xlu0 %v13005_v36, %s14021_s12  ;;  %v12972_v11 = vpack.c.bf16 %v1881_v38, %v1881_v38  ;;  %v1379_v36 = vld [vmem:[%s14203_s13 + $0xfb] sm:$0xff] }
 0x2d7   : > { %2048 = vrot.lane.b32.xlu1 %v12970_v46, %s14023_s15 }
 0x2d8   : > { %679 = vrot.lane.b32.xlu0 %v12791_v28, %s14022_s14  ;;  %v12902_v28 = vpack.c.bf16 %v1379_v36, %v1379_v36  ;;  %v12796_v36 = vpack.c.bf16 %v514_v44, %v514_v44 }
 0x2da   : > { %1559 = vst.msk [vmem:[#allocation2 + $0x160] sm:$0xf] %vm446_vm7, %v12902_v28 }
 0x2db   : > { %1255 = vrot.lane.b32.xlu1 %v12862_v48, %s14021_s12 }
 0x2dc   : > { %1762 = vrot.lane.b32.xlu0 %v12969_v22, %s14022_s14  ;;  %v12793_v22 = vpack.c.bf16 %v511_v55, %v511_v55  ;;  %v15368_v55 = vpack.c.bf16 %v1090_v41, %v1090_v41 }
 0x2df   : > { %2336 = vrot.lane.b32.xlu1 %v13006_v54, %s14021_s12  ;;  %v3300_v54 = vld [vmem:[%s18994_s2 + $0x70] sm:$0xff] }
 0x2e0   : > { %968 = vrot.lane.b32.xlu0 %v12861_v16, %s14023_s15  ;;  %v15302_v16 = vsub.s32 0, %v14849_v51  ;;  %v2445_v51 = vld [vmem:[%s14203_s13 + $0x9e] sm:$0xff] }
 0x2e1   : > { %v13032_v29 = vpack.c.bf16 %v2445_v51, %v2445_v51 }
 0x2e2   : > { %19018 = vst [vmem:[#allocation5_spill] sm:$0xff] %v15302_v16 }
 0x2e3   : > { %681 = vrot.lane.b32.xlu1 %v12792_v35, %s14022_s14  ;;  %2625 = vst.msk [vmem:[#allocation2 + $0xbc] sm:$0xf] %vm446_vm7, %v13032_v29  ;;  %v3321_v35 = vld [vmem:[%s18994_s2 + $0x118] sm:$0xff]  ;;  %v1380_v29 = vld [vmem:[%s14203_s13 + $0x103] sm:$0xff] }
 0x2e4   : > { %2050 = vrot.lane.b32.xlu0 %v12971_v62, %s14023_s15 }
 0x2e7   : > { %1764 = vrot.lane.b32.xlu1 %v12970_v46, %s14022_s14  ;;  %v3323_v46 = vsel %vm3322_vm6, 1, %v19017_v63 }
 0x2e8   : > { %1257 = vrot.lane.b32.xlu0 %v12863_v26, %s14021_s12  ;;  %v3327_v33 = vrot.slane %v3323_v46, %v15302_v16  ;;  %v3297_v46 = vld [vmem:[%s18994_s2 + $0x58] sm:$0xff] }
 0x2ea   : > { %vm15329_vm8 = vcmp.eq.s32.totalorder %v3327_v33, 1  ;;  %v1381_v33 = vld [vmem:[%s14203_s13 + $0x10b] sm:$0xff] }
 0x2eb   : > { %970 = vrot.lane.b32.xlu1 %v12862_v48, %s14023_s15  ;;  %v13029_v48 = vpack.c.bf16 %v2442_v1, %v2442_v1 }
 0x2ec   : > { %2338 = vrot.lane.b32.xlu0 %v13007_v17, %s14021_s12 }
 0x2ed   : > { %2622 = vst.msk [vmem:[#allocation2 + $0x98] sm:$0xf] %vm446_vm7, %v13029_v48 }
 0x2ef   : > { %2052 = vrot.lane.b32.xlu1 %v12972_v11, %s14023_s15 }
 0x2f0   : > { %683 = vrot.lane.b32.xlu0 %v12793_v22, %s14022_s14  ;;  %v13034_v22 = vpack.c.bf16 %v2447_v12, %v2447_v12 }
 0x2f2   : > { %2627 = vst.msk [vmem:[#allocation2 + $0xd4] sm:$0xf] %vm446_vm7, %v13034_v22  ;;  %v2453_v22 = vld [vmem:[%s14203_s13 + $0xde] sm:$0xff] }
 0x2f3   : > { %1259 = vrot.lane.b32.xlu1 %v12864_v58, %s14021_s12 }
 0x2f4   : > { %1766 = vrot.lane.b32.xlu0 %v12971_v62, %s14022_s14  ;;  %v15354_v62 = vpack.c.bf16 %v1883_v3, %v1883_v3 }
 0x2f7   : > { %2340 = vrot.lane.b32.xlu1 %v13008_v31, %s14021_s12  ;;  %v3298_v31 = vld [vmem:[%s18994_s2 + $0x60] sm:$0xff] }
 0x2f8   : > { %972 = vrot.lane.b32.xlu0 %v12863_v26, %s14023_s15  ;;  %v12795_v26 = vpack.c.bf16 %v513_v10, %v513_v10  ;;  %v13260_v10 = vld [vmem:[#allocation2 + $0x20] ss:$12 sps:$4 sm:$0xff]  }
 0x2fb   : > { %685 = vrot.lane.b32.xlu1 %v12794_v61, %s14022_s14  ;;  %v1884_v61 = vld [vmem:[%s14203_s13 + $0x114] sm:$0xff] }
 0x2fc   : > { %2054 = vrot.lane.b32.xlu0 %v15305_v0, %s14023_s15  ;;  %v15425_v2 = vpack.c.bf16 %v1884_v61, %v1884_v61  ;;  %v515_v61 = vld [vmem:[%s14203_s13 + $0x101] sm:$0xff] }
 0x2ff   : > { %1768 = vrot.lane.b32.xlu1 %v12972_v11, %s14022_s14  ;;  %v296_v11 = vld [vmem:[%s14203_s13 + $0xf0] sm:$0xff] }
 0x300   : > { %1261 = vrot.lane.b32.xlu0 %v15323_v30, %s14021_s12  ;;  %v12759_v7 = vpack.c.bf16 %v296_v11, %v296_v11 }
 0x302   : > { %v3342_v18 = vpop.permute.xlu1 %3341  ;;  %477 = vst.msk [vmem:[#allocation2 + $0x168] sm:$0xf] %vm446_vm7, %v12759_v7  ;;  %v1092_v7 = vld [vmem:[%s14203_s13 + $0x10a] sm:$0xff] }
 0x303   : > { %v15351_v34 = vsel %vm15329_vm8, %v3342_v18, 1.0  ;;  %v3347_v52 = vpop.permute.xlu0 %3346  ;;  %974 = vrot.lane.b32.xlu1 %v12864_v58, %s14023_s15  ;;  %v2448_v58 = vld [vmem:[%s14203_s13 + $0xb6] sm:$0xff]  ;;  %v12903_v18 = vpack.c.bf16 %v1380_v29, %v1380_v29  ;;  %v15500_v23 = vpack.c.bf16 %v1092_v7, %v1092_v7 }
 0x304   : > { %v15358_v53 = vsel %vm15329_vm8, %v3347_v52, 1.0  ;;  %v3367_v42 = vmul.f32 %v15351_v34, %v3300_v54  ;;  %v3387_v39 = vmul.f32 %v15351_v34, %v3320_v49  ;;  %2342 = vrot.lane.b32.xlu0 %v13009_v9, %s14021_s12  ;;  %v13035_v57 = vpack.c.bf16 %v2448_v58, %v2448_v58  ;;  %v1091_v49 = vld [vmem:[%s14203_s13 + $0x102] sm:$0xff] }
 0x305   : > { %v3368_v8 = vmul.f32 %v15358_v53, %v3301_v37  ;;  %v3388_v38 = vmul.f32 %v15358_v53, %v3321_v35  ;;  %v3363_v54 = vmul.f32 %v15351_v34, %v3296_v32  ;;  %v3295_v37 = vld [vmem:[%s18994_s2 + $0x48] sm:$0xff]  ;;  %v12904_v35 = vpack.c.bf16 %v1381_v33, %v1381_v33  ;;  %v3294_v52 = vld [vmem:[%s18994_s2 + $0x40] sm:$0xff]  ;;  %1560 = vst.msk [vmem:[#allocation2 + $0x16c] sm:$0xf] %vm446_vm7, %v12903_v18 }
 0x306   : > { %2628 = vst.msk [vmem:[#allocation2 + $0xe0] sm:$0xf] %vm446_vm7, %v13035_v57  ;;  %v13266_v57 = vld [vmem:[#allocation2 + $0x50] ss:$12 sps:$4 sm:$0xff]   ;;  %v3286_v18 = vld [vmem:[%s18994_s2] sm:$0xff] }
 0x307   : > { %v2323_v17 = vpop.permute.xlu0 %2322  ;;  %2056 = vrot.lane.b32.xlu1 %v15354_v62, %s14023_s15  ;;  %v3396_v14 = vpack.c.bf16 %v3368_v8, %v3367_v42  ;;  %v3406_v15 = vpack.c.bf16 %v3388_v38, %v3387_v39  ;;  %v2172_v42 = vld [vmem:[%s14203_s13 + $0x115] sm:$0xff]  ;;  %1561 = vst.msk [vmem:[#allocation2 + $0x178] sm:$0xf] %vm446_vm7, %v12904_v35 }
 0x308   : > { %2412 = vst.msk [vmem:[#allocation2 + $0xdc] sm:$0xf] %vm1313_vm5, %v2323_v17  ;;  %687 = vrot.lane.b32.xlu0 %v12795_v26, %s14022_s14  ;;  %v13265_v39 = vld [vmem:[#allocation2 + $0x38] ss:$12 sps:$4 sm:$0xff]   ;;  %v3292_v38 = vld [vmem:[%s18994_s2 + $0x30] sm:$0xff]  ;;  %v13011_v12 = vpack.c.bf16 %v2172_v42, %v2172_v42 }
 0x309   : > { %3804 = vmatpush1.bf16.msra.mxu0 %v3396_v14  ;;  %13135 = vmatprep.subr.bf16.mxu1 %v3406_v15  ;;  %v3293_v17 = vld [vmem:[%s18994_s2 + $0x38] sm:$0xff]  ;;  %v15454_v14 = vpack.c.bf16 %v1091_v49, %v1091_v49  ;;  %v13272_v49 = vld [vmem:[#allocation2 + $0x80] ss:$12 sps:$4 sm:$0xff]   ;;  %v3316_v35 = vld [vmem:[%s18994_s2 + $0xf0] sm:$0xff] }
 0x30a   : > { %13136 = vmatpush3.bf16.msra.mxu1 %v3406_v15  ;;  %v3332_v6 = vpop.permute.xlu1 %3331  ;;  %3805 = vmatprep.subr.bf16.mxu0 %v19017_v63 }
 0x30b   : > { %1263 = vrot.lane.b32.xlu1 %v15368_v55, %s14021_s12  ;;  %v668_v45 = vpop.permute.xlu0 %667  ;;  %v15390_v59 = vsel %vm15329_vm8, %v3332_v6, 1.0  ;;  %v2450_v6 = vld [vmem:[%s14203_s13 + $0xc6] sm:$0xff] }
 0x30c   : > { %756 = vst.msk [vmem:[#allocation2 + $0xf0] sm:$0xf] %vm735_vm2, %v668_v45  ;;  %1770 = vrot.lane.b32.xlu0 %v15305_v0, %s14022_s14  ;;  %v297_v0 = vld [vmem:[%s14203_s13 + $0xf8] sm:$0xff]  ;;  %v3365_v48 = vmul.f32 %v15390_v59, %v3298_v31  ;;  %v3385_v56 = vmul.f32 %v15390_v59, %v3318_v25  ;;  %v3361_v43 = vmul.f32 %v15390_v59, %v3294_v52 }
 0x30d   : > { %v12760_v28 = vpack.c.bf16 %v297_v0, %v297_v0  ;;  %v3360_v45 = vmul.f32 %v15358_v53, %v3293_v17  ;;  %v13037_v11 = vpack.c.bf16 %v2450_v6, %v2450_v6  ;;  %v15479_v25 = vpack.c.bf16 %v1885_v50, %v1885_v50  ;;  %v13271_v0 = vld [vmem:[#allocation2 + $0x68] ss:$12 sps:$4 sm:$0xff]   ;;  %v13277_v52 = vld [vmem:[#allocation2 + $0x98] ss:$12 sps:$4 sm:$0xff]  }
 0x30e   : > { %v3337_v27 = vpop.permute.xlu1 %3336  ;;  %v3383_v6 = vmul.f32 %v15351_v34, %v3316_v35  ;;  %v3310_v35 = vld [vmem:[%s18994_s2 + $0xc0] sm:$0xff] }
 0x30f   : > { %v15407_v60 = vsel %vm15329_vm8, %v3337_v27, 1.0  ;;  %2344 = vrot.lane.b32.xlu1 %v13010_v13, %s14021_s12  ;;  %v1751_v1 = vpop.permute.xlu0 %1750  ;;  %478 = vst.msk [vmem:[#allocation2 + $0x174] sm:$0xf] %vm446_vm7, %v12760_v28  ;;  %v3359_v13 = vmul.f32 %v15351_v34, %v3292_v38  ;;  %v3291_v27 = vld [vmem:[%s18994_s2 + $0x28] sm:$0xff]  ;;  %2630 = vst.msk [vmem:[#allocation2 + $0xf8] sm:$0xf] %vm446_vm7, %v13037_v11 }
 0x310   : > { %v3366_v20 = vmul.f32 %v15407_v60, %v3299_v47  ;;  %v3386_v51 = vmul.f32 %v15407_v60, %v3319_v19  ;;  %1838 = vst.msk [vmem:[#allocation2 + $0xf4] sm:$0xf] %vm735_vm2, %v1751_v1  ;;  %976 = vrot.lane.b32.xlu0 %v15323_v30, %s14023_s15  ;;  %v3364_v30 = vmul.f32 %v15358_v53, %v3297_v46  ;;  %v2455_v11 = vld [vmem:[%s14203_s13 + $0xee] sm:$0xff] }
 0x311   : > { %v3362_v8 = vmul.f32 %v15407_v60, %v3295_v37  ;;  %v13040_v47 = vpack.c.bf16 %v2453_v22, %v2453_v22  ;;  %v3392_v1 = vpack.c.bf16 %v3360_v45, %v3359_v13  ;;  %v3358_v32 = vmul.f32 %v15407_v60, %v3291_v27  ;;  %v1886_v37 = vld [vmem:[%s14203_s13 + $0x124] sm:$0xff]  ;;  %v1383_v45 = vld [vmem:[%s14203_s13 + $0x11b] sm:$0xff] }
 0x312   : > { %v2325_v5 = vpop.permute.xlu1 %2324  ;;  %v3395_v4 = vpack.c.bf16 %v3366_v20, %v3365_v48  ;;  %v3405_v3 = vpack.c.bf16 %v3386_v51, %v3385_v56  ;;  %v3394_v26 = vpack.c.bf16 %v3364_v30, %v3363_v54  ;;  %v12797_v46 = vpack.c.bf16 %v515_v61, %v515_v61  ;;  %v3288_v48 = vld [vmem:[%s18994_s2 + $0x10] sm:$0xff]  ;;  %v3289_v20 = vld [vmem:[%s18994_s2 + $0x18] sm:$0xff]  ;;  %v3287_v54 = vld [vmem:[%s18994_s2 + $0x8] sm:$0xff] }
 0x313   : > { %2413 = vst.msk [vmem:[#allocation2 + $0xe8] sm:$0xf] %vm1313_vm5, %v2325_v5  ;;  %689 = vrot.lane.b32.xlu1 %v12796_v36, %s14022_s14  ;;  %v957_v9 = vpop.permute.xlu0 %956  ;;  %v3393_v44 = vpack.c.bf16 %v3362_v8, %v3361_v43  ;;  %v2173_v51 = vld [vmem:[%s14203_s13 + $0x11d] sm:$0xff]  ;;  %v3355_v5 = vmul.f32 %v15351_v34, %v3288_v48  ;;  %v299_v8 = vld [vmem:[%s14203_s13 + $0x108] sm:$0xff]  ;;  %v15543_v43 = vpack.c.bf16 %v1886_v37, %v1886_v37 }
 0x314   : > { %3806 = vmatpush1.bf16.msra.mxu0 %v3395_v4  ;;  %13137 = vmatprep.subr.bf16.mxu1 %v3405_v3  ;;  %1045 = vst.msk [vmem:[#allocation2 + $0xf0] sm:$0xf] %vm1024_vm4, %v957_v9  ;;  %v3356_v4 = vmul.f32 %v15358_v53, %v3289_v20  ;;  %v13012_v30 = vpack.c.bf16 %v2173_v51, %v2173_v51  ;;  %v3312_v20 = vld [vmem:[%s18994_s2 + $0xd0] sm:$0xff]  ;;  %v2174_v51 = vld [vmem:[%s14203_s13 + $0x125] sm:$0xff] }
 0x315   : > { %13138 = vmatpush3.bf16.msra.mxu1 %v3405_v3  ;;  %3807 = vmatprep.subr.bf16.mxu0 %v19017_v63  ;;  %2633 = vst.msk [vmem:[#allocation2 + $0x11c] sm:$0xf] %vm446_vm7, %v13040_v47  ;;  %v516_v3 = vld [vmem:[%s14203_s13 + $0x109] sm:$0xff]  ;;  %v12762_v50 = vpack.c.bf16 %v299_v8, %v299_v8  ;;  %v12906_v21 = vpack.c.bf16 %v1383_v45, %v1383_v45 }
 0x316   : > { %v670_v41 = vpop.permute.xlu1 %669  ;;  %2058 = vrot.lane.b32.xlu0 %v15425_v2, %s14023_s15  ;;  %9644 = vmatprep.subr.bf16.mxu1 %v19017_v63  ;;  %v12798_v38 = vpack.c.bf16 %v516_v3, %v516_v3 }
 0x317   : > { %757 = vst.msk [vmem:[#allocation2 + $0xfc] sm:$0xf] %vm735_vm2, %v670_v41  ;;  %1772 = vrot.lane.b32.xlu1 %v15354_v62, %s14022_s14  ;;  %v2039_v15 = vpop.permute.xlu0 %2038  ;;  %v2451_v62 = vld [vmem:[%s14203_s13 + $0xce] sm:$0xff]  ;;  %v3390_v41 = vpack.c.bf16 %v3356_v4, %v3355_v5  ;;  %v3379_v4 = vmul.f32 %v15351_v34, %v3312_v20 }
 0x318   : > { %3808 = vmatpush1.bf16.msra.mxu0 %v3394_v26  ;;  %2126 = vst.msk [vmem:[#allocation2 + $0xf4] sm:$0xf] %vm1024_vm4, %v2039_v15  ;;  %13140 = vmatmul.mubr.msk.bf16.vlgmr.msra.gmra.mxu1 %vm2718_vm3, %v13260_v10  ;;  %v13038_v31 = vpack.c.bf16 %v2451_v62, %v2451_v62  ;;  %v298_v10 = vld [vmem:[%s14203_s13 + $0x100] sm:$0xff]  ;;  %v3354_v26 = vmul.f32 %v15407_v60, %v3287_v54  ;;  %v3317_v15 = vld [vmem:[%s18994_s2 + $0xf8] sm:$0xff]  ;;  %v3311_v54 = vld [vmem:[%s18994_s2 + $0xc8] sm:$0xff] }
 0x319   : > { %3809 = vmatprep.subr.bf16.mxu0 %v19017_v63  ;;  %13143 = vmatprep.mubr.msk.bf16.mxu1 %vm2718_vm3, %v13265_v39  ;;  %v12761_v42 = vpack.c.bf16 %v298_v10, %v298_v10  ;;  %v2454_v62 = vld [vmem:[%s14203_s13 + $0xe6] sm:$0xff]  ;;  %480 = vst.msk [vmem:[#allocation2 + $0x18c] sm:$0xf] %vm446_vm7, %v12762_v50  ;;  %1563 = vst.msk [vmem:[#allocation2 + $0x190] sm:$0xf] %vm446_vm7, %v12906_v21  ;;  %v1094_v10 = vld [vmem:[%s14203_s13 + $0x11a] sm:$0xff] }
 0x31a   : > { %v1753_v58 = vpop.permute.xlu1 %1752  ;;  %1265 = vrot.lane.b32.xlu0 %v15454_v14, %s14021_s12  ;;  %2631 = vst.msk [vmem:[#allocation2 + $0x104] sm:$0xf] %vm446_vm7, %v13038_v31  ;;  %v13041_v22 = vpack.c.bf16 %v2454_v62, %v2454_v62  ;;  %v2457_v31 = vld [vmem:[%s14203_s13 + $0xfe] sm:$0xff]  ;;  %v15627_v8 = vpack.c.bf16 %v1094_v10, %v1094_v10  ;;  %v2175_v50 = vld [vmem:[%s14203_s13 + $0x12d] sm:$0xff]  ;;  %v2460_v62 = vld [vmem:[%s14203_s13 + $0x116] sm:$0xff] }
 0x31b   : > { %1839 = vst.msk [vmem:[#allocation2 + $0x100] sm:$0xf] %vm735_vm2, %v1753_v58  ;;  %978 = vrot.lane.b32.xlu1 %v15368_v55, %s14023_s15  ;;  %v1246_v19 = vpop.permute.xlu0 %1245  ;;  %v3290_v55 = vld [vmem:[%s18994_s2 + $0x20] sm:$0xff]  ;;  %v13042_v58 = vpack.c.bf16 %v2455_v11, %v2455_v11  ;;  %v13044_v61 = vpack.c.bf16 %v2457_v31, %v2457_v31 }
 0x31c   : > { %3810 = vmatpush1.bf16.msra.mxu0 %v3393_v44  ;;  %1334 = vst.msk [vmem:[#allocation2 + $0xf0] sm:$0xf] %vm1313_vm5, %v1246_v19  ;;  %v3357_v56 = vmul.f32 %v15390_v59, %v3290_v55  ;;  %v2456_v44 = vld [vmem:[%s14203_s13 + $0xf6] sm:$0xff]  ;;  %v3384_v19 = vmul.f32 %v15358_v53, %v3317_v15  ;;  %v3377_v15 = vmul.f32 %v15390_v59, %v3310_v35  ;;  %v2461_v11 = vld [vmem:[%s14203_s13 + $0x11e] sm:$0xff] }
 0x31d   : > { %3811 = vmatprep.subr.bf16.mxu0 %v19017_v63  ;;  %479 = vst.msk [vmem:[#allocation2 + $0x180] sm:$0xf] %vm446_vm7, %v12761_v42  ;;  %v13043_v27 = vpack.c.bf16 %v2456_v44, %v2456_v44  ;;  %v1093_v55 = vld [vmem:[%s14203_s13 + $0x112] sm:$0xff]  ;;  %2634 = vst.msk [vmem:[#allocation2 + $0x128] sm:$0xf] %vm446_vm7, %v13041_v22  ;;  %v13047_v44 = vpack.c.bf16 %v2460_v62, %v2460_v62  ;;  %v13048_v31 = vpack.c.bf16 %v2461_v11, %v2461_v11  ;;  %v1095_v35 = vld [vmem:[%s14203_s13 + $0x122] sm:$0xff] }
 0x31e   : > { %v959_v36 = vpop.permute.xlu1 %958  ;;  %2346 = vrot.lane.b32.xlu0 %v13011_v12, %s14021_s12  ;;  %v3391_v33 = vpack.c.bf16 %v3358_v32, %v3357_v56  ;;  %v3353_v12 = vmul.f32 %v15390_v59, %v3286_v18  ;;  %2635 = vst.msk [vmem:[#allocation2 + $0x134] sm:$0xf] %vm446_vm7, %v13042_v58  ;;  %2637 = vst.msk [vmem:[#allocation2 + $0x14c] sm:$0xf] %vm446_vm7, %v13044_v61  ;;  %v3404_v32 = vpack.c.bf16 %v3384_v19, %v3383_v6  ;;  %v3313_v56 = vld [vmem:[%s18994_s2 + $0xd8] sm:$0xff]  ;;  %v3307_v19 = vld [vmem:[%s18994_s2 + $0xa8] sm:$0xff] }
 0x31f   : > { %1046 = vst.msk [vmem:[#allocation2 + $0xfc] sm:$0xf] %vm1024_vm4, %v959_v36  ;;  %2060 = vrot.lane.b32.xlu1 %v15479_v25, %s14023_s15  ;;  %v2327_v28 = vpop.permute.xlu0 %2326  ;;  %v13283_v36 = vld [vmem:[#allocation2 + $0xc8] ss:$12 sps:$4 sm:$0xff]   ;;  %v3380_v3 = vmul.f32 %v15358_v53, %v3313_v56  ;;  %v13284_v18 = vld [vmem:[#allocation2 + $0xe0] ss:$12 sps:$4 sm:$0xff]  }
 0x320   : > { %3812 = vmatpush1.bf16.msra.mxu0 %v3392_v1  ;;  %2414 = vst.msk [vmem:[#allocation2 + $0xf4] sm:$0xf] %vm1313_vm5, %v2327_v28  ;;  %13144 = vmatmul.mubr.msk.bf16.gmra.mxu1 %vm2718_vm3, %v13266_v57  ;;  %v3389_v47 = vpack.c.bf16 %v3354_v26, %v3353_v12  ;;  %v3315_v57 = vld [vmem:[%s18994_s2 + $0xe8] sm:$0xff]  ;;  %v15582_v28 = vpack.c.bf16 %v1093_v55, %v1093_v55  ;;  %v518_v61 = vld [vmem:[%s14203_s13 + $0x119] sm:$0xff] }
 0x321   : > { %3813 = vmatprep.subr.bf16.mxu0 %v19017_v63  ;;  %13147 = vmatprep.mubr.msk.bf16.mxu1 %vm2718_vm3, %v13271_v0  ;;  %2636 = vst.msk [vmem:[#allocation2 + $0x140] sm:$0xf] %vm446_vm7, %v13043_v27  ;;  %v3314_v0 = vld [vmem:[%s18994_s2 + $0xe0] sm:$0xff]  ;;  %v2459_v12 = vld [vmem:[%s14203_s13 + $0x10e] sm:$0xff]  ;;  %2640 = vst.msk [vmem:[#allocation2 + $0x170] sm:$0xf] %vm446_vm7, %v13047_v44 }
 0x322   : > { %v2041_v29 = vpop.permute.xlu1 %2040  ;;  %691 = vrot.lane.b32.xlu0 %v12797_v46, %s14022_s14  ;;  %v3382_v46 = vmul.f32 %v15407_v60, %v3315_v57  ;;  %v13046_v45 = vpack.c.bf16 %v2459_v12, %v2459_v12  ;;  %v300_v27 = vld [vmem:[%s14203_s13 + $0x110] sm:$0xff]  ;;  %2641 = vst.msk [vmem:[#allocation2 + $0x17c] sm:$0xf] %vm446_vm7, %v13048_v31  ;;  %v3306_v55 = vld [vmem:[%s18994_s2 + $0xa0] sm:$0xff]  ;;  %v3305_v56 = vld [vmem:[%s18994_s2 + $0x98] sm:$0xff] }
 0x323   : > { %2127 = vst.msk [vmem:[#allocation2 + $0x100] sm:$0xf] %vm1024_vm4, %v2041_v29  ;;  %1267 = vrot.lane.b32.xlu1 %v15500_v23, %s14021_s12  ;;  %v672_v9 = vpop.permute.xlu0 %671  ;;  %v3381_v29 = vmul.f32 %v15390_v59, %v3314_v0  ;;  %v12763_v57 = vpack.c.bf16 %v300_v27, %v300_v27  ;;  %v2464_v12 = vld [vmem:[%s14203_s13 + $0x136] sm:$0xff]  ;;  %v13256_v44 = vld [vmem:[#allocation2] ss:$12 sps:$4 sm:$0xff]   ;;  %v3413_v27 = vld [vmem:[#allocation2 + $0x24] sm:$0xff] }
 0x324   : > { %3814 = vmatpush1.bf16.msra.mxu0 %v3391_v33  ;;  %758 = vst.msk [vmem:[#allocation2 + $0x108] sm:$0xf] %vm735_vm2, %v672_v9  ;;  %v1887_v33 = vld [vmem:[%s14203_s13 + $0x12c] sm:$0xff]  ;;  %v13261_v31 = vld [vmem:[#allocation2 + $0x1c] ss:$12 sps:$4 sm:$0xff]  }
 0x325   : > { %3815 = vmatprep.subr.bf16.mxu0 %v19017_v63  ;;  %v3403_v5 = vpack.c.bf16 %v3382_v46, %v3381_v29  ;;  %v15610_v9 = vpack.c.bf16 %v1887_v33, %v1887_v33  ;;  %2639 = vst.msk [vmem:[#allocation2 + $0x164] sm:$0xf] %vm446_vm7, %v13046_v45  ;;  %481 = vst.msk [vmem:[#allocation2 + $0x198] sm:$0xf] %vm446_vm7, %v12763_v57  ;;  %v301_v46 = vld [vmem:[%s14203_s13 + $0x118] sm:$0xff]  ;;  %v1384_v33 = vld [vmem:[%s14203_s13 + $0x123] sm:$0xff]  ;;  %v13051_v45 = vpack.c.bf16 %v2464_v12, %v2464_v12 }
 0x326   : > { %v1248_v39 = vpop.permute.xlu1 %1247  ;;  %1774 = vrot.lane.b32.xlu0 %v15425_v2, %s14022_s14  ;;  %v1382_v2 = vld [vmem:[%s14203_s13 + $0x113] sm:$0xff]  ;;  %v12764_v29 = vpack.c.bf16 %v301_v46, %v301_v46 }
 0x327   : > { %1335 = vst.msk [vmem:[#allocation2 + $0xfc] sm:$0xf] %vm1313_vm5, %v1248_v39  ;;  %2348 = vrot.lane.b32.xlu1 %v13012_v30, %s14021_s12  ;;  %v1755_v17 = vpop.permute.xlu0 %1754  ;;  %v12905_v13 = vpack.c.bf16 %v1382_v2, %v1382_v2  ;;  %v13013_v30 = vpack.c.bf16 %v2174_v51, %v2174_v51  ;;  %v3378_v39 = vmul.f32 %v15407_v60, %v3311_v54  ;;  %v2458_v2 = vld [vmem:[%s14203_s13 + $0x106] sm:$0xff]  ;;  %v1888_v51 = vld [vmem:[%s14203_s13 + $0x134] sm:$0xff] }
 0x328   : > { %3816 = vmatpush1.bf16.msra.mxu0 %v3390_v41  ;;  %1840 = vst.msk [vmem:[#allocation2 + $0x10c] sm:$0xf] %vm735_vm2, %v1755_v17  ;;  %13148 = vmatmul.mubr.msk.bf16.gmra.mxu1 %vm2718_vm3, %v13272_v49  ;;  %v517_v49 = vld [vmem:[%s14203_s13 + $0x111] sm:$0xff]  ;;  %v12979_v10 = vpack.c.bf16 %v1888_v51, %v1888_v51  ;;  %v3417_v51 = vld [vmem:[#allocation2 + $0x3c] sm:$0xff] }
 0x329   : > { %3817 = vmatprep.subr.bf16.mxu0 %v19017_v63  ;;  %13151 = vmatprep.mubr.msk.bf16.mxu1 %vm2718_vm3, %v13277_v52  ;;  %1562 = vst.msk [vmem:[#allocation2 + $0x184] sm:$0xf] %vm446_vm7, %v12905_v13  ;;  %v13289_v52 = vld [vmem:[#allocation2 + $0xf8] ss:$12 sps:$4 sm:$0xff]   ;;  %v3308_v41 = vld [vmem:[%s18994_s2 + $0xb0] sm:$0xff]  ;;  %v12799_v26 = vpack.c.bf16 %v517_v49, %v517_v49  ;;  %v13045_v13 = vpack.c.bf16 %v2458_v2, %v2458_v2  ;;  %v3303_v49 = vld [vmem:[%s18994_s2 + $0x88] sm:$0xff] }
 0x32a   : > { %v2329_v40 = vpop.permute.xlu1 %2328  ;;  %980 = vrot.lane.b32.xlu0 %v15454_v14, %s14023_s15  ;;  %v13278_v14 = vld [vmem:[#allocation2 + $0xb0] ss:$12 sps:$4 sm:$0xff]   ;;  %v3375_v6 = vmul.f32 %v15351_v34, %v3308_v41  ;;  %v3401_v22 = vpack.c.bf16 %v3378_v39, %v3377_v15  ;;  %482 = vst.msk [vmem:[#allocation2 + $0x1a4] sm:$0xf] %vm446_vm7, %v12764_v29  ;;  %v12871_v39 = vpack.c.bf16 %v1095_v35, %v1095_v35  ;;  %2644 = vst.msk [vmem:[#allocation2 + $0x1a0] sm:$0xf] %vm446_vm7, %v13051_v45 }
 0x32b   : > { %2415 = vst.msk [vmem:[#allocation2 + $0x100] sm:$0xf] %vm1313_vm5, %v2329_v40  ;;  %693 = vrot.lane.b32.xlu1 %v12798_v38, %s14022_s14  ;;  %v961_v7 = vpop.permute.xlu0 %960  ;;  %v3309_v17 = vld [vmem:[%s18994_s2 + $0xb8] sm:$0xff]  ;;  %v13014_v40 = vpack.c.bf16 %v2175_v50, %v2175_v50  ;;  %v2463_v15 = vld [vmem:[%s14203_s13 + $0x12e] sm:$0xff] }
 0x32c   : > { %3818 = vmatpush1.bf16.msra.mxu0 %v3389_v47  ;;  %1047 = vst.msk [vmem:[#allocation2 + $0x108] sm:$0xf] %vm1024_vm4, %v961_v7  ;;  %v3376_v58 = vmul.f32 %v15358_v53, %v3309_v17  ;;  %v13290_v7 = vld [vmem:[#allocation2 + $0x110] ss:$12 sps:$4 sm:$0xff]   ;;  %v13050_v2 = vpack.c.bf16 %v2463_v15, %v2463_v15  ;;  %v13263_v46 = vld [vmem:[#allocation2 + $0x34] ss:$12 sps:$4 sm:$0xff]  }
 0x32d   : > { %3819 = vmatprep.subr.bf16.mxu0 %v19017_v63  ;;  %2638 = vst.msk [vmem:[#allocation2 + $0x158] sm:$0xf] %vm446_vm7, %v13045_v13  ;;  %v1889_v17 = vld [vmem:[%s14203_s13 + $0x13c] sm:$0xff]  ;;  %v13937_v35 = vld [vmem:[%s18993_s1 + $0x48] sm:$0xff] }
 0x32e   : > { %v674_v1 = vpop.permute.xlu1 %673  ;;  %2062 = vrot.lane.b32.xlu0 %v15543_v43, %s14023_s15  ;;  %v12980_v11 = vpack.c.bf16 %v1889_v17, %v1889_v17  ;;  %2643 = vst.msk [vmem:[#allocation2 + $0x194] sm:$0xf] %vm446_vm7, %v13050_v2  ;;  %v13942_v15 = vld [vmem:[%s18993_s1 + $0x40] sm:$0xff]  ;;  %v3427_v45 = vld [vmem:[#allocation2 + $0x78] sm:$0xff] }
 0x32f   : > { %759 = vst.msk [vmem:[#allocation2 + $0x114] sm:$0xf] %vm735_vm2, %v674_v1  ;;  %1776 = vrot.lane.b32.xlu1 %v15479_v25, %s14022_s14  ;;  %v2043_v48 = vpop.permute.xlu0 %2042  ;;  %v3374_v1 = vmul.f32 %v15407_v60, %v3307_v19  ;;  %v2177_v19 = vld [vmem:[%s14203_s13 + $0x13d] sm:$0xff] }
 0x330   : > { %3820 = vmatpush2.bf16.msra.mxu0 %v3404_v32  ;;  %2128 = vst.msk [vmem:[#allocation2 + $0x10c] sm:$0xf] %vm1024_vm4, %v2043_v48  ;;  %13152 = vmatmul.mubr.msk.bf16.gmra.mxu1 %vm2718_vm3, %v13278_v14  ;;  %v13295_v14 = vld [vmem:[#allocation2 + $0x128] ss:$12 sps:$4 sm:$0xff]   ;;  %v12800_v48 = vpack.c.bf16 %v518_v61, %v518_v61 }
 0x331   : > { %3821 = vmatprep.subr.bf16.mxu0 %v19017_v63  ;;  %13155 = vmatprep.mubr.msk.bf16.mxu1 %vm2718_vm3, %v13283_v36  ;;  %v3400_v36 = vpack.c.bf16 %v3376_v58, %v3375_v6  ;;  %v3304_v32 = vld [vmem:[%s18994_s2 + $0x90] sm:$0xff] }
 0x332   : > { %v1757_v25 = vpop.permute.xlu1 %1756  ;;  %1269 = vrot.lane.b32.xlu0 %v15582_v28, %s14021_s12  ;;  %v13302_v58 = vld [vmem:[#allocation2 + $0x170] ss:$12 sps:$4 sm:$0xff]  }
 0x333   : > { %1841 = vst.msk [vmem:[#allocation2 + $0x118] sm:$0xf] %vm735_vm2, %v1757_v25  ;;  %982 = vrot.lane.b32.xlu1 %v15500_v23, %s14023_s15  ;;  %v1250_v37 = vpop.permute.xlu0 %1249  ;;  %v3402_v23 = vpack.c.bf16 %v3380_v3, %v3379_v4  ;;  %v12907_v25 = vpack.c.bf16 %v1384_v33, %v1384_v33  ;;  %v13933_v33 = vld [vmem:[%s18993_s1 + $0x28] sm:$0xff] }
 0x334   : > { %3822 = vmatpush2.bf16.msra.mxu0 %v3403_v5  ;;  %1336 = vst.msk [vmem:[#allocation2 + $0x108] sm:$0xf] %vm1313_vm5, %v1250_v37  ;;  %v1385_v5 = vld [vmem:[%s14203_s13 + $0x12b] sm:$0xff]  ;;  %v3372_v37 = vmul.f32 %v15358_v53, %v3305_v56  ;;  %v3302_v53 = vld [vmem:[%s18994_s2 + $0x80] sm:$0xff] }
 0x335   : > { %3823 = vmatprep.subr.bf16.mxu0 %v19017_v63  ;;  %v12908_v4 = vpack.c.bf16 %v1385_v5, %v1385_v5  ;;  %1564 = vst.msk [vmem:[#allocation2 + $0x19c] sm:$0xf] %vm446_vm7, %v12907_v25  ;;  %v3415_v56 = vld [vmem:[#allocation2 + $0x30] sm:$0xff] }
 0x336   : > { %v963_v42 = vpop.permute.xlu1 %962  ;;  %2350 = vrot.lane.b32.xlu0 %v13013_v30, %s14021_s12  ;;  %v3371_v30 = vmul.f32 %v15351_v34, %v3304_v32  ;;  %v13296_v34 = vld [vmem:[#allocation2 + $0x140] ss:$12 sps:$4 sm:$0xff]   ;;  %v12274_v5 = vcombine.low %v3415_v56, %v3417_v51  ;;  %v3437_v56 = vld [vmem:[#allocation2 + $0xb4] sm:$0xff] }
 0x337   : > { %1048 = vst.msk [vmem:[#allocation2 + $0x114] sm:$0xf] %vm1024_vm4, %v963_v42  ;;  %2064 = vrot.lane.b32.xlu1 %v15610_v9, %s14023_s15  ;;  %v2331_v38 = vpop.permute.xlu0 %2330 }
 0x338   : > { %3824 = vmatpush2.bf16.msra.mxu0 %v3402_v23  ;;  %2416 = vst.msk [vmem:[#allocation2 + $0x10c] sm:$0xf] %vm1313_vm5, %v2331_v38  ;;  %13156 = vmatmul.mubr.msk.bf16.gmra.mxu1 %vm2718_vm3, %v13284_v18  ;;  %v3398_v42 = vpack.c.bf16 %v3372_v37, %v3371_v30  ;;  %v3370_v23 = vmul.f32 %v15407_v60, %v3303_v49  ;;  %v2462_v60 = vld [vmem:[%s14203_s13 + $0x126] sm:$0xff]  ;;  %v13936_v30 = vld [vmem:[%s18993_s1 + $0x10] sm:$0xff] }
 0x339   : > { %3825 = vmatprep.subr.bf16.mxu0 %v19017_v63  ;;  %13159 = vmatprep.mubr.msk.bf16.mxu1 %vm2718_vm3, %v13289_v52  ;;  %1565 = vst.msk [vmem:[#allocation2 + $0x1a8] sm:$0xf] %vm446_vm7, %v12908_v4  ;;  %v3369_v38 = vmul.f32 %v15390_v59, %v3302_v53  ;;  %v13049_v50 = vpack.c.bf16 %v2462_v60, %v2462_v60  ;;  %v3419_v49 = vld [vmem:[#allocation2 + $0x48] sm:$0xff] }
 0x33a   : > { %v2045_v21 = vpop.permute.xlu1 %2044  ;;  %695 = vrot.lane.b32.xlu0 %v12799_v26, %s14022_s14  ;;  %v2176_v26 = vld [vmem:[%s14203_s13 + $0x135] sm:$0xff]  ;;  %v13941_v60 = vld [vmem:[%s18993_s1 + $0x68] sm:$0xff] }
 0x33b   : > { %2129 = vst.msk [vmem:[#allocation2 + $0x118] sm:$0xf] %vm1024_vm4, %v2045_v21  ;;  %1271 = vrot.lane.b32.xlu1 %v15627_v8, %s14021_s12  ;;  %v676_v47 = vpop.permute.xlu0 %675  ;;  %v3397_v13 = vpack.c.bf16 %v3370_v23, %v3369_v38  ;;  %v13939_v23 = vld [vmem:[%s18993_s1 + $0x58] sm:$0xff]  ;;  %v3425_v38 = vld [vmem:[#allocation2 + $0x6c] sm:$0xff] }
 0x33c   : > { %3826 = vmatpush2.bf16.msra.mxu0 %v3401_v22  ;;  %760 = vst.msk [vmem:[#allocation2 + $0x120] sm:$0xf] %vm735_vm2, %v676_v47  ;;  %v1096_v22 = vld [vmem:[%s14203_s13 + $0x12a] sm:$0xff] }
 0x33d   : > { %3827 = vmatprep.subr.bf16.mxu0 %v19017_v63  ;;  %2642 = vst.msk [vmem:[#allocation2 + $0x188] sm:$0xf] %vm446_vm7, %v13049_v50 }
 0x33e   : > { %v1252_v0 = vpop.permute.xlu1 %1251  ;;  %1778 = vrot.lane.b32.xlu0 %v15543_v43, %s14022_s14  ;;  %v3373_v43 = vmul.f32 %v15390_v59, %v3306_v55  ;;  %v13015_v59 = vpack.c.bf16 %v2176_v26, %v2176_v26  ;;  %v13016_v55 = vpack.c.bf16 %v2177_v19, %v2177_v19  ;;  %v3423_v26 = vld [vmem:[#allocation2 + $0x60] sm:$0xff] }
 0x33f   : > { %1337 = vst.msk [vmem:[#allocation2 + $0x114] sm:$0xf] %vm1313_vm5, %v1252_v0  ;;  %2352 = vrot.lane.b32.xlu1 %v13014_v40, %s14021_s12  ;;  %v1759_v20 = vpop.permute.xlu0 %1758  ;;  %v12872_v40 = vpack.c.bf16 %v1096_v22, %v1096_v22  ;;  %v3411_v0 = vld [vmem:[#allocation2 + $0x18] sm:$0xff]  ;;  %v12280_v2 = vcombine.low %v3423_v26, %v3425_v38  ;;  %v13946_v22 = vld [vmem:[%s18993_s1 + $0x60] sm:$0xff] }
 0x340   : > { %3828 = vmatpush2.bf16.msra.mxu0 %v3400_v36  ;;  %1842 = vst.msk [vmem:[#allocation2 + $0x124] sm:$0xf] %vm735_vm2, %v1759_v20  ;;  %13160 = vmatmul.mubr.msk.bf16.gmra.mxu1 %vm2718_vm3, %v13290_v7  ;;  %v3399_v54 = vpack.c.bf16 %v3374_v1, %v3373_v43  ;;  %v13931_v7 = vld [vmem:[%s18993_s1] sm:$0xff]  ;;  %v12271_v1 = vcombine.low %v3411_v0, %v3413_v27  ;;  %v13934_v43 = vld [vmem:[%s18993_s1 + $0x8] sm:$0xff]  ;;  %v3431_v27 = vld [vmem:[#allocation2 + $0x90] sm:$0xff] }
 0x341   : > { %3829 = vmatprep.subr.bf16.mxu0 %v19017_v63  ;;  %13163 = vmatprep.mubr.msk.bf16.mxu1 %vm2718_vm3, %v13295_v14  ;;  %v3445_v26 = vld [vmem:[#allocation2 + $0xe4] sm:$0xff] }
 0x342   : > { %v2333_v3 = vpop.permute.xlu1 %2332  ;;  %984 = vrot.lane.b32.xlu0 %v15582_v28, %s14023_s15  ;;  %v13301_v28 = vld [vmem:[#allocation2 + $0x158] ss:$12 sps:$4 sm:$0xff]  }
 0x343   : > { %2417 = vst.msk [vmem:[#allocation2 + $0x118] sm:$0xf] %vm1313_vm5, %v2333_v3  ;;  %697 = vrot.lane.b32.xlu1 %v12800_v48, %s14022_s14  ;;  %v965_v18 = vpop.permute.xlu0 %964  ;;  %v13932_v48 = vld [vmem:[%s18993_s1 + $0x18] sm:$0xff] }
 0x344   : > { %3830 = vmatpush2.bf16.msra.mxu0 %v3399_v54  ;;  %1049 = vst.msk [vmem:[#allocation2 + $0x120] sm:$0xf] %vm1024_vm4, %v965_v18  ;;  %v13307_v57 = vld [vmem:[#allocation2 + $0x188] ss:$12 sps:$4 sm:$0xff]   ;;  %v13267_v3 = vld [vmem:[#allocation2 + $0x4c] ss:$12 sps:$4 sm:$0xff]  }
 0x345   : > { %3831 = vmatprep.subr.bf16.mxu0 %v19017_v63  ;;  %v13935_v54 = vld [vmem:[%s18993_s1 + $0x38] sm:$0xff] }
 0x346   : > { %v678_v52 = vpop.permute.xlu1 %677  ;;  %2066 = vrot.lane.b32.xlu0 %v12979_v10, %s14023_s15  ;;  %v3421_v10 = vld [vmem:[#allocation2 + $0x54] sm:$0xff] }
 0x347   : > { %761 = vst.msk [vmem:[#allocation2 + $0x12c] sm:$0xf] %vm735_vm2, %v678_v52  ;;  %1780 = vrot.lane.b32.xlu1 %v15610_v9, %s14022_s14  ;;  %v2047_v41 = vpop.permute.xlu0 %2046  ;;  %v2465_v9 = vld [vmem:[%s14203_s13 + $0x13e] sm:$0xff] }
 0x348   : > { %3832 = vmatpush2.bf16.msra.mxu0 %v3398_v42  ;;  %2130 = vst.msk [vmem:[#allocation2 + $0x124] sm:$0xf] %vm1024_vm4, %v2047_v41  ;;  %13164 = vmatmul.mubr.msk.bf16.gmra.mxu1 %vm2718_vm3, %v13296_v34  ;;  %v13052_v62 = vpack.c.bf16 %v2465_v9, %v2465_v9  ;;  %v13938_v34 = vld [vmem:[%s18993_s1 + $0x20] sm:$0xff]  ;;  %v13273_v9 = vld [vmem:[#allocation2 + $0x7c] ss:$12 sps:$4 sm:$0xff]  }
 0x349   : > { %3833 = vmatprep.subr.bf16.mxu0 %v19017_v63  ;;  %13167 = vmatprep.mubr.msk.bf16.mxu1 %vm2718_vm3, %v13301_v28  ;;  %v12277_v28 = vcombine.low %v3419_v49, %v3421_v10  ;;  %v13269_v42 = vld [vmem:[#allocation2 + $0x64] ss:$12 sps:$4 sm:$0xff]  }
 0x34a   : > { %v1761_v6 = vpop.permute.xlu1 %1760  ;;  %1273 = vrot.lane.b32.xlu0 %v12871_v39, %s14021_s12  ;;  %2645 = vst.msk [vmem:[#allocation2 + $0x1ac] sm:$0xf] %vm446_vm7, %v13052_v62  ;;  %v13940_v39 = vld [vmem:[%s18993_s1 + $0x30] sm:$0xff]  ;;  %v3429_v62 = vld [vmem:[#allocation2 + $0x84] sm:$0xff]  ;;  %vm4495_vm7 = vcmask 1041408  }
 0x34b   : > { %1843 = vst.msk [vmem:[#allocation2 + $0x130] sm:$0xf] %vm735_vm2, %v1761_v6  ;;  %986 = vrot.lane.b32.xlu1 %v15627_v8, %s14023_s15  ;;  %v1254_v21 = vpop.permute.xlu0 %1253  ;;  %v13943_v6 = vld [vmem:[%s18993_s1 + $0x78] sm:$0xff]  ;;  %v3441_v49 = vld [vmem:[#allocation2 + $0xcc] sm:$0xff]  ;;  %vm15934_vm11 = vmand %vm4495_vm7, %vm4496_vm9 }
 0x34c   : > { %3834 = vmatpush2.bf16.msra.mxu0 %v3397_v13  ;;  %1338 = vst.msk [vmem:[#allocation2 + $0x120] sm:$0xf] %vm1313_vm5, %v1254_v21  ;;  %v13944_v13 = vld [vmem:[%s18993_s1 + $0x50] sm:$0xff]  ;;  %v13945_v21 = vld [vmem:[%s18993_s1 + $0x88] sm:$0xff] }
 0x34d   : > { %9821 = vmatprep.subr.bf16.mxu0 %v19017_v63 }
 0x34e   : > { %v967_v8 = vpop.permute.xlu1 %966  ;;  %2354 = vrot.lane.b32.xlu0 %v13015_v59, %s14021_s12 }
 0x34f   : > { %1050 = vst.msk [vmem:[#allocation2 + $0x12c] sm:$0xf] %vm1024_vm4, %v967_v8  ;;  %2068 = vrot.lane.b32.xlu1 %v12980_v11, %s14023_s15  ;;  %3836 = vmatmul.mubr.bf16.vlgmr.msra.gmra.mxu0 %v13256_v44  ;;  %v2335_v47 = vpop.permute.xlu0 %2334  ;;  %v12283_v44 = vcombine.low %v3427_v45, %v3429_v62  ;;  %v3449_v45 = vld [vmem:[#allocation2 + $0xfc] sm:$0xff] }
 0x350   : > { %3843 = vmatprep.mubr.bf16.mxu0 %v13261_v31  ;;  %2418 = vst.msk [vmem:[#allocation2 + $0x124] sm:$0xf] %vm1313_vm5, %v2335_v47  ;;  %13168 = vmatmul.mubr.msk.bf16.gmra.mxu1 %vm2718_vm3, %v13302_v58  ;;  %v13275_v31 = vld [vmem:[#allocation2 + $0x94] ss:$12 sps:$4 sm:$0xff]  }
 0x351   : > { %13171 = vmatprep.mubr.msk.bf16.mxu1 %vm2718_vm3, %v13307_v57  ;;  %v13308_v36 = vld [vmem:[#allocation2 + $0x1a0] ss:$12 sps:$4 sm:$0xff]   ;;  %v13948_v47 = vld [vmem:[%s18993_s1 + $0x70] sm:$0xff] }
 0x352   : > { %v2049_v61 = vpop.permute.xlu1 %2048  ;;  %4511 = vperm.xlu0 %13251, %v13931_v7   ;;  %v13949_v57 = vld [vmem:[%s18993_s1 + $0xa8] sm:$0xff] }
 0x353   : > { %2131 = vst.msk [vmem:[#allocation2 + $0x130] sm:$0xf] %vm1024_vm4, %v2049_v61  ;;  %1275 = vrot.lane.b32.xlu1 %v12872_v40, %s14021_s12  ;;  %v680_v14 = vpop.permute.xlu0 %679  ;;  %v13947_v40 = vld [vmem:[%s18993_s1 + $0x98] sm:$0xff] }
 0x354   : > { %762 = vst.msk [vmem:[#allocation2 + $0x138] sm:$0xf] %vm735_vm2, %v680_v14  ;;  %v3433_v61 = vld [vmem:[#allocation2 + $0x9c] sm:$0xff] }
 0x355   : > { %v12286_v0 = vcombine.low %v3431_v27, %v3433_v61  ;;  %v13316_v61 = vld [vmem:[%s18995_s3 + $0xb0] sm:$0xff]  }
 0x356   : > { %v1256_v32 = vpop.permute.xlu1 %1255  ;;  %4526 = vperm.xlu0 %13251, %v13932_v48  }
 0x357   : > { %1339 = vst.msk [vmem:[#allocation2 + $0x12c] sm:$0xf] %vm1313_vm5, %v1256_v32  ;;  %2356 = vrot.lane.b32.xlu1 %v13016_v55, %s14021_s12  ;;  %3844 = vmatmul.mubr.bf16.gmra.mxu0 %v12271_v1  ;;  %v1763_v20 = vpop.permute.xlu0 %1762  ;;  %v13950_v55 = vld [vmem:[%s18993_s1 + $0x80] sm:$0xff]  ;;  %v13279_v1 = vld [vmem:[#allocation2 + $0xac] ss:$12 sps:$4 sm:$0xff]  }
 0x358   : > { %3851 = vmatprep.mubr.bf16.mxu0 %v13263_v46  ;;  %1844 = vst.msk [vmem:[#allocation2 + $0x13c] sm:$0xf] %vm735_vm2, %v1763_v20  ;;  %13172 = vmatmul.mubr.msk.bf16.gmra.mxu1 %vm2718_vm3, %v13308_v36  ;;  %v13951_v32 = vld [vmem:[%s18993_s1 + $0xb8] sm:$0xff]  ;;  %v13952_v46 = vld [vmem:[%s18993_s1 + $0x90] sm:$0xff]  ;;  %v3435_v20 = vld [vmem:[#allocation2 + $0xa8] sm:$0xff] }
 0x35a   : > { %v2337_v29 = vpop.permute.xlu1 %2336  ;;  %4536 = vperm.xlu0 %13251, %v13933_v33   ;;  %v13954_v33 = vld [vmem:[%s18993_s1 + $0xa0] sm:$0xff] }
 0x35b   : > { %2419 = vst.msk [vmem:[#allocation2 + $0x130] sm:$0xf] %vm1313_vm5, %v2337_v29  ;;  %4516 = vperm.xlu1 %13252, %v13934_v43   ;;  %v969_v25 = vpop.permute.xlu0 %968  ;;  %v13953_v29 = vld [vmem:[%s18993_s1 + $0xc8] sm:$0xff] }
 0x35c   : > { %1051 = vst.msk [vmem:[#allocation2 + $0x138] sm:$0xf] %vm1024_vm4, %v969_v25  ;;  %v12289_v25 = vcombine.low %v3435_v20, %v3437_v56  ;;  %v13319_v20 = vld [vmem:[%s18995_s3 + $0x18] sm:$0xff]   ;;  %v13320_v56 = vld [vmem:[%s18995_s3 + $0xa0] sm:$0xff]  }
 0x35e   : > { %v682_v4 = vpop.permute.xlu1 %681  ;;  %4546 = vperm.xlu0 %13251, %v13935_v54   ;;  %v13956_v54 = vld [vmem:[%s18993_s1 + $0xb0] sm:$0xff] }
 0x35f   : > { %763 = vst.msk [vmem:[#allocation2 + $0x144] sm:$0xf] %vm735_vm2, %v682_v4  ;;  %4521 = vperm.xlu1 %13252, %v13936_v30   ;;  %3852 = vmatmul.mubr.bf16.gmra.mxu0 %v12274_v5  ;;  %v2051_v37 = vpop.permute.xlu0 %2050  ;;  %v13281_v4 = vld [vmem:[#allocation2 + $0xc4] ss:$12 sps:$4 sm:$0xff]  }
 0x360   : > { %3859 = vmatprep.mubr.bf16.mxu0 %v13267_v3  ;;  %2132 = vst.msk [vmem:[#allocation2 + $0x13c] sm:$0xf] %vm1024_vm4, %v2051_v37  ;;  %v13955_v3 = vld [vmem:[%s18993_s1 + $0xd8] sm:$0xff]  ;;  %v3439_v37 = vld [vmem:[#allocation2 + $0xc0] sm:$0xff] }
 0x362   : > { %v1765_v18 = vpop.permute.xlu1 %1764  ;;  %4556 = vperm.xlu0 %13251, %v13937_v35   ;;  %v13958_v35 = vld [vmem:[%s18993_s1 + $0xc0] sm:$0xff] }
 0x363   : > { %1845 = vst.msk [vmem:[#allocation2 + $0x148] sm:$0xf] %vm735_vm2, %v1765_v18  ;;  %4531 = vperm.xlu1 %13252, %v13938_v34   ;;  %v1258_v53 = vpop.permute.xlu0 %1257  ;;  %v13957_v18 = vld [vmem:[%s18993_s1 + $0xe8] sm:$0xff] }
 0x364   : > { %1340 = vst.msk [vmem:[#allocation2 + $0x138] sm:$0xf] %vm1313_vm5, %v1258_v53  ;;  %v12292_v53 = vcombine.low %v3439_v37, %v3441_v49 }
 0x366   : > { %v971_v52 = vpop.permute.xlu1 %970  ;;  %4566 = vperm.xlu0 %13251, %v13939_v23   ;;  %v13312_v23 = vld [vmem:[%s18995_s3 + $0x38] sm:$0xff]  }
 0x367   : > { %1052 = vst.msk [vmem:[#allocation2 + $0x144] sm:$0xf] %vm1024_vm4, %v971_v52  ;;  %4541 = vperm.xlu1 %13252, %v13940_v39   ;;  %3860 = vmatmul.mubr.bf16.gmra.mxu0 %v12277_v28  ;;  %v2339_v41 = vpop.permute.xlu0 %2338  ;;  %v13285_v52 = vld [vmem:[#allocation2 + $0xdc] ss:$12 sps:$4 sm:$0xff]   ;;  %v13960_v39 = vld [vmem:[%s18993_s1 + $0xd0] sm:$0xff] }
 0x368   : > { %3867 = vmatprep.mubr.bf16.mxu0 %v13269_v42  ;;  %2420 = vst.msk [vmem:[#allocation2 + $0x13c] sm:$0xf] %vm1313_vm5, %v2339_v41  ;;  %v13959_v42 = vld [vmem:[%s18993_s1 + $0xf8] sm:$0xff]  ;;  %9645 = vmatpush1.bf16.msra.mxu1 %v13312_v23  ;;  %v13325_v23 = vld [vmem:[%s18995_s3] sm:$0xff]  }
 0x369   : > { %9646 = vmatprep.subr.bf16.mxu1 %v19017_v63 }
 0x36a   : > { %v2053_v17 = vpop.permute.xlu1 %2052  ;;  %4576 = vperm.xlu0 %13251, %v13941_v60   ;;  %v13962_v60 = vld [vmem:[%s18993_s1 + $0xe0] sm:$0xff] }
 0x36b   : > { %2133 = vst.msk [vmem:[#allocation2 + $0x148] sm:$0xf] %vm1024_vm4, %v2053_v17  ;;  %4551 = vperm.xlu1 %13252, %v13942_v15   ;;  %v684_v50 = vpop.permute.xlu0 %683  ;;  %v13961_v17 = vld [vmem:[%s18993_s1 + $0x108] sm:$0xff] }
 0x36c   : > { %764 = vst.msk [vmem:[#allocation2 + $0x150] sm:$0xf] %vm735_vm2, %v684_v50  ;;  %v3443_v50 = vld [vmem:[#allocation2 + $0xd8] sm:$0xff] }
 0x36e   : > { %v1260_v12 = vpop.permute.xlu1 %1259  ;;  %4586 = vperm.xlu0 %13251, %v13943_v6   ;;  %v13963_v6 = vld [vmem:[%s18993_s1 + $0x118] sm:$0xff] }
 0x36f   : > { %1341 = vst.msk [vmem:[#allocation2 + $0x144] sm:$0xf] %vm1313_vm5, %v1260_v12  ;;  %4561 = vperm.xlu1 %13252, %v13944_v13   ;;  %3868 = vmatmul.mubr.bf16.gmra.mxu0 %v12280_v2  ;;  %v1767_v59 = vpop.permute.xlu0 %1766  ;;  %v12295_v2 = vcombine.low %v3443_v50, %v3445_v26  ;;  %v13964_v13 = vld [vmem:[%s18993_s1 + $0xf0] sm:$0xff]  ;;  %v13327_v50 = vld [vmem:[%s18995_s3 + $0x78] sm:$0xff]  }
 0x370   : > { %3875 = vmatprep.mubr.bf16.mxu0 %v13273_v9  ;;  %1846 = vst.msk [vmem:[#allocation2 + $0x154] sm:$0xf] %vm735_vm2, %v1767_v59  ;;  %v13287_v9 = vld [vmem:[#allocation2 + $0xf4] ss:$12 sps:$4 sm:$0xff]  }
 0x372   : > { %v2341_v11 = vpop.permute.xlu1 %2340  ;;  %4596 = vperm.xlu0 %13251, %v13945_v21   ;;  %v13965_v21 = vld [vmem:[%s18993_s1 + $0x100] sm:$0xff] }
 0x373   : > { %2421 = vst.msk [vmem:[#allocation2 + $0x148] sm:$0xf] %vm1313_vm5, %v2341_v11  ;;  %4571 = vperm.xlu1 %13252, %v13946_v22   ;;  %v973_v58 = vpop.permute.xlu0 %972  ;;  %v13313_v11 = vld [vmem:[%s18995_s3 + $0x30] sm:$0xff]  }
 0x374   : > { %1053 = vst.msk [vmem:[#allocation2 + $0x150] sm:$0xf] %vm1024_vm4, %v973_v58  ;;  %v3447_v58 = vld [vmem:[#allocation2 + $0xf0] sm:$0xff]  ;;  %9647 = vmatpush1.bf16.msra.mxu1 %v13313_v11 }
 0x375   : > { %9648 = vmatprep.subr.bf16.mxu1 %v19017_v63 }
 0x376   : > { %v686_v8 = vpop.permute.xlu1 %685  ;;  %4606 = vperm.xlu0 %13251, %v13947_v40   ;;  %v13291_v40 = vld [vmem:[#allocation2 + $0x10c] ss:$12 sps:$4 sm:$0xff]  }
 0x377   : > { %765 = vst.msk [vmem:[#allocation2 + $0x15c] sm:$0xf] %vm735_vm2, %v686_v8  ;;  %4581 = vperm.xlu1 %13252, %v13948_v47   ;;  %3876 = vmatmul.mubr.bf16.gmra.mxu0 %v12283_v44  ;;  %v2055_v19 = vpop.permute.xlu0 %2054  ;;  %v13314_v44 = vld [vmem:[%s18995_s3 + $0xb8] sm:$0xff]   ;;  %v12298_v8 = vcombine.low %v3447_v58, %v3449_v45  ;;  %v13315_v47 = vld [vmem:[%s18995_s3 + $0x28] sm:$0xff]   ;;  %v13329_v45 = vld [vmem:[%s18995_s3 + $0x70] sm:$0xff]  }
 0x378   : > { %3883 = vmatprep.mubr.bf16.mxu0 %v13275_v31  ;;  %2134 = vst.msk [vmem:[#allocation2 + $0x154] sm:$0xf] %vm1024_vm4, %v2055_v19  ;;  %9822 = vmatpush1.bf16.msra.mxu0 %v13314_v44  ;;  %v13966_v19 = vld [vmem:[%s18993_s1 + $0x110] sm:$0xff] }
 0x379   : > { %9649 = vmatpush1.bf16.msra.mxu1 %v13315_v47  ;;  %9823 = vmatprep.subr.bf16.mxu0 %v19017_v63  ;;  %v13331_v47 = vld [vmem:[%s18995_s3 + $0x68] sm:$0xff]  }
 0x37a   : > { %v1769_v7 = vpop.permute.xlu1 %1768  ;;  %4616 = vperm.xlu0 %13251, %v13949_v57   ;;  %9650 = vmatprep.subr.bf16.mxu1 %v19017_v63  ;;  %v13297_v49 = vld [vmem:[#allocation2 + $0x13c] ss:$12 sps:$4 sm:$0xff]  }
 0x37b   : > { %1847 = vst.msk [vmem:[#allocation2 + $0x160] sm:$0xf] %vm735_vm2, %v1769_v7  ;;  %4591 = vperm.xlu1 %13252, %v13950_v55   ;;  %v1262_v14 = vpop.permute.xlu0 %1261  ;;  %v3453_v7 = vld [vmem:[#allocation2 + $0x114] sm:$0xff]  ;;  %v13317_v55 = vld [vmem:[%s18995_s3 + $0x20] sm:$0xff]  }
 0x37c   : > { %1342 = vst.msk [vmem:[#allocation2 + $0x150] sm:$0xf] %vm1313_vm5, %v1262_v14  ;;  %9824 = vmatpush1.bf16.msra.mxu0 %v13316_v61  ;;  %v14028_v14 = vmov 64  }
 0x37d   : > { %9825 = vmatprep.subr.bf16.mxu0 %v19017_v63  ;;  %9651 = vmatpush1.bf16.msra.mxu1 %v13317_v55  ;;  %v13333_v55 = vld [vmem:[%s18995_s3 + $0x60] sm:$0xff]  }
 0x37e   : > { %v975_v36 = vpop.permute.xlu1 %974  ;;  %4626 = vperm.xlu0 %13251, %v13951_v32   ;;  %9652 = vmatprep.subr.bf16.mxu1 %v19017_v63 }
 0x37f   : > { %1054 = vst.msk [vmem:[#allocation2 + $0x15c] sm:$0xf] %vm1024_vm4, %v975_v36  ;;  %4601 = vperm.xlu1 %13252, %v13952_v46   ;;  %3884 = vmatmul.mubr.bf16.gmra.mxu0 %v12286_v0  ;;  %v2343_v48 = vpop.permute.xlu0 %2342  ;;  %v3451_v36 = vld [vmem:[#allocation2 + $0x108] sm:$0xff] }
 0x380   : > { %3891 = vmatprep.mubr.bf16.mxu0 %v13279_v1  ;;  %2422 = vst.msk [vmem:[#allocation2 + $0x154] sm:$0xf] %vm1313_vm5, %v2343_v48  ;;  %v13318_v1 = vld [vmem:[%s18995_s3 + $0xa8] sm:$0xff]   ;;  %v12301_v32 = vcombine.low %v3451_v36, %v3453_v7  ;;  %v13293_v48 = vld [vmem:[#allocation2 + $0x124] ss:$12 sps:$4 sm:$0xff]  }
 0x381   : > { %9826 = vmatpush1.bf16.msra.mxu0 %v13318_v1  ;;  %9653 = vmatpush1.bf16.msra.mxu1 %v13319_v20  ;;  %v13332_v7 = vld [vmem:[%s18995_s3 + $0xf0] sm:$0xff]  }
 0x382   : > { %v2057_v51 = vpop.permute.xlu1 %2056  ;;  %4636 = vperm.xlu0 %13251, %v13953_v29   ;;  %9827 = vmatprep.subr.bf16.mxu0 %v19017_v63  ;;  %v5345_v36 = vld [vmem:[#allocation3 + $0x4] sm:$0xf] }
 0x383   : > { %2135 = vst.msk [vmem:[#allocation2 + $0x160] sm:$0xf] %vm1024_vm4, %v2057_v51  ;;  %4611 = vperm.xlu1 %13252, %v13954_v33   ;;  %v688_v43 = vpop.permute.xlu0 %687  ;;  %9654 = vmatprep.subr.bf16.mxu1 %v19017_v63  ;;  %v3457_v51 = vld [vmem:[#allocation2 + $0x12c] sm:$0xff]  ;;  %v5394_v20 = vshll.u32 %v5345_v36, 16 }
 0x384   : > { %766 = vst.msk [vmem:[#allocation2 + $0x168] sm:$0xf] %vm735_vm2, %v688_v43  ;;  %v13321_v33 = vld [vmem:[%s18995_s3 + $0x10] sm:$0xff]   ;;  %v3455_v43 = vld [vmem:[#allocation2 + $0x120] sm:$0xff] }
 0x385   : > { %9828 = vmatpush1.bf16.msra.mxu0 %v13320_v56  ;;  %9655 = vmatpush1.bf16.msra.mxu1 %v13321_v33 }
 0x386   : > { %v1264_v5 = vpop.permute.xlu1 %1263  ;;  %4646 = vperm.xlu0 %13251, %v13955_v3   ;;  %9829 = vmatprep.subr.bf16.mxu0 %v19017_v63 }
 0x387   : > { %1343 = vst.msk [vmem:[#allocation2 + $0x15c] sm:$0xf] %vm1313_vm5, %v1264_v5  ;;  %4621 = vperm.xlu1 %13252, %v13956_v54   ;;  %3892 = vmatmul.mubr.bf16.gmra.mxu0 %v12289_v25  ;;  %v1771_v30 = vpop.permute.xlu0 %1770  ;;  %v4498_v5 = vld [vmem:[#allocation3 + $0x8] sm:$0x3]  ;;  %v4504_v54 = vld [vmem:[#allocation3 + $0x98] sm:$0xe] }
 0x388   : > { %3899 = vmatprep.mubr.bf16.mxu0 %v13281_v4  ;;  %1848 = vst.msk [vmem:[#allocation2 + $0x16c] sm:$0xf] %vm735_vm2, %v1771_v30  ;;  %v12304_v4 = vcombine.low %v3455_v43, %v3457_v51  ;;  %v13322_v30 = vld [vmem:[%s18995_s3 + $0x98] sm:$0xff]   ;;  %9656 = vmatprep.subr.bf16.mxu1 %v19017_v63  ;;  %v16016_v43 = vrot.slane %v5394_v20, 5 }
 0x389   : > { %9830 = vmatpush1.bf16.msra.mxu0 %v13322_v30  ;;  %v13335_v51 = vld [vmem:[%s18995_s3 + $0x58] sm:$0xff]  }
 0x38a   : > { %v2345_v10 = vpop.permute.xlu1 %2344  ;;  %4656 = vperm.xlu0 %13251, %v13957_v18   ;;  %9831 = vmatprep.subr.bf16.mxu0 %v19017_v63 }
 0x38b   : > { %2423 = vst.msk [vmem:[#allocation2 + $0x160] sm:$0xf] %vm1313_vm5, %v2345_v10  ;;  %4631 = vperm.xlu1 %13252, %v13958_v35   ;;  %v977_v34 = vpop.permute.xlu0 %976  ;;  %v4499_v10 = vsel %vm15934_vm11, 0, %v4498_v5  ;;  %v13323_v35 = vld [vmem:[%s18995_s3 + $0x8] sm:$0xff]  }
 0x38c   : > { %1055 = vst.msk [vmem:[#allocation2 + $0x168] sm:$0xf] %vm1024_vm4, %v977_v34  ;;  %4500 = vst [vmem:[#allocation3 + $0x8] sm:$0x3] %v4499_v10  ;;  %9657 = vmatpush1.bf16.msra.mxu1 %v13323_v35 }
 0x38d   : > { %9658 = vmatprep.subr.bf16.mxu1 %v19017_v63 }
 0x38e   : > { %v690_v28 = vpop.permute.xlu1 %689  ;;  %4666 = vperm.xlu0 %13251, %v13959_v42  }
 0x38f   : > { %767 = vst.msk [vmem:[#allocation2 + $0x174] sm:$0xf] %vm735_vm2, %v690_v28  ;;  %4641 = vperm.xlu1 %13252, %v13960_v39   ;;  %3900 = vmatmul.mubr.bf16.gmra.mxu0 %v12292_v53  ;;  %v2059_v41 = vpop.permute.xlu0 %2058  ;;  %v4505_v53 = vsel %vm15944_vm13, 0, %v4504_v54  ;;  %v13324_v28 = vld [vmem:[%s18995_s3 + $0x90] sm:$0xff]  }
 0x390   : > { %3907 = vmatprep.mubr.bf16.mxu0 %v13285_v52  ;;  %2136 = vst.msk [vmem:[#allocation2 + $0x16c] sm:$0xf] %vm1024_vm4, %v2059_v41  ;;  %4506 = vst [vmem:[#allocation3 + $0x98] sm:$0xe] %v4505_v53  ;;  %v3461_v52 = vld [vmem:[#allocation2 + $0x144] sm:$0xff]  ;;  %v3459_v41 = vld [vmem:[#allocation2 + $0x138] sm:$0xff]  ;;  %9832 = vmatpush1.bf16.msra.mxu0 %v13324_v28 }
 0x391   : > { %v12307_v26 = vcombine.low %v3459_v41, %v3461_v52  ;;  %9659 = vmatpush1.bf16.msra.mxu1 %v13325_v23  ;;  %9833 = vmatprep.subr.bf16.mxu0 %v19017_v63  ;;  %v5272_v53 = vld [vmem:[#allocation3] sm:$0xf]  ;;  %v5273_v28 = vld [vmem:[#allocation3 + $0x4] sm:$0xf] }
 0x392   : > { %v1773_v38 = vpop.permute.xlu1 %1772  ;;  %4676 = vperm.xlu0 %13251, %v13961_v17   ;;  %v13299_v17 = vld [vmem:[#allocation2 + $0x154] ss:$12 sps:$4 sm:$0xff]   ;;  %9660 = vmatprep.subr.bf16.mxu1 %v19017_v63  ;;  %5308 = vst [vmem:[#allocation4] sm:$0xf] %v5272_v53  ;;  %5309 = vst [vmem:[#allocation4 + $0x24] sm:$0xf] %v5273_v28 }
 0x393   : > { %1849 = vst.msk [vmem:[#allocation2 + $0x178] sm:$0xf] %vm735_vm2, %v1773_v38  ;;  %4651 = vperm.xlu1 %13252, %v13962_v60   ;;  %v1266_v15 = vpop.permute.xlu0 %1265  ;;  %v13340_v23 = vld [vmem:[%s18995_s3 + $0xd0] sm:$0xff]  }
 0x394   : > { %1344 = vst.msk [vmem:[#allocation2 + $0x168] sm:$0xf] %vm1313_vm5, %v1266_v15  ;;  %v13326_v15 = vld [vmem:[%s18995_s3 + $0x88] sm:$0xff]  }
 0x395   : > { %9834 = vmatpush1.bf16.msra.mxu0 %v13326_v15  ;;  %9661 = vmatpush2.bf16.msra.mxu1 %v13327_v50 }
 0x396   : > { %v979_v12 = vpop.permute.xlu1 %978  ;;  %4686 = vperm.xlu0 %13251, %v13963_v6   ;;  %9835 = vmatprep.subr.bf16.mxu0 %v19017_v63  ;;  %v13328_v6 = vld [vmem:[%s18995_s3 + $0x80] sm:$0xff]  }
 0x397   : > { %1056 = vst.msk [vmem:[#allocation2 + $0x174] sm:$0xf] %vm1024_vm4, %v979_v12  ;;  %4661 = vperm.xlu1 %13252, %v13964_v13   ;;  %3908 = vmatmul.mubr.bf16.gmra.mxu0 %v12295_v2  ;;  %v2347_v59 = vpop.permute.xlu0 %2346  ;;  %v3465_v2 = vld [vmem:[#allocation2 + $0x15c] sm:$0xff]  ;;  %v3463_v13 = vld [vmem:[#allocation2 + $0x150] sm:$0xff] }
 0x398   : > { %3915 = vmatprep.mubr.bf16.mxu0 %v13287_v9  ;;  %2424 = vst.msk [vmem:[#allocation2 + $0x16c] sm:$0xf] %vm1313_vm5, %v2347_v59  ;;  %9662 = vmatprep.subr.bf16.mxu1 %v19017_v63  ;;  %v12310_v59 = vcombine.low %v3463_v13, %v3465_v2 }
 0x399   : > { %9836 = vmatpush1.bf16.msra.mxu0 %v13328_v6  ;;  %9663 = vmatpush2.bf16.msra.mxu1 %v13329_v45  ;;  %v16079_v45 = vld [vmem:[%s18996_s4 + $0x2c] ss:$0 sm:$0xff] }
 0x39a   : > { %v2061_v62 = vpop.permute.xlu1 %2060  ;;  %9837 = vmatprep.subr.bf16.mxu0 %v19017_v63  ;;  %9664 = vmatprep.subr.bf16.mxu1 %v19017_v63 }
 0x39b   : > { %2137 = vst.msk [vmem:[#allocation2 + $0x178] sm:$0xf] %vm1024_vm4, %v2061_v62  ;;  %4671 = vperm.xlu1 %13252, %v13965_v21   ;;  %v692_v22 = vpop.permute.xlu0 %691 }
 0x39c   : > { %768 = vst.msk [vmem:[#allocation2 + $0x180] sm:$0xf] %vm735_vm2, %v692_v22 }
 0x39d   : > { %9665 = vmatpush2.bf16.msra.mxu1 %v13331_v47 }
 0x39e   : > { %v1268_v31 = vpop.permute.xlu1 %1267  ;;  %9666 = vmatprep.subr.bf16.mxu1 %v19017_v63 }
 0x39f   : > { %1345 = vst.msk [vmem:[#allocation2 + $0x174] sm:$0xf] %vm1313_vm5, %v1268_v31  ;;  %4681 = vperm.xlu1 %13252, %v13966_v19   ;;  %3916 = vmatmul.mubr.bf16.gmra.mxu0 %v12298_v8  ;;  %v1775_v27 = vpop.permute.xlu0 %1774  ;;  %v13330_v8 = vld [vmem:[%s18995_s3 + $0xf8] sm:$0xff]   ;;  %v3467_v31 = vld [vmem:[#allocation2 + $0x168] sm:$0xff] }
 0x3a0   : > { %3923 = vmatprep.mubr.bf16.mxu0 %v13291_v40  ;;  %1850 = vst.msk [vmem:[#allocation2 + $0x184] sm:$0xf] %vm735_vm2, %v1775_v27  ;;  %9838 = vmatpush2.bf16.msra.mxu0 %v13330_v8 }
 0x3a1   : > { %9839 = vmatprep.subr.bf16.mxu0 %v19017_v63  ;;  %9667 = vmatpush2.bf16.msra.mxu1 %v13333_v55 }
 0x3a2   : > { %v2349_v57 = vpop.permute.xlu1 %2348  ;;  %9668 = vmatprep.subr.bf16.mxu1 %v19017_v63 }
 0x3a3   : > { %2425 = vst.msk [vmem:[#allocation2 + $0x178] sm:$0xf] %vm1313_vm5, %v2349_v57  ;;  %13253 = vset.pattern.permute.xlu1 %v14028_v14  ;;  %v981_v0 = vpop.permute.xlu0 %980 }
 0x3a4   : > { %3146 = vperm.xlu1 %13253, %v14858_v24   ;;  %1057 = vst.msk [vmem:[#allocation2 + $0x180] sm:$0xf] %vm1024_vm4, %v981_v0  ;;  %9840 = vmatpush2.bf16.msra.mxu0 %v13332_v7  ;;  %v5344_v0 = vld [vmem:[#allocation3] sm:$0xf] }
 0x3a5   : > { %9841 = vmatprep.subr.bf16.mxu0 %v19017_v63  ;;  %9669 = vmatpush2.bf16.msra.mxu1 %v13335_v51 }
 0x3a6   : > { %v694_v46 = vpop.permute.xlu1 %693  ;;  %9670 = vmatprep.subr.bf16.mxu1 %v19017_v63 }
 0x3a7   : > { %769 = vst.msk [vmem:[#allocation2 + $0x18c] sm:$0xf] %vm735_vm2, %v694_v46  ;;  %3924 = vmatmul.mubr.bf16.gmra.mxu0 %v12301_v32  ;;  %v2063_v24 = vpop.permute.xlu0 %2062  ;;  %v13334_v32 = vld [vmem:[%s18995_s3 + $0xe8] sm:$0xff]   ;;  %v5385_v46 = vshrl.u32 %v5344_v0, 16 }
 0x3a8   : > { %3931 = vmatprep.mubr.bf16.mxu0 %v13293_v48  ;;  %2138 = vst.msk [vmem:[#allocation2 + $0x184] sm:$0xf] %vm1024_vm4, %v2063_v24  ;;  %v5388_v48 = vshll.u32 %v5344_v0, 16  ;;  %v5398_v24 = vshrl.u32 %v5345_v36, 16  ;;  %9842 = vmatpush2.bf16.msra.mxu0 %v13334_v32 }
 0x3a9   : > { %9843 = vmatprep.subr.bf16.mxu0 %v19017_v63 }
 0x3aa   : > { %v1777_v29 = vpop.permute.xlu1 %1776  ;;  %v13303_v11 = vld [vmem:[#allocation2 + $0x16c] ss:$12 sps:$4 sm:$0xff]   ;;  %v5390_v33 = vrot.slane %v5388_v48, 5 }
 0x3ab   : > { %1851 = vst.msk [vmem:[#allocation2 + $0x190] sm:$0xf] %vm735_vm2, %v1777_v29  ;;  %v1270_v25 = vpop.permute.xlu0 %1269  ;;  %v3469_v22 = vld [vmem:[#allocation2 + $0x174] sm:$0xff]  ;;  %v5387_v29 = vrot.slane %v5385_v46, 4 }
 0x3ac   : > { %1346 = vst.msk [vmem:[#allocation2 + $0x180] sm:$0xf] %vm1313_vm5, %v1270_v25  ;;  %v12313_v40 = vcombine.low %v3467_v31, %v3469_v22  ;;  %v16018_v25 = vrot.slane %v5398_v24, 4 }
 0x3ad   : > { %v5391_v54 = vor.u32 %v5390_v33, %v5387_v29 }
 0x3ae   : > { %v983_v37 = vpop.permute.xlu1 %982  ;;  %v5401_v30 = vor.u32 %v16018_v25, %v16016_v43 }
 0x3af   : > { %1058 = vst.msk [vmem:[#allocation2 + $0x18c] sm:$0xf] %vm1024_vm4, %v983_v37  ;;  %3932 = vmatmul.mubr.bf16.gmra.mxu0 %v12304_v4  ;;  %v2351_v34 = vpop.permute.xlu0 %2350  ;;  %v13336_v4 = vld [vmem:[%s18995_s3 + $0xe0] sm:$0xff]   ;;  %v13337_v37 = vld [vmem:[%s18995_s3 + $0x50] sm:$0xff]  }
 0x3b0   : > { %3939 = vmatprep.mubr.bf16.mxu0 %v13297_v49  ;;  %2426 = vst.msk [vmem:[#allocation2 + $0x184] sm:$0xf] %vm1313_vm5, %v2351_v34  ;;  %9844 = vmatpush2.bf16.msra.mxu0 %v13336_v4  ;;  %v5392_v49 = vrot.slane %v5391_v54, 4  ;;  %v13338_v34 = vld [vmem:[%s18995_s3 + $0xd8] sm:$0xff]  }
 0x3b1   : > { %9845 = vmatprep.subr.bf16.mxu0 %v19017_v63  ;;  %9671 = vmatpush2.bf16.msra.mxu1 %v13337_v37 }
 0x3b2   : > { %v2065_v42 = vpop.permute.xlu1 %2064  ;;  %v5397_v52 = vsel %vm16032_vm0, %v5392_v49, %v16016_v43  ;;  %9672 = vmatprep.subr.bf16.mxu1 %v19017_v63 }
 0x3b3   : > { %2139 = vst.msk [vmem:[#allocation2 + $0x190] sm:$0xf] %vm1024_vm4, %v2065_v42  ;;  %v696_v39 = vpop.permute.xlu0 %695  ;;  %5784 = vst [vmem:[#allocation4 + $0x4] sm:$0xf] %v5397_v52  ;;  %v13339_v42 = vld [vmem:[%s18995_s3 + $0x48] sm:$0xff]  }
 0x3b4   : > { %770 = vst.msk [vmem:[#allocation2 + $0x198] sm:$0xf] %vm735_vm2, %v696_v39  ;;  %9846 = vmatpush2.bf16.msra.mxu0 %v13338_v34  ;;  %v13341_v39 = vld [vmem:[%s18995_s3 + $0x40] sm:$0xff]  }
 0x3b5   : > { %9847 = vmatprep.subr.bf16.mxu0 %v19017_v63  ;;  %9673 = vmatpush2.bf16.msra.mxu1 %v13339_v42 }
 0x3b6   : > { %v1272_v38 = vpop.permute.xlu1 %1271  ;;  %9674 = vmatprep.subr.bf16.mxu1 %v19017_v63 }
 0x3b7   : > { %1347 = vst.msk [vmem:[#allocation2 + $0x18c] sm:$0xf] %vm1313_vm5, %v1272_v38  ;;  %3940 = vmatmul.mubr.bf16.gmra.mxu0 %v12307_v26  ;;  %v1779_v60 = vpop.permute.xlu0 %1778  ;;  %v3471_v1 = vld [vmem:[#allocation2 + $0x180] sm:$0xff]  ;;  %v16057_v38 = vld [vmem:[#allocation3 + $0x4] sm:$0xf] }
 0x3b8   : > { %3947 = vmatprep.mubr.bf16.mxu0 %v13299_v17  ;;  %1852 = vst.msk [vmem:[#allocation2 + $0x19c] sm:$0xf] %vm735_vm2, %v1779_v60  ;;  %9848 = vmatpush2.bf16.msra.mxu0 %v13340_v23  ;;  %v5820_v17 = vld [vmem:[#allocation3] sm:$0xe]  ;;  %v5899_v15 = vrot.slane %v16057_v38, 5 }
 0x3b9   : > { %9849 = vmatprep.subr.bf16.mxu0 %v19017_v63  ;;  %9675 = vmatpush2.bf16.msra.mxu1 %v13341_v39  ;;  %v12414_v60 = vrot.slane %v5820_v17, 9 }
 0x3ba   : > { %v2353_v12 = vpop.permute.xlu1 %2352  ;;  %9998 = vmatprep.subr.bf16.mxu1 %v19017_v63  ;;  %v5901_v43 = vrot.slane %v5899_v15, 4 }
 0x3bb   : > { %2427 = vst.msk [vmem:[#allocation2 + $0x190] sm:$0xf] %vm1313_vm5, %v2353_v12  ;;  %v985_v9 = vpop.permute.xlu0 %984  ;;  %v13345_v12 = vld [vmem:[%s18995_s3 + $0xc8] sm:$0xff]  }
 0x3bc   : > { %1059 = vst.msk [vmem:[#allocation2 + $0x198] sm:$0xf] %vm1024_vm4, %v985_v9  ;;  %9850 = vmatpush2.bf16.msra.mxu0 %v13345_v12  ;;  %v13346_v9 = vld [vmem:[%s18995_s3 + $0xc0] sm:$0xff]  }
 0x3bd   : > { %9851 = vmatprep.subr.bf16.mxu0 %v19017_v63 }
 0x3be   : > { %v698_v62 = vpop.permute.xlu1 %697 }
 0x3bf   : > { %771 = vst.msk [vmem:[#allocation2 + $0x1a4] sm:$0xf] %vm735_vm2, %v698_v62  ;;  %3948 = vmatmul.mubr.bf16.gmra.mxu0 %v12310_v59  ;;  %v2067_v21 = vpop.permute.xlu0 %2066 }
 0x3c0   : > { %3955 = vmatprep.mubr.bf16.mxu0 %v13303_v11  ;;  %2140 = vst.msk [vmem:[#allocation2 + $0x19c] sm:$0xf] %vm1024_vm4, %v2067_v21  ;;  %9852 = vmatpush2.bf16.msra.mxu0 %v13346_v9  ;;  %v16084_v21 = vld [vmem:[%s18996_s4 + $0x2d] ss:$0 sm:$0xff] }
 0x3c1   : > { %10175 = vmatprep.subr.bf16.mxu0 %v19017_v63 }
 0x3c2   : > { %v1781_v58 = vpop.permute.xlu1 %1780  ;;  %v13305_v27 = vld [vmem:[#allocation2 + $0x184] ss:$12 sps:$4 sm:$0xff]  }
 0x3c3   : > { %1853 = vst.msk [vmem:[#allocation2 + $0x1a8] sm:$0xf] %vm735_vm2, %v1781_v58  ;;  %v1274_v44 = vpop.permute.xlu0 %1273  ;;  %v3473_v57 = vld [vmem:[#allocation2 + $0x18c] sm:$0xff]  ;;  %vm5895_vm2 = vcmask 1046532  }
 0x3c4   : > { %1348 = vst.msk [vmem:[#allocation2 + $0x198] sm:$0xf] %vm1313_vm5, %v1274_v44  ;;  %v12316_v56 = vcombine.low %v3471_v1, %v3473_v57 }
 0x3c6   : > { %v987_v19 = vpop.permute.xlu1 %986 }
 0x3c7   : > { %1060 = vst.msk [vmem:[#allocation2 + $0x1a4] sm:$0xf] %vm1024_vm4, %v987_v19  ;;  %3956 = vmatmul.mubr.bf16.gmra.mxu0 %v12313_v40  ;;  %v2355_v61 = vpop.permute.xlu0 %2354 }
 0x3c8   : > { %3963 = vmatprep.mubr.bf16.mxu0 %v13305_v27  ;;  %2428 = vst.msk [vmem:[#allocation2 + $0x19c] sm:$0xf] %vm1313_vm5, %v2355_v61 }
 0x3ca   : > { %v2069_v14 = vpop.permute.xlu1 %2068 }
 0x3cb   : > { %2141 = vst.msk [vmem:[#allocation2 + $0x1a8] sm:$0xf] %vm1024_vm4, %v2069_v14  ;;  %vm16060_vm4 = vmor %vm5894_vm1, %vm5895_vm2 }
 0x3cc   : > { %v5900_v2 = vsel %vm16060_vm4, %v12414_v60, %v5899_v15 }
 0x3cd   : > { %6042 = vst [vmem:[#allocation4 + $0x8] sm:$0xf] %v5900_v2 }
 0x3ce   : > { %v1276_v5 = vpop.permute.xlu1 %1275 }
 0x3cf   : > { %1349 = vst.msk [vmem:[#allocation2 + $0x1a4] sm:$0xf] %vm1313_vm5, %v1276_v5  ;;  %3964 = vmatmul.mubr.bf16.gmra.mxu0 %v12316_v56 }
 0x3d2   : > { %v2357_v10 = vpop.permute.xlu1 %2356 }
 0x3d3   : > { %2429 = vst.msk [vmem:[#allocation2 + $0x1a8] sm:$0xf] %vm1313_vm5, %v2357_v10 }
 0x3d6   : > { %v13311_v26 = vld [vmem:[#allocation2 + $0x198] ss:$12 sps:$4 sm:$0xff]  }
 0x3d8   : > { %v13141_v6 = vpop.f32.mrf.mxu1 }
 0x3da   : > { %v13309_v41 = vld [vmem:[#allocation2 + $0x19c] ss:$12 sps:$4 sm:$0xff]   ;;  %v4014_v13 = vpop.f32.mrf.mxu1 }
 0x3db   : > { %3971 = vmatprep.mubr.bf16.mxu0 %v13309_v41  ;;  %v16110_v41 = vld [vmem:[%s18996_s4 + $0x2e] ss:$0 sm:$0xff] }
 0x3dc   : > { %3972 = vmatmul.mubr.bf16.gmra.mxu0 %v13311_v26  ;;  %v13142_v59 = vpop.f32.mrf.mxu1 }
 0x3de   : > { %v4017_v58 = vpop.f32.mrf.mxu1 }
 0x3e0   : > { %v13145_v19 = vpop.f32.mrf.mxu1 }
 0x3e2   : > { %v4030_v36 = vpop.f32.mrf.mxu1 }
 0x3e4   : > { %v13146_v51 = vpop.f32.mrf.mxu1 }
 0x3e6   : > { %v4033_v10 = vpop.f32.mrf.mxu1 }
 0x40f   : > { %v3837_v62 = vpop.f32.mrf.mxu0 }
 0x410   : > { %v4015_v11 = vadd.f32 %v4014_v13, %v3837_v62 }
 0x411   : > { %v3839_v22 = vpop.f32.mrf.mxu0 }
 0x412   : > { %v4161_v44 = vmul.f32 %v16079_v45, %v4015_v11  ;;  %v16119_v22 = vpop.f32.mrf.mxu1 }
 0x413   : > { %v3840_v8 = vpop.f32.mrf.mxu0 }
 0x414   : > { %v4201_v31 = vadd.f32 %v16084_v21, %v4161_v44  ;;  %v4018_v40 = vadd.f32 %v4017_v58, %v3840_v8 }
 0x415   : > { %v3842_v47 = vpop.f32.mrf.mxu0 }
 0x416   : > { %v4273_v27 = vmin.f32 %v4201_v31, 0.0  ;;  %v4162_v61 = vmul.f32 %v16079_v45, %v4018_v40  ;;  %vm4237_vm5 = vcmp.gt.f32.partialorder %v4201_v31, 0.0  ;;  %v4512_v40 = vpop.permute.xlu0 %4511 }
 0x417   : > { %v3845_v7 = vpop.f32.mrf.mxu0 }
 0x418   : > { %v4309_v57 = vmul.f32 1.442695, %v4273_v27  ;;  %v16090_v55 = vadd.f32 %v16084_v21, %v4162_v61  ;;  %v4023_v14 = vadd.f32 %v13141_v6, %v3845_v7 }
 0x419   : > { %v3847_v0 = vpop.f32.mrf.mxu0 }
 0x41a   : > { %13634 = vpow2.f32 %v4309_v57  ;;  %v4274_v1 = vmin.f32 %v16090_v55, 0.0  ;;  %v4163_v32 = vmul.f32 %v16079_v45, %v4023_v14  ;;  %v4517_v0 = vpop.permute.xlu1 %4516  ;;  %vm4238_vm6 = vcmp.gt.f32.partialorder %v16090_v55, 0.0 }
 0x41b   : > { %v3848_v46 = vpop.f32.mrf.mxu0 }
 0x41c   : > { %v4311_v48 = vmul.f32 1.442695, %v4274_v1  ;;  %v16095_v20 = vadd.f32 %v16084_v21, %v4163_v32  ;;  %v4026_v24 = vadd.f32 %v13142_v59, %v3848_v46  ;;  %v4046_v1 = vpop.f32.mrf.mxu1 }
 0x41d   : > { %v3850_v56 = vpop.f32.mrf.mxu0 }
 0x41e   : > { %13636 = vpow2.f32 %v4311_v48  ;;  %v4275_v29 = vmin.f32 %v16095_v20, 0.0  ;;  %v4164_v33 = vmul.f32 %v16079_v45, %v4026_v24  ;;  %vm4239_vm8 = vcmp.gt.f32.partialorder %v16095_v20, 0.0 }
 0x41f   : > { %v3853_v5 = vpop.f32.mrf.mxu0 }
 0x420   : > { %v4313_v4 = vmul.f32 1.442695, %v4275_v29  ;;  %v16100_v54 = vadd.f32 %v16084_v21, %v4164_v33  ;;  %v4031_v37 = vadd.f32 %v4030_v36, %v3853_v5 }
 0x421   : > { %v3855_v49 = vpop.f32.mrf.mxu0 }
 0x422   : > { %13638 = vpow2.f32 %v4313_v4  ;;  %v4276_v34 = vmin.f32 %v16100_v54, 0.0  ;;  %v4165_v53 = vmul.f32 %v16079_v45, %v4031_v37  ;;  %vm4240_vm12 = vcmp.gt.f32.partialorder %v16100_v54, 0.0 }
 0x423   : > { %v3856_v28 = vpop.f32.mrf.mxu0 }
 0x424   : > { %v4315_v52 = vmul.f32 1.442695, %v4276_v34  ;;  %v4034_v42 = vadd.f32 %v4033_v10, %v3856_v28  ;;  %v16105_v23 = vadd.f32 %v16084_v21, %v4165_v53  ;;  %v16134_v34 = vpop.f32.mrf.mxu1 }
 0x425   : > { %v3858_v39 = vpop.f32.mrf.mxu0 }
 0x426   : > { %13640 = vpow2.f32 %v4315_v52  ;;  %v4166_v26 = vmul.f32 %v16079_v45, %v4034_v42  ;;  %v4277_v60 = vmin.f32 %v16105_v23, 0.0  ;;  %v4522_v39 = vpop.permute.xlu1 %4521  ;;  %vm4241_vm9 = vcmp.gt.f32.partialorder %v16105_v23, 0.0 }
 0x427   : > { %v13635_v17 = vpop.eup %13634  ;;  %v3861_v2 = vpop.f32.mrf.mxu0 }
 0x428   : > { %v12342_v12 = vadd.f32 -1.0, %v13635_v17  ;;  %v16115_v9 = vadd.f32 %v16084_v21, %v4166_v26  ;;  %v4039_v6 = vadd.f32 %v13145_v19, %v3861_v2  ;;  %v4317_v13 = vmul.f32 1.442695, %v4277_v60  ;;  %v5231_v26 = vld [vmem:[#allocation3 + $0x8] sm:$0xe] }
 0x429   : > { %v3863_v59 = vpop.f32.mrf.mxu0 }
 0x42a   : > { %v4421_v62 = vmul.f32 %v16110_v41, %v12342_v12  ;;  %v4278_v11 = vmin.f32 %v16115_v9, 0.0  ;;  %13642 = vpow2.f32 %v4317_v13  ;;  %v4167_v44 = vmul.f32 %v16079_v45, %v4039_v6 }
 0x42b   : > { %v13637_v58 = vpop.eup %13636  ;;  %v3864_v8 = vpop.f32.mrf.mxu0 }
 0x42c   : > { %v4457_v47 = vsel %vm4237_vm5, %v4201_v31, %v4421_v62  ;;  %v12343_v27 = vadd.f32 -1.0, %v13637_v58  ;;  %v4319_v61 = vmul.f32 1.442695, %v4278_v11  ;;  %v16123_v19 = vadd.f32 %v16084_v21, %v4167_v44  ;;  %v4049_v58 = vpop.f32.mrf.mxu1 }
 0x42d   : > { %v4689_v7 = vmul.f32 %v4512_v40, %v4457_v47  ;;  %v4042_v57 = vadd.f32 %v13146_v51, %v3864_v8  ;;  %v3866_v14 = vpop.f32.mrf.mxu0 }
 0x42e   : > { %v4422_v36 = vmul.f32 %v16110_v41, %v12343_v27  ;;  %13644 = vpow2.f32 %v4319_v61  ;;  %v4279_v48 = vmin.f32 %v16123_v19, 0.0  ;;  %v4527_v61 = vpop.permute.xlu0 %4526  ;;  %vm4243_vm15 = vcmp.gt.f32.partialorder %v16123_v19, 0.0 }
 0x42f   : > { %v13639_v32 = vpop.eup %13638  ;;  %v13053_v46 = vpack.c.bf16 %v4689_v7, %v4689_v7  ;;  %v3869_v31 = vpop.f32.mrf.mxu0  ;;  %v4168_v29 = vmul.f32 %v16079_v45, %v4042_v57 }
 0x430   : > { %v4458_v24 = vsel %vm4238_vm6, %v16090_v55, %v4422_v36  ;;  %v12344_v56 = vadd.f32 -1.0, %v13639_v32  ;;  %v4321_v49 = vmul.f32 1.442695, %v4279_v48  ;;  %v4047_v36 = vadd.f32 %v4046_v1, %v3869_v31  ;;  %v16159_v31 = vpop.f32.mrf.mxu1 }
 0x431   : > { %v4836_v33 = vshrl.u32 %v13053_v46, 16  ;;  %v4839_v51 = vshll.u32 %v13053_v46, 16  ;;  %v4690_v5 = vmul.f32 %v4517_v0, %v4458_v24  ;;  %v3871_v4 = vpop.f32.mrf.mxu0  ;;  %v16132_v10 = vadd.f32 %v16084_v21, %v4168_v29 }
 0x432   : > { %v4423_v37 = vmul.f32 %v16110_v41, %v12344_v56  ;;  %13646 = vpow2.f32 %v4321_v49 }
 0x433   : > { %v13641_v53 = vpop.eup %13640  ;;  %v4838_v28 = vrot.slane %v4836_v33, 6  ;;  %v4841_v52 = vrot.slane %v4839_v51, 7  ;;  %v13054_v42 = vpack.c.bf16 %v4690_v5, %v4690_v5  ;;  %v3872_v55 = vpop.f32.mrf.mxu0  ;;  %v4280_v11 = vmin.f32 %v16132_v10, 0.0 }
 0x434   : > { %v4459_v17 = vsel %vm4239_vm8, %v16095_v20, %v4423_v37  ;;  %v12345_v60 = vadd.f32 -1.0, %v13641_v53  ;;  %v4050_v48 = vadd.f32 %v4049_v58, %v3872_v55  ;;  %v4169_v33 = vmul.f32 %v16079_v45, %v4047_v36  ;;  %v4062_v58 = vpop.f32.mrf.mxu1 }
 0x435   : > { %v4842_v2 = vor.u32 %v4841_v52, %v4838_v28  ;;  %v4845_v12 = vshrl.u32 %v13054_v42, 16  ;;  %v4848_v6 = vshll.u32 %v13054_v42, 16  ;;  %v4691_v13 = vmul.f32 %v4522_v39, %v4459_v17  ;;  %v3874_v59 = vpop.f32.mrf.mxu0  ;;  %v4532_v52 = vpop.permute.xlu1 %4531 }
 0x436   : > { %v4424_v62 = vmul.f32 %v16110_v41, %v12345_v60  ;;  %v4323_v0 = vmul.f32 1.442695, %v4280_v11  ;;  %v16162_v28 = vadd.f32 %v16084_v21, %v4169_v33  ;;  %vm4244_vm1 = vcmp.gt.f32.partialorder %v16132_v10, 0.0 }
 0x437   : > { %v4843_v44 = vrot.slane %v4842_v2, 4  ;;  %v5232_v8 = vsel %vm15944_vm13, %v4842_v2, %v5231_v26  ;;  %v4847_v40 = vrot.slane %v4845_v12, 6  ;;  %v4850_v20 = vrot.slane %v4848_v6, 7  ;;  %v16143_v47 = vpop.f32.mrf.mxu0  ;;  %v13643_v27 = vpop.eup %13642 }
 0x438   : > { %5233 = vst [vmem:[#allocation3 + $0x8] sm:$0xe] %v5232_v8  ;;  %v13055_v57 = vpack.c.bf16 %v4691_v13, %v4691_v13  ;;  %v4460_v14 = vsel %vm4240_vm12, %v16100_v54, %v4424_v62  ;;  %v12346_v46 = vadd.f32 -1.0, %v13643_v27  ;;  %13648 = vpow2.f32 %v4323_v0 }
 0x439   : > { %v4851_v18 = vor.u32 %v4850_v20, %v4847_v40  ;;  %v4692_v32 = vmul.f32 %v4527_v61, %v4460_v14  ;;  %v3879_v24 = vpop.f32.mrf.mxu0  ;;  %v4170_v26 = vmul.f32 %v16079_v45, %v4050_v48  ;;  %vm4242_vm13 = vcmp.gt.f32.partialorder %v16115_v9, 0.0 }
 0x43a   : > { %v4855_v56 = vshrl.u32 %v13055_v57, 16  ;;  %v4858_v29 = vshll.u32 %v13055_v57, 16  ;;  %v4425_v54 = vmul.f32 %v16110_v41, %v12346_v46  ;;  %v4281_v62 = vmin.f32 %v16162_v28, 0.0 }
 0x43b   : > { %v13645_v51 = vpop.eup %13644  ;;  %v4852_v5 = vsel %vm16147_vm14, %v4843_v44, %v4851_v18  ;;  %v13056_v4 = vpack.c.bf16 %v4692_v32, %v4692_v32  ;;  %v16157_v1 = vpop.f32.mrf.mxu0  ;;  %v4853_v60 = vrot.slane %v4851_v18, 4  ;;  %v16173_v20 = vadd.f32 %v16084_v21, %v4170_v26 }
 0x43c   : > { %5234 = vst [vmem:[#allocation3 + $0xc] sm:$0xf] %v4852_v5  ;;  %v4857_v37 = vrot.slane %v4855_v56, 6  ;;  %v4860_v49 = vrot.slane %v4858_v29, 7  ;;  %v12347_v53 = vadd.f32 -1.0, %v13645_v51  ;;  %v4461_v39 = vsel %vm4241_vm9, %v16105_v23, %v4425_v54  ;;  %v4537_v44 = vpop.permute.xlu0 %4536 }
 0x43d   : > { %v4865_v42 = vshrl.u32 %v13056_v4, 16  ;;  %v4868_v55 = vshll.u32 %v13056_v4, 16  ;;  %v3882_v17 = vpop.f32.mrf.mxu0  ;;  %v4693_v12 = vmul.f32 %v4532_v52, %v4461_v39  ;;  %v4325_v0 = vmul.f32 1.442695, %v4281_v62  ;;  %v4542_v52 = vpop.permute.xlu1 %4541 }
 0x43e   : > { %v4861_v2 = vor.u32 %v4860_v49, %v4857_v37  ;;  %v4426_v6 = vmul.f32 %v16110_v41, %v12347_v53  ;;  %v4282_v49 = vmin.f32 %v16173_v20, 0.0  ;;  %v4055_v26 = vadd.f32 %v16119_v22, %v16143_v47 }
 0x43f   : > { %v4867_v13 = vrot.slane %v4865_v42, 6  ;;  %v4870_v59 = vrot.slane %v4868_v55, 7  ;;  %v3885_v11 = vpop.f32.mrf.mxu0  ;;  %v13057_v8 = vpack.c.bf16 %v4693_v12, %v4693_v12  ;;  %v13647_v27 = vpop.eup %13646  ;;  %v5274_v18 = vld [vmem:[#allocation3 + $0x8] sm:$0xf]  ;;  %13650 = vpow2.f32 %v4325_v0 }
 0x440   : > { %v4862_v23 = vsel %vm16147_vm14, %v4853_v60, %v4861_v2  ;;  %v4462_v40 = vsel %vm4242_vm13, %v16115_v9, %v4426_v6  ;;  %v4863_v61 = vrot.slane %v4861_v2, 4  ;;  %v12348_v48 = vadd.f32 -1.0, %v13647_v27  ;;  %5310 = vst [vmem:[#allocation4 + $0x48] sm:$0xf] %v5274_v18  ;;  %v16177_v9 = vpop.f32.mrf.mxu1 }
 0x441   : > { %5235 = vst [vmem:[#allocation3 + $0x10] sm:$0xf] %v4862_v23  ;;  %v4871_v57 = vor.u32 %v4870_v59, %v4867_v13  ;;  %v4694_v14 = vmul.f32 %v4537_v44, %v4462_v40  ;;  %v3887_v36 = vpop.f32.mrf.mxu0  ;;  %v4875_v32 = vshrl.u32 %v13057_v8, 16  ;;  %v4878_v46 = vshll.u32 %v13057_v8, 16 }
 0x442   : > { %v4427_v4 = vmul.f32 %v16110_v41, %v12348_v48  ;;  %v4327_v6 = vmul.f32 1.442695, %v4282_v49  ;;  %v4065_v13 = vpop.f32.mrf.mxu1  ;;  %v4171_v8 = vmul.f32 %v16079_v45, %v4055_v26  ;;  %v4058_v22 = vadd.f32 %v16134_v34, %v16157_v1  ;;  %v4547_v48 = vpop.permute.xlu0 %4546 }
 0x443   : > { %v4872_v24 = vsel %vm16147_vm14, %v4863_v61, %v4871_v57  ;;  %v13058_v56 = vpack.c.bf16 %v4694_v14, %v4694_v14  ;;  %v3888_v29 = vpop.f32.mrf.mxu0  ;;  %v5275_v33 = vld [vmem:[#allocation3 + $0xc] sm:$0xf]  ;;  %v4877_v51 = vrot.slane %v4875_v32, 6  ;;  %v4880_v5 = vrot.slane %v4878_v46, 7 }
 0x444   : > { %5236 = vst [vmem:[#allocation3 + $0x14] sm:$0xf] %v4872_v24  ;;  %5311 = vst [vmem:[#allocation4 + $0x6c] sm:$0xf] %v5275_v33  ;;  %v4873_v42 = vrot.slane %v4871_v57, 4  ;;  %v4463_v39 = vsel %vm4243_vm15, %v16123_v19, %v4427_v4  ;;  %13652 = vpow2.f32 %v4327_v6  ;;  %v16192_v57 = vadd.f32 %v16084_v21, %v4171_v8 }
 0x445   : > { %v4885_v54 = vshrl.u32 %v13058_v56, 16  ;;  %v4888_v37 = vshll.u32 %v13058_v56, 16  ;;  %v3890_v53 = vpop.f32.mrf.mxu0  ;;  %v4881_v55 = vor.u32 %v4880_v5, %v4877_v51  ;;  %v13649_v17 = vpop.eup %13648  ;;  %v4695_v12 = vmul.f32 %v4542_v52, %v4463_v39 }
 0x446   : > { %v12349_v23 = vadd.f32 -1.0, %v13649_v17  ;;  %v4063_v14 = vadd.f32 %v4062_v58, %v3885_v11  ;;  %v4066_v0 = vadd.f32 %v4065_v13, %v3888_v29  ;;  %v4283_v1 = vmin.f32 %v16192_v57, 0.0  ;;  %v16208_v52 = vpop.f32.mrf.mxu1 }
 0x447   : > { %v4887_v60 = vrot.slane %v4885_v54, 6  ;;  %v4890_v2 = vrot.slane %v4888_v37, 7  ;;  %v3893_v59 = vpop.f32.mrf.mxu0  ;;  %v4882_v62 = vsel %vm16147_vm14, %v4873_v42, %v4881_v55  ;;  %v4883_v44 = vrot.slane %v4881_v55, 4 }
 0x448   : > { %5237 = vst [vmem:[#allocation3 + $0x18] sm:$0xf] %v4882_v62  ;;  %v13059_v19 = vpack.c.bf16 %v4695_v12, %v4695_v12  ;;  %v5276_v27 = vld [vmem:[#allocation3 + $0x10] sm:$0xf]  ;;  %v4428_v61 = vmul.f32 %v16110_v41, %v12349_v23  ;;  %v4172_v24 = vmul.f32 %v16079_v45, %v4058_v22  ;;  %v4173_v33 = vmul.f32 %v16079_v45, %v4063_v14  ;;  %v4078_v22 = vpop.f32.mrf.mxu1 }
 0x449   : > { %v4891_v40 = vor.u32 %v4890_v2, %v4887_v60  ;;  %v3895_v47 = vpop.f32.mrf.mxu0  ;;  %5312 = vst [vmem:[#allocation4 + $0x90] sm:$0xf] %v5276_v27  ;;  %v4329_v5 = vmul.f32 1.442695, %v4283_v1  ;;  %v4174_v54 = vmul.f32 %v16079_v45, %v4066_v0  ;;  %v4071_v60 = vadd.f32 %v16159_v31, %v3893_v59 }
 0x44a   : > { %v4895_v18 = vshrl.u32 %v13059_v19, 16  ;;  %v4898_v32 = vshll.u32 %v13059_v19, 16  ;;  %v4464_v34 = vsel %vm4244_vm1, %v16132_v10, %v4428_v61  ;;  %v16202_v4 = vadd.f32 %v16084_v21, %v4172_v24 }
 0x44b   : > { %v4892_v36 = vsel %vm16147_vm14, %v4883_v44, %v4891_v40  ;;  %v3896_v46 = vpop.f32.mrf.mxu0  ;;  %v5277_v56 = vld [vmem:[#allocation3 + $0x14] sm:$0xf]  ;;  %v4696_v29 = vmul.f32 %v4547_v48, %v4464_v34  ;;  %v4893_v37 = vrot.slane %v4891_v40, 4  ;;  %v16206_v53 = vadd.f32 %v16084_v21, %v4173_v33  ;;  %v4552_v34 = vpop.permute.xlu1 %4551 }
 0x44c   : > { %5238 = vst [vmem:[#allocation3 + $0x1c] sm:$0xf] %v4892_v36  ;;  %v4897_v11 = vrot.slane %v4895_v18, 6  ;;  %v4900_v58 = vrot.slane %v4898_v32, 7  ;;  %5313 = vst [vmem:[#allocation4 + $0xb4] sm:$0xf] %v5277_v56  ;;  %13654 = vpow2.f32 %v4329_v5  ;;  %v16212_v39 = vadd.f32 %v16084_v21, %v4174_v54  ;;  %v13651_v6 = vpop.eup %13650 }
 0x44d   : > { %v3898_v51 = vpop.f32.mrf.mxu0  ;;  %v13060_v49 = vpack.c.bf16 %v4696_v29, %v4696_v29  ;;  %v4284_v55 = vmin.f32 %v16202_v4, 0.0  ;;  %v4285_v44 = vmin.f32 %v16206_v53, 0.0  ;;  %v4074_v23 = vadd.f32 %v16177_v9, %v3896_v46 }
 0x44e   : > { %v4901_v10 = vor.u32 %v4900_v58, %v4897_v11  ;;  %v12350_v40 = vadd.f32 -1.0, %v13651_v6  ;;  %v4286_v19 = vmin.f32 %v16212_v39, 0.0  ;;  %vm4245_vm2 = vcmp.gt.f32.partialorder %v16162_v28, 0.0  ;;  %v16232_v11 = vld [vmem:[#allocation3 + $0x8] sm:$0xf] }
 0x44f   : > { %v3901_v42 = vpop.f32.mrf.mxu0  ;;  %v4905_v17 = vshrl.u32 %v13060_v49, 16  ;;  %v5278_v12 = vld [vmem:[#allocation3 + $0x18] sm:$0xf]  ;;  %v4908_v13 = vshll.u32 %v13060_v49, 16  ;;  %v4331_v62 = vmul.f32 1.442695, %v4284_v55  ;;  %v4175_v0 = vmul.f32 %v16079_v45, %v4071_v60  ;;  %v16250_v55 = vpop.f32.mrf.mxu1 }
 0x450   : > { %v4902_v26 = vsel %vm16147_vm14, %v4893_v37, %v4901_v10  ;;  %5314 = vst [vmem:[#allocation4 + $0xd8] sm:$0xf] %v5278_v12  ;;  %v4429_v59 = vmul.f32 %v16110_v41, %v12350_v40  ;;  %v4333_v61 = vmul.f32 1.442695, %v4285_v44  ;;  %v4335_v14 = vmul.f32 1.442695, %v4286_v19 }
 0x451   : > { %v3903_v2 = vpop.f32.mrf.mxu0  ;;  %5239 = vst [vmem:[#allocation3 + $0x20] sm:$0xf] %v4902_v26  ;;  %v4907_v8 = vrot.slane %v4905_v17, 6  ;;  %v4910_v27 = vrot.slane %v4908_v13, 7  ;;  %13656 = vpow2.f32 %v4331_v62  ;;  %v13653_v36 = vpop.eup %13652  ;;  %v4903_v18 = vrot.slane %v4901_v10, 4 }
 0x452   : > { %v4176_v46 = vmul.f32 %v16079_v45, %v4074_v23  ;;  %v4079_v48 = vadd.f32 %v4078_v22, %v3901_v42  ;;  %v4465_v1 = vsel %vm4245_vm2, %v16162_v28, %v4429_v59  ;;  %v12351_v24 = vadd.f32 -1.0, %v13653_v36  ;;  %v4557_v26 = vpop.permute.xlu0 %4556  ;;  %v4081_v22 = vpop.f32.mrf.mxu1 }
 0x453   : > { %v16220_v47 = vpop.f32.mrf.mxu0  ;;  %v5279_v31 = vld [vmem:[#allocation3 + $0x1c] sm:$0xf]  ;;  %v16225_v32 = vor.u32 %v4910_v27, %v4907_v8  ;;  %13658 = vpow2.f32 %v4333_v61  ;;  %v16230_v56 = vadd.f32 %v16084_v21, %v4175_v0  ;;  %v4697_v33 = vmul.f32 %v4552_v34, %v4465_v1  ;;  %v16265_v27 = vld [vmem:[#allocation3 + $0x8] sm:$0xf] }
 0x454   : > { %5315 = vst [vmem:[#allocation4 + $0xfc] sm:$0xf] %v5279_v31  ;;  %13660 = vpow2.f32 %v4335_v14  ;;  %v4430_v51 = vmul.f32 %v16110_v41, %v12351_v24  ;;  %v16242_v5 = vadd.f32 %v16084_v21, %v4176_v46  ;;  %v5402_v54 = vrot.slane %v5401_v30, 4 }
 0x455   : > { %v3906_v9 = vpop.f32.mrf.mxu0  ;;  %v4912_v29 = vsel %vm16147_vm14, %v4903_v18, %v16225_v32  ;;  %v4287_v28 = vmin.f32 %v16230_v56, 0.0  ;;  %v13061_v10 = vpack.c.bf16 %v4697_v33, %v4697_v33  ;;  %vm4246_vm5 = vcmp.gt.f32.partialorder %v16173_v20, 0.0 }
 0x456   : > { %5240 = vst [vmem:[#allocation3 + $0x24] sm:$0xf] %v4912_v29  ;;  %v4177_v49 = vmul.f32 %v16079_v45, %v4079_v48  ;;  %v5404_v42 = vshll.u32 %v16232_v11, 16  ;;  %v4466_v17 = vsel %vm4246_vm5, %v16173_v20, %v4430_v51  ;;  %v4288_v2 = vmin.f32 %v16242_v5, 0.0  ;;  %v6079_v29 = vld [vmem:[#allocation3 + $0xc] sm:$0xf] }
 0x457   : > { %v16234_v58 = vpop.f32.mrf.mxu0  ;;  %v4337_v60 = vmul.f32 1.442695, %v4287_v28  ;;  %v4915_v12 = vshrl.u32 %v13061_v10, 16  ;;  %v4918_v6 = vshll.u32 %v13061_v10, 16  ;;  %v4698_v13 = vmul.f32 %v4557_v26, %v4466_v17  ;;  %v6078_v10 = vld [vmem:[#allocation3 + $0x8] sm:$0xe] }
 0x458   : > { %v5280_v30 = vld [vmem:[#allocation3 + $0x20] sm:$0xf]  ;;  %v16259_v62 = vadd.f32 %v16084_v21, %v4177_v49  ;;  %vm4247_vm6 = vcmp.gt.f32.partialorder %v16192_v57, 0.0  ;;  %v4339_v20 = vmul.f32 1.442695, %v4288_v2  ;;  %v16262_v23 = vrot.slane %v5404_v42, 5  ;;  %v4562_v49 = vpop.permute.xlu1 %4561 }
 0x459   : > { %v3911_v37 = vpop.f32.mrf.mxu0  ;;  %5316 = vst [vmem:[#allocation4 + $0x120] sm:$0xf] %v5280_v30  ;;  %v13655_v44 = vpop.eup %13654  ;;  %13662 = vpow2.f32 %v4337_v60  ;;  %v4917_v38 = vrot.slane %v4915_v12, 6  ;;  %v4920_v15 = vrot.slane %v4918_v6, 7  ;;  %v13062_v40 = vpack.c.bf16 %v4698_v13, %v4698_v13  ;;  %v16286_v17 = vld [vmem:[#allocation3 + $0x10] sm:$0xf] }
 0x45a   : > { %v12352_v19 = vadd.f32 -1.0, %v13655_v44  ;;  %vm4248_vm8 = vcmp.gt.f32.partialorder %v16202_v4, 0.0  ;;  %v4913_v31 = vrot.slane %v16225_v32, 4  ;;  %13664 = vpow2.f32 %v4339_v20 }
 0x45b   : > { %v16256_v25 = vpop.f32.mrf.mxu0  ;;  %v4289_v59 = vmin.f32 %v16259_v62, 0.0  ;;  %v5407_v61 = vsel %vm16032_vm0, %v5402_v54, %v16262_v23  ;;  %v4921_v0 = vor.u32 %v4920_v15, %v4917_v38  ;;  %v4925_v9 = vshrl.u32 %v13062_v40, 16 }
 0x45c   : > { %v4928_v36 = vshll.u32 %v13062_v40, 16  ;;  %v4431_v18 = vmul.f32 %v16110_v41, %v12352_v19  ;;  %vm4249_vm10 = vcmp.gt.f32.partialorder %v16206_v53, 0.0  ;;  %5785 = vst [vmem:[#allocation4 + $0x28] sm:$0xf] %v5407_v61  ;;  %v5408_v34 = vshrl.u32 %v16232_v11, 16  ;;  %v4567_v40 = vpop.permute.xlu0 %4566 }
 0x45d   : > { %v3914_v8 = vpop.f32.mrf.mxu0  ;;  %v5281_v46 = vld [vmem:[#allocation3 + $0x24] sm:$0xf]  ;;  %v4341_v32 = vmul.f32 1.442695, %v4289_v59  ;;  %v4082_v1 = vadd.f32 %v4081_v22, %v16220_v47  ;;  %v5902_v24 = vrot.slane %v16265_v27, 5  ;;  %v4922_v51 = vsel %vm16147_vm14, %v4913_v31, %v4921_v0  ;;  %v13352_v59 = vld [vmem:[%s18995_s3 + $0x138] sm:$0xff]  }
 0x45e   : > { %v13657_v48 = vpop.eup %13656  ;;  %5317 = vst [vmem:[#allocation4 + $0x144] sm:$0xf] %v5281_v46  ;;  %v4923_v28 = vrot.slane %v4921_v0, 4  ;;  %v4927_v54 = vrot.slane %v4925_v9, 6  ;;  %v4930_v37 = vrot.slane %v4928_v36, 7  ;;  %vm4250_vm12 = vcmp.gt.f32.partialorder %v16212_v39, 0.0 }
 0x45f   : > { %v16272_v14 = vpop.f32.mrf.mxu0  ;;  %5241 = vst [vmem:[#allocation3 + $0x28] sm:$0xf] %v4922_v51  ;;  %v4467_v47 = vsel %vm4247_vm6, %v16192_v57, %v4431_v18  ;;  %v12353_v42 = vadd.f32 -1.0, %v13657_v48  ;;  %13666 = vpow2.f32 %v4341_v32  ;;  %v4178_v26 = vmul.f32 %v16079_v45, %v4082_v1  ;;  %v13342_v36 = vld [vmem:[#allocation4] ss:$36 sps:$4 sm:$0xff]   ;;  %v4572_v51 = vpop.permute.xlu1 %4571 }
 0x460   : > { %v13659_v2 = vpop.eup %13658  ;;  %v16290_v30 = vor.u32 %v4930_v37, %v4927_v54  ;;  %v4699_v12 = vmul.f32 %v4562_v49, %v4467_v47  ;;  %v5903_v6 = vsel %vm16060_vm4, %v5901_v43, %v5902_v24  ;;  %v6154_v13 = vrot.slane %v6079_v29, 5  ;;  %v16425_v27 = vld [vmem:[#allocation3 + $0x18] sm:$0xf] }
 0x461   : > { %v3919_v33 = vpop.f32.mrf.mxu0  ;;  %v13661_v44 = vpop.eup %13660  ;;  %v4432_v57 = vmul.f32 %v16110_v41, %v12353_v42  ;;  %v12354_v20 = vadd.f32 -1.0, %v13659_v2  ;;  %v16298_v8 = vadd.f32 %v16084_v21, %v4178_v26  ;;  %6043 = vst [vmem:[#allocation4 + $0x2c] sm:$0xf] %v5903_v6  ;;  %v12415_v38 = vrot.slane %v6078_v10, 9 }
 0x462   : > { %v4932_v19 = vsel %vm16147_vm14, %v4923_v28, %v16290_v30  ;;  %v13063_v22 = vpack.c.bf16 %v4699_v12, %v4699_v12  ;;  %v12355_v31 = vadd.f32 -1.0, %v13661_v44  ;;  %vm4251_vm9 = vcmp.gt.f32.partialorder %v16230_v56, 0.0  ;;  %v4577_v44 = vpop.permute.xlu0 %4576 }
 0x463   : > { %v16288_v60 = vpop.f32.mrf.mxu0  ;;  %v6157_v43 = vrot.slane %v16286_v17, 5  ;;  %v4933_v61 = vrot.slane %v16290_v30, 4  ;;  %5242 = vst [vmem:[#allocation3 + $0x2c] sm:$0xf] %v4932_v19  ;;  %v4468_v0 = vsel %vm4248_vm8, %v16202_v4, %v4432_v57  ;;  %v4433_v9 = vmul.f32 %v16110_v41, %v12354_v20  ;;  %v13344_v18 = vld [vmem:[#allocation4 + $0x4] ss:$36 sps:$4 sm:$0xff]  }
 0x464   : > { %v6155_v46 = vsel %vm16060_vm4, %v12415_v38, %v6154_v13  ;;  %v4935_v32 = vshrl.u32 %v13063_v22, 16  ;;  %v4938_v1 = vshll.u32 %v13063_v22, 16  ;;  %v4700_v29 = vmul.f32 %v4567_v40, %v4468_v0  ;;  %9676 = vmatprep.mubr.bf16.mxu1 %v13344_v18  ;;  %v4582_v18 = vpop.permute.xlu1 %4581 }
 0x465   : > { %v3922_v15 = vpop.f32.mrf.mxu0  ;;  %v4434_v33 = vmul.f32 %v16110_v41, %v12355_v31  ;;  %6297 = vst [vmem:[#allocation4 + $0xc] sm:$0xf] %v6155_v46  ;;  %v4469_v4 = vsel %vm4249_vm10, %v16206_v53, %v4433_v9  ;;  %vm4252_vm13 = vcmp.gt.f32.partialorder %v16242_v5, 0.0  ;;  %v4290_v28 = vmin.f32 %v16298_v8, 0.0  ;;  %9677 = vmatmul.mubr.bf16.vlgmr.msra.gmra.mxu1 %v13342_v36 }
 0x466   : > { %v6156_v54 = vrot.slane %v6154_v13, 4  ;;  %v4087_v37 = vadd.f32 %v16208_v52, %v16234_v58  ;;  %v13663_v49 = vpop.eup %13662  ;;  %v4937_v47 = vrot.slane %v4935_v32, 6  ;;  %v4940_v42 = vrot.slane %v4938_v1, 7  ;;  %9999 = vmatpush1.bf16.msra.mxu1 %v13352_v59  ;;  %v13360_v52 = vld [vmem:[%s18995_s3 + $0x130] sm:$0xff]   ;;  %v5282_v15 = vld [vmem:[#allocation3 + $0x28] sm:$0xf] }
 0x467   : > { %v16315_v48 = vpop.f32.mrf.mxu0  ;;  %v13064_v26 = vpack.c.bf16 %v4700_v29, %v4700_v29  ;;  %v4701_v2 = vmul.f32 %v4572_v51, %v4469_v4  ;;  %v4470_v53 = vsel %vm4250_vm12, %v16212_v39, %v4434_v33  ;;  %v12356_v30 = vadd.f32 -1.0, %v13663_v49  ;;  %v13665_v13 = vpop.eup %13664  ;;  %10000 = vmatprep.subr.bf16.mxu1 %v19017_v63  ;;  %5318 = vst [vmem:[#allocation4 + $0x168] sm:$0xf] %v5282_v15  ;;  %v13367_v33 = vld [vmem:[%s18995_s3 + $0x128] sm:$0xff]  }
 0x468   : > { %v4343_v12 = vmul.f32 1.442695, %v4290_v28  ;;  %v6158_v6 = vsel %vm16060_vm4, %v6156_v54, %v6157_v43  ;;  %v4941_v57 = vor.u32 %v4940_v42, %v4937_v47  ;;  %v4702_v40 = vmul.f32 %v4577_v44, %v4470_v53  ;;  %v4587_v53 = vpop.permute.xlu0 %4586 }
 0x469   : > { %v3927_v10 = vpop.f32.mrf.mxu0  ;;  %v4945_v20 = vshrl.u32 %v13064_v26, 16  ;;  %v4948_v38 = vshll.u32 %v13064_v26, 16  ;;  %v13065_v39 = vpack.c.bf16 %v4701_v2, %v4701_v2  ;;  %6298 = vst [vmem:[#allocation4 + $0x30] sm:$0xf] %v6158_v6  ;;  %v4435_v19 = vmul.f32 %v16110_v41, %v12356_v30 }
 0x46a   : > { %v12357_v22 = vadd.f32 -1.0, %v13665_v13  ;;  %13668 = vpow2.f32 %v4343_v12  ;;  %v4942_v59 = vsel %vm16147_vm14, %v4933_v61, %v4941_v57  ;;  %v4943_v0 = vrot.slane %v4941_v57, 4  ;;  %10001 = vmatpush1.bf16.msra.mxu1 %v13360_v52  ;;  %v5283_v61 = vld [vmem:[#allocation3 + $0x2c] sm:$0xf] }
 0x46b   : > { %v16335_v58 = vpop.f32.mrf.mxu0  ;;  %v4947_v9 = vrot.slane %v4945_v20, 6  ;;  %v4950_v36 = vrot.slane %v4948_v38, 7  ;;  %5243 = vst [vmem:[#allocation3 + $0x30] sm:$0xf] %v4942_v59  ;;  %v4955_v46 = vshrl.u32 %v13065_v39, 16  ;;  %v4958_v32 = vshll.u32 %v13065_v39, 16  ;;  %10002 = vmatprep.subr.bf16.mxu1 %v19017_v63 }
 0x46c   : > { %v13066_v1 = vpack.c.bf16 %v4702_v40, %v4702_v40  ;;  %v4471_v29 = vsel %vm4251_vm9, %v16230_v56, %v4435_v19  ;;  %v13667_v4 = vpop.eup %13666  ;;  %v4436_v10 = vmul.f32 %v16110_v41, %v12357_v22  ;;  %v4179_v49 = vmul.f32 %v16079_v45, %v4087_v37  ;;  %5319 = vst [vmem:[#allocation4 + $0x18c] sm:$0xf] %v5283_v61  ;;  %v13347_v57 = vld [vmem:[#allocation4 + $0x8] ss:$36 sps:$4 sm:$0xff]  }
 0x46d   : > { %v3930_v31 = vpop.f32.mrf.mxu0  ;;  %v4951_v28 = vor.u32 %v4950_v36, %v4947_v9  ;;  %v4703_v54 = vmul.f32 %v4582_v18, %v4471_v29  ;;  %v4957_v47 = vrot.slane %v4955_v46, 6  ;;  %v4960_v56 = vrot.slane %v4958_v32, 7  ;;  %v13374_v20 = vld [vmem:[%s18995_s3 + $0x120] sm:$0xff]   ;;  %v5347_v32 = vld [vmem:[#allocation3 + $0xc] sm:$0xf] }
 0x46e   : > { %v4965_v42 = vshrl.u32 %v13066_v1, 16  ;;  %v4968_v26 = vshll.u32 %v13066_v1, 16  ;;  %v4472_v52 = vsel %vm4252_vm13, %v16242_v5, %v4436_v10  ;;  %10003 = vmatpush1.bf16.msra.mxu1 %v13367_v33  ;;  %v12358_v40 = vadd.f32 -1.0, %v13667_v4  ;;  %v13381_v4 = vld [vmem:[%s18995_s3 + $0x118] sm:$0xff]  }
 0x46f   : > { %v16347_v51 = vpop.f32.mrf.mxu0  ;;  %v4952_v30 = vsel %vm16147_vm14, %v4943_v0, %v4951_v28  ;;  %v4953_v12 = vrot.slane %v4951_v28, 4  ;;  %v13067_v6 = vpack.c.bf16 %v4703_v54, %v4703_v54  ;;  %v4961_v45 = vor.u32 %v4960_v56, %v4957_v47  ;;  %10004 = vmatprep.subr.bf16.mxu1 %v19017_v63  ;;  %v4592_v28 = vpop.permute.xlu1 %4591 }
 0x470   : > { %5244 = vst [vmem:[#allocation3 + $0x34] sm:$0xf] %v4952_v30  ;;  %v4967_v37 = vrot.slane %v4965_v42, 6  ;;  %v4970_v13 = vrot.slane %v4968_v26, 7  ;;  %v4704_v44 = vmul.f32 %v4587_v53, %v4472_v52  ;;  %v13349_v19 = vld [vmem:[#allocation4 + $0xc] ss:$36 sps:$4 sm:$0xff]   ;;  %v16363_v22 = vadd.f32 %v16084_v21, %v4179_v49 }
 0x471   : > { %v3935_v2 = vpop.f32.mrf.mxu0  ;;  %v4975_v39 = vshrl.u32 %v13067_v6, 16  ;;  %v4978_v15 = vshll.u32 %v13067_v6, 16  ;;  %v4962_v5 = vsel %vm16147_vm14, %v4953_v12, %v4961_v45  ;;  %v4963_v31 = vrot.slane %v4961_v45, 4  ;;  %9853 = vmatprep.mubr.bf16.mxu0 %v13349_v19  ;;  %v16382_v53 = vld [vmem:[#allocation3 + $0x10] sm:$0xf] }
 0x472   : > { %v4971_v59 = vor.u32 %v4970_v13, %v4967_v37  ;;  %v13068_v0 = vpack.c.bf16 %v4704_v44, %v4704_v44  ;;  %5245 = vst [vmem:[#allocation3 + $0x38] sm:$0xf] %v4962_v5  ;;  %vm4253_vm15 = vcmp.gt.f32.partialorder %v16259_v62, 0.0  ;;  %v4437_v46 = vmul.f32 %v16110_v41, %v12358_v40  ;;  %9854 = vmatmul.mubr.bf16.vlgmr.msra.gmra.mxu0 %v13347_v57  ;;  %v5284_v56 = vld [vmem:[#allocation3 + $0x30] sm:$0xf] }
 0x473   : > { %v16360_v38 = vpop.f32.mrf.mxu0  ;;  %v4977_v36 = vrot.slane %v4975_v39, 6  ;;  %v4980_v18 = vrot.slane %v4978_v15, 7  ;;  %10005 = vmatpush1.bf16.msra.mxu1 %v13374_v20  ;;  %v4291_v49 = vmin.f32 %v16363_v22, 0.0  ;;  %v5410_v47 = vrot.slane %v5408_v34, 4  ;;  %5320 = vst [vmem:[#allocation4 + $0x1b0] sm:$0xf] %v5284_v56 }
 0x474   : > { %v4972_v21 = vsel %vm16147_vm14, %v4963_v31, %v4971_v59  ;;  %v4973_v1 = vrot.slane %v4971_v59, 4  ;;  %v4985_v29 = vshrl.u32 %v13068_v0, 16  ;;  %v4988_v33 = vshll.u32 %v13068_v0, 16  ;;  %10006 = vmatprep.subr.bf16.mxu1 %v19017_v63  ;;  %v13388_v39 = vld [vmem:[%s18995_s3 + $0x110] sm:$0xff]   ;;  %v16397_v59 = vpop.f32.mrf.mxu1  ;;  %v5823_v0 = vld [vmem:[#allocation3 + $0xc] sm:$0xf] }
 0x475   : > { %v3938_v9 = vpop.f32.mrf.mxu0  ;;  %5246 = vst [vmem:[#allocation3 + $0x3c] sm:$0xf] %v4972_v21  ;;  %v4981_v54 = vor.u32 %v4980_v18, %v4977_v36  ;;  %v4473_v10 = vsel %vm4253_vm15, %v16259_v62, %v4437_v46  ;;  %v5414_v30 = vshll.u32 %v5347_v32, 16  ;;  %v4345_v45 = vmul.f32 1.442695, %v4291_v49 }
 0x476   : > { %v4987_v42 = vrot.slane %v4985_v29, 6  ;;  %v4990_v26 = vrot.slane %v4988_v33, 7  ;;  %v4705_v2 = vmul.f32 %v4592_v28, %v4473_v10  ;;  %v5411_v11 = vor.u32 %v5410_v47, %v16262_v23  ;;  %v16402_v21 = vld [vmem:[#allocation3 + $0x10] sm:$0xf] }
 0x477   : > { %v16372_v61 = vpop.f32.mrf.mxu0  ;;  %v13669_v6 = vpop.eup %13668  ;;  %v4982_v62 = vsel %vm16147_vm14, %v4973_v1, %v4981_v54  ;;  %v4983_v52 = vrot.slane %v4981_v54, 4  ;;  %v5416_v44 = vrot.slane %v5414_v30, 5  ;;  %10007 = vmatpush1.bf16.msra.mxu1 %v13381_v4  ;;  %v5285_v20 = vld [vmem:[#allocation3 + $0x34] sm:$0xf]  ;;  %13670 = vpow2.f32 %v4345_v45 }
 0x478   : > { %5247 = vst [vmem:[#allocation3 + $0x40] sm:$0xf] %v4982_v62  ;;  %v4991_v34 = vor.u32 %v4990_v26, %v4987_v42  ;;  %v13069_v37 = vpack.c.bf16 %v4705_v2, %v4705_v2  ;;  %v12359_v13 = vadd.f32 -1.0, %v13669_v6  ;;  %v5412_v15 = vrot.slane %v5411_v11, 4  ;;  %5321 = vst [vmem:[#allocation4 + $0x1d4] sm:$0xf] %v5285_v20  ;;  %10008 = vmatprep.subr.bf16.mxu1 %v19017_v63  ;;  %v4597_v54 = vpop.permute.xlu0 %4596 }
 0x479   : > { %v3943_v12 = vpop.f32.mrf.mxu0  ;;  %v5418_v40 = vshrl.u32 %v5347_v32, 16  ;;  %v5424_v19 = vshll.u32 %v16382_v53, 16  ;;  %vm4254_vm1 = vcmp.gt.f32.partialorder %v16298_v8, 0.0  ;;  %v4090_v4 = vadd.f32 %v16250_v55, %v16256_v25  ;;  %v5286_v42 = vld [vmem:[#allocation3 + $0x38] sm:$0xf] }
 0x47a   : > { %v4992_v23 = vsel %vm16147_vm14, %v4983_v52, %v4991_v34  ;;  %v4995_v5 = vshrl.u32 %v13069_v37, 16  ;;  %v4998_v31 = vshll.u32 %v13069_v37, 16  ;;  %v4993_v36 = vrot.slane %v4991_v34, 4  ;;  %v16421_v25 = vld [vmem:[%s18996_s4 + $0x2c] ss:$0 sm:$0xff] }
 0x47b   : > { %v16387_v57 = vpop.f32.mrf.mxu0  ;;  %5248 = vst [vmem:[#allocation3 + $0x44] sm:$0xf] %v4992_v23  ;;  %v4438_v18 = vmul.f32 %v16110_v41, %v12359_v13  ;;  %v5417_v46 = vsel %vm16032_vm0, %v5412_v15, %v5416_v44  ;;  %v5420_v32 = vrot.slane %v5418_v40, 4  ;;  %v16404_v33 = vrot.slane %v5424_v19, 5  ;;  %10009 = vmatpush1.bf16.msra.mxu1 %v13388_v39  ;;  %v6081_v12 = vld [vmem:[#allocation3 + $0x14] sm:$0xf] }
 0x47c   : > { %v4997_v1 = vrot.slane %v4995_v5, 6  ;;  %v5000_v29 = vrot.slane %v4998_v31, 7  ;;  %5786 = vst [vmem:[#allocation4 + $0x4c] sm:$0xf] %v5417_v46  ;;  %v5904_v47 = vrot.slane %v5902_v24, 4  ;;  %v5905_v56 = vrot.slane %v5823_v0, 5  ;;  %10010 = vmatprep.subr.bf16.mxu1 %v19017_v63  ;;  %v4094_v24 = vpop.f32.mrf.mxu1 }
 0x47d   : > { %v3946_v9 = vpop.f32.mrf.mxu0  ;;  %v4474_v10 = vsel %vm4254_vm1, %v16298_v8, %v4438_v18  ;;  %v5421_v49 = vor.u32 %v5420_v32, %v5416_v44  ;;  %v5287_v26 = vld [vmem:[#allocation3 + $0x3c] sm:$0xf]  ;;  %v4180_v30 = vmul.f32 %v16421_v25, %v4090_v4  ;;  %v5908_v8 = vrot.slane %v16402_v21, 5  ;;  %5322 = vst [vmem:[#allocation4 + $0x1f8] sm:$0xf] %v5286_v42 }
 0x47e   : > { %v16416_v2 = vor.u32 %v5000_v29, %v4997_v1  ;;  %v4706_v55 = vmul.f32 %v4597_v54, %v4474_v10  ;;  %5323 = vst [vmem:[#allocation4 + $0x21c] sm:$0xf] %v5287_v26  ;;  %v13397_v62 = vld [vmem:[%s18995_s3 + $0x108] sm:$0xff]   ;;  %v5428_v45 = vshrl.u32 %v16382_v53, 16  ;;  %v5906_v11 = vsel %vm16060_vm4, %v5904_v47, %v5905_v56  ;;  %v5349_v5 = vld [vmem:[#allocation3 + $0x14] sm:$0xf]  ;;  %v16461_v18 = vpop.f32.mrf.mxu1 }
 0x47f   : > { %v16408_v28 = vpop.f32.mrf.mxu0  ;;  %v5422_v52 = vrot.slane %v5421_v49, 4  ;;  %v5907_v34 = vrot.slane %v5905_v56, 4  ;;  %v16439_v44 = vld [vmem:[%s18996_s4 + $0x2d] ss:$0 sm:$0xff]  ;;  %6044 = vst [vmem:[#allocation4 + $0x50] sm:$0xf] %v5906_v11  ;;  %10011 = vmatpush1.bf16.msra.mxu1 %v13397_v62  ;;  %v4095_v29 = vadd.f32 %v4094_v24, %v16272_v14 }
 0x480   : > { %v5002_v37 = vsel %vm16147_vm14, %v4993_v36, %v16416_v2  ;;  %v13070_v13 = vpack.c.bf16 %v4706_v55, %v4706_v55  ;;  %v16442_v20 = vadd.f32 %v16439_v44, %v4180_v30  ;;  %v6159_v53 = vrot.slane %v6157_v43, 4  ;;  %v5288_v31 = vld [vmem:[#allocation3 + $0x40] sm:$0xf]  ;;  %10012 = vmatprep.subr.bf16.mxu1 %v19017_v63  ;;  %v16459_v36 = vld [vmem:[#allocation3 + $0x18] sm:$0xf]  ;;  %v4097_v62 = vpop.f32.mrf.mxu1 }
 0x481   : > { %v3951_v6 = vpop.f32.mrf.mxu0  ;;  %5249 = vst [vmem:[#allocation3 + $0x48] sm:$0xf] %v5002_v37  ;;  %v5427_v15 = vsel %vm16032_vm0, %v5422_v52, %v16404_v33  ;;  %v5909_v40 = vsel %vm16060_vm4, %v5907_v34, %v5908_v8  ;;  %v6160_v19 = vrot.slane %v6081_v12, 5  ;;  %v6163_v23 = vrot.slane %v16425_v27, 5  ;;  %5324 = vst [vmem:[#allocation4 + $0x240] sm:$0xf] %v5288_v31 }
 0x482   : > { %v5003_v17 = vrot.slane %v16416_v2, 4  ;;  %v5005_v43 = vshrl.u32 %v13070_v13, 16  ;;  %v5008_v0 = vshll.u32 %v13070_v13, 16  ;;  %5787 = vst [vmem:[#allocation4 + $0x70] sm:$0xf] %v5427_v15  ;;  %v4292_v9 = vmin.f32 %v16442_v20, 0.0 }
 0x483   : > { %v16446_v39 = vpop.f32.mrf.mxu0  ;;  %6045 = vst [vmem:[#allocation4 + $0x74] sm:$0xf] %v5909_v40  ;;  %v6161_v32 = vsel %vm16060_vm4, %v6159_v53, %v6160_v19  ;;  %v6162_v1 = vrot.slane %v6160_v19, 4  ;;  %v5430_v4 = vrot.slane %v5428_v45, 4  ;;  %v5289_v54 = vld [vmem:[#allocation3 + $0x44] sm:$0xf]  ;;  %v4181_v2 = vmul.f32 %v16421_v25, %v4095_v29  ;;  %v16488_v40 = vpop.f32.mrf.mxu1 }
 0x484   : > { %v5007_v10 = vrot.slane %v5005_v43, 6  ;;  %v5010_v49 = vrot.slane %v5008_v0, 7  ;;  %v4347_v47 = vmul.f32 1.442695, %v4292_v9  ;;  %6299 = vst [vmem:[#allocation4 + $0x54] sm:$0xf] %v6161_v32  ;;  %v13671_v30 = vpop.eup %13670  ;;  %v4098_v32 = vadd.f32 %v4097_v62, %v16288_v60 }
 0x485   : > { %v3954_v46 = vpop.f32.mrf.mxu0  ;;  %v5434_v56 = vshll.u32 %v5349_v5, 16  ;;  %5325 = vst [vmem:[#allocation4 + $0x264] sm:$0xf] %v5289_v54  ;;  %v6164_v26 = vsel %vm16060_vm4, %v6162_v1, %v6163_v23  ;;  %v5431_v55 = vor.u32 %v5430_v4, %v16404_v33  ;;  %v5438_v14 = vshrl.u32 %v5349_v5, 16  ;;  %v5825_v13 = vld [vmem:[#allocation3 + $0x14] sm:$0xf]  ;;  %v4602_v54 = vpop.permute.xlu1 %4601 }
 0x486   : > { %v16474_v12 = vor.u32 %v5010_v49, %v5007_v10  ;;  %13672 = vpow2.f32 %v4347_v47  ;;  %6300 = vst [vmem:[#allocation4 + $0x78] sm:$0xf] %v6164_v26  ;;  %v5444_v6 = vshll.u32 %v16459_v36, 16  ;;  %v12360_v45 = vadd.f32 -1.0, %v13671_v30  ;;  %v16486_v15 = vld [vmem:[#allocation3 + $0x18] sm:$0xf] }
 0x487   : > { %v16466_v42 = vpop.f32.mrf.mxu0  ;;  %v5436_v24 = vrot.slane %v5434_v56, 5  ;;  %v16478_v11 = vadd.f32 %v16439_v44, %v4181_v2  ;;  %v5432_v34 = vrot.slane %v5431_v55, 4  ;;  %v5440_v37 = vrot.slane %v5438_v14, 4  ;;  %v13353_v43 = vld [vmem:[#allocation4 + $0x48] ss:$36 sps:$4 sm:$0xff]   ;;  %v16511_v55 = vpop.f32.mrf.mxu1 }
 0x488   : > { %v5012_v33 = vsel %vm16147_vm14, %v5003_v17, %v16474_v12  ;;  %vm4255_vm2 = vcmp.gt.f32.partialorder %v16363_v22, 0.0  ;;  %v16484_v53 = vrot.slane %v5444_v6, 5  ;;  %v4439_v5 = vmul.f32 %v16110_v41, %v12360_v45  ;;  %v16509_v2 = vld [vmem:[#allocation3 + $0x20] sm:$0xf]  ;;  %v5290_v14 = vld [vmem:[#allocation3 + $0x48] sm:$0xf] }
 0x489   : > { %v3959_v52 = vpop.f32.mrf.mxu0  ;;  %5250 = vst [vmem:[#allocation3 + $0x4c] sm:$0xf] %v5012_v33  ;;  %v13350_v31 = vld [vmem:[#allocation4 + $0x4c] ss:$36 sps:$4 sm:$0xff]   ;;  %v5437_v0 = vsel %vm16032_vm0, %v5432_v34, %v5436_v24  ;;  %v5441_v9 = vor.u32 %v5440_v37, %v5436_v24  ;;  %v5448_v17 = vshrl.u32 %v16459_v36, 16  ;;  %v4293_v46 = vmin.f32 %v16478_v11, 0.0 }
 0x48a   : > { %5788 = vst [vmem:[#allocation4 + $0x94] sm:$0xf] %v5437_v0  ;;  %v5910_v1 = vrot.slane %v5908_v8, 4  ;;  %v5911_v29 = vrot.slane %v5825_v13, 5  ;;  %v4475_v10 = vsel %vm4255_vm2, %v16363_v22, %v4439_v5  ;;  %9684 = vmatprep.mubr.bf16.mxu1 %v13350_v31  ;;  %v5914_v47 = vrot.slane %v16486_v15, 5 }
 0x48b   : > { %v16490_v19 = vpop.f32.mrf.mxu0  ;;  %v5442_v49 = vrot.slane %v5441_v9, 4  ;;  %v6083_v36 = vld [vmem:[#allocation3 + $0x1c] sm:$0xf]  ;;  %v6165_v56 = vrot.slane %v6163_v23, 4  ;;  %v4707_v26 = vmul.f32 %v4602_v54, %v4475_v10  ;;  %9685 = vmatmul.mubr.bf16.gmra.mxu1 %v13353_v43  ;;  %v4349_v60 = vmul.f32 1.442695, %v4293_v46  ;;  %v16533_v9 = vpop.f32.mrf.mxu1 }
 0x48c   : > { %v4182_v21 = vmul.f32 %v16421_v25, %v4098_v32  ;;  %v5912_v8 = vsel %vm16060_vm4, %v5910_v1, %v5911_v29  ;;  %v13356_v24 = vld [vmem:[#allocation4 + $0x50] ss:$36 sps:$4 sm:$0xff]   ;;  %v5913_v23 = vrot.slane %v5911_v29, 4  ;;  %v4103_v6 = vadd.f32 %v16397_v59, %v16315_v48  ;;  %5326 = vst [vmem:[#allocation4 + $0x288] sm:$0xf] %v5290_v14 }
 0x48d   : > { %v3962_v4 = vpop.f32.mrf.mxu0  ;;  %v13354_v30 = vld [vmem:[#allocation4 + $0x54] ss:$36 sps:$4 sm:$0xff]   ;;  %v5447_v27 = vsel %vm16032_vm0, %v5442_v49, %v16484_v53  ;;  %6046 = vst [vmem:[#allocation4 + $0x98] sm:$0xf] %v5912_v8  ;;  %v13071_v62 = vpack.c.bf16 %v4707_v26, %v4707_v26  ;;  %13674 = vpow2.f32 %v4349_v60  ;;  %v6166_v45 = vrot.slane %v6083_v36, 5 }
 0x48e   : > { %5789 = vst [vmem:[#allocation4 + $0xb8] sm:$0xf] %v5447_v27  ;;  %v16521_v52 = vadd.f32 %v16439_v44, %v4182_v21  ;;  %vm4256_vm5 = vcmp.gt.f32.partialorder %v16442_v20, 0.0  ;;  %9861 = vmatprep.mubr.bf16.mxu0 %v13354_v30  ;;  %v5915_v37 = vsel %vm16060_vm4, %v5913_v23, %v5914_v47  ;;  %v6169_v13 = vrot.slane %v16509_v2, 5  ;;  %v5351_v59 = vld [vmem:[#allocation3 + $0x1c] sm:$0xf] }
 0x48f   : > { %v16513_v22 = vpop.f32.mrf.mxu0  ;;  %v4183_v48 = vmul.f32 %v16421_v25, %v4103_v6  ;;  %v5450_v33 = vrot.slane %v5448_v17, 4  ;;  %v5015_v5 = vshrl.u32 %v13071_v62, 16  ;;  %v5018_v31 = vshll.u32 %v13071_v62, 16  ;;  %9862 = vmatmul.mubr.bf16.gmra.mxu0 %v13356_v24  ;;  %6047 = vst [vmem:[#allocation4 + $0xbc] sm:$0xf] %v5915_v37  ;;  %v4113_v24 = vpop.f32.mrf.mxu1 }
 0x490   : > { %v4294_v43 = vmin.f32 %v16521_v52, 0.0  ;;  %v4106_v0 = vadd.f32 %v16461_v18, %v16335_v58  ;;  %v6167_v32 = vsel %vm16060_vm4, %v6165_v56, %v6166_v45  ;;  %v6168_v1 = vrot.slane %v6166_v45, 4  ;;  %v5291_v4 = vld [vmem:[#allocation3 + $0x4c] sm:$0xf]  ;;  %v16554_v30 = vld [vmem:[#allocation3 + $0x20] sm:$0xf] }
 0x491   : > { %v3967_v34 = vpop.f32.mrf.mxu0  ;;  %v16540_v29 = vadd.f32 %v16439_v44, %v4183_v48  ;;  %v5451_v17 = vor.u32 %v5450_v33, %v16484_v53  ;;  %v5017_v54 = vrot.slane %v5015_v5, 6  ;;  %v5020_v10 = vrot.slane %v5018_v31, 7  ;;  %6301 = vst [vmem:[#allocation4 + $0x9c] sm:$0xf] %v6167_v32  ;;  %5327 = vst [vmem:[#allocation4 + $0x2ac] sm:$0xf] %v5291_v4  ;;  %v4607_v32 = vpop.permute.xlu0 %4606 }
 0x492   : > { %v4351_v49 = vmul.f32 1.442695, %v4294_v43  ;;  %v5454_v36 = vshll.u32 %v5351_v59, 16  ;;  %v5013_v26 = vrot.slane %v16474_v12, 4  ;;  %v6170_v56 = vsel %vm16060_vm4, %v6168_v1, %v6169_v13  ;;  %v13405_v53 = vld [vmem:[%s18995_s3 + $0x100] sm:$0xff]  }
 0x493   : > { %v16535_v46 = vpop.f32.mrf.mxu0  ;;  %v13673_v18 = vpop.eup %13672  ;;  %v4295_v60 = vmin.f32 %v16540_v29, 0.0  ;;  %v5452_v21 = vrot.slane %v5451_v17, 4  ;;  %v16552_v8 = vor.u32 %v5020_v10, %v5017_v54  ;;  %6302 = vst [vmem:[#allocation4 + $0xc0] sm:$0xf] %v6170_v56  ;;  %v13359_v23 = vld [vmem:[#allocation4 + $0x90] ss:$36 sps:$4 sm:$0xff]   ;;  %v4184_v62 = vmul.f32 %v16421_v25, %v4106_v0  ;;  %10013 = vmatpush1.bf16.msra.mxu1 %v13405_v53 }
 0x494   : > { %v12361_v14 = vadd.f32 -1.0, %v13673_v18  ;;  %13676 = vpow2.f32 %v4351_v49  ;;  %v5456_v12 = vrot.slane %v5454_v36, 5  ;;  %v5458_v6 = vshrl.u32 %v5351_v59, 16  ;;  %v5827_v48 = vld [vmem:[#allocation3 + $0x1c] sm:$0xf]  ;;  %10014 = vmatprep.subr.bf16.mxu1 %v19017_v63 }
 0x495   : > { %v3970_v58 = vpop.f32.mrf.mxu0  ;;  %v13357_v27 = vld [vmem:[#allocation4 + $0x94] ss:$36 sps:$4 sm:$0xff]   ;;  %v5022_v45 = vsel %vm16147_vm14, %v5013_v26, %v16552_v8  ;;  %v4353_v37 = vmul.f32 1.442695, %v4295_v60  ;;  %v4111_v33 = vadd.f32 %v16511_v55, %v16347_v51  ;;  %vm4257_vm6 = vcmp.gt.f32.partialorder %v16478_v11, 0.0 }
 0x496   : > { %v4440_v34 = vmul.f32 %v16110_v41, %v12361_v14  ;;  %5251 = vst [vmem:[#allocation3 + $0x50] sm:$0xf] %v5022_v45  ;;  %9692 = vmatprep.mubr.bf16.mxu1 %v13357_v27  ;;  %v5457_v59 = vsel %vm16032_vm0, %v5452_v21, %v5456_v12  ;;  %v5460_v5 = vrot.slane %v5458_v6, 4  ;;  %v5464_v31 = vshll.u32 %v16554_v30, 16  ;;  %v16568_v43 = vld [vmem:[#allocation3 + $0x20] sm:$0xf] }
 0x497   : > { %v16571_v0 = vadd.f32 %v4113_v24, %v16360_v38  ;;  %9693 = vmatmul.mubr.bf16.gmra.mxu1 %v13359_v23  ;;  %13678 = vpow2.f32 %v4353_v37  ;;  %5790 = vst [vmem:[#allocation4 + $0xdc] sm:$0xf] %v5457_v59  ;;  %v16577_v55 = vadd.f32 %v16439_v44, %v4184_v62  ;;  %v5916_v1 = vrot.slane %v5914_v47, 4  ;;  %v6085_v10 = vld [vmem:[#allocation3 + $0x24] sm:$0xf] }
 0x498   : > { %v4476_v51 = vsel %vm4256_vm5, %v16442_v20, %v4440_v34  ;;  %v5461_v4 = vor.u32 %v5460_v5, %v5456_v12  ;;  %v16581_v54 = vrot.slane %v5464_v31, 5  ;;  %v5917_v38 = vrot.slane %v5827_v48, 5  ;;  %v16586_v58 = vld [vmem:[#allocation3 + $0x28] sm:$0xf]  ;;  %v13363_v60 = vld [vmem:[#allocation4 + $0x98] ss:$36 sps:$4 sm:$0xff]  }
 0x499   : > { %v4708_v17 = vmul.f32 %v4607_v32, %v4476_v51  ;;  %v5468_v49 = vshrl.u32 %v16554_v30, 16  ;;  %v4296_v36 = vmin.f32 %v16577_v55, 0.0  ;;  %v5920_v20 = vrot.slane %v16568_v43, 5  ;;  %v5353_v45 = vld [vmem:[#allocation3 + $0x24] sm:$0xf] }
 0x49a   : > { %v6171_v18 = vrot.slane %v6169_v13, 4  ;;  %v13675_v15 = vpop.eup %13674  ;;  %v13361_v56 = vld [vmem:[#allocation4 + $0x9c] ss:$36 sps:$4 sm:$0xff]   ;;  %v5462_v21 = vrot.slane %v5461_v4, 4  ;;  %v5918_v53 = vsel %vm16060_vm4, %v5916_v1, %v5917_v38  ;;  %v4185_v14 = vmul.f32 %v16421_v25, %v4111_v33  ;;  %v4612_v1 = vpop.permute.xlu1 %4611 }
 0x49b   : > { %v13072_v47 = vpack.c.bf16 %v4708_v17, %v4708_v17  ;;  %v12362_v30 = vadd.f32 -1.0, %v13675_v15  ;;  %v4355_v12 = vmul.f32 1.442695, %v4296_v36  ;;  %v5919_v24 = vrot.slane %v5917_v38, 4  ;;  %6048 = vst [vmem:[#allocation4 + $0xe0] sm:$0xf] %v5918_v53  ;;  %9869 = vmatprep.mubr.bf16.mxu0 %v13361_v56 }
 0x49c   : > { %v16590_v26 = vpop.f32.mrf.mxu0  ;;  %v6172_v27 = vrot.slane %v6085_v10, 5  ;;  %vm4258_vm8 = vcmp.gt.f32.partialorder %v16521_v52, 0.0  ;;  %v5467_v6 = vsel %vm16032_vm0, %v5462_v21, %v16581_v54  ;;  %v6175_v62 = vrot.slane %v16586_v58, 5  ;;  %9870 = vmatmul.mubr.bf16.gmra.mxu0 %v13363_v60  ;;  %v13414_v36 = vld [vmem:[%s18995_s3 + $0x178] sm:$0xff]  }
 0x49d   : > { %v5025_v2 = vshrl.u32 %v13072_v47, 16  ;;  %v5028_v13 = vshll.u32 %v13072_v47, 16  ;;  %v4441_v34 = vmul.f32 %v16110_v41, %v12362_v30  ;;  %5791 = vst [vmem:[#allocation4 + $0x100] sm:$0xf] %v5467_v6  ;;  %13680 = vpow2.f32 %v4355_v12  ;;  %v5292_v51 = vld [vmem:[#allocation3 + $0x50] sm:$0xf]  ;;  %10015 = vmatpush2.bf16.msra.mxu1 %v13414_v36 }
 0x49e   : > { %v3975_v23 = vpop.f32.mrf.mxu0  ;;  %v5921_v37 = vsel %vm16060_vm4, %v5919_v24, %v5920_v20  ;;  %v6173_v48 = vsel %vm16060_vm4, %v6171_v18, %v6172_v27  ;;  %v6174_v31 = vrot.slane %v6172_v27, 4  ;;  %v16610_v32 = vadd.f32 %v16439_v44, %v4185_v14  ;;  %5328 = vst [vmem:[#allocation4 + $0x2d0] sm:$0xf] %v5292_v51  ;;  %10016 = vmatprep.subr.bf16.mxu1 %v19017_v63 }
 0x49f   : > { %v5027_v59 = vrot.slane %v5025_v2, 6  ;;  %v5030_v5 = vrot.slane %v5028_v13, 7  ;;  %6049 = vst [vmem:[#allocation4 + $0x104] sm:$0xf] %v5921_v37  ;;  %6303 = vst [vmem:[#allocation4 + $0xe4] sm:$0xf] %v6173_v48  ;;  %v4477_v17 = vsel %vm4257_vm6, %v16478_v11, %v4441_v34 }
 0x4a0   : > { %v16607_v33 = vpop.f32.mrf.mxu0  ;;  %v5470_v4 = vrot.slane %v5468_v49, 4  ;;  %v5474_v38 = vshll.u32 %v5353_v45, 16  ;;  %v5478_v10 = vshrl.u32 %v5353_v45, 16  ;;  %v5023_v47 = vrot.slane %v16552_v8, 4  ;;  %v16626_v49 = vld [vmem:[#allocation3 + $0x28] sm:$0xf] }
 0x4a1   : > { %v13677_v15 = vpop.eup %13676  ;;  %v16619_v56 = vor.u32 %v5030_v5, %v5027_v59  ;;  %v4709_v60 = vmul.f32 %v4612_v1, %v4477_v17  ;;  %vm4259_vm10 = vcmp.gt.f32.partialorder %v16540_v29, 0.0  ;;  %v6176_v11 = vsel %vm16060_vm4, %v6174_v31, %v6175_v62  ;;  %v4617_v31 = vpop.permute.xlu0 %4616  ;;  %v13366_v17 = vld [vmem:[#allocation4 + $0xd8] ss:$36 sps:$4 sm:$0xff]  }
 0x4a2   : > { %v3978_v18 = vpop.f32.mrf.mxu0  ;;  %v12363_v21 = vadd.f32 -1.0, %v13677_v15  ;;  %6304 = vst [vmem:[#allocation4 + $0x108] sm:$0xf] %v6176_v11  ;;  %v4297_v53 = vmin.f32 %v16610_v32, 0.0  ;;  %v5471_v14 = vor.u32 %v5470_v4, %v16581_v54  ;;  %v5476_v30 = vrot.slane %v5474_v38, 5  ;;  %v13426_v38 = vld [vmem:[%s18995_s3 + $0x1b8] sm:$0xff]  }
 0x4a3   : > { %v5032_v8 = vsel %vm16147_vm14, %v5023_v47, %v16619_v56  ;;  %v5033_v12 = vrot.slane %v16619_v56, 4  ;;  %v13073_v24 = vpack.c.bf16 %v4709_v60, %v4709_v60  ;;  %v5480_v27 = vrot.slane %v5478_v10, 4  ;;  %v16637_v54 = vld [vmem:[#allocation3 + $0x24] sm:$0xf]  ;;  %v16654_v60 = vld [vmem:[#allocation3 + $0x28] sm:$0xf]  ;;  %10176 = vmatpush1.bf16.msra.mxu0 %v13426_v38 }
 0x4a4   : > { %5252 = vst [vmem:[#allocation3 + $0x54] sm:$0xf] %v5032_v8  ;;  %v4442_v23 = vmul.f32 %v16110_v41, %v12363_v21  ;;  %v4357_v2 = vmul.f32 1.442695, %v4297_v53  ;;  %v5472_v13 = vrot.slane %v5471_v14, 4  ;;  %v5484_v6 = vshll.u32 %v16626_v49, 16  ;;  %v13679_v45 = vpop.eup %13678  ;;  %10177 = vmatprep.subr.bf16.mxu0 %v19017_v63 }
 0x4a5   : > { %v5035_v34 = vshrl.u32 %v13073_v24, 16  ;;  %v5038_v37 = vshll.u32 %v13073_v24, 16  ;;  %v13364_v48 = vld [vmem:[#allocation4 + $0xdc] ss:$36 sps:$4 sm:$0xff]   ;;  %v5481_v59 = vor.u32 %v5480_v27, %v5476_v30  ;;  %v5488_v5 = vshrl.u32 %v16626_v49, 16  ;;  %v13435_v38 = vld [vmem:[%s18995_s3 + $0x1a8] sm:$0xff]  }
 0x4a6   : > { %v4478_v51 = vsel %vm4258_vm8, %v16521_v52, %v4442_v23  ;;  %v12364_v1 = vadd.f32 -1.0, %v13679_v45  ;;  %13682 = vpow2.f32 %v4357_v2  ;;  %v5477_v4 = vsel %vm16032_vm0, %v5472_v13, %v5476_v30  ;;  %9700 = vmatprep.mubr.bf16.mxu1 %v13364_v48  ;;  %v13370_v30 = vld [vmem:[#allocation4 + $0xe0] ss:$36 sps:$4 sm:$0xff]   ;;  %v4622_v13 = vpop.permute.xlu1 %4621  ;;  %v13440_v49 = vld [vmem:[%s18995_s3 + $0x1a0] sm:$0xff]  }
 0x4a7   : > { %v5037_v10 = vrot.slane %v5035_v34, 6  ;;  %v5040_v36 = vrot.slane %v5038_v37, 7  ;;  %v4710_v18 = vmul.f32 %v4617_v31, %v4478_v51  ;;  %vm4260_vm12 = vcmp.gt.f32.partialorder %v16577_v55, 0.0  ;;  %5792 = vst [vmem:[#allocation4 + $0x124] sm:$0xf] %v5477_v4  ;;  %9701 = vmatmul.mubr.bf16.gmra.mxu1 %v13366_v17  ;;  %v13422_v23 = vld [vmem:[%s18995_s3 + $0x170] sm:$0xff]  }
 0x4a8   : > { %v5482_v15 = vrot.slane %v5481_v59, 4  ;;  %v4443_v52 = vmul.f32 %v16110_v41, %v12364_v1  ;;  %v16650_v47 = vrot.slane %v5484_v6, 5  ;;  %v4186_v56 = vmul.f32 %v16421_v25, %v16571_v0  ;;  %v13431_v2 = vld [vmem:[%s18995_s3 + $0x1b0] sm:$0xff]   ;;  %10017 = vmatpush2.bf16.msra.mxu1 %v13422_v23 }
 0x4a9   : > { %v5922_v11 = vrot.slane %v5920_v20, 4  ;;  %v5041_v21 = vor.u32 %v5040_v36, %v5037_v10  ;;  %v13074_v53 = vpack.c.bf16 %v4710_v18, %v4710_v18  ;;  %v13368_v14 = vld [vmem:[#allocation4 + $0xe4] ss:$36 sps:$4 sm:$0xff]   ;;  %v5923_v8 = vrot.slane %v16637_v54, 5  ;;  %10018 = vmatprep.subr.bf16.mxu1 %v19017_v63  ;;  %10178 = vmatpush1.bf16.msra.mxu0 %v13431_v2 }
 0x4aa   : > { %v4479_v24 = vsel %vm4259_vm10, %v16540_v29, %v4443_v52  ;;  %v5487_v0 = vsel %vm16032_vm0, %v5482_v15, %v16650_v47  ;;  %v16667_v43 = vadd.f32 %v16439_v44, %v4186_v56  ;;  %v6087_v20 = vld [vmem:[#allocation3 + $0x2c] sm:$0xf]  ;;  %v4119_v27 = vadd.f32 %v16488_v40, %v16372_v61  ;;  %v13681_v29 = vpop.eup %13680  ;;  %9877 = vmatprep.mubr.bf16.mxu0 %v13368_v14  ;;  %v16680_v61 = vld [vmem:[#allocation3 + $0x30] sm:$0xf]  ;;  %v4627_v14 = vpop.permute.xlu0 %4626 }
 0x4ab   : > { %v5042_v6 = vsel %vm16147_vm14, %v5033_v12, %v5041_v21  ;;  %v5045_v54 = vshrl.u32 %v13074_v53, 16  ;;  %v5048_v45 = vshll.u32 %v13074_v53, 16  ;;  %5793 = vst [vmem:[#allocation4 + $0x148] sm:$0xf] %v5487_v0  ;;  %v5926_v34 = vrot.slane %v16654_v60, 5  ;;  %9878 = vmatmul.mubr.bf16.gmra.mxu0 %v13370_v30  ;;  %v13430_v12 = vld [vmem:[%s18995_s3 + $0x168] sm:$0xff]   ;;  %10179 = vmatprep.subr.bf16.mxu0 %v19017_v63  ;;  %v16701_v53 = vpop.f32.mrf.mxu1 }
 0x4ac   : > { %v5043_v40 = vrot.slane %v5041_v21, 4  ;;  %5253 = vst [vmem:[#allocation3 + $0x58] sm:$0xf] %v5042_v6  ;;  %v4711_v37 = vmul.f32 %v4622_v13, %v4479_v24  ;;  %v12365_v48 = vadd.f32 -1.0, %v13681_v29  ;;  %v4298_v59 = vmin.f32 %v16667_v43, 0.0  ;;  %10019 = vmatpush2.bf16.msra.mxu1 %v13430_v12  ;;  %v13439_v12 = vld [vmem:[%s18995_s3 + $0x160] sm:$0xff]  }
 0x4ad   : > { %v5293_v31 = vld [vmem:[#allocation3 + $0x54] sm:$0xf]  ;;  %v5047_v51 = vrot.slane %v5045_v54, 6  ;;  %v5050_v1 = vrot.slane %v5048_v45, 7  ;;  %v5924_v17 = vsel %vm16060_vm4, %v5922_v11, %v5923_v8  ;;  %v5925_v4 = vrot.slane %v5923_v8, 4  ;;  %10180 = vmatpush1.bf16.msra.mxu0 %v13435_v38  ;;  %10020 = vmatprep.subr.bf16.mxu1 %v19017_v63 }
 0x4ae   : > { %5329 = vst [vmem:[#allocation4 + $0x2f4] sm:$0xf] %v5293_v31  ;;  %v13075_v10 = vpack.c.bf16 %v4711_v37, %v4711_v37  ;;  %v4444_v36 = vmul.f32 %v16110_v41, %v12365_v48  ;;  %v4359_v18 = vmul.f32 1.442695, %v4298_v59  ;;  %6050 = vst [vmem:[#allocation4 + $0x128] sm:$0xf] %v5924_v17  ;;  %v4187_v6 = vmul.f32 %v16421_v25, %v4119_v27  ;;  %v16715_v31 = vpop.f32.mrf.mxu1 }
 0x4af   : > { %v6177_v15 = vrot.slane %v6175_v62, 4  ;;  %v5051_v52 = vor.u32 %v5050_v1, %v5047_v51  ;;  %v5927_v56 = vsel %vm16060_vm4, %v5925_v4, %v5926_v34  ;;  %v6178_v11 = vrot.slane %v6087_v20, 5  ;;  %v5355_v62 = vld [vmem:[#allocation3 + $0x2c] sm:$0xf]  ;;  %10181 = vmatprep.subr.bf16.mxu0 %v19017_v63  ;;  %v16730_v38 = vld [vmem:[#allocation3 + $0x30] sm:$0xf] }
 0x4b0   : > { %v6181_v21 = vrot.slane %v16680_v61, 5  ;;  %v5055_v30 = vshrl.u32 %v13075_v10, 16  ;;  %v5058_v8 = vshll.u32 %v13075_v10, 16  ;;  %v4480_v58 = vsel %vm4260_vm12, %v16577_v55, %v4444_v36  ;;  %6051 = vst [vmem:[#allocation4 + $0x14c] sm:$0xf] %v5927_v56  ;;  %10021 = vmatpush2.bf16.msra.mxu1 %v13439_v12 }
 0x4b1   : > { %13684 = vpow2.f32 %v4359_v18  ;;  %v5052_v24 = vsel %vm16147_vm14, %v5043_v40, %v5051_v52  ;;  %v5053_v0 = vrot.slane %v5051_v52, 4  ;;  %v4712_v20 = vmul.f32 %v4627_v14, %v4480_v58  ;;  %v13373_v40 = vld [vmem:[#allocation4 + $0x120] ss:$36 sps:$4 sm:$0xff]   ;;  %10182 = vmatpush1.bf16.msra.mxu0 %v13440_v49  ;;  %v16741_v58 = vpop.f32.mrf.mxu1  ;;  %10022 = vmatprep.subr.bf16.mxu1 %v19017_v63 }
 0x4b2   : > { %v6179_v23 = vsel %vm16060_vm4, %v6177_v15, %v6178_v11  ;;  %5254 = vst [vmem:[#allocation3 + $0x5c] sm:$0xf] %v5052_v24  ;;  %v5057_v2 = vrot.slane %v5055_v30, 6  ;;  %v5060_v29 = vrot.slane %v5058_v8, 7  ;;  %v13371_v13 = vld [vmem:[#allocation4 + $0x124] ss:$36 sps:$4 sm:$0xff]   ;;  %v16725_v17 = vadd.f32 %v16439_v44, %v4187_v6  ;;  %10183 = vmatprep.subr.bf16.mxu0 %v19017_v63 }
 0x4b3   : > { %v6180_v55 = vrot.slane %v6178_v11, 4  ;;  %6305 = vst [vmem:[#allocation4 + $0x12c] sm:$0xf] %v6179_v23  ;;  %v13683_v54 = vpop.eup %13682  ;;  %v13076_v45 = vpack.c.bf16 %v4712_v20, %v4712_v20  ;;  %v5490_v37 = vrot.slane %v5488_v5, 4  ;;  %v5494_v48 = vshll.u32 %v5355_v62, 16  ;;  %9708 = vmatprep.mubr.bf16.mxu1 %v13371_v13  ;;  %v13444_v11 = vld [vmem:[%s18995_s3 + $0x198] sm:$0xff]  }
 0x4b4   : > { %v5498_v59 = vshrl.u32 %v5355_v62, 16  ;;  %v5061_v51 = vor.u32 %v5060_v29, %v5057_v2  ;;  %v12366_v1 = vadd.f32 -1.0, %v13683_v54  ;;  %9709 = vmatmul.mubr.bf16.gmra.mxu1 %v13373_v40  ;;  %vm4261_vm9 = vcmp.gt.f32.partialorder %v16610_v32, 0.0  ;;  %v5294_v56 = vld [vmem:[#allocation3 + $0x58] sm:$0xf]  ;;  %v4632_v62 = vpop.permute.xlu1 %4631 }
 0x4b5   : > { %v6182_v27 = vsel %vm16060_vm4, %v6180_v55, %v6181_v21  ;;  %v5065_v5 = vshrl.u32 %v13076_v45, 16  ;;  %v5068_v4 = vshll.u32 %v13076_v45, 16  ;;  %v5491_v10 = vor.u32 %v5490_v37, %v16650_v47  ;;  %5330 = vst [vmem:[#allocation4 + $0x318] sm:$0xf] %v5294_v56  ;;  %v5831_v6 = vld [vmem:[#allocation3 + $0x2c] sm:$0xf]  ;;  %10184 = vmatpush1.bf16.msra.mxu0 %v13444_v11 }
 0x4b6   : > { %6306 = vst [vmem:[#allocation4 + $0x150] sm:$0xf] %v6182_v27  ;;  %v5496_v36 = vrot.slane %v5494_v48, 5  ;;  %v5062_v18 = vsel %vm16147_vm14, %v5053_v0, %v5061_v51  ;;  %v5063_v15 = vrot.slane %v5061_v51, 4  ;;  %v4445_v52 = vmul.f32 %v16110_v41, %v12366_v1  ;;  %v16759_v40 = vld [vmem:[#allocation3 + $0x30] sm:$0xf]  ;;  %v4129_v1 = vpop.f32.mrf.mxu1  ;;  %10185 = vmatprep.subr.bf16.mxu0 %v19017_v63 }
 0x4b7   : > { %5255 = vst [vmem:[#allocation3 + $0x60] sm:$0xf] %v5062_v18  ;;  %v5067_v14 = vrot.slane %v5065_v5, 6  ;;  %v5070_v30 = vrot.slane %v5068_v4, 7  ;;  %v4299_v47 = vmin.f32 %v16725_v17, 0.0  ;;  %v5492_v8 = vrot.slane %v5491_v10, 4 }
 0x4b8   : > { %v4481_v24 = vsel %vm4261_vm9, %v16610_v32, %v4445_v52  ;;  %v5500_v0 = vrot.slane %v5498_v59, 4  ;;  %v5504_v20 = vshll.u32 %v16730_v38, 16  ;;  %v5508_v23 = vshrl.u32 %v16730_v38, 16  ;;  %v6089_v52 = vld [vmem:[#allocation3 + $0x34] sm:$0xf] }
 0x4b9   : > { %v16750_v2 = vor.u32 %v5070_v30, %v5067_v14  ;;  %v4713_v29 = vmul.f32 %v4632_v62, %v4481_v24  ;;  %vm4262_vm13 = vcmp.gt.f32.partialorder %v16667_v43, 0.0  ;;  %v4361_v13 = vmul.f32 1.442695, %v4299_v47  ;;  %v5295_v48 = vld [vmem:[#allocation3 + $0x5c] sm:$0xf] }
 0x4ba   : > { %v5497_v55 = vsel %vm16032_vm0, %v5492_v8, %v5496_v36  ;;  %v5501_v54 = vor.u32 %v5500_v0, %v5496_v36  ;;  %v16755_v45 = vrot.slane %v5504_v20, 5  ;;  %v4122_v32 = vadd.f32 %v16533_v9, %v16387_v57  ;;  %5331 = vst [vmem:[#allocation4 + $0x33c] sm:$0xf] %v5295_v48  ;;  %v13448_v57 = vld [vmem:[%s18995_s3 + $0x190] sm:$0xff]   ;;  %v13449_v9 = vld [vmem:[%s18995_s3 + $0x158] sm:$0xff]  }
 0x4bb   : > { %5794 = vst [vmem:[#allocation4 + $0x16c] sm:$0xf] %v5497_v55  ;;  %v5928_v37 = vrot.slane %v5926_v34, 4  ;;  %v5072_v59 = vsel %vm16147_vm14, %v5063_v15, %v16750_v2  ;;  %v5073_v12 = vrot.slane %v16750_v2, 4  ;;  %v13077_v51 = vpack.c.bf16 %v4713_v29, %v4713_v29  ;;  %v13377_v34 = vld [vmem:[#allocation4 + $0x128] ss:$36 sps:$4 sm:$0xff]   ;;  %10023 = vmatpush2.bf16.msra.mxu1 %v13449_v9  ;;  %10186 = vmatpush1.bf16.msra.mxu0 %v13448_v57 }
 0x4bc   : > { %13686 = vpow2.f32 %v4361_v13  ;;  %5256 = vst [vmem:[#allocation3 + $0x64] sm:$0xf] %v5072_v59  ;;  %v5502_v27 = vrot.slane %v5501_v54, 4  ;;  %v4188_v49 = vmul.f32 %v16421_v25, %v4122_v32  ;;  %v4127_v5 = vadd.f32 %v16715_v31, %v16408_v28  ;;  %v16784_v30 = vld [vmem:[#allocation3 + $0x38] sm:$0xf]  ;;  %10187 = vmatprep.subr.bf16.mxu0 %v19017_v63  ;;  %10024 = vmatprep.subr.bf16.mxu1 %v19017_v63 }
 0x4bd   : > { %v13375_v60 = vld [vmem:[#allocation4 + $0x12c] ss:$36 sps:$4 sm:$0xff]   ;;  %v5075_v10 = vshrl.u32 %v13077_v51, 16  ;;  %v5078_v36 = vshll.u32 %v13077_v51, 16  ;;  %v5929_v18 = vrot.slane %v5831_v6, 5  ;;  %v5932_v15 = vrot.slane %v16759_v40, 5 }
 0x4be   : > { %v13685_v4 = vpop.eup %13684  ;;  %9885 = vmatprep.mubr.bf16.mxu0 %v13375_v60  ;;  %v5507_v11 = vsel %vm16032_vm0, %v5502_v27, %v16755_v45  ;;  %v16782_v14 = vadd.f32 %v16439_v44, %v4188_v49  ;;  %v4130_v28 = vadd.f32 %v4129_v1, %v16446_v39  ;;  %v13453_v31 = vld [vmem:[%s18995_s3 + $0x188] sm:$0xff]   ;;  %v6183_v39 = vrot.slane %v6181_v21, 4  ;;  %v5296_v29 = vld [vmem:[#allocation3 + $0x60] sm:$0xf]  ;;  %v5357_v32 = vld [vmem:[#allocation3 + $0x34] sm:$0xf] }
 0x4bf   : > { %v12367_v56 = vadd.f32 -1.0, %v13685_v4  ;;  %v5077_v47 = vrot.slane %v5075_v10, 6  ;;  %v5080_v8 = vrot.slane %v5078_v36, 7  ;;  %9886 = vmatmul.mubr.bf16.gmra.mxu0 %v13377_v34  ;;  %5795 = vst [vmem:[#allocation4 + $0x190] sm:$0xf] %v5507_v11  ;;  %v5930_v62 = vsel %vm16060_vm4, %v5928_v37, %v5929_v18  ;;  %v4637_v37 = vpop.permute.xlu0 %4636  ;;  %v13458_v4 = vld [vmem:[%s18995_s3 + $0x150] sm:$0xff]  }
 0x4c0   : > { %v5931_v24 = vrot.slane %v5929_v18, 4  ;;  %v4300_v20 = vmin.f32 %v16782_v14, 0.0  ;;  %6052 = vst [vmem:[#allocation4 + $0x170] sm:$0xf] %v5930_v62  ;;  %v6184_v2 = vrot.slane %v6089_v52, 5  ;;  %v6187_v6 = vrot.slane %v16784_v30, 5  ;;  %10188 = vmatpush1.bf16.msra.mxu0 %v13453_v31  ;;  %10025 = vmatpush2.bf16.msra.mxu1 %v13458_v4 }
 0x4c1   : > { %v4446_v0 = vmul.f32 %v16110_v41, %v12367_v56  ;;  %v16798_v13 = vor.u32 %v5080_v8, %v5077_v47  ;;  %v4189_v54 = vmul.f32 %v16421_v25, %v4127_v5  ;;  %5332 = vst [vmem:[#allocation4 + $0x360] sm:$0xf] %v5296_v29  ;;  %10189 = vmatprep.subr.bf16.mxu0 %v19017_v63  ;;  %vm4263_vm15 = vcmp.gt.f32.partialorder %v16725_v17, 0.0  ;;  %v16826_v9 = vld [vmem:[#allocation3 + $0x38] sm:$0xf]  ;;  %v13462_v10 = vld [vmem:[%s18995_s3 + $0x1f8] sm:$0xff]  }
 0x4c2   : > { %v5933_v55 = vsel %vm16060_vm4, %v5931_v24, %v5932_v15  ;;  %v4363_v21 = vmul.f32 1.442695, %v4300_v20  ;;  %v6185_v48 = vsel %vm16060_vm4, %v6183_v39, %v6184_v2  ;;  %v6186_v59 = vrot.slane %v6184_v2, 4  ;;  %v13380_v38 = vld [vmem:[#allocation4 + $0x168] ss:$36 sps:$4 sm:$0xff]   ;;  %10026 = vmatprep.subr.bf16.mxu1 %v19017_v63  ;;  %v13468_v30 = vld [vmem:[%s18995_s3 + $0x1e8] sm:$0xff]  }
 0x4c3   : > { %v4482_v61 = vsel %vm4262_vm13, %v16667_v43, %v4446_v0  ;;  %6053 = vst [vmem:[#allocation4 + $0x194] sm:$0xf] %v5933_v55  ;;  %v5082_v51 = vsel %vm16147_vm14, %v5073_v12, %v16798_v13  ;;  %6307 = vst [vmem:[#allocation4 + $0x174] sm:$0xf] %v6185_v48  ;;  %v16815_v25 = vadd.f32 %v16439_v44, %v4189_v54  ;;  %v5297_v57 = vld [vmem:[#allocation3 + $0x64] sm:$0xf] }
 0x4c4   : > { %v4714_v1 = vmul.f32 %v4637_v37, %v4482_v61  ;;  %v13457_v43 = vld [vmem:[%s18995_s3 + $0x180] sm:$0xff]   ;;  %5257 = vst [vmem:[#allocation3 + $0x68] sm:$0xf] %v5082_v51  ;;  %13688 = vpow2.f32 %v4363_v21  ;;  %v6188_v12 = vsel %vm16060_vm4, %v6186_v59, %v6187_v6  ;;  %v5510_v44 = vrot.slane %v5508_v23, 4  ;;  %5333 = vst [vmem:[#allocation4 + $0x384] sm:$0xf] %v5297_v57 }
 0x4c5   : > { %v5514_v60 = vshll.u32 %v5357_v32, 16  ;;  %v5083_v34 = vrot.slane %v16798_v13, 4  ;;  %6308 = vst [vmem:[#allocation4 + $0x198] sm:$0xf] %v6188_v12  ;;  %v4301_v49 = vmin.f32 %v16815_v25, 0.0  ;;  %v5518_v5 = vshrl.u32 %v5357_v32, 16  ;;  %10190 = vmatpush1.bf16.msra.mxu0 %v13457_v43 }
 0x4c6   : > { %v13078_v27 = vpack.c.bf16 %v4714_v1, %v4714_v1  ;;  %v13378_v36 = vld [vmem:[#allocation4 + $0x16c] ss:$36 sps:$4 sm:$0xff]   ;;  %v5511_v23 = vor.u32 %v5510_v44, %v16755_v45  ;;  %v16842_v52 = vld [vmem:[%s18996_s4 + $0x2c] ss:$0 sm:$0xff]  ;;  %10191 = vmatprep.subr.bf16.mxu0 %v19017_v63  ;;  %v5524_v45 = vshll.u32 %v16826_v9, 16  ;;  %v4135_v20 = vadd.f32 %v16701_v53, %v16466_v42  ;;  %v4642_v44 = vpop.permute.xlu1 %4641 }
 0x4c7   : > { %v5516_v18 = vrot.slane %v5514_v60, 5  ;;  %v4190_v56 = vmul.f32 %v16842_v52, %v4130_v28  ;;  %v4365_v47 = vmul.f32 1.442695, %v4301_v49  ;;  %v5520_v8 = vrot.slane %v5518_v5, 4  ;;  %9716 = vmatprep.mubr.bf16.mxu1 %v13378_v36  ;;  %v16850_v0 = vld [vmem:[%s18996_s4 + $0x2d] ss:$0 sm:$0xff] }
 0x4c8   : > { %v5085_v11 = vshrl.u32 %v13078_v27, 16  ;;  %v5088_v31 = vshll.u32 %v13078_v27, 16  ;;  %v5512_v24 = vrot.slane %v5511_v23, 4  ;;  %9717 = vmatmul.mubr.bf16.gmra.mxu1 %v13380_v38  ;;  %v5833_v13 = vld [vmem:[#allocation3 + $0x34] sm:$0xf]  ;;  %v16860_v32 = vrot.slane %v5524_v45, 5 }
 0x4c9   : > { %v13687_v62 = vpop.eup %13686  ;;  %v16853_v28 = vadd.f32 %v16850_v0, %v4190_v56  ;;  %13690 = vpow2.f32 %v4365_v47  ;;  %v5521_v54 = vor.u32 %v5520_v8, %v5516_v18  ;;  %v5528_v37 = vshrl.u32 %v16826_v9, 16  ;;  %v16863_v61 = vld [vmem:[#allocation3 + $0x38] sm:$0xf]  ;;  %10192 = vmatpush2.bf16.msra.mxu0 %v13462_v10  ;;  %v6091_v59 = vld [vmem:[#allocation3 + $0x3c] sm:$0xf]  ;;  %v16875_v9 = vpop.f32.mrf.mxu1  ;;  %v13466_v5 = vld [vmem:[%s18995_s3 + $0x1f0] sm:$0xff]  }
 0x4ca   : > { %v5087_v39 = vrot.slane %v5085_v11, 6  ;;  %v5090_v2 = vrot.slane %v5088_v31, 7  ;;  %v12368_v29 = vadd.f32 -1.0, %v13687_v62  ;;  %v5517_v55 = vsel %vm16032_vm0, %v5512_v24, %v5516_v18  ;;  %v16871_v51 = vld [vmem:[#allocation3 + $0x40] sm:$0xf]  ;;  %10193 = vmatprep.subr.bf16.mxu0 %v19017_v63 }
 0x4cb   : > { %5796 = vst [vmem:[#allocation4 + $0x1b4] sm:$0xf] %v5517_v55  ;;  %v4302_v21 = vmin.f32 %v16853_v28, 0.0  ;;  %v5934_v48 = vrot.slane %v5932_v15, 4  ;;  %v13384_v57 = vld [vmem:[#allocation4 + $0x170] ss:$36 sps:$4 sm:$0xff]   ;;  %v4191_v12 = vmul.f32 %v16842_v52, %v4135_v20  ;;  %v16888_v49 = vadd.f32 %v16741_v58, %v16490_v19  ;;  %v4142_v47 = vpop.f32.mrf.mxu1 }
 0x4cc   : > { %v16865_v42 = vor.u32 %v5090_v2, %v5087_v39  ;;  %v4447_v53 = vmul.f32 %v16110_v41, %v12368_v29  ;;  %v13382_v1 = vld [vmem:[#allocation4 + $0x174] ss:$36 sps:$4 sm:$0xff]   ;;  %v5522_v43 = vrot.slane %v5521_v54, 4  ;;  %vm4264_vm1 = vcmp.gt.f32.partialorder %v16782_v14, 0.0  ;;  %v5298_v36 = vld [vmem:[#allocation3 + $0x68] sm:$0xf] }
 0x4cd   : > { %v4367_v15 = vmul.f32 1.442695, %v4302_v21  ;;  %v16884_v27 = vld [vmem:[#allocation3 + $0x3c] sm:$0xf]  ;;  %9893 = vmatprep.mubr.bf16.mxu0 %v13382_v1  ;;  %v5938_v10 = vrot.slane %v16863_v61, 5  ;;  %v6189_v58 = vrot.slane %v6187_v6, 4  ;;  %v16906_v31 = vadd.f32 %v16850_v0, %v4191_v12  ;;  %10194 = vmatpush2.bf16.msra.mxu0 %v13466_v5 }
 0x4ce   : > { %v5092_v60 = vsel %vm16147_vm14, %v5083_v34, %v16865_v42  ;;  %v4483_v40 = vsel %vm4263_vm15, %v16725_v17, %v4447_v53  ;;  %v5527_v17 = vsel %vm16032_vm0, %v5522_v43, %v16860_v32  ;;  %v5935_v34 = vrot.slane %v5833_v13, 5  ;;  %v13467_v19 = vld [vmem:[%s18995_s3 + $0x148] sm:$0xff]   ;;  %9894 = vmatmul.mubr.bf16.gmra.mxu0 %v13384_v57  ;;  %5334 = vst [vmem:[#allocation4 + $0x3a8] sm:$0xf] %v5298_v36  ;;  %v13475_v6 = vld [vmem:[%s18995_s3 + $0x140] sm:$0xff]  }
 0x4cf   : > { %5258 = vst [vmem:[#allocation3 + $0x6c] sm:$0xf] %v5092_v60  ;;  %v4715_v4 = vmul.f32 %v4642_v44, %v4483_v40  ;;  %5797 = vst [vmem:[#allocation4 + $0x1d8] sm:$0xf] %v5527_v17  ;;  %13692 = vpow2.f32 %v4367_v15  ;;  %v6190_v38 = vrot.slane %v6091_v59, 5  ;;  %v6193_v23 = vrot.slane %v16871_v51, 5  ;;  %10027 = vmatpush2.bf16.msra.mxu1 %v13467_v19  ;;  %10195 = vmatprep.subr.bf16.mxu0 %v19017_v63  ;;  %v4647_v15 = vpop.permute.xlu0 %4646 }
 0x4d0   : > { %v5936_v56 = vsel %vm16060_vm4, %v5934_v48, %v5935_v34  ;;  %v5937_v11 = vrot.slane %v5935_v34, 4  ;;  %v5530_v45 = vrot.slane %v5528_v37, 4  ;;  %v5534_v20 = vshll.u32 %v16884_v27, 16  ;;  %10028 = vmatprep.subr.bf16.mxu1 %v19017_v63  ;;  %v16924_v55 = vld [vmem:[#allocation3 + $0x40] sm:$0xf]  ;;  %v13469_v43 = vld [vmem:[%s18995_s3 + $0x1e0] sm:$0xff]  }
 0x4d1   : > { %v13079_v18 = vpack.c.bf16 %v4715_v4, %v4715_v4  ;;  %v13689_v8 = vpop.eup %13688  ;;  %6054 = vst [vmem:[#allocation4 + $0x1b8] sm:$0xf] %v5936_v56  ;;  %v6191_v62 = vsel %vm16060_vm4, %v6189_v58, %v6190_v38  ;;  %v6192_v24 = vrot.slane %v6190_v38, 4  ;;  %vm4265_vm2 = vcmp.gt.f32.partialorder %v16815_v25, 0.0  ;;  %10196 = vmatpush2.bf16.msra.mxu0 %v13468_v30  ;;  %v13387_v36 = vld [vmem:[#allocation4 + $0x1b0] ss:$36 sps:$4 sm:$0xff]  }
 0x4d2   : > { %v12369_v29 = vadd.f32 -1.0, %v13689_v8  ;;  %v5939_v13 = vsel %vm16060_vm4, %v5937_v11, %v5938_v10  ;;  %6309 = vst [vmem:[#allocation4 + $0x1bc] sm:$0xf] %v6191_v62  ;;  %v4303_v37 = vmin.f32 %v16906_v31, 0.0  ;;  %v5531_v53 = vor.u32 %v5530_v45, %v16860_v32  ;;  %10197 = vmatprep.subr.bf16.mxu0 %v19017_v63 }
 0x4d3   : > { %v5095_v39 = vshrl.u32 %v13079_v18, 16  ;;  %v5098_v2 = vshll.u32 %v13079_v18, 16  ;;  %6055 = vst [vmem:[#allocation4 + $0x1dc] sm:$0xf] %v5939_v13  ;;  %v6194_v54 = vsel %vm16060_vm4, %v6192_v24, %v6193_v23  ;;  %v16933_v21 = vadd.f32 %v4142_v47, %v16513_v22  ;;  %10029 = vmatpush2.bf16.msra.mxu1 %v13475_v6  ;;  %v5835_v22 = vld [vmem:[#allocation3 + $0x3c] sm:$0xf]  ;;  %v4652_v13 = vpop.permute.xlu1 %4651 }
 0x4d4   : > { %v4448_v1 = vmul.f32 %v16110_v41, %v12369_v29  ;;  %6310 = vst [vmem:[#allocation4 + $0x1e0] sm:$0xf] %v6194_v54  ;;  %v5536_v57 = vrot.slane %v5534_v20, 5  ;;  %v4369_v12 = vmul.f32 1.442695, %v4303_v37  ;;  %v5532_v44 = vrot.slane %v5531_v53, 4 }
 0x4d5   : > { %v5097_v48 = vrot.slane %v5095_v39, 6  ;;  %v5100_v59 = vrot.slane %v5098_v2, 7  ;;  %v5538_v60 = vshrl.u32 %v16884_v27, 16  ;;  %v5544_v32 = vshll.u32 %v16924_v55, 16  ;;  %v16952_v18 = vld [vmem:[#allocation3 + $0x40] sm:$0xf]  ;;  %10198 = vmatpush2.bf16.msra.mxu0 %v13469_v43 }
 0x4d6   : > { %v13691_v40 = vpop.eup %13690  ;;  %v5093_v5 = vrot.slane %v16865_v42, 4  ;;  %v4484_v17 = vsel %vm4264_vm1, %v16782_v14, %v4448_v1  ;;  %v13385_v34 = vld [vmem:[#allocation4 + $0x1b4] ss:$36 sps:$4 sm:$0xff]   ;;  %v4192_v27 = vmul.f32 %v16842_v52, %v16888_v49  ;;  %13694 = vpow2.f32 %v4369_v12  ;;  %v5299_v42 = vld [vmem:[#allocation3 + $0x6c] sm:$0xf]  ;;  %10199 = vmatprep.subr.bf16.mxu0 %v19017_v63 }
 0x4d7   : > { %v16943_v4 = vor.u32 %v5100_v59, %v5097_v48  ;;  %v4716_v19 = vmul.f32 %v4647_v15, %v4484_v17  ;;  %v12370_v58 = vadd.f32 -1.0, %v13691_v40  ;;  %v5537_v38 = vsel %vm16032_vm0, %v5532_v44, %v5536_v57  ;;  %9724 = vmatprep.mubr.bf16.mxu1 %v13385_v34  ;;  %5335 = vst [vmem:[#allocation4 + $0x3cc] sm:$0xf] %v5299_v42  ;;  %v13476_v47 = vld [vmem:[%s18995_s3 + $0x1d8] sm:$0xff]   ;;  %v6093_v24 = vld [vmem:[#allocation3 + $0x44] sm:$0xf] }
 0x4d8   : > { %vm4266_vm5 = vcmp.gt.f32.partialorder %v16853_v28, 0.0  ;;  %v5540_v11 = vrot.slane %v5538_v60, 4  ;;  %v5548_v49 = vshrl.u32 %v16924_v55, 16  ;;  %5798 = vst [vmem:[#allocation4 + $0x1fc] sm:$0xf] %v5537_v38  ;;  %9725 = vmatmul.mubr.bf16.gmra.mxu1 %v13387_v36  ;;  %v16964_v8 = vrot.slane %v5544_v32, 5 }
 0x4d9   : > { %v5102_v56 = vsel %vm16147_vm14, %v5093_v5, %v16943_v4  ;;  %v5103_v14 = vrot.slane %v16943_v4, 4  ;;  %v13080_v30 = vpack.c.bf16 %v4716_v19, %v4716_v19  ;;  %v4449_v6 = vmul.f32 %v16110_v41, %v12370_v58  ;;  %v16973_v29 = vld [vmem:[#allocation3 + $0x48] sm:$0xf]  ;;  %10200 = vmatpush2.bf16.msra.mxu0 %v13476_v47  ;;  %v13484_v44 = vld [vmem:[%s18995_s3 + $0x1d0] sm:$0xff]   ;;  %v13485_v42 = vld [vmem:[%s18995_s3 + $0x1c8] sm:$0xff]  }
 0x4da   : > { %5259 = vst [vmem:[#allocation3 + $0x70] sm:$0xf] %v5102_v56  ;;  %v16967_v62 = vadd.f32 %v16850_v0, %v4192_v27  ;;  %v5541_v45 = vor.u32 %v5540_v11, %v5536_v57  ;;  %v5940_v20 = vrot.slane %v5938_v10, 4  ;;  %v5941_v39 = vrot.slane %v5835_v22, 5  ;;  %v13391_v61 = vld [vmem:[#allocation4 + $0x1b8] ss:$36 sps:$4 sm:$0xff]   ;;  %10201 = vmatprep.subr.bf16.mxu0 %v19017_v63  ;;  %v4657_v56 = vpop.permute.xlu0 %4656 }
 0x4db   : > { %v5944_v2 = vrot.slane %v16952_v18, 5  ;;  %v5105_v54 = vshrl.u32 %v13080_v30, 16  ;;  %v5108_v37 = vshll.u32 %v13080_v30, 16  ;;  %v4485_v53 = vsel %vm4265_vm2, %v16815_v25, %v4449_v6  ;;  %v13389_v48 = vld [vmem:[#allocation4 + $0x1bc] ss:$36 sps:$4 sm:$0xff]  }
 0x4dc   : > { %v6195_v59 = vrot.slane %v6193_v23, 4  ;;  %v13693_v1 = vpop.eup %13692  ;;  %v4717_v57 = vmul.f32 %v4652_v13, %v4485_v53  ;;  %v5542_v10 = vrot.slane %v5541_v45, 4  ;;  %v4304_v43 = vmin.f32 %v16967_v62, 0.0  ;;  %9901 = vmatprep.mubr.bf16.mxu0 %v13389_v48  ;;  %v5361_v38 = vld [vmem:[#allocation3 + $0x44] sm:$0xf]  ;;  %v13174_v48 = vpop.f32.mrf.mxu1 }
 0x4dd   : > { %v5942_v12 = vsel %vm16060_vm4, %v5940_v20, %v5941_v39  ;;  %v5107_v60 = vrot.slane %v5105_v54, 6  ;;  %v5110_v25 = vrot.slane %v5108_v37, 7  ;;  %v12371_v32 = vadd.f32 -1.0, %v13693_v1  ;;  %9902 = vmatmul.mubr.bf16.gmra.mxu0 %v13391_v61 }
 0x4de   : > { %v5943_v51 = vrot.slane %v5941_v39, 4  ;;  %6056 = vst [vmem:[#allocation4 + $0x200] sm:$0xf] %v5942_v12  ;;  %v13081_v23 = vpack.c.bf16 %v4717_v57, %v4717_v57  ;;  %v5547_v22 = vsel %vm16032_vm0, %v5542_v10, %v16964_v8  ;;  %v4371_v40 = vmul.f32 1.442695, %v4304_v43  ;;  %10202 = vmatpush2.bf16.msra.mxu0 %v13484_v44 }
 0x4df   : > { %v6196_v15 = vrot.slane %v6093_v24, 5  ;;  %v5111_v5 = vor.u32 %v5110_v25, %v5107_v60  ;;  %v4450_v17 = vmul.f32 %v16110_v41, %v12371_v32  ;;  %5799 = vst [vmem:[#allocation4 + $0x220] sm:$0xf] %v5547_v22  ;;  %v6199_v36 = vrot.slane %v16973_v29, 5  ;;  %v17008_v24 = vld [vmem:[#allocation3 + $0x48] sm:$0xf]  ;;  %10203 = vmatprep.subr.bf16.mxu0 %v19017_v63 }
 0x4e0   : > { %v5945_v34 = vsel %vm16060_vm4, %v5943_v51, %v5944_v2  ;;  %v5115_v27 = vshrl.u32 %v13081_v23, 16  ;;  %v5118_v19 = vshll.u32 %v13081_v23, 16  ;;  %13696 = vpow2.f32 %v4371_v40  ;;  %v13394_v23 = vld [vmem:[#allocation4 + $0x1f8] ss:$36 sps:$4 sm:$0xff]   ;;  %v4145_v40 = vpop.f32.mrf.mxu1 }
 0x4e1   : > { %6057 = vst [vmem:[#allocation4 + $0x224] sm:$0xf] %v5945_v34  ;;  %v6197_v58 = vsel %vm16060_vm4, %v6195_v59, %v6196_v15  ;;  %v5112_v11 = vsel %vm16147_vm14, %v5103_v14, %v5111_v5  ;;  %v5113_v47 = vrot.slane %v5111_v5, 4  ;;  %v4486_v30 = vsel %vm4266_vm5, %v16853_v28, %v4450_v17  ;;  %v5300_v45 = vld [vmem:[#allocation3 + $0x70] sm:$0xf]  ;;  %v13489_v14 = vld [vmem:[%s18995_s3 + $0x238] sm:$0xff]  }
 0x4e2   : > { %v6198_v6 = vrot.slane %v6196_v15, 4  ;;  %6311 = vst [vmem:[#allocation4 + $0x204] sm:$0xf] %v6197_v58  ;;  %5260 = vst [vmem:[#allocation3 + $0x74] sm:$0xf] %v5112_v11  ;;  %v5117_v20 = vrot.slane %v5115_v27, 6  ;;  %v4718_v13 = vmul.f32 %v4657_v56, %v4486_v30  ;;  %v4193_v4 = vmul.f32 %v16842_v52, %v16933_v21  ;;  %10204 = vmatpush2.bf16.msra.mxu0 %v13485_v42 }
 0x4e3   : > { %v5120_v39 = vrot.slane %v5118_v19, 7  ;;  %5336 = vst [vmem:[#allocation4 + $0x3f0] sm:$0xf] %v5300_v45  ;;  %v5550_v54 = vrot.slane %v5548_v49, 4  ;;  %v5554_v37 = vshll.u32 %v5361_v38, 16  ;;  %v5558_v53 = vshrl.u32 %v5361_v38, 16  ;;  %v13695_v59 = vpop.eup %13694  ;;  %13175 = vmatprep.subr.bf16.mxu1 %v13489_v14  ;;  %10205 = vmatprep.subr.bf16.mxu0 %v19017_v63  ;;  %v4662_v19 = vpop.permute.xlu1 %4661 }
 0x4e4   : > { %v6200_v28 = vsel %vm16060_vm4, %v6198_v6, %v6199_v36  ;;  %v13082_v57 = vpack.c.bf16 %v4718_v13, %v4718_v13  ;;  %v17023_v21 = vadd.f32 %v16850_v0, %v4193_v4  ;;  %v5564_v61 = vshll.u32 %v17008_v24, 16  ;;  %v13493_v49 = vld [vmem:[%s18995_s3 + $0x1c0] sm:$0xff]   ;;  %v5837_v27 = vld [vmem:[#allocation3 + $0x44] sm:$0xf]  ;;  %v17045_v11 = vld [vmem:[#allocation3 + $0x48] sm:$0xf] }
 0x4e5   : > { %v5121_v1 = vor.u32 %v5120_v39, %v5117_v20  ;;  %6312 = vst [vmem:[#allocation4 + $0x228] sm:$0xf] %v6200_v28  ;;  %v12372_v10 = vadd.f32 -1.0, %v13695_v59  ;;  %v5551_v43 = vor.u32 %v5550_v54, %v16964_v8  ;;  %v5556_v12 = vrot.slane %v5554_v37, 5  ;;  %v6095_v20 = vld [vmem:[#allocation3 + $0x4c] sm:$0xf] }
 0x4e6   : > { %v5560_v55 = vrot.slane %v5558_v53, 4  ;;  %v5125_v60 = vshrl.u32 %v13082_v57, 16  ;;  %v5128_v25 = vshll.u32 %v13082_v57, 16  ;;  %vm4267_vm6 = vcmp.gt.f32.partialorder %v16906_v31, 0.0  ;;  %v13392_v32 = vld [vmem:[#allocation4 + $0x1fc] ss:$36 sps:$4 sm:$0xff]   ;;  %10206 = vmatpush2.bf16.msra.mxu0 %v13493_v49 }
 0x4e7   : > { %v5122_v44 = vsel %vm16147_vm14, %v5113_v47, %v5121_v1  ;;  %v5123_v51 = vrot.slane %v5121_v1, 4  ;;  %v4451_v8 = vmul.f32 %v16110_v41, %v12372_v10  ;;  %v4305_v22 = vmin.f32 %v17023_v21, 0.0  ;;  %9732 = vmatprep.mubr.bf16.mxu1 %v13392_v32  ;;  %v17057_v54 = vld [vmem:[#allocation3 + $0x50] sm:$0xf] }
 0x4e8   : > { %5261 = vst [vmem:[#allocation3 + $0x78] sm:$0xf] %v5122_v44  ;;  %v5552_v63 = vrot.slane %v5551_v43, 4  ;;  %v5127_v15 = vrot.slane %v5125_v60, 6  ;;  %v5130_v5 = vrot.slane %v5128_v25, 7  ;;  %v5561_v17 = vor.u32 %v5560_v55, %v5556_v12  ;;  %9733 = vmatmul.mubr.bf16.gmra.mxu1 %v13394_v23 }
 0x4e9   : > { %v17036_v34 = vrot.slane %v5564_v61, 5  ;;  %v4487_v58 = vsel %vm4267_vm6, %v16906_v31, %v4451_v8  ;;  %vm4268_vm8 = vcmp.gt.f32.partialorder %v16967_v62, 0.0  ;;  %v4373_v38 = vmul.f32 1.442695, %v4305_v22  ;;  %v5301_v39 = vld [vmem:[#allocation3 + $0x74] sm:$0xf]  ;;  %v4667_v8 = vpop.permute.xlu0 %4666 }
 0x4ea   : > { %v5557_v42 = vsel %vm16032_vm0, %v5552_v63, %v5556_v12  ;;  %v5568_v56 = vshrl.u32 %v17008_v24, 16  ;;  %v5131_v47 = vor.u32 %v5130_v5, %v5127_v15  ;;  %v4719_v30 = vmul.f32 %v4662_v19, %v4487_v58  ;;  %v13398_v13 = vld [vmem:[#allocation4 + $0x200] ss:$36 sps:$4 sm:$0xff]   ;;  %5337 = vst [vmem:[#allocation4 + $0x414] sm:$0xf] %v5301_v39 }
 0x4eb   : > { %v5562_v6 = vrot.slane %v5561_v17, 4  ;;  %5800 = vst [vmem:[#allocation4 + $0x244] sm:$0xf] %v5557_v42  ;;  %v4146_v45 = vadd.f32 %v4145_v40, %v16535_v46  ;;  %13698 = vpow2.f32 %v4373_v38  ;;  %v5946_v4 = vrot.slane %v5944_v2, 4  ;;  %v5363_v12 = vld [vmem:[#allocation3 + $0x4c] sm:$0xf] }
 0x4ec   : > { %v13395_v31 = vld [vmem:[#allocation4 + $0x204] ss:$36 sps:$4 sm:$0xff]   ;;  %v4151_v14 = vadd.f32 %v16875_v9, %v16590_v26  ;;  %v5132_v24 = vsel %vm16147_vm14, %v5123_v51, %v5131_v47  ;;  %v13083_v28 = vpack.c.bf16 %v4719_v30, %v4719_v30  ;;  %v17060_v37 = vadd.f32 %v13174_v48, %v16607_v33  ;;  %v5364_v19 = vld [vmem:[#allocation3 + $0x50] sm:$0xf] }
 0x4ed   : > { %v5567_v46 = vsel %vm16032_vm0, %v5562_v6, %v17036_v34  ;;  %v13697_v53 = vpop.eup %13696  ;;  %5262 = vst [vmem:[#allocation3 + $0x7c] sm:$0xf] %v5132_v24  ;;  %9909 = vmatprep.mubr.bf16.mxu0 %v13395_v31  ;;  %v4194_v26 = vmul.f32 %v16842_v52, %v4146_v45  ;;  %v5947_v9 = vrot.slane %v5837_v27, 5  ;;  %v5950_v18 = vrot.slane %v17045_v11, 5  ;;  %v5839_v15 = vld [vmem:[#allocation3 + $0x4c] sm:$0xf] }
 0x4ee   : > { %5801 = vst [vmem:[#allocation4 + $0x268] sm:$0xf] %v5567_v46  ;;  %v6201_v2 = vrot.slane %v6199_v36, 4  ;;  %v5135_v59 = vshrl.u32 %v13083_v28, 16  ;;  %v5138_v1 = vshll.u32 %v13083_v28, 16  ;;  %v12373_v57 = vadd.f32 -1.0, %v13697_v53  ;;  %9910 = vmatmul.mubr.bf16.gmra.mxu0 %v13398_v13 }
 0x4ef   : > { %v6202_v61 = vrot.slane %v6095_v20, 5  ;;  %v17067_v33 = vadd.f32 %v16850_v0, %v4194_v26  ;;  %v5948_v48 = vsel %vm16060_vm4, %v5946_v4, %v5947_v9  ;;  %v5949_v10 = vrot.slane %v5947_v9, 4  ;;  %v5302_v44 = vld [vmem:[#allocation3 + $0x78] sm:$0xf]  ;;  %v13401_v11 = vld [vmem:[#allocation4 + $0x240] ss:$36 sps:$4 sm:$0xff]  }
 0x4f0   : > { %v6205_v43 = vrot.slane %v17057_v54, 5  ;;  %v5137_v55 = vrot.slane %v5135_v59, 6  ;;  %v5140_v49 = vrot.slane %v5138_v1, 7  ;;  %v4452_v29 = vmul.f32 %v16110_v41, %v12373_v57  ;;  %6058 = vst [vmem:[#allocation4 + $0x248] sm:$0xf] %v5948_v48 }
 0x4f1   : > { %v6203_v36 = vsel %vm16060_vm4, %v6201_v2, %v6202_v61  ;;  %v5133_v60 = vrot.slane %v5131_v47, 4  ;;  %v4306_v25 = vmin.f32 %v17067_v33, 0.0  ;;  %v5951_v32 = vsel %vm16060_vm4, %v5949_v10, %v5950_v18  ;;  %5338 = vst [vmem:[#allocation4 + $0x438] sm:$0xf] %v5302_v44  ;;  %v17092_v20 = vld [vmem:[#allocation3 + $0x50] sm:$0xf] }
 0x4f2   : > { %v6204_v51 = vrot.slane %v6202_v61, 4  ;;  %6313 = vst [vmem:[#allocation4 + $0x24c] sm:$0xf] %v6203_v36  ;;  %v17078_v23 = vor.u32 %v5140_v49, %v5137_v55  ;;  %v4488_v22 = vsel %vm4268_vm8, %v16967_v62, %v4452_v29  ;;  %6059 = vst [vmem:[#allocation4 + $0x26c] sm:$0xf] %v5951_v32  ;;  %v5570_v63 = vrot.slane %v5568_v56, 4 }
 0x4f3   : > { %v5574_v40 = vshll.u32 %v5363_v12, 16  ;;  %v4720_v5 = vmul.f32 %v4667_v8, %v4488_v22  ;;  %v4375_v17 = vmul.f32 1.442695, %v4306_v25  ;;  %v5578_v58 = vshrl.u32 %v5363_v12, 16  ;;  %v6097_v28 = vld [vmem:[#allocation3 + $0x54] sm:$0xf] }
 0x4f4   : > { %v6206_v27 = vsel %vm16060_vm4, %v6204_v51, %v6205_v43  ;;  %v5142_v38 = vsel %vm16147_vm14, %v5133_v60, %v17078_v23  ;;  %v5143_v42 = vrot.slane %v17078_v23, 4  ;;  %vm4269_vm10 = vcmp.gt.f32.partialorder %v17023_v21, 0.0  ;;  %v5303_v39 = vld [vmem:[#allocation3 + $0x7c] sm:$0xf]  ;;  %v17094_v53 = vld [vmem:[#allocation3 + $0x58] sm:$0xf] }
 0x4f5   : > { %v13399_v62 = vld [vmem:[#allocation4 + $0x244] ss:$36 sps:$4 sm:$0xff]   ;;  %6314 = vst [vmem:[#allocation4 + $0x270] sm:$0xf] %v6206_v27  ;;  %v5571_v56 = vor.u32 %v5570_v63, %v17036_v34  ;;  %v4195_v47 = vmul.f32 %v16842_v52, %v4151_v14  ;;  %5263 = vst [vmem:[#allocation3 + $0x80] sm:$0xf] %v5142_v38  ;;  %v13084_v30 = vpack.c.bf16 %v4720_v5, %v4720_v5  ;;  %13700 = vpow2.f32 %v4375_v17 }
 0x4f6   : > { %v5576_v6 = vrot.slane %v5574_v40, 5  ;;  %v5580_v45 = vrot.slane %v5578_v58, 4  ;;  %9740 = vmatprep.mubr.bf16.mxu1 %v13399_v62  ;;  %v5584_v13 = vshll.u32 %v5364_v19, 16  ;;  %v5588_v4 = vshrl.u32 %v5364_v19, 16  ;;  %5339 = vst [vmem:[#allocation4 + $0x45c] sm:$0xf] %v5303_v39  ;;  %v4672_v40 = vpop.permute.xlu1 %4671 }
 0x4f7   : > { %v5572_v31 = vrot.slane %v5571_v56, 4  ;;  %v5952_v24 = vrot.slane %v5950_v18, 4  ;;  %v5145_v46 = vshrl.u32 %v13084_v30, 16  ;;  %v5148_v54 = vshll.u32 %v13084_v30, 16  ;;  %9741 = vmatmul.mubr.bf16.gmra.mxu1 %v13401_v11  ;;  %v5365_v23 = vld [vmem:[#allocation3 + $0x54] sm:$0xf] }
 0x4f8   : > { %v5581_v34 = vor.u32 %v5580_v45, %v5576_v6  ;;  %v5953_v14 = vrot.slane %v5839_v15, 5  ;;  %v13699_v26 = vpop.eup %13698  ;;  %v5586_v2 = vrot.slane %v5584_v13, 5  ;;  %v5956_v59 = vrot.slane %v17092_v20, 5  ;;  %v17116_v22 = vld [vmem:[#allocation3 + $0x58] sm:$0xf]  ;;  %v4677_v20 = vpop.permute.xlu0 %4676 }
 0x4f9   : > { %v5577_v9 = vsel %vm16032_vm0, %v5572_v31, %v5576_v6  ;;  %v6207_v1 = vrot.slane %v6205_v43, 4  ;;  %v5147_v57 = vrot.slane %v5145_v46, 6  ;;  %v5150_v61 = vrot.slane %v5148_v54, 7  ;;  %v13404_v60 = vld [vmem:[#allocation4 + $0x248] ss:$36 sps:$4 sm:$0xff]  }
 0x4fa   : > { %v12374_v18 = vadd.f32 -1.0, %v13699_v26  ;;  %v5582_v48 = vrot.slane %v5581_v34, 4  ;;  %5802 = vst [vmem:[#allocation4 + $0x28c] sm:$0xf] %v5577_v9  ;;  %v5954_v10 = vsel %vm16060_vm4, %v5952_v24, %v5953_v14  ;;  %v5955_v12 = vrot.slane %v5953_v14, 4 }
 0x4fb   : > { %v6208_v55 = vrot.slane %v6097_v28, 5  ;;  %v6211_v49 = vrot.slane %v17094_v53, 5  ;;  %v17102_v29 = vor.u32 %v5150_v61, %v5147_v57  ;;  %6060 = vst [vmem:[#allocation4 + $0x290] sm:$0xf] %v5954_v10  ;;  %v17108_v25 = vadd.f32 %v16850_v0, %v4195_v47  ;;  %v5841_v54 = vld [vmem:[#allocation3 + $0x54] sm:$0xf] }
 0x4fc   : > { %v4453_v36 = vmul.f32 %v16110_v41, %v12374_v18  ;;  %v13402_v44 = vld [vmem:[#allocation4 + $0x24c] ss:$36 sps:$4 sm:$0xff]   ;;  %v5587_v43 = vsel %vm16032_vm0, %v5582_v48, %v5586_v2  ;;  %v5957_v32 = vsel %vm16060_vm4, %v5955_v12, %v5956_v59  ;;  %v5590_v63 = vrot.slane %v5588_v4, 4  ;;  %v5304_v17 = vld [vmem:[#allocation3 + $0x80] sm:$0xf] }
 0x4fd   : > { %5803 = vst [vmem:[#allocation4 + $0x2b0] sm:$0xf] %v5587_v43  ;;  %v6209_v51 = vsel %vm16060_vm4, %v6207_v1, %v6208_v55  ;;  %v6210_v8 = vrot.slane %v6208_v55, 4  ;;  %v5152_v15 = vsel %vm16147_vm14, %v5143_v42, %v17102_v29  ;;  %9917 = vmatprep.mubr.bf16.mxu0 %v13402_v44  ;;  %6061 = vst [vmem:[#allocation4 + $0x2b4] sm:$0xf] %v5957_v32  ;;  %vm4270_vm12 = vcmp.gt.f32.partialorder %v17067_v33, 0.0 }
 0x4fe   : > { %v4489_v5 = vsel %vm4269_vm10, %v17023_v21, %v4453_v36  ;;  %6315 = vst [vmem:[#allocation4 + $0x294] sm:$0xf] %v6209_v51  ;;  %5264 = vst [vmem:[#allocation3 + $0x84] sm:$0xf] %v5152_v15  ;;  %9918 = vmatmul.mubr.bf16.gmra.mxu0 %v13404_v60  ;;  %v4307_v58 = vmin.f32 %v17108_v25, 0.0  ;;  %v5591_v38 = vor.u32 %v5590_v63, %v5586_v2  ;;  %v5153_v21 = vrot.slane %v17102_v29, 4 }
 0x4ff   : > { %v4721_v27 = vmul.f32 %v4672_v40, %v4489_v5  ;;  %v6212_v19 = vsel %vm16060_vm4, %v6210_v8, %v6211_v49  ;;  %5340 = vst [vmem:[#allocation4 + $0x480] sm:$0xf] %v5304_v17  ;;  %v5594_v42 = vshll.u32 %v5365_v23, 16  ;;  %v5598_v62 = vshrl.u32 %v5365_v23, 16  ;;  %v17140_v34 = vld [vmem:[#allocation3 + $0x58] sm:$0xf] }
 0x500   : > { %6316 = vst [vmem:[#allocation4 + $0x2b8] sm:$0xf] %v6212_v19  ;;  %v5604_v11 = vshll.u32 %v17116_v22, 16  ;;  %v4377_v47 = vmul.f32 1.442695, %v4307_v58  ;;  %v5592_v30 = vrot.slane %v5591_v38, 4  ;;  %v4196_v6 = vmul.f32 %v16842_v52, %v17060_v37 }
 0x501   : > { %v13085_v56 = vpack.c.bf16 %v4721_v27, %v4721_v27  ;;  %v5596_v45 = vrot.slane %v5594_v42, 5  ;;  %v5600_v39 = vrot.slane %v5598_v62, 4  ;;  %v5608_v13 = vshrl.u32 %v17116_v22, 16  ;;  %v13408_v9 = vld [vmem:[#allocation4 + $0x288] ss:$36 sps:$4 sm:$0xff]  }
 0x502   : > { %v17134_v31 = vrot.slane %v5604_v11, 5  ;;  %v13701_v4 = vpop.eup %13700  ;;  %13702 = vpow2.f32 %v4377_v47  ;;  %v17138_v46 = vadd.f32 %v16850_v0, %v4196_v6  ;;  %v5958_v61 = vrot.slane %v5956_v59, 4  ;;  %v6099_v0 = vld [vmem:[#allocation3 + $0x5c] sm:$0xf]  ;;  %v17149_v55 = vld [vmem:[#allocation3 + $0x60] sm:$0xf] }
 0x503   : > { %v5155_v24 = vshrl.u32 %v13085_v56, 16  ;;  %v5158_v28 = vshll.u32 %v13085_v56, 16  ;;  %v12375_v14 = vadd.f32 -1.0, %v13701_v4  ;;  %v5597_v52 = vsel %vm16032_vm0, %v5592_v30, %v5596_v45  ;;  %v5367_v8 = vld [vmem:[#allocation3 + $0x5c] sm:$0xf] }
 0x504   : > { %v13406_v26 = vld [vmem:[#allocation4 + $0x28c] ss:$36 sps:$4 sm:$0xff]   ;;  %v5601_v37 = vor.u32 %v5600_v39, %v5596_v45  ;;  %5804 = vst [vmem:[#allocation4 + $0x2d4] sm:$0xf] %v5597_v52  ;;  %v4308_v57 = vmin.f32 %v17138_v46, 0.0  ;;  %v5959_v10 = vrot.slane %v5841_v54, 5 }
 0x505   : > { %v5157_v2 = vrot.slane %v5155_v24, 6  ;;  %v5160_v1 = vrot.slane %v5158_v28, 7  ;;  %v4454_v18 = vmul.f32 %v16110_v41, %v12375_v14  ;;  %9748 = vmatprep.mubr.bf16.mxu1 %v13406_v26  ;;  %v5962_v12 = vrot.slane %v17140_v34, 5  ;;  %v13411_v44 = vld [vmem:[#allocation4 + $0x290] ss:$36 sps:$4 sm:$0xff]  }
 0x506   : > { %v5602_v48 = vrot.slane %v5601_v37, 4  ;;  %9749 = vmatmul.mubr.bf16.gmra.mxu1 %v13408_v9  ;;  %v6213_v60 = vrot.slane %v6211_v49, 4  ;;  %v4379_v32 = vmul.f32 1.442695, %v4308_v57  ;;  %v5960_v51 = vsel %vm16060_vm4, %v5958_v61, %v5959_v10  ;;  %v5305_v23 = vld [vmem:[#allocation3 + $0x84] sm:$0xf] }
 0x507   : > { %v17151_v29 = vor.u32 %v5160_v1, %v5157_v2  ;;  %v13409_v36 = vld [vmem:[#allocation4 + $0x294] ss:$36 sps:$4 sm:$0xff]   ;;  %v4490_v59 = vsel %vm4270_vm12, %v17067_v33, %v4454_v18  ;;  %v5961_v33 = vrot.slane %v5959_v10, 4  ;;  %6062 = vst [vmem:[#allocation4 + $0x2d8] sm:$0xf] %v5960_v51  ;;  %v6214_v40 = vrot.slane %v6099_v0, 5 }
 0x508   : > { %v5607_v43 = vsel %vm16032_vm0, %v5602_v48, %v17134_v31  ;;  %v4722_v22 = vmul.f32 %v4677_v20, %v4490_v59  ;;  %9925 = vmatprep.mubr.bf16.mxu0 %v13409_v36  ;;  %v17167_v63 = vld [vmem:[#allocation3 + $0x60] sm:$0xf]  ;;  %5341 = vst [vmem:[#allocation4 + $0x4a4] sm:$0xf] %v5305_v23  ;;  %13704 = vpow2.f32 %v4379_v32  ;;  %v6217_v15 = vrot.slane %v17149_v55, 5 }
 0x509   : > { %v5162_v53 = vsel %vm16147_vm14, %v5153_v21, %v17151_v29  ;;  %v5163_v49 = vrot.slane %v17151_v29, 4  ;;  %5805 = vst [vmem:[#allocation4 + $0x2f8] sm:$0xf] %v5607_v43  ;;  %9926 = vmatmul.mubr.bf16.gmra.mxu0 %v13411_v44  ;;  %v5610_v5 = vrot.slane %v5608_v13, 4  ;;  %v5963_v27 = vsel %vm16060_vm4, %v5961_v33, %v5962_v12  ;;  %v5843_v6 = vld [vmem:[#allocation3 + $0x5c] sm:$0xf] }
 0x50a   : > { %5265 = vst [vmem:[#allocation3 + $0x88] sm:$0xf] %v5162_v53  ;;  %v13086_v17 = vpack.c.bf16 %v4722_v22, %v4722_v22  ;;  %v5614_v19 = vshll.u32 %v5367_v8, 16  ;;  %v5618_v58 = vshrl.u32 %v5367_v8, 16  ;;  %vm4271_vm9 = vcmp.gt.f32.partialorder %v17108_v25, 0.0 }
 0x50b   : > { %6063 = vst [vmem:[#allocation4 + $0x2fc] sm:$0xf] %v5963_v27  ;;  %v6215_v38 = vsel %vm16060_vm4, %v6213_v60, %v6214_v40  ;;  %v6216_v21 = vrot.slane %v6214_v40, 4  ;;  %v5611_v42 = vor.u32 %v5610_v5, %v17134_v31  ;;  %v5624_v62 = vshll.u32 %v17167_v63, 16  ;;  %v17182_v24 = vld [vmem:[#allocation3 + $0x60] sm:$0xf] }
 0x50c   : > { %v5165_v11 = vshrl.u32 %v13086_v17, 16  ;;  %v5168_v56 = vshll.u32 %v13086_v17, 16  ;;  %6317 = vst [vmem:[#allocation4 + $0x2dc] sm:$0xf] %v6215_v38  ;;  %v5616_v47 = vrot.slane %v5614_v19, 5  ;;  %v5620_v30 = vrot.slane %v5618_v58, 4 }
 0x50d   : > { %v6218_v45 = vsel %vm16060_vm4, %v6216_v21, %v6217_v15  ;;  %v5612_v39 = vrot.slane %v5611_v42, 4  ;;  %v17179_v13 = vrot.slane %v5624_v62, 5  ;;  %v5628_v4 = vshrl.u32 %v17167_v63, 16  ;;  %v6101_v14 = vld [vmem:[#allocation3 + $0x64] sm:$0xf] }
 0x50e   : > { %v5167_v28 = vrot.slane %v5165_v11, 6  ;;  %v5170_v31 = vrot.slane %v5168_v56, 7  ;;  %6318 = vst [vmem:[#allocation4 + $0x300] sm:$0xf] %v6218_v45  ;;  %v5621_v54 = vor.u32 %v5620_v30, %v5616_v47  ;;  %v5964_v34 = vrot.slane %v5962_v12, 4 }
 0x50f   : > { %v13703_v26 = vpop.eup %13702  ;;  %v13415_v52 = vld [vmem:[#allocation4 + $0x2d0] ss:$36 sps:$4 sm:$0xff]   ;;  %v5617_v37 = vsel %vm16032_vm0, %v5612_v39, %v5616_v47  ;;  %v5965_v2 = vrot.slane %v5843_v6, 5  ;;  %v5968_v0 = vrot.slane %v17182_v24, 5  ;;  %v6102_v18 = vld [vmem:[#allocation3 + $0x68] sm:$0xf] }
 0x510   : > { %v13412_v9 = vld [vmem:[#allocation4 + $0x2d4] ss:$36 sps:$4 sm:$0xff]   ;;  %v17186_v1 = vor.u32 %v5170_v31, %v5167_v28  ;;  %v12376_v57 = vadd.f32 -1.0, %v13703_v26  ;;  %v5622_v61 = vrot.slane %v5621_v54, 4  ;;  %5806 = vst [vmem:[#allocation4 + $0x31c] sm:$0xf] %v5617_v37 }
 0x511   : > { %9756 = vmatprep.mubr.bf16.mxu1 %v13412_v9  ;;  %v5966_v48 = vsel %vm16060_vm4, %v5964_v34, %v5965_v2  ;;  %v5967_v10 = vrot.slane %v5965_v2, 4  ;;  %v6219_v12 = vrot.slane %v6217_v15, 4  ;;  %v6220_v55 = vrot.slane %v6101_v14, 5  ;;  %v5369_v29 = vld [vmem:[#allocation3 + $0x64] sm:$0xf]  ;;  %v4687_v2 = vpop.permute.xlu0 %4686 }
 0x512   : > { %v5172_v36 = vsel %vm16147_vm14, %v5163_v49, %v17186_v1  ;;  %v5173_v44 = vrot.slane %v17186_v1, 4  ;;  %v4455_v60 = vmul.f32 %v16110_v41, %v12376_v57  ;;  %9757 = vmatmul.mubr.bf16.gmra.mxu1 %v13415_v52  ;;  %vm4272_vm13 = vcmp.gt.f32.partialorder %v17138_v46, 0.0  ;;  %6064 = vst [vmem:[#allocation4 + $0x320] sm:$0xf] %v5966_v48  ;;  %v17200_v59 = vld [vmem:[#allocation3 + $0x68] sm:$0xf]  ;;  %v4682_v49 = vpop.permute.xlu1 %4681 }
 0x513   : > { %v5627_v20 = vsel %vm16032_vm0, %v5622_v61, %v17179_v13  ;;  %v5306_v43 = vld [vmem:[#allocation3 + $0x88] sm:$0xf]  ;;  %5266 = vst [vmem:[#allocation3 + $0x8c] sm:$0xf] %v5172_v36  ;;  %v5969_v32 = vsel %vm16060_vm4, %v5967_v10, %v5968_v0  ;;  %v6221_v51 = vsel %vm16060_vm4, %v6219_v12, %v6220_v55  ;;  %v6222_v8 = vrot.slane %v6220_v55, 4 }
 0x514   : > { %5807 = vst [vmem:[#allocation4 + $0x340] sm:$0xf] %v5627_v20  ;;  %v6223_v23 = vrot.slane %v6102_v18, 5  ;;  %v5845_v53 = vld [vmem:[#allocation3 + $0x64] sm:$0xf]  ;;  %v4491_v22 = vsel %vm4271_vm9, %v17108_v25, %v4455_v60  ;;  %v5630_v33 = vrot.slane %v5628_v4, 4 }
 0x515   : > { %5342 = vst [vmem:[#allocation4 + $0x4c8] sm:$0xf] %v5306_v43  ;;  %6065 = vst [vmem:[#allocation4 + $0x344] sm:$0xf] %v5969_v32  ;;  %v5634_v63 = vshll.u32 %v5369_v29, 16  ;;  %v5638_v40 = vshrl.u32 %v5369_v29, 16  ;;  %v4723_v5 = vmul.f32 %v4682_v49, %v4491_v22  ;;  %v13705_v38 = vpop.eup %13704 }
 0x516   : > { %6319 = vst [vmem:[#allocation4 + $0x324] sm:$0xf] %v6221_v51  ;;  %v17209_v15 = vld [vmem:[#allocation3 + $0x68] sm:$0xf]  ;;  %v13416_v17 = vld [vmem:[#allocation4 + $0x2d8] ss:$36 sps:$4 sm:$0xff]   ;;  %v6224_v19 = vsel %vm16060_vm4, %v6222_v8, %v6223_v23  ;;  %v5631_v21 = vor.u32 %v5630_v33, %v17179_v13 }
 0x517   : > { %v13418_v27 = vld [vmem:[#allocation4 + $0x2dc] ss:$36 sps:$4 sm:$0xff]   ;;  %v5644_v58 = vshll.u32 %v17200_v59, 16  ;;  %6320 = vst [vmem:[#allocation4 + $0x348] sm:$0xf] %v6224_v19  ;;  %v5636_v25 = vrot.slane %v5634_v63, 5  ;;  %v13087_v11 = vpack.c.bf16 %v4723_v5, %v4723_v5 }
 0x518   : > { %v5640_v42 = vrot.slane %v5638_v40, 4  ;;  %v5648_v62 = vshrl.u32 %v17200_v59, 16  ;;  %v12377_v56 = vadd.f32 -1.0, %v13705_v38  ;;  %9933 = vmatprep.mubr.bf16.mxu0 %v13418_v27  ;;  %v5970_v30 = vrot.slane %v5968_v0, 4  ;;  %v6103_v24 = vld [vmem:[#allocation3 + $0x6c] sm:$0xf] }
 0x519   : > { %v5646_v47 = vrot.slane %v5644_v58, 5  ;;  %9934 = vmatmul.mubr.bf16.gmra.mxu0 %v13416_v17  ;;  %v5632_v6 = vrot.slane %v5631_v21, 4  ;;  %v5971_v39 = vrot.slane %v5845_v53, 5  ;;  %v5974_v4 = vrot.slane %v17209_v15, 5  ;;  %v17218_v54 = vld [vmem:[#allocation3 + $0x70] sm:$0xf] }
 0x51a   : > { %v5641_v45 = vor.u32 %v5640_v42, %v5636_v25  ;;  %v5175_v28 = vshrl.u32 %v13087_v11, 16  ;;  %v5178_v31 = vshll.u32 %v13087_v11, 16  ;;  %v4456_v13 = vmul.f32 %v16110_v41, %v12377_v56  ;;  %v13421_v26 = vld [vmem:[#allocation4 + $0x318] ss:$36 sps:$4 sm:$0xff]   ;;  %v5371_v18 = vld [vmem:[#allocation3 + $0x6c] sm:$0xf] }
 0x51b   : > { %v6225_v34 = vrot.slane %v6223_v23, 4  ;;  %v13419_v14 = vld [vmem:[#allocation4 + $0x31c] ss:$36 sps:$4 sm:$0xff]   ;;  %v5637_v9 = vsel %vm16032_vm0, %v5632_v6, %v5636_v25  ;;  %v5972_v37 = vsel %vm16060_vm4, %v5970_v30, %v5971_v39  ;;  %v5973_v41 = vrot.slane %v5971_v39, 4  ;;  %v5307_v29 = vld [vmem:[#allocation3 + $0x8c] sm:$0xf] }
 0x51c   : > { %v5642_v52 = vrot.slane %v5641_v45, 4  ;;  %v5177_v57 = vrot.slane %v5175_v28, 6  ;;  %v5180_v61 = vrot.slane %v5178_v31, 7  ;;  %v4492_v0 = vsel %vm4272_vm13, %v17138_v46, %v4456_v13  ;;  %5808 = vst [vmem:[#allocation4 + $0x364] sm:$0xf] %v5637_v9  ;;  %9764 = vmatprep.mubr.bf16.mxu1 %v13419_v14 }
 0x51d   : > { %6066 = vst [vmem:[#allocation4 + $0x368] sm:$0xf] %v5972_v37  ;;  %v4724_v48 = vmul.f32 %v4687_v2, %v4492_v0  ;;  %v6226_v12 = vrot.slane %v6103_v24, 5  ;;  %v6229_v55 = vrot.slane %v17218_v54, 5  ;;  %9765 = vmatmul.mubr.bf16.gmra.mxu1 %v13421_v26  ;;  %v13423_v60 = vld [vmem:[#allocation4 + $0x320] ss:$36 sps:$4 sm:$0xff]   ;;  %v5975_v46 = vsel %vm16060_vm4, %v5973_v41, %v5974_v4 }
 0x51e   : > { %v5647_v10 = vsel %vm16032_vm0, %v5642_v52, %v5646_v47  ;;  %v5181_v36 = vor.u32 %v5180_v61, %v5177_v57  ;;  %v13425_v20 = vld [vmem:[#allocation4 + $0x324] ss:$36 sps:$4 sm:$0xff]   ;;  %v5650_v59 = vrot.slane %v5648_v62, 4  ;;  %5343 = vst [vmem:[#allocation4 + $0x4ec] sm:$0xf] %v5307_v29  ;;  %v5654_v23 = vshll.u32 %v5371_v18, 16 }
 0x51f   : > { %5809 = vst [vmem:[#allocation4 + $0x388] sm:$0xf] %v5647_v10  ;;  %v13088_v43 = vpack.c.bf16 %v4724_v48, %v4724_v48  ;;  %6067 = vst [vmem:[#allocation4 + $0x38c] sm:$0xf] %v5975_v46  ;;  %v6227_v32 = vsel %vm16060_vm4, %v6225_v34, %v6226_v12  ;;  %v6228_v51 = vrot.slane %v6226_v12, 4  ;;  %9941 = vmatprep.mubr.bf16.mxu0 %v13425_v20  ;;  %v5658_v33 = vshrl.u32 %v5371_v18, 16 }
 0x520   : > { %v5372_v8 = vld [vmem:[#allocation3 + $0x70] sm:$0xf]  ;;  %v5182_v53 = vsel %vm16147_vm14, %v5173_v44, %v5181_v36  ;;  %v5183_v49 = vrot.slane %v5181_v36, 4  ;;  %6321 = vst [vmem:[#allocation4 + $0x36c] sm:$0xf] %v6227_v32  ;;  %v5651_v22 = vor.u32 %v5650_v59, %v5646_v47  ;;  %v5656_v27 = vrot.slane %v5654_v23, 5 }
 0x521   : > { %v5847_v63 = vld [vmem:[#allocation3 + $0x6c] sm:$0xf]  ;;  %v17238_v40 = vld [vmem:[#allocation3 + $0x70] sm:$0xf]  ;;  %5267 = vst [vmem:[#allocation3 + $0x90] sm:$0xf] %v5182_v53  ;;  %9942 = vmatmul.mubr.bf16.gmra.mxu0 %v13423_v60  ;;  %v6230_v17 = vsel %vm16060_vm4, %v6228_v51, %v6229_v55 }
 0x522   : > { %v5185_v15 = vshrl.u32 %v13088_v43, 16  ;;  %v5188_v5 = vshll.u32 %v13088_v43, 16  ;;  %v6105_v1 = vld [vmem:[#allocation3 + $0x74] sm:$0xf]  ;;  %6322 = vst [vmem:[#allocation4 + $0x390] sm:$0xf] %v6230_v17 }
 0x523   : > { %v5652_v19 = vrot.slane %v5651_v22, 4  ;;  %v5660_v44 = vrot.slane %v5658_v33, 4  ;;  %v5664_v58 = vshll.u32 %v5372_v8, 16  ;;  %v5668_v38 = vshrl.u32 %v5372_v8, 16  ;;  %v17242_v21 = vld [vmem:[#allocation3 + $0x78] sm:$0xf] }
 0x524   : > { %v5187_v25 = vrot.slane %v5185_v15, 6  ;;  %v5190_v42 = vrot.slane %v5188_v5, 7  ;;  %v5976_v62 = vrot.slane %v5974_v4, 4  ;;  %v5977_v11 = vrot.slane %v5847_v63, 5  ;;  %v5269_v56 = vld [vmem:[#allocation3 + $0x98] sm:$0x3] }
 0x525   : > { %v5657_v47 = vsel %vm16032_vm0, %v5652_v19, %v5656_v27  ;;  %v5661_v30 = vor.u32 %v5660_v44, %v5656_v27  ;;  %v5666_v6 = vrot.slane %v5664_v58, 5  ;;  %v5980_v45 = vrot.slane %v17238_v40, 5  ;;  %v5373_v39 = vld [vmem:[#allocation3 + $0x74] sm:$0xf]  ;;  %v13429_v31 = vld [vmem:[#allocation4 + $0x360] ss:$36 sps:$4 sm:$0xff]  }
 0x526   : > { %v5191_v24 = vor.u32 %v5190_v42, %v5187_v25  ;;  %v13427_v28 = vld [vmem:[#allocation4 + $0x364] ss:$36 sps:$4 sm:$0xff]   ;;  %5810 = vst [vmem:[#allocation4 + $0x3ac] sm:$0xf] %v5657_v47  ;;  %v5978_v13 = vsel %vm16060_vm4, %v5976_v62, %v5977_v11  ;;  %v5979_v54 = vrot.slane %v5977_v11, 4  ;;  %v6231_v4 = vrot.slane %v6229_v55, 4  ;;  %v17260_v55 = vpop.f32.mrf.mxu1 }
 0x527   : > { %v5662_v34 = vrot.slane %v5661_v30, 4  ;;  %6068 = vst [vmem:[#allocation4 + $0x3b0] sm:$0xf] %v5978_v13  ;;  %v6232_v14 = vrot.slane %v6105_v1, 5  ;;  %v6235_v26 = vrot.slane %v17242_v21, 5  ;;  %9772 = vmatprep.mubr.bf16.mxu1 %v13427_v28  ;;  %v5670_v61 = vrot.slane %v5668_v38, 4 }
 0x528   : > { %v5849_v9 = vld [vmem:[#allocation3 + $0x74] sm:$0xf]  ;;  %v5192_v52 = vsel %vm16147_vm14, %v5183_v49, %v5191_v24  ;;  %v5193_v37 = vrot.slane %v5191_v24, 4  ;;  %v5981_v2 = vsel %vm16060_vm4, %v5979_v54, %v5980_v45  ;;  %v5374_v57 = vld [vmem:[#allocation3 + $0x78] sm:$0xf]  ;;  %9773 = vmatmul.mubr.bf16.gmra.mxu1 %v13429_v31  ;;  %v5674_v48 = vshll.u32 %v5373_v39, 16  ;;  %v9680_v23 = vpop.f32.mrf.mxu1 }
 0x529   : > { %5268 = vst [vmem:[#allocation3 + $0x94] sm:$0xf] %v5192_v52  ;;  %v5667_v0 = vsel %vm16032_vm0, %v5662_v34, %v5666_v6  ;;  %6069 = vst [vmem:[#allocation4 + $0x3d4] sm:$0xf] %v5981_v2  ;;  %v6233_v41 = vsel %vm16060_vm4, %v6231_v4, %v6232_v14  ;;  %v6234_v18 = vrot.slane %v6232_v14, 4  ;;  %v5671_v20 = vor.u32 %v5670_v61, %v5666_v6 }
 0x52a   : > { %v17258_v10 = vld [vmem:[#allocation3 + $0x78] sm:$0xf]  ;;  %v6107_v12 = vld [vmem:[#allocation3 + $0x7c] sm:$0xf]  ;;  %v5270_v29 = vsel %vm15934_vm11, %v5193_v37, %v5269_v56  ;;  %v13432_v36 = vld [vmem:[#allocation4 + $0x368] ss:$36 sps:$4 sm:$0xff]   ;;  %v17267_v17 = vpop.f32.mrf.mxu1 }
 0x52b   : > { %v13434_v60 = vld [vmem:[#allocation4 + $0x36c] ss:$36 sps:$4 sm:$0xff]   ;;  %5811 = vst [vmem:[#allocation4 + $0x3d0] sm:$0xf] %v5667_v0  ;;  %6323 = vst [vmem:[#allocation4 + $0x3b4] sm:$0xf] %v6233_v41  ;;  %v6236_v59 = vsel %vm16060_vm4, %v6234_v18, %v6235_v26 }
 0x52c   : > { %v5678_v46 = vshrl.u32 %v5373_v39, 16  ;;  %5271 = vst [vmem:[#allocation3 + $0x98] sm:$0x3] %v5270_v29  ;;  %v5676_v43 = vrot.slane %v5674_v48, 5  ;;  %v5684_v32 = vshll.u32 %v5374_v57, 16  ;;  %v5688_v51 = vshrl.u32 %v5374_v57, 16  ;;  %9949 = vmatprep.mubr.bf16.mxu0 %v13434_v60  ;;  %v9683_v11 = vpop.f32.mrf.mxu1 }
 0x52d   : > { %v5375_v8 = vld [vmem:[#allocation3 + $0x7c] sm:$0xf]  ;;  %6324 = vst [vmem:[#allocation4 + $0x3d8] sm:$0xf] %v6236_v59  ;;  %v5672_v53 = vrot.slane %v5671_v20, 4  ;;  %v5982_v49 = vrot.slane %v5980_v45, 4  ;;  %9950 = vmatmul.mubr.bf16.gmra.mxu0 %v13432_v36 }
 0x52e   : > { %v5680_v3 = vrot.slane %v5678_v46, 4  ;;  %v5983_v22 = vrot.slane %v5849_v9, 5  ;;  %v6108_v33 = vld [vmem:[#allocation3 + $0x80] sm:$0xf]  ;;  %v5686_v63 = vrot.slane %v5684_v32, 5  ;;  %v5986_v40 = vrot.slane %v17258_v10, 5 }
 0x52f   : > { %v6237_v15 = vrot.slane %v6235_v26, 4  ;;  %v6238_v5 = vrot.slane %v6107_v12, 5  ;;  %v5677_v27 = vsel %vm16032_vm0, %v5672_v53, %v5676_v43  ;;  %v5376_v58 = vld [vmem:[#allocation3 + $0x80] sm:$0xf]  ;;  %v6241_v25 = vrot.slane %v6108_v33, 5 }
 0x530   : > { %v5681_v1 = vor.u32 %v5680_v3, %v5676_v43  ;;  %v5984_v19 = vsel %vm16060_vm4, %v5982_v49, %v5983_v22  ;;  %v5985_v44 = vrot.slane %v5983_v22, 4  ;;  %5812 = vst [vmem:[#allocation4 + $0x3f4] sm:$0xf] %v5677_v27  ;;  %v5690_v42 = vrot.slane %v5688_v51, 4  ;;  %v5851_v62 = vld [vmem:[#allocation3 + $0x7c] sm:$0xf] }
 0x531   : > { %6070 = vst [vmem:[#allocation4 + $0x3f8] sm:$0xf] %v5984_v19  ;;  %v6239_v38 = vsel %vm16060_vm4, %v6237_v15, %v6238_v5  ;;  %v6240_v21 = vrot.slane %v6238_v5, 4  ;;  %v5694_v30 = vshll.u32 %v5375_v8, 16  ;;  %v5698_v6 = vshrl.u32 %v5375_v8, 16 }
 0x532   : > { %v5682_v56 = vrot.slane %v5681_v1, 4  ;;  %v5987_v47 = vsel %vm16060_vm4, %v5985_v44, %v5986_v40  ;;  %6325 = vst [vmem:[#allocation4 + $0x3fc] sm:$0xf] %v6239_v38  ;;  %v17277_v45 = vld [vmem:[#allocation3 + $0x80] sm:$0xf]  ;;  %v5691_v13 = vor.u32 %v5690_v42, %v5686_v63  ;;  %v5704_v54 = vshll.u32 %v5376_v58, 16  ;;  %v9855_v43 = vpop.f32.mrf.mxu0 }
 0x533   : > { %v6109_v39 = vld [vmem:[#allocation3 + $0x84] sm:$0xf]  ;;  %v13436_v24 = vld [vmem:[#allocation4 + $0x3ac] ss:$36 sps:$4 sm:$0xff]   ;;  %6071 = vst [vmem:[#allocation4 + $0x41c] sm:$0xf] %v5987_v47  ;;  %v6242_v31 = vsel %vm16060_vm4, %v6240_v21, %v6241_v25  ;;  %v17304_v38 = vadd.f32 %v9855_v43, %v17260_v55 }
 0x534   : > { %v13438_v28 = vld [vmem:[#allocation4 + $0x3a8] ss:$36 sps:$4 sm:$0xff]   ;;  %v5687_v34 = vsel %vm16032_vm0, %v5682_v56, %v5686_v63  ;;  %6326 = vst [vmem:[#allocation4 + $0x420] sm:$0xf] %v6242_v31  ;;  %v5696_v4 = vrot.slane %v5694_v30, 5  ;;  %v5700_v14 = vrot.slane %v5698_v6, 4  ;;  %9780 = vmatprep.mubr.bf16.mxu1 %v13436_v24  ;;  %v9857_v5 = vpop.f32.mrf.mxu0 }
 0x535   : > { %v5708_v26 = vshrl.u32 %v5376_v58, 16  ;;  %v17283_v9 = vld [vmem:[#allocation3 + $0x88] sm:$0xf]  ;;  %v13441_v52 = vld [vmem:[#allocation4 + $0x3b0] ss:$36 sps:$4 sm:$0xff]   ;;  %v5692_v2 = vrot.slane %v5691_v13, 4  ;;  %9781 = vmatmul.mubr.bf16.gmra.mxu1 %v13438_v28 }
 0x536   : > { %v13443_v37 = vld [vmem:[#allocation4 + $0x3b4] ss:$36 sps:$4 sm:$0xff]   ;;  %5813 = vst [vmem:[#allocation4 + $0x418] sm:$0xf] %v5687_v34  ;;  %v5701_v57 = vor.u32 %v5700_v14, %v5696_v4  ;;  %v5706_v61 = vrot.slane %v5704_v54, 5  ;;  %v5988_v0 = vrot.slane %v5986_v40, 4 }
 0x537   : > { %v5989_v41 = vrot.slane %v5851_v62, 5  ;;  %v5377_v18 = vld [vmem:[#allocation3 + $0x84] sm:$0xf]  ;;  %9957 = vmatprep.mubr.bf16.mxu0 %v13443_v37  ;;  %v5697_v48 = vsel %vm16032_vm0, %v5692_v2, %v5696_v4  ;;  %v5992_v10 = vrot.slane %v17277_v45, 5  ;;  %v6243_v12 = vrot.slane %v6241_v25, 4  ;;  %v9858_v62 = vpop.f32.mrf.mxu0 }
 0x538   : > { %v6244_v29 = vrot.slane %v6109_v39, 5  ;;  %v5378_v36 = vld [vmem:[#allocation3 + $0x88] sm:$0xf]  ;;  %9958 = vmatmul.mubr.bf16.gmra.mxu0 %v13441_v52  ;;  %v5702_v60 = vrot.slane %v5701_v57, 4  ;;  %5814 = vst [vmem:[#allocation4 + $0x43c] sm:$0xf] %v5697_v48 }
 0x539   : > { %v5990_v20 = vsel %vm16060_vm4, %v5988_v0, %v5989_v41  ;;  %v5991_v46 = vrot.slane %v5989_v41, 4  ;;  %v6247_v59 = vrot.slane %v17283_v9, 5  ;;  %v5710_v8 = vrot.slane %v5708_v26, 4  ;;  %v5853_v53 = vld [vmem:[#allocation3 + $0x84] sm:$0xf]  ;;  %v9860_v55 = vpop.f32.mrf.mxu0 }
 0x53a   : > { %6072 = vst [vmem:[#allocation4 + $0x440] sm:$0xf] %v5990_v20  ;;  %v6245_v32 = vsel %vm16060_vm4, %v6243_v12, %v6244_v29  ;;  %v6246_v51 = vrot.slane %v6244_v29, 4  ;;  %v5714_v23 = vshll.u32 %v5377_v18, 16  ;;  %v17293_v3 = vld [vmem:[#allocation3 + $0x88] sm:$0xf]  ;;  %v5707_v49 = vsel %vm16032_vm0, %v5702_v60, %v5706_v61 }
 0x53b   : > { %v5993_v22 = vsel %vm16060_vm4, %v5991_v46, %v5992_v10  ;;  %6327 = vst [vmem:[#allocation4 + $0x444] sm:$0xf] %v6245_v32  ;;  %v5718_v33 = vshrl.u32 %v5377_v18, 16  ;;  %v5724_v63 = vshll.u32 %v5378_v36, 16  ;;  %v6111_v40 = vld [vmem:[#allocation3 + $0x8c] sm:$0xf]  ;;  %v5711_v44 = vor.u32 %v5710_v8, %v5706_v61 }
 0x53c   : > { %v17299_v15 = vld [vmem:[#allocation3 + $0x90] sm:$0xf]  ;;  %v13450_v27 = vld [vmem:[#allocation4 + $0x3f8] ss:$36 sps:$4 sm:$0xff]   ;;  %5815 = vst [vmem:[#allocation4 + $0x460] sm:$0xf] %v5707_v49  ;;  %v6248_v19 = vsel %vm16060_vm4, %v6246_v51, %v6247_v59  ;;  %v17321_v60 = vadd.f32 %v9858_v62, %v17267_v17 }
 0x53d   : > { %v13452_v1 = vld [vmem:[#allocation4 + $0x3fc] ss:$36 sps:$4 sm:$0xff]   ;;  %6073 = vst [vmem:[#allocation4 + $0x464] sm:$0xf] %v5993_v22  ;;  %v5716_v58 = vrot.slane %v5714_v23, 5  ;;  %v5720_v42 = vrot.slane %v5718_v33, 4 }
 0x53e   : > { %v13445_v21 = vld [vmem:[#allocation4 + $0x3f4] ss:$36 sps:$4 sm:$0xff]   ;;  %6328 = vst [vmem:[#allocation4 + $0x468] sm:$0xf] %v6248_v19  ;;  %vm6887_vm11 = vcmask 1045508   ;;  %9965 = vmatprep.mubr.bf16.mxu0 %v13452_v1  ;;  %v5712_v11 = vrot.slane %v5711_v44, 4 }
 0x53f   : > { %v13447_v25 = vld [vmem:[#allocation4 + $0x3f0] ss:$36 sps:$4 sm:$0xff]   ;;  %v5726_v56 = vrot.slane %v5724_v63, 5  ;;  %v5728_v47 = vshrl.u32 %v5378_v36, 16  ;;  %v5994_v30 = vrot.slane %v5992_v10, 4  ;;  %9788 = vmatprep.mubr.bf16.mxu1 %v13445_v21  ;;  %v5721_v45 = vor.u32 %v5720_v42, %v5716_v58  ;;  %vm17333_vm2 = vmor %vm4495_vm7, %vm6887_vm11 }
 0x540   : > { %v5379_v6 = vld [vmem:[#allocation3 + $0x8c] sm:$0xf]  ;;  %v5995_v39 = vrot.slane %v5853_v53, 5  ;;  %v5998_v24 = vrot.slane %v17293_v3, 5  ;;  %v6249_v28 = vrot.slane %v6247_v59, 4  ;;  %9789 = vmatmul.mubr.bf16.gmra.mxu1 %v13447_v25  ;;  %v5717_v31 = vsel %vm16032_vm0, %v5712_v11, %v5716_v58  ;;  %9966 = vmatmul.mubr.bf16.gmra.mxu0 %v13450_v27 }
 0x541   : > { %v6250_v13 = vrot.slane %v6111_v40, 5  ;;  %v6253_v54 = vrot.slane %v17299_v15, 5  ;;  %v5730_v34 = vrot.slane %v5728_v47, 4  ;;  %v5722_v4 = vrot.slane %v5721_v45, 4  ;;  %5816 = vst [vmem:[#allocation4 + $0x484] sm:$0xf] %v5717_v31 }
 0x542   : > { %v5996_v14 = vsel %vm16060_vm4, %v5994_v30, %v5995_v39  ;;  %v5997_v26 = vrot.slane %v5995_v39, 4  ;;  %v5734_v9 = vshll.u32 %v5379_v6, 16  ;;  %v6333_v52 = vld [vmem:[#allocation3 + $0x8] sm:$0xe]  ;;  %v6334_v37 = vld [vmem:[#allocation3 + $0xc] sm:$0xf] }
 0x543   : > { %6074 = vst [vmem:[#allocation4 + $0x488] sm:$0xf] %v5996_v14  ;;  %v6251_v2 = vsel %vm16060_vm4, %v6249_v28, %v6250_v13  ;;  %v6252_v57 = vrot.slane %v6250_v13, 4  ;;  %v5380_v61 = vld [vmem:[#allocation3 + $0x90] sm:$0x1]  ;;  %v5731_v0 = vor.u32 %v5730_v34, %v5726_v56  ;;  %v5738_v41 = vshrl.u32 %v5379_v6, 16 }
 0x544   : > { %v6335_v18 = vld [vmem:[#allocation3 + $0x10] sm:$0xf]  ;;  %v13454_v48 = vld [vmem:[#allocation4 + $0x43c] ss:$36 sps:$4 sm:$0xff]   ;;  %v5727_v12 = vsel %vm16032_vm0, %v5722_v4, %v5726_v56  ;;  %v5999_v29 = vsel %vm16060_vm4, %v5997_v26, %v5998_v24  ;;  %6329 = vst [vmem:[#allocation4 + $0x48c] sm:$0xf] %v6251_v2 }
 0x545   : > { %v13456_v10 = vld [vmem:[#allocation4 + $0x438] ss:$36 sps:$4 sm:$0xff]   ;;  %v5736_v36 = vrot.slane %v5734_v9, 5  ;;  %v13459_v20 = vld [vmem:[#allocation4 + $0x440] ss:$36 sps:$4 sm:$0xff]   ;;  %v6254_v59 = vsel %vm16060_vm4, %v6252_v57, %v6253_v54  ;;  %v5732_v43 = vrot.slane %v5731_v0, 4  ;;  %9796 = vmatprep.mubr.bf16.mxu1 %v13454_v48 }
 0x546   : > { %v13461_v46 = vld [vmem:[#allocation4 + $0x444] ss:$36 sps:$4 sm:$0xff]   ;;  %5817 = vst [vmem:[#allocation4 + $0x4a8] sm:$0xf] %v5727_v12  ;;  %6075 = vst [vmem:[#allocation4 + $0x4ac] sm:$0xf] %v5999_v29 }
 0x547   : > { %6330 = vst [vmem:[#allocation4 + $0x4b0] sm:$0xf] %v6254_v59  ;;  %v5740_v32 = vrot.slane %v5738_v41, 4  ;;  %v5744_v51 = vshll.u32 %v5380_v61, 16  ;;  %vm6370_vm15 = vsmask.f32 2304  ;;  %9973 = vmatprep.mubr.bf16.mxu0 %v13461_v46  ;;  %v5737_v17 = vsel %vm16032_vm0, %v5732_v43, %v5736_v36 }
 0x548   : > { %vm6371_vm1 = vsmask.f32 6416  ;;  %v6813_v8 = vld [vmem:[#allocation3 + $0x8] sm:$0xc]  ;;  %v6374_v23 = vshrl.u32 %v6333_v52, 16  ;;  %v6377_v53 = vshll.u32 %v6333_v52, 16  ;;  %9797 = vmatmul.mubr.bf16.gmra.mxu1 %v13456_v10  ;;  %9974 = vmatmul.mubr.bf16.gmra.mxu0 %v13459_v20 }
 0x549   : > { %v6383_v49 = vshrl.u32 %v6334_v37, 16  ;;  %v6814_v22 = vld [vmem:[#allocation3 + $0xc] sm:$0xf]  ;;  %v5741_v33 = vor.u32 %v5740_v32, %v5736_v36  ;;  %v5746_v63 = vrot.slane %v5744_v51, 5  ;;  %5818 = vst [vmem:[#allocation4 + $0x4cc] sm:$0xf] %v5737_v17  ;;  %vm17339_vm5 = vmor %vm6370_vm15, %vm6371_vm1 }
 0x54a   : > { %v6386_v40 = vshll.u32 %v6334_v37, 16  ;;  %v6393_v5 = vshrl.u32 %v6335_v18, 16  ;;  %v17329_v27 = vld [vmem:[#allocation3 + $0x10] sm:$0xf]  ;;  %v6376_v1 = vrot.slane %v6374_v23, 5  ;;  %v6379_v19 = vrot.slane %v6377_v53, 6 }
 0x54b   : > { %v6385_v44 = vrot.slane %v6383_v49, 5  ;;  %v6396_v58 = vshll.u32 %v6335_v18, 16  ;;  %v5855_v21 = vld [vmem:[#allocation3 + $0x8c] sm:$0xf]  ;;  %v5856_v25 = vld [vmem:[#allocation3 + $0x90] sm:$0x1] }
 0x54c   : > { %v5742_v62 = vrot.slane %v5741_v33, 4  ;;  %v6388_v11 = vrot.slane %v6386_v40, 6  ;;  %v6395_v56 = vrot.slane %v6393_v5, 5  ;;  %v6113_v47 = vld [vmem:[#allocation3 + $0x94] sm:$0xf]  ;;  %v6380_v6 = vor.u32 %v6379_v19, %v6376_v1 }
 0x54d   : > { %v6398_v45 = vrot.slane %v6396_v58, 6  ;;  %v12416_v39 = vrot.slane %v6813_v8, 10  ;;  %v6891_v28 = vrot.slane %v6814_v22, 6  ;;  %v6114_v55 = vld [vmem:[#allocation3 + $0x98] sm:$0x1]  ;;  %v6894_v14 = vrot.slane %v17329_v27, 6  ;;  %v9686_v22 = vpop.f32.mrf.mxu1 }
 0x54e   : > { %v13463_v31 = vld [vmem:[#allocation4 + $0x484] ss:$36 sps:$4 sm:$0xff]   ;;  %v5747_v34 = vsel %vm16032_vm0, %v5742_v62, %v5746_v63  ;;  %v6389_v4 = vor.u32 %v6388_v11, %v6385_v44  ;;  %v7070_v26 = vld [vmem:[#allocation3 + $0x10] sm:$0xc]  ;;  %v7071_v9 = vld [vmem:[#allocation3 + $0x14] sm:$0xf] }
 0x54f   : > { %v13465_v13 = vld [vmem:[#allocation4 + $0x480] ss:$36 sps:$4 sm:$0xff]   ;;  %v13472_v52 = vld [vmem:[#allocation4 + $0x48c] ss:$36 sps:$4 sm:$0xff]   ;;  %5819 = vst [vmem:[#allocation4 + $0x4f0] sm:$0xf] %v5747_v34  ;;  %v17346_v2 = vor.u32 %v6398_v45, %v6395_v56  ;;  %v6892_v57 = vsel %vm17333_vm2, %v12416_v39, %v6891_v28  ;;  %9804 = vmatprep.mubr.bf16.mxu1 %v13463_v31 }
 0x550   : > { %v6381_v37 = vrot.slane %v6380_v6, 4  ;;  %v6000_v61 = vrot.slane %v5998_v24, 4  ;;  %v7325_v0 = vld [vmem:[#allocation3 + $0x10] sm:$0xc]  ;;  %v6391_v41 = vrot.slane %v6389_v4, 4  ;;  %v6893_v18 = vrot.slane %v6891_v28, 4  ;;  %9981 = vmatprep.mubr.bf16.mxu0 %v13472_v52  ;;  %9805 = vmatmul.mubr.bf16.gmra.mxu1 %v13465_v13 }
 0x551   : > { %v13470_v35 = vld [vmem:[#allocation4 + $0x488] ss:$36 sps:$4 sm:$0xff]   ;;  %7034 = vst [vmem:[#allocation4 + $0x14] sm:$0xf] %v6892_v57  ;;  %v6001_v48 = vrot.slane %v5855_v21, 5  ;;  %v6004_v10 = vrot.slane %v5856_v25, 5  ;;  %v9688_v25 = vpop.f32.mrf.mxu1 }
 0x552   : > { %v6390_v12 = vsel %vm17339_vm5, %v6381_v37, %v6389_v4  ;;  %v6255_v29 = vrot.slane %v6253_v54, 4  ;;  %v6256_v36 = vrot.slane %v6113_v47, 5  ;;  %v6259_v20 = vrot.slane %v6114_v55, 5  ;;  %v17356_v46 = vld [vmem:[#allocation3 + $0x18] sm:$0xf]  ;;  %9982 = vmatmul.mubr.bf16.gmra.mxu0 %v13470_v35  ;;  %v9863_v55 = vpop.f32.mrf.mxu0 }
 0x553   : > { %v6400_v3 = vsel %vm17339_vm5, %v6391_v41, %v17346_v2  ;;  %6777 = vst [vmem:[#allocation4 + $0x10] sm:$0xf] %v6390_v12  ;;  %v6895_v24 = vsel %vm17333_vm2, %v6893_v18, %v6894_v14  ;;  %v6002_v59 = vsel %vm16060_vm4, %v6000_v61, %v6001_v48  ;;  %v6003_v43 = vrot.slane %v6001_v48, 4  ;;  %v7326_v15 = vld [vmem:[#allocation3 + $0x14] sm:$0xf]  ;;  %v9689_v28 = vpop.f32.mrf.mxu1 }
 0x554   : > { %6778 = vst [vmem:[#allocation4 + $0x34] sm:$0xf] %v6400_v3  ;;  %7035 = vst [vmem:[#allocation4 + $0x38] sm:$0xf] %v6895_v24  ;;  %v6257_v54 = vsel %vm16060_vm4, %v6255_v29, %v6256_v36  ;;  %v6258_v32 = vrot.slane %v6256_v36, 4  ;;  %v12417_v51 = vrot.slane %v7070_v26, 10  ;;  %v9865_v35 = vpop.f32.mrf.mxu0 }
 0x555   : > { %6076 = vst [vmem:[#allocation4 + $0x4d0] sm:$0xf] %v6002_v59  ;;  %v7146_v8 = vrot.slane %v7071_v9, 6  ;;  %v6005_v17 = vsel %vm16060_vm4, %v6003_v43, %v6004_v10  ;;  %6331 = vst [vmem:[#allocation4 + $0x4d4] sm:$0xf] %v6257_v54  ;;  %v7149_v23 = vrot.slane %v17356_v46, 6  ;;  %v9691_v61 = vpop.f32.mrf.mxu1 }
 0x556   : > { %v7363_v53 = vshrl.u32 %v7325_v0, 16  ;;  %v7366_v49 = vshll.u32 %v7325_v0, 16  ;;  %6077 = vst [vmem:[#allocation4 + $0x4f4] sm:$0xf] %v6005_v17  ;;  %v6260_v33 = vsel %vm16060_vm4, %v6258_v32, %v6259_v20  ;;  %v7327_v5 = vld [vmem:[#allocation3 + $0x18] sm:$0xf]  ;;  %v17383_v0 = vadd.f32 %v9863_v55, %v9686_v22 }
 0x557   : > { %v7147_v63 = vsel %vm17333_vm2, %v12417_v51, %v7146_v8  ;;  %v7148_v40 = vrot.slane %v7146_v8, 4  ;;  %v7372_v1 = vshrl.u32 %v7326_v15, 16  ;;  %v6336_v19 = vld [vmem:[#allocation3 + $0x14] sm:$0xf]  ;;  %6332 = vst [vmem:[#allocation4 + $0x4f8] sm:$0xf] %v6260_v33  ;;  %v9694_v25 = vpop.f32.mrf.mxu1 }
 0x558   : > { %v13473_v44 = vld [vmem:[#allocation4 + $0x4cc] ss:$36 sps:$4 sm:$0xff]   ;;  %7289 = vst [vmem:[#allocation4 + $0x18] sm:$0xf] %v7147_v63  ;;  %v7365_v58 = vrot.slane %v7363_v53, 6  ;;  %v7368_v11 = vrot.slane %v7366_v49, 7 }
 0x559   : > { %v6337_v21 = vld [vmem:[#allocation3 + $0x18] sm:$0xf]  ;;  %v13477_v62 = vld [vmem:[#allocation4 + $0x4c8] ss:$36 sps:$4 sm:$0xff]   ;;  %v7150_v50 = vsel %vm17333_vm2, %v7148_v40, %v7149_v23  ;;  %v7374_v56 = vrot.slane %v7372_v1, 6  ;;  %v7375_v47 = vshll.u32 %v7326_v15, 16  ;;  %9812 = vmatprep.mubr.bf16.mxu1 %v13473_v44 }
 0x55a   : > { %7290 = vst [vmem:[#allocation4 + $0x3c] sm:$0xf] %v7150_v50  ;;  %v7382_v6 = vshrl.u32 %v7327_v5, 16  ;;  %v7385_v45 = vshll.u32 %v7327_v5, 16  ;;  %v6403_v39 = vshrl.u32 %v6336_v19, 16  ;;  %v7369_v31 = vor.u32 %v7368_v11, %v7365_v58  ;;  %9813 = vmatmul.mubr.bf16.gmra.mxu1 %v13477_v62  ;;  %v13506_v11 = vld [vmem:[%s18995_s3 + $0x230] sm:$0xff]  }
 0x55b   : > { %v7377_v13 = vrot.slane %v7375_v47, 7  ;;  %v6406_v34 = vshll.u32 %v6336_v19, 16  ;;  %v6413_v4 = vshrl.u32 %v6337_v21, 16  ;;  %v6816_v26 = vld [vmem:[#allocation3 + $0x14] sm:$0xf]  ;;  %v6401_v57 = vrot.slane %v17346_v2, 4  ;;  %v9866_v2 = vpop.f32.mrf.mxu0 }
 0x55c   : > { %v17380_v9 = vld [vmem:[#allocation3 + $0x18] sm:$0xf]  ;;  %v7384_v37 = vrot.slane %v7382_v6, 6  ;;  %v7370_v41 = vrot.slane %v7369_v31, 4  ;;  %v7387_v48 = vrot.slane %v7385_v45, 7  ;;  %v6405_v10 = vrot.slane %v6403_v39, 5 }
 0x55d   : > { %v13480_v52 = vld [vmem:[#allocation4 + $0x14] ss:$36 sps:$4 sm:$0xff]   ;;  %v7378_v18 = vor.u32 %v7377_v13, %v7374_v56  ;;  %v6408_v29 = vrot.slane %v6406_v34, 6  ;;  %v6415_v36 = vrot.slane %v6413_v4, 5  ;;  %v6416_v20 = vshll.u32 %v6337_v21, 16 }
 0x55e   : > { %v7073_v12 = vld [vmem:[#allocation3 + $0x1c] sm:$0xf]  ;;  %10030 = vmatprep.mubr.bf16.mxu1 %v13480_v52  ;;  %v6896_v3 = vrot.slane %v6894_v14, 4  ;;  %v17387_v24 = vld [vmem:[#allocation3 + $0x20] sm:$0xf]  ;;  %v17391_v54 = vor.u32 %v7387_v48, %v7384_v37  ;;  %v17393_v51 = vadd.f32 %v9866_v2, %v9689_v28  ;;  %v6897_v49 = vrot.slane %v6816_v26, 6  ;;  %v9868_v14 = vpop.f32.mrf.mxu0  ;;  %v9696_v28 = vpop.f32.mrf.mxu1 }
 0x55f   : > { %v13483_v59 = vld [vmem:[#allocation4 + $0x4d4] ss:$36 sps:$4 sm:$0xff]   ;;  %v7379_v43 = vsel %vm16147_vm14, %v7370_v41, %v7378_v18  ;;  %v7380_v15 = vrot.slane %v7378_v18, 4  ;;  %v6409_v17 = vor.u32 %v6408_v29, %v6405_v10  ;;  %v6418_v53 = vrot.slane %v6416_v20, 6  ;;  %v7329_v5 = vld [vmem:[#allocation3 + $0x20] sm:$0xf] }
 0x560   : > { %v7328_v32 = vld [vmem:[#allocation3 + $0x1c] sm:$0xf]  ;;  %v13481_v8 = vld [vmem:[#allocation4 + $0x4d0] ss:$36 sps:$4 sm:$0xff]   ;;  %7766 = vst [vmem:[#allocation4 + $0x1c] sm:$0xf] %v7379_v43  ;;  %9989 = vmatprep.mubr.bf16.mxu0 %v13483_v59  ;;  %v6898_v58 = vsel %vm17333_vm2, %v6896_v3, %v6897_v49  ;;  %v9697_v35 = vpop.f32.mrf.mxu1  ;;  %v9871_v43 = vpop.f32.mrf.mxu0 }
 0x561   : > { %v6900_v27 = vrot.slane %v17380_v9, 6  ;;  %v7389_v22 = vsel %vm16147_vm14, %v7380_v15, %v17391_v54  ;;  %v7151_v33 = vrot.slane %v7149_v23, 4  ;;  %v7152_v63 = vrot.slane %v7073_v12, 6  ;;  %9990 = vmatmul.mubr.bf16.gmra.mxu0 %v13481_v8  ;;  %v6338_v21 = vld [vmem:[#allocation3 + $0x1c] sm:$0xf]  ;;  %v13972_v26 = vld [vmem:[%s18995_s3 + $0x238] sm:$0xff]  }
 0x562   : > { %v7155_v40 = vrot.slane %v17387_v24, 6  ;;  %7767 = vst [vmem:[#allocation4 + $0x40] sm:$0xf] %v7389_v22  ;;  %v6410_v1 = vsel %vm17339_vm5, %v6401_v57, %v6409_v17  ;;  %v6411_v19 = vrot.slane %v6409_v17, 4  ;;  %v17404_v44 = vor.u32 %v6418_v53, %v6415_v36  ;;  %v13478_v62 = vld [vmem:[#allocation4 + $0x10] ss:$36 sps:$4 sm:$0xff]   ;;  %v9699_v59 = vpop.f32.mrf.mxu1 }
 0x563   : > { %6779 = vst [vmem:[#allocation4 + $0x58] sm:$0xf] %v6410_v1  ;;  %v6899_v46 = vrot.slane %v6897_v49, 4  ;;  %7036 = vst [vmem:[#allocation4 + $0x5c] sm:$0xf] %v6898_v58  ;;  %v7153_v23 = vsel %vm17333_vm2, %v7151_v33, %v7152_v63  ;;  %v7154_v50 = vrot.slane %v7152_v63, 4  ;;  %10031 = vmatmul.mubr.bf16.vlgmr.msra.gmra.mxu1 %v13478_v62  ;;  %v17434_v17 = vadd.f32 %v9871_v43, %v9694_v25  ;;  %v9873_v63 = vpop.f32.mrf.mxu0 }
 0x564   : > { %v6420_v56 = vsel %vm17339_vm5, %v6411_v19, %v17404_v44  ;;  %7291 = vst [vmem:[#allocation4 + $0x60] sm:$0xf] %v7153_v23  ;;  %v7392_v47 = vshrl.u32 %v7328_v32, 16  ;;  %v7395_v6 = vshll.u32 %v7328_v32, 16  ;;  %v7402_v45 = vshrl.u32 %v7329_v5, 16  ;;  %13176 = vmatpush3.bf16.msra.mxu1 %v13972_v26  ;;  %v13519_v12 = vld [vmem:[%s18995_s3 + $0x228] sm:$0xff]  }
 0x565   : > { %v6339_v39 = vld [vmem:[#allocation3 + $0x20] sm:$0xf]  ;;  %6780 = vst [vmem:[#allocation4 + $0x7c] sm:$0xf] %v6420_v56  ;;  %v6901_v55 = vsel %vm17333_vm2, %v6899_v46, %v6900_v27  ;;  %v7156_v31 = vsel %vm17333_vm2, %v7154_v50, %v7155_v40  ;;  %v7390_v13 = vrot.slane %v17391_v54, 4  ;;  %v7405_v34 = vshll.u32 %v7329_v5, 16  ;;  %13177 = vmatprep.subr.bf16.mxu1 %v13506_v11 }
 0x566   : > { %v6818_v4 = vld [vmem:[#allocation3 + $0x1c] sm:$0xf]  ;;  %7037 = vst [vmem:[#allocation4 + $0x80] sm:$0xf] %v6901_v55  ;;  %7292 = vst [vmem:[#allocation4 + $0x84] sm:$0xf] %v7156_v31 }
 0x567   : > { %v7394_v9 = vrot.slane %v7392_v47, 6  ;;  %v7397_v52 = vrot.slane %v7395_v6, 7  ;;  %v7404_v37 = vrot.slane %v7402_v45, 6  ;;  %v6423_v57 = vshrl.u32 %v6338_v21, 16  ;;  %v17426_v61 = vld [vmem:[#allocation3 + $0x20] sm:$0xf]  ;;  %v17476_v43 = vpop.f32.mrf.mxu1 }
 0x568   : > { %v7407_v41 = vrot.slane %v7405_v34, 7  ;;  %v6426_v18 = vshll.u32 %v6338_v21, 16  ;;  %v6433_v48 = vshrl.u32 %v6339_v39, 16  ;;  %v6436_v10 = vshll.u32 %v6339_v39, 16  ;;  %v7075_v2 = vld [vmem:[#allocation3 + $0x24] sm:$0xf]  ;;  %13178 = vmatpush3.bf16.msra.mxu1 %v13506_v11  ;;  %v9874_v11 = vpop.f32.mrf.mxu0 }
 0x569   : > { %v7398_v29 = vor.u32 %v7397_v52, %v7394_v9  ;;  %v6421_v36 = vrot.slane %v17404_v44, 4  ;;  %v6425_v20 = vrot.slane %v6423_v57, 5  ;;  %v6903_v3 = vrot.slane %v6818_v4, 6  ;;  %v13488_v15 = vld [vmem:[#allocation4 + $0x1c] ss:$36 sps:$4 sm:$0xff]   ;;  %13179 = vmatprep.subr.bf16.mxu1 %v13519_v12  ;;  %v13532_v58 = vld [vmem:[%s18995_s3 + $0x220] sm:$0xff]  }
 0x56a   : > { %v17432_v54 = vor.u32 %v7407_v41, %v7404_v37  ;;  %v6428_v32 = vrot.slane %v6426_v18, 6  ;;  %v6902_v8 = vrot.slane %v6900_v27, 4  ;;  %v13486_v53 = vld [vmem:[#allocation4 + $0x18] ss:$36 sps:$4 sm:$0xff]   ;;  %v6435_v22 = vrot.slane %v6433_v48, 5  ;;  %10207 = vmatprep.mubr.bf16.mxu0 %v13488_v15  ;;  %v13548_v37 = vld [vmem:[%s18995_s3 + $0x218] sm:$0xff]  }
 0x56b   : > { %v7399_v49 = vsel %vm16147_vm14, %v7390_v13, %v7398_v29  ;;  %v7400_v14 = vrot.slane %v7398_v29, 4  ;;  %v6438_v33 = vrot.slane %v6436_v10, 6  ;;  %v6905_v19 = vrot.slane %v6903_v3, 4  ;;  %v17441_v44 = vld [vmem:[#allocation3 + $0x28] sm:$0xf]  ;;  %10208 = vmatmul.mubr.bf16.vlgmr.msra.gmra.mxu0 %v13486_v53  ;;  %v9876_v13 = vpop.f32.mrf.mxu0 }
 0x56c   : > { %7768 = vst [vmem:[#allocation4 + $0x64] sm:$0xf] %v7399_v49  ;;  %v6429_v5 = vor.u32 %v6428_v32, %v6425_v20  ;;  %v6904_v1 = vsel %vm17333_vm2, %v6902_v8, %v6903_v3  ;;  %v6906_v27 = vrot.slane %v17426_v61, 6  ;;  %v7157_v62 = vrot.slane %v7155_v40, 4  ;;  %v7330_v23 = vld [vmem:[#allocation3 + $0x24] sm:$0xf]  ;;  %13180 = vmatpush3.bf16.msra.mxu1 %v13519_v12 }
 0x56d   : > { %v7409_v21 = vsel %vm16147_vm14, %v7400_v14, %v17432_v54  ;;  %v17449_v25 = vor.u32 %v6438_v33, %v6435_v22  ;;  %7038 = vst [vmem:[#allocation4 + $0xa4] sm:$0xf] %v6904_v1  ;;  %v7158_v46 = vrot.slane %v7075_v2, 6  ;;  %v7331_v50 = vld [vmem:[#allocation3 + $0x28] sm:$0xf]  ;;  %v17459_v28 = vadd.f32 %v9874_v11, %v9697_v35  ;;  %13181 = vmatprep.subr.bf16.mxu1 %v13532_v58  ;;  %v13564_v22 = vld [vmem:[%s18995_s3 + $0x210] sm:$0xff]  }
 0x56e   : > { %v13492_v56 = vld [vmem:[#allocation4 + $0x5c] ss:$36 sps:$4 sm:$0xff]   ;;  %7769 = vst [vmem:[#allocation4 + $0x88] sm:$0xf] %v7409_v21  ;;  %v6430_v47 = vsel %vm17339_vm5, %v6421_v36, %v6429_v5  ;;  %v6431_v6 = vrot.slane %v6429_v5, 4  ;;  %v6907_v45 = vsel %vm17333_vm2, %v6905_v19, %v6906_v27  ;;  %v7161_v31 = vrot.slane %v17441_v44, 6  ;;  %v9704_v19 = vpop.f32.mrf.mxu1 }
 0x56f   : > { %v6340_v39 = vld [vmem:[#allocation3 + $0x24] sm:$0xf]  ;;  %v13490_v24 = vld [vmem:[#allocation4 + $0x58] ss:$36 sps:$4 sm:$0xff]   ;;  %6781 = vst [vmem:[#allocation4 + $0xa0] sm:$0xf] %v6430_v47  ;;  %v7159_v40 = vsel %vm17333_vm2, %v7157_v62, %v7158_v46  ;;  %10038 = vmatprep.mubr.bf16.mxu1 %v13492_v56 }
 0x570   : > { %7039 = vst [vmem:[#allocation4 + $0xc8] sm:$0xf] %v6907_v45  ;;  %v7160_v55 = vrot.slane %v7158_v46, 4  ;;  %v6440_v34 = vsel %vm17339_vm5, %v6431_v6, %v17449_v25  ;;  %7293 = vst [vmem:[#allocation4 + $0xa8] sm:$0xf] %v7159_v40  ;;  %v7412_v4 = vshrl.u32 %v7330_v23, 16  ;;  %10039 = vmatmul.mubr.bf16.gmra.mxu1 %v13490_v24  ;;  %v17494_v61 = vpop.f32.mrf.mxu1 }
 0x571   : > { %v7415_v26 = vshll.u32 %v7330_v23, 16  ;;  %v7422_v9 = vshrl.u32 %v7331_v50, 16  ;;  %v6341_v52 = vld [vmem:[#allocation3 + $0x28] sm:$0xf]  ;;  %6782 = vst [vmem:[#allocation4 + $0xc4] sm:$0xf] %v6440_v34  ;;  %13182 = vmatpush3.bf16.msra.mxu1 %v13532_v58 }
 0x572   : > { %v7162_v57 = vsel %vm17333_vm2, %v7160_v55, %v7161_v31  ;;  %v7425_v35 = vshll.u32 %v7331_v50, 16  ;;  %v6443_v41 = vshrl.u32 %v6340_v39, 16  ;;  %v6820_v18 = vld [vmem:[#allocation3 + $0x24] sm:$0xf]  ;;  %v7414_v48 = vrot.slane %v7412_v4, 6  ;;  %13183 = vmatprep.subr.bf16.mxu1 %v13548_v37 }
 0x573   : > { %7294 = vst [vmem:[#allocation4 + $0xcc] sm:$0xf] %v7162_v57  ;;  %v7417_v10 = vrot.slane %v7415_v26, 7  ;;  %v7424_v12 = vrot.slane %v7422_v9, 6  ;;  %v6446_v29 = vshll.u32 %v6340_v39, 16  ;;  %v6453_v2 = vshrl.u32 %v6341_v52, 16 }
 0x574   : > { %v17474_v36 = vld [vmem:[#allocation3 + $0x28] sm:$0xf]  ;;  %v7427_v20 = vrot.slane %v7425_v35, 7  ;;  %v6445_v3 = vrot.slane %v6443_v41, 5  ;;  %v6456_v59 = vshll.u32 %v6341_v52, 16  ;;  %v7410_v15 = vrot.slane %v17432_v54, 4  ;;  %v9707_v52 = vpop.f32.mrf.mxu1 }
 0x575   : > { %v7418_v32 = vor.u32 %v7417_v10, %v7414_v48  ;;  %v6448_v8 = vrot.slane %v6446_v29, 6  ;;  %v6909_v53 = vrot.slane %v6820_v18, 6  ;;  %v7077_v49 = vld [vmem:[#allocation3 + $0x2c] sm:$0xf]  ;;  %v17479_v14 = vld [vmem:[#allocation3 + $0x30] sm:$0xf]  ;;  %13184 = vmatpush3.bf16.msra.mxu1 %v13548_v37 }
 0x576   : > { %v13496_v33 = vld [vmem:[#allocation4 + $0x64] ss:$36 sps:$4 sm:$0xff]   ;;  %v17484_v63 = vor.u32 %v7427_v20, %v7424_v12  ;;  %v6441_v5 = vrot.slane %v17449_v25, 4  ;;  %v6455_v1 = vrot.slane %v6453_v2, 5  ;;  %v6908_v54 = vrot.slane %v6906_v27, 4  ;;  %v17496_v27 = vpop.f32.mrf.mxu0  ;;  %13185 = vmatprep.subr.bf16.mxu1 %v13564_v22 }
 0x577   : > { %v13494_v58 = vld [vmem:[#allocation4 + $0x60] ss:$36 sps:$4 sm:$0xff]   ;;  %v7419_v21 = vsel %vm16147_vm14, %v7410_v15, %v7418_v32  ;;  %v7420_v62 = vrot.slane %v7418_v32, 4  ;;  %v6449_v46 = vor.u32 %v6448_v8, %v6445_v3  ;;  %v6458_v23 = vrot.slane %v6456_v59, 6  ;;  %10215 = vmatprep.mubr.bf16.mxu0 %v13496_v33  ;;  %v7332_v56 = vld [vmem:[#allocation3 + $0x2c] sm:$0xf] }
 0x578   : > { %7770 = vst [vmem:[#allocation4 + $0xac] sm:$0xf] %v7419_v21  ;;  %v6910_v50 = vsel %vm17333_vm2, %v6908_v54, %v6909_v53  ;;  %v6911_v11 = vrot.slane %v6909_v53, 4  ;;  %v6912_v25 = vrot.slane %v17474_v36, 6  ;;  %v7333_v47 = vld [vmem:[#allocation3 + $0x30] sm:$0xf]  ;;  %10216 = vmatmul.mubr.bf16.gmra.mxu0 %v13494_v58  ;;  %v9881_v37 = vpop.f32.mrf.mxu0 }
 0x579   : > { %v13499_v6 = vld [vmem:[#allocation4 + $0xa4] ss:$36 sps:$4 sm:$0xff]   ;;  %v7429_v45 = vsel %vm16147_vm14, %v7420_v62, %v17484_v63  ;;  %v6450_v39 = vsel %vm17339_vm5, %v6441_v5, %v6449_v46  ;;  %v6451_v24 = vrot.slane %v6449_v46, 4  ;;  %v17503_v40 = vor.u32 %v6458_v23, %v6455_v1  ;;  %7040 = vst [vmem:[#allocation4 + $0xec] sm:$0xf] %v6910_v50  ;;  %v13577_v36 = vld [vmem:[%s18995_s3 + $0x208] sm:$0xff]   ;;  %13186 = vmatpush3.bf16.msra.mxu1 %v13564_v22 }
 0x57a   : > { %v6342_v55 = vld [vmem:[#allocation3 + $0x2c] sm:$0xf]  ;;  %v13497_v13 = vld [vmem:[#allocation4 + $0xa0] ss:$36 sps:$4 sm:$0xff]   ;;  %7771 = vst [vmem:[#allocation4 + $0xd0] sm:$0xf] %v7429_v45  ;;  %v6913_v34 = vsel %vm17333_vm2, %v6911_v11, %v6912_v25  ;;  %10046 = vmatprep.mubr.bf16.mxu1 %v13499_v6  ;;  %v9882_v29 = vpop.f32.mrf.mxu0  ;;  %13187 = vmatprep.subr.bf16.mxu1 %v13577_v36  ;;  %v17533_v45 = vadd.f32 %v17496_v27, %v17476_v43 }
 0x57b   : > { %6783 = vst [vmem:[#allocation4 + $0xe8] sm:$0xf] %v6450_v39  ;;  %v7163_v4 = vrot.slane %v7161_v31, 4  ;;  %v7164_v26 = vrot.slane %v7077_v49, 6  ;;  %v7167_v9 = vrot.slane %v17479_v14, 6  ;;  %v6460_v57 = vsel %vm17339_vm5, %v6451_v24, %v17503_v40  ;;  %10047 = vmatmul.mubr.bf16.gmra.mxu1 %v13497_v13 }
 0x57c   : > { %7041 = vst [vmem:[#allocation4 + $0x110] sm:$0xf] %v6913_v34  ;;  %v7432_v35 = vshrl.u32 %v7332_v56, 16  ;;  %v7435_v41 = vshll.u32 %v7332_v56, 16  ;;  %v7442_v18 = vshrl.u32 %v7333_v47, 16  ;;  %v7430_v10 = vrot.slane %v17484_v63, 4  ;;  %v9884_v33 = vpop.f32.mrf.mxu0 }
 0x57d   : > { %v6343_v48 = vld [vmem:[#allocation3 + $0x30] sm:$0xf]  ;;  %6784 = vst [vmem:[#allocation4 + $0x10c] sm:$0xf] %v6460_v57  ;;  %v7165_v44 = vsel %vm17333_vm2, %v7163_v4, %v7164_v26  ;;  %v7166_v31 = vrot.slane %v7164_v26, 4  ;;  %v7445_v12 = vshll.u32 %v7333_v47, 16  ;;  %v17538_v39 = vadd.f32 %v9882_v29, %v17494_v61  ;;  %13188 = vmatpush3.bf16.msra.mxu1 %v13577_v36 }
 0x57e   : > { %7295 = vst [vmem:[#allocation4 + $0xf0] sm:$0xf] %v7165_v44  ;;  %v7434_v20 = vrot.slane %v7432_v35, 6  ;;  %v7437_v3 = vrot.slane %v7435_v41, 7  ;;  %v7444_v2 = vrot.slane %v7442_v18, 6  ;;  %v6463_v59 = vshrl.u32 %v6342_v55, 16 }
 0x57f   : > { %v6822_v15 = vld [vmem:[#allocation3 + $0x2c] sm:$0xf]  ;;  %v7168_v32 = vsel %vm17333_vm2, %v7166_v31, %v7167_v9  ;;  %v7447_v8 = vrot.slane %v7445_v12, 7  ;;  %v6466_v53 = vshll.u32 %v6342_v55, 16  ;;  %v6473_v49 = vshrl.u32 %v6343_v48, 16 }
 0x580   : > { %7296 = vst [vmem:[#allocation4 + $0x114] sm:$0xf] %v7168_v32  ;;  %v7438_v63 = vor.u32 %v7437_v3, %v7434_v20  ;;  %v6465_v5 = vrot.slane %v6463_v59, 5  ;;  %v6476_v1 = vshll.u32 %v6343_v48, 16  ;;  %v17523_v54 = vld [vmem:[#allocation3 + $0x30] sm:$0xf] }
 0x581   : > { %v6914_v19 = vrot.slane %v6912_v25, 4  ;;  %v17525_v58 = vor.u32 %v7447_v8, %v7444_v2  ;;  %v6468_v22 = vrot.slane %v6466_v53, 6  ;;  %v6475_v21 = vrot.slane %v6473_v49, 5  ;;  %v7079_v46 = vld [vmem:[#allocation3 + $0x34] sm:$0xf]  ;;  %v17535_v25 = vpop.f32.mrf.mxu1 }
 0x582   : > { %v6915_v62 = vrot.slane %v6822_v15, 6  ;;  %v17527_v23 = vld [vmem:[#allocation3 + $0x38] sm:$0xf]  ;;  %v13502_v50 = vld [vmem:[#allocation4 + $0xac] ss:$36 sps:$4 sm:$0xff]   ;;  %v7439_v11 = vsel %vm16147_vm14, %v7430_v10, %v7438_v63  ;;  %v7440_v56 = vrot.slane %v7438_v63, 4 }
 0x583   : > { %v7334_v47 = vld [vmem:[#allocation3 + $0x34] sm:$0xf]  ;;  %v7335_v6 = vld [vmem:[#allocation3 + $0x38] sm:$0xf]  ;;  %v13500_v24 = vld [vmem:[#allocation4 + $0xa8] ss:$36 sps:$4 sm:$0xff]   ;;  %v6469_v13 = vor.u32 %v6468_v22, %v6465_v5  ;;  %10223 = vmatprep.mubr.bf16.mxu0 %v13502_v50  ;;  %v9712_v52 = vpop.f32.mrf.mxu1 }
 0x584   : > { %7772 = vst [vmem:[#allocation4 + $0xf4] sm:$0xf] %v7439_v11  ;;  %v6461_v55 = vrot.slane %v17503_v40, 4  ;;  %v6478_v34 = vrot.slane %v6476_v1, 6  ;;  %v6916_v4 = vsel %vm17333_vm2, %v6914_v19, %v6915_v62  ;;  %v13505_v26 = vld [vmem:[#allocation4 + $0xec] ss:$36 sps:$4 sm:$0xff]   ;;  %v7449_v43 = vsel %vm16147_vm14, %v7440_v56, %v17525_v58  ;;  %10224 = vmatmul.mubr.bf16.gmra.mxu0 %v13500_v24 }
 0x585   : > { %v6917_v27 = vrot.slane %v6915_v62, 4  ;;  %v6918_v61 = vrot.slane %v17523_v54, 6  ;;  %7042 = vst [vmem:[#allocation4 + $0x134] sm:$0xf] %v6916_v4  ;;  %v13503_v37 = vld [vmem:[#allocation4 + $0xe8] ss:$36 sps:$4 sm:$0xff]   ;;  %10054 = vmatprep.mubr.bf16.mxu1 %v13505_v26  ;;  %v17556_v10 = vpop.f32.mrf.mxu1 }
 0x586   : > { %7773 = vst [vmem:[#allocation4 + $0x118] sm:$0xf] %v7449_v43  ;;  %v6470_v40 = vsel %vm17339_vm5, %v6461_v55, %v6469_v13  ;;  %v6471_v57 = vrot.slane %v6469_v13, 4  ;;  %v17549_v35 = vor.u32 %v6478_v34, %v6475_v21  ;;  %v7169_v18 = vrot.slane %v7167_v9, 4  ;;  %v6344_v31 = vld [vmem:[#allocation3 + $0x34] sm:$0xf]  ;;  %10055 = vmatmul.mubr.bf16.gmra.mxu1 %v13503_v37 }
 0x587   : > { %6785 = vst [vmem:[#allocation4 + $0x130] sm:$0xf] %v6470_v40  ;;  %v6919_v41 = vsel %vm17333_vm2, %v6917_v27, %v6918_v61  ;;  %v7170_v48 = vrot.slane %v7079_v46, 6  ;;  %v7173_v44 = vrot.slane %v17527_v23, 6  ;;  %v7452_v29 = vshrl.u32 %v7334_v47, 16  ;;  %v9715_v59 = vpop.f32.mrf.mxu1 }
 0x588   : > { %v6480_v12 = vsel %vm17339_vm5, %v6471_v57, %v17549_v35  ;;  %7043 = vst [vmem:[#allocation4 + $0x158] sm:$0xf] %v6919_v41  ;;  %v7455_v36 = vshll.u32 %v7334_v47, 16  ;;  %v7462_v20 = vshrl.u32 %v7335_v6, 16  ;;  %v6345_v3 = vld [vmem:[#allocation3 + $0x38] sm:$0xf] }
 0x589   : > { %6786 = vst [vmem:[#allocation4 + $0x154] sm:$0xf] %v6480_v12  ;;  %v7171_v14 = vsel %vm17333_vm2, %v7169_v18, %v7170_v48  ;;  %v7172_v9 = vrot.slane %v7170_v48, 4  ;;  %v7465_v2 = vshll.u32 %v7335_v6, 16  ;;  %v7454_v15 = vrot.slane %v7452_v29, 6  ;;  %v9887_v6 = vpop.f32.mrf.mxu0 }
 0x58a   : > { %7297 = vst [vmem:[#allocation4 + $0x138] sm:$0xf] %v7171_v14  ;;  %v7457_v32 = vrot.slane %v7455_v36, 7  ;;  %v7464_v8 = vrot.slane %v7462_v20, 6  ;;  %v6483_v53 = vshrl.u32 %v6344_v31, 16  ;;  %v6486_v5 = vshll.u32 %v6344_v31, 16 }
 0x58b   : > { %v6824_v49 = vld [vmem:[#allocation3 + $0x34] sm:$0xf]  ;;  %v7174_v33 = vsel %vm17333_vm2, %v7172_v9, %v7173_v44  ;;  %v7467_v63 = vrot.slane %v7465_v2, 7  ;;  %v6493_v1 = vshrl.u32 %v6345_v3, 16  ;;  %v17565_v54 = vld [vmem:[#allocation3 + $0x38] sm:$0xf]  ;;  %v9889_v37 = vpop.f32.mrf.mxu0  ;;  %v17582_v18 = vadd.f32 %v9887_v6, %v17535_v25 }
 0x58c   : > { %7298 = vst [vmem:[#allocation4 + $0x15c] sm:$0xf] %v7174_v33  ;;  %v7450_v19 = vrot.slane %v17525_v58, 4  ;;  %v7458_v22 = vor.u32 %v7457_v32, %v7454_v15  ;;  %v6485_v21 = vrot.slane %v6483_v53, 5  ;;  %v6496_v62 = vshll.u32 %v6345_v3, 16 }
 0x58d   : > { %v7081_v46 = vld [vmem:[#allocation3 + $0x3c] sm:$0xf]  ;;  %v17568_v50 = vor.u32 %v7467_v63, %v7464_v8  ;;  %v6481_v11 = vrot.slane %v17549_v35, 4  ;;  %v6488_v56 = vrot.slane %v6486_v5, 6  ;;  %v6920_v47 = vrot.slane %v6918_v61, 4  ;;  %v9890_v20 = vpop.f32.mrf.mxu0 }
 0x58e   : > { %v13509_v23 = vld [vmem:[#allocation4 + $0xf4] ss:$36 sps:$4 sm:$0xff]   ;;  %v7459_v55 = vsel %vm16147_vm14, %v7450_v19, %v7458_v22  ;;  %v7460_v13 = vrot.slane %v7458_v22, 4  ;;  %v6495_v34 = vrot.slane %v6493_v1, 5  ;;  %v6498_v4 = vrot.slane %v6496_v62, 6 }
 0x58f   : > { %v13507_v24 = vld [vmem:[#allocation4 + $0xf0] ss:$36 sps:$4 sm:$0xff]   ;;  %10231 = vmatprep.mubr.bf16.mxu0 %v13509_v23  ;;  %7774 = vst [vmem:[#allocation4 + $0x13c] sm:$0xf] %v7459_v55  ;;  %v6489_v58 = vor.u32 %v6488_v56, %v6485_v21  ;;  %v6921_v26 = vrot.slane %v6824_v49, 6  ;;  %v6924_v43 = vrot.slane %v17565_v54, 6  ;;  %v9892_v53 = vpop.f32.mrf.mxu0  ;;  %v17612_v37 = vadd.f32 %v9890_v20, %v17556_v10 }
 0x590   : > { %v17574_v27 = vld [vmem:[#allocation3 + $0x40] sm:$0xf]  ;;  %v7175_v52 = vrot.slane %v7173_v44, 4  ;;  %v13512_v40 = vld [vmem:[#allocation4 + $0x134] ss:$36 sps:$4 sm:$0xff]   ;;  %10232 = vmatmul.mubr.bf16.gmra.mxu0 %v13507_v24  ;;  %v7469_v61 = vsel %vm16147_vm14, %v7460_v13, %v17568_v50  ;;  %v17579_v57 = vor.u32 %v6498_v4, %v6495_v34  ;;  %v7176_v35 = vrot.slane %v7081_v46, 6  ;;  %v17605_v34 = vpop.f32.mrf.mxu1 }
 0x591   : > { %v7336_v41 = vld [vmem:[#allocation3 + $0x3c] sm:$0xf]  ;;  %v13510_v48 = vld [vmem:[#allocation4 + $0x130] ss:$36 sps:$4 sm:$0xff]   ;;  %7775 = vst [vmem:[#allocation4 + $0x160] sm:$0xf] %v7469_v61  ;;  %v6490_v31 = vsel %vm17339_vm5, %v6481_v11, %v6489_v58  ;;  %v6922_v12 = vsel %vm17333_vm2, %v6920_v47, %v6921_v26  ;;  %10062 = vmatprep.mubr.bf16.mxu1 %v13512_v40 }
 0x592   : > { %v6491_v44 = vrot.slane %v6489_v58, 4  ;;  %v6923_v29 = vrot.slane %v6921_v26, 4  ;;  %v7337_v36 = vld [vmem:[#allocation3 + $0x40] sm:$0xf]  ;;  %6787 = vst [vmem:[#allocation4 + $0x178] sm:$0xf] %v6490_v31  ;;  %v7177_v3 = vsel %vm17333_vm2, %v7175_v52, %v7176_v35  ;;  %10063 = vmatmul.mubr.bf16.gmra.mxu1 %v13510_v48  ;;  %v9720_v48 = vpop.f32.mrf.mxu1 }
 0x593   : > { %7044 = vst [vmem:[#allocation4 + $0x17c] sm:$0xf] %v6922_v12  ;;  %v7178_v25 = vrot.slane %v7176_v35, 4  ;;  %v7179_v14 = vrot.slane %v17574_v27, 6  ;;  %v6346_v9 = vld [vmem:[#allocation3 + $0x3c] sm:$0xf] }
 0x594   : > { %v6500_v2 = vsel %vm17339_vm5, %v6491_v44, %v17579_v57  ;;  %v6925_v59 = vsel %vm17333_vm2, %v6923_v29, %v6924_v43  ;;  %7299 = vst [vmem:[#allocation4 + $0x180] sm:$0xf] %v7177_v3  ;;  %v7472_v15 = vshrl.u32 %v7336_v41, 16  ;;  %v7475_v32 = vshll.u32 %v7336_v41, 16  ;;  %v6347_v8 = vld [vmem:[#allocation3 + $0x40] sm:$0xf] }
 0x595   : > { %v13590_v49 = vld [vmem:[%s18995_s3 + $0x200] sm:$0xff]   ;;  %6788 = vst [vmem:[#allocation4 + $0x19c] sm:$0xf] %v6500_v2  ;;  %7045 = vst [vmem:[#allocation4 + $0x1a0] sm:$0xf] %v6925_v59  ;;  %v7180_v33 = vsel %vm17333_vm2, %v7178_v25, %v7179_v14  ;;  %v7470_v63 = vrot.slane %v17568_v50, 4  ;;  %v9721_v2 = vpop.f32.mrf.mxu1 }
 0x596   : > { %v7482_v5 = vshrl.u32 %v7337_v36, 16  ;;  %v7485_v1 = vshll.u32 %v7337_v36, 16  ;;  %7300 = vst [vmem:[#allocation4 + $0x1a4] sm:$0xf] %v7180_v33  ;;  %v7474_v54 = vrot.slane %v7472_v15, 6  ;;  %v7477_v19 = vrot.slane %v7475_v32, 7  ;;  %13189 = vmatprep.subr.bf16.mxu1 %v13590_v49 }
 0x597   : > { %v6503_v22 = vshrl.u32 %v6346_v9, 16  ;;  %v6506_v21 = vshll.u32 %v6346_v9, 16  ;;  %v6826_v62 = vld [vmem:[#allocation3 + $0x3c] sm:$0xf]  ;;  %v17602_v46 = vld [vmem:[#allocation3 + $0x40] sm:$0xf]  ;;  %13190 = vmatpush3.bf16.msra.mxu1 %v13590_v49 }
 0x598   : > { %v7484_v23 = vrot.slane %v7482_v5, 6  ;;  %v7487_v11 = vrot.slane %v7485_v1, 7  ;;  %v6513_v56 = vshrl.u32 %v6347_v8, 16  ;;  %v6516_v47 = vshll.u32 %v6347_v8, 16  ;;  %v7083_v13 = vld [vmem:[#allocation3 + $0x44] sm:$0xf]  ;;  %v9723_v5 = vpop.f32.mrf.mxu1  ;;  %v9895_v1 = vpop.f32.mrf.mxu0 }
 0x599   : > { %v7478_v6 = vor.u32 %v7477_v19, %v7474_v54  ;;  %v6501_v24 = vrot.slane %v17579_v57, 4  ;;  %v6505_v50 = vrot.slane %v6503_v22, 5  ;;  %v6508_v55 = vrot.slane %v6506_v21, 6  ;;  %v13515_v4 = vld [vmem:[#allocation4 + $0x13c] ss:$36 sps:$4 sm:$0xff]  }
 0x59a   : > { %v17607_v58 = vor.u32 %v7487_v11, %v7484_v23  ;;  %v6515_v26 = vrot.slane %v6513_v56, 5  ;;  %v6926_v27 = vrot.slane %v6924_v43, 4  ;;  %v17609_v52 = vld [vmem:[#allocation3 + $0x48] sm:$0xf]  ;;  %v13513_v40 = vld [vmem:[#allocation4 + $0x138] ss:$36 sps:$4 sm:$0xff]   ;;  %10239 = vmatprep.mubr.bf16.mxu0 %v13515_v4 }
 0x59b   : > { %v7479_v61 = vsel %vm16147_vm14, %v7470_v63, %v7478_v6  ;;  %v7480_v57 = vrot.slane %v7478_v6, 4  ;;  %v6509_v35 = vor.u32 %v6508_v55, %v6505_v50  ;;  %v6518_v41 = vrot.slane %v6516_v47, 6  ;;  %v7338_v29 = vld [vmem:[#allocation3 + $0x44] sm:$0xf]  ;;  %10240 = vmatmul.mubr.bf16.gmra.mxu0 %v13513_v40  ;;  %v7339_v9 = vld [vmem:[#allocation3 + $0x48] sm:$0xf]  ;;  %v9897_v6 = vpop.f32.mrf.mxu0 }
 0x59c   : > { %7776 = vst [vmem:[#allocation4 + $0x184] sm:$0xf] %v7479_v61  ;;  %v6927_v31 = vrot.slane %v6826_v62, 6  ;;  %v6930_v44 = vrot.slane %v17602_v46, 6  ;;  %v7181_v12 = vrot.slane %v7179_v14, 4  ;;  %v7182_v43 = vrot.slane %v7083_v13, 6 }
 0x59d   : > { %v13518_v36 = vld [vmem:[#allocation4 + $0x17c] ss:$36 sps:$4 sm:$0xff]   ;;  %v7489_v10 = vsel %vm16147_vm14, %v7480_v57, %v17607_v58  ;;  %v6510_v20 = vsel %vm17339_vm5, %v6501_v24, %v6509_v35  ;;  %v6511_v3 = vrot.slane %v6509_v35, 4  ;;  %v17622_v25 = vor.u32 %v6518_v41, %v6515_v26  ;;  %v6349_v62 = vld [vmem:[#allocation3 + $0x48] sm:$0xf]  ;;  %v9898_v57 = vpop.f32.mrf.mxu0 }
 0x59e   : > { %v13516_v59 = vld [vmem:[#allocation4 + $0x178] ss:$36 sps:$4 sm:$0xff]   ;;  %7777 = vst [vmem:[#allocation4 + $0x1a8] sm:$0xf] %v7489_v10  ;;  %6789 = vst [vmem:[#allocation4 + $0x1c0] sm:$0xf] %v6510_v20  ;;  %v6928_v14 = vsel %vm17333_vm2, %v6926_v27, %v6927_v31  ;;  %v7183_v32 = vsel %vm17333_vm2, %v7181_v12, %v7182_v43  ;;  %10070 = vmatprep.mubr.bf16.mxu1 %v13518_v36  ;;  %v17647_v10 = vadd.f32 %v9895_v1, %v17605_v34 }
 0x59f   : > { %v6929_v15 = vrot.slane %v6927_v31, 4  ;;  %v6348_v8 = vld [vmem:[#allocation3 + $0x44] sm:$0xf]  ;;  %v6520_v53 = vsel %vm17339_vm5, %v6511_v3, %v17622_v25  ;;  %7046 = vst [vmem:[#allocation4 + $0x1c4] sm:$0xf] %v6928_v14  ;;  %v7184_v49 = vrot.slane %v7182_v43, 4  ;;  %10071 = vmatmul.mubr.bf16.gmra.mxu1 %v13516_v59  ;;  %v17649_v20 = vadd.f32 %v9898_v57, %v9721_v2  ;;  %v9900_v3 = vpop.f32.mrf.mxu0 }
 0x5a0   : > { %v7185_v33 = vrot.slane %v17609_v52, 6  ;;  %7301 = vst [vmem:[#allocation4 + $0x1c8] sm:$0xf] %v7183_v32  ;;  %v7492_v63 = vshrl.u32 %v7338_v29, 16  ;;  %6790 = vst [vmem:[#allocation4 + $0x1e4] sm:$0xf] %v6520_v53 }
 0x5a1   : > { %v6931_v54 = vsel %vm17333_vm2, %v6929_v15, %v6930_v44  ;;  %v7495_v19 = vshll.u32 %v7338_v29, 16  ;;  %v7502_v22 = vshrl.u32 %v7339_v9, 16  ;;  %v7505_v21 = vshll.u32 %v7339_v9, 16  ;;  %v6828_v47 = vld [vmem:[#allocation3 + $0x44] sm:$0xf] }
 0x5a2   : > { %7047 = vst [vmem:[#allocation4 + $0x1e8] sm:$0xf] %v6931_v54  ;;  %v7186_v46 = vsel %vm17333_vm2, %v7184_v49, %v7185_v33  ;;  %v7490_v23 = vrot.slane %v17607_v58, 4  ;;  %v7494_v11 = vrot.slane %v7492_v63, 6  ;;  %v6523_v56 = vshrl.u32 %v6348_v8, 16 }
 0x5a3   : > { %7302 = vst [vmem:[#allocation4 + $0x1ec] sm:$0xf] %v7186_v46  ;;  %v7497_v24 = vrot.slane %v7495_v19, 7  ;;  %v7504_v50 = vrot.slane %v7502_v22, 6  ;;  %v7507_v55 = vrot.slane %v7505_v21, 7  ;;  %v6526_v13 = vshll.u32 %v6348_v8, 16 }
 0x5a4   : > { %v17639_v4 = vld [vmem:[#allocation3 + $0x48] sm:$0xf]  ;;  %v6521_v26 = vrot.slane %v17622_v25, 4  ;;  %v6525_v27 = vrot.slane %v6523_v56, 5  ;;  %v6533_v40 = vshrl.u32 %v6349_v62, 16  ;;  %v6536_v61 = vshll.u32 %v6349_v62, 16 }
 0x5a5   : > { %v7498_v35 = vor.u32 %v7497_v24, %v7494_v11  ;;  %v17642_v41 = vor.u32 %v7507_v55, %v7504_v50  ;;  %v6528_v58 = vrot.slane %v6526_v13, 6  ;;  %v6933_v48 = vrot.slane %v6828_v47, 6  ;;  %v7085_v31 = vld [vmem:[#allocation3 + $0x4c] sm:$0xf]  ;;  %v17644_v12 = vld [vmem:[#allocation3 + $0x50] sm:$0xf] }
 0x5a6   : > { %v13522_v43 = vld [vmem:[#allocation4 + $0x184] ss:$36 sps:$4 sm:$0xff]   ;;  %v6535_v29 = vrot.slane %v6533_v40, 5  ;;  %v6932_v36 = vrot.slane %v6930_v44, 4  ;;  %v6538_v15 = vrot.slane %v6536_v61, 6  ;;  %v6936_v44 = vrot.slane %v17639_v4, 6 }
 0x5a7   : > { %v13520_v25 = vld [vmem:[#allocation4 + $0x180] ss:$36 sps:$4 sm:$0xff]   ;;  %v7499_v9 = vsel %vm16147_vm14, %v7490_v23, %v7498_v35  ;;  %v7500_v59 = vrot.slane %v7498_v35, 4  ;;  %v6529_v14 = vor.u32 %v6528_v58, %v6525_v27  ;;  %10247 = vmatprep.mubr.bf16.mxu0 %v13522_v43  ;;  %v6935_v8 = vrot.slane %v6933_v48, 4  ;;  %v7340_v34 = vld [vmem:[#allocation3 + $0x4c] sm:$0xf]  ;;  %v9726_v23 = vpop.f32.mrf.mxu1 }
 0x5a8   : > { %7778 = vst [vmem:[#allocation4 + $0x1cc] sm:$0xf] %v7499_v9  ;;  %v6934_v32 = vsel %vm17333_vm2, %v6932_v36, %v6933_v48  ;;  %v7341_v53 = vld [vmem:[#allocation3 + $0x50] sm:$0xf]  ;;  %10248 = vmatmul.mubr.bf16.gmra.mxu0 %v13520_v25  ;;  %v17661_v1 = vor.u32 %v6538_v15, %v6535_v29  ;;  %v6350_v54 = vld [vmem:[#allocation3 + $0x4c] sm:$0xf]  ;;  %v9903_v25 = vpop.f32.mrf.mxu0 }
 0x5a9   : > { %v13525_v2 = vld [vmem:[#allocation4 + $0x1c4] ss:$36 sps:$4 sm:$0xff]   ;;  %v7509_v49 = vsel %vm16147_vm14, %v7500_v59, %v17642_v41  ;;  %v6530_v63 = vsel %vm17339_vm5, %v6521_v26, %v6529_v14  ;;  %v6531_v5 = vrot.slane %v6529_v14, 4  ;;  %7048 = vst [vmem:[#allocation4 + $0x20c] sm:$0xf] %v6934_v32  ;;  %v6937_v22 = vsel %vm17333_vm2, %v6935_v8, %v6936_v44  ;;  %v9728_v13 = vpop.f32.mrf.mxu1 }
 0x5aa   : > { %v13523_v19 = vld [vmem:[#allocation4 + $0x1c0] ss:$36 sps:$4 sm:$0xff]   ;;  %7779 = vst [vmem:[#allocation4 + $0x1f0] sm:$0xf] %v7509_v49  ;;  %6791 = vst [vmem:[#allocation4 + $0x208] sm:$0xf] %v6530_v63  ;;  %10078 = vmatprep.mubr.bf16.mxu1 %v13525_v2 }
 0x5ab   : > { %v7187_v21 = vrot.slane %v7185_v33, 4  ;;  %v7188_v62 = vrot.slane %v7085_v31, 6  ;;  %v7191_v46 = vrot.slane %v17644_v12, 6  ;;  %v6540_v11 = vsel %vm17339_vm5, %v6531_v5, %v17661_v1  ;;  %7049 = vst [vmem:[#allocation4 + $0x230] sm:$0xf] %v6937_v22  ;;  %10079 = vmatmul.mubr.bf16.gmra.mxu1 %v13523_v19  ;;  %v17678_v31 = vpop.f32.mrf.mxu1 }
 0x5ac   : > { %v7512_v56 = vshrl.u32 %v7340_v34, 16  ;;  %v7515_v47 = vshll.u32 %v7340_v34, 16  ;;  %v7522_v6 = vshrl.u32 %v7341_v53, 16  ;;  %v6351_v24 = vld [vmem:[#allocation3 + $0x50] sm:$0xf]  ;;  %v7510_v50 = vrot.slane %v17642_v41, 4 }
 0x5ad   : > { %6792 = vst [vmem:[#allocation4 + $0x22c] sm:$0xf] %v6540_v11  ;;  %v7189_v52 = vsel %vm17333_vm2, %v7187_v21, %v7188_v62  ;;  %v7190_v33 = vrot.slane %v7188_v62, 4  ;;  %v7525_v55 = vshll.u32 %v7341_v53, 16  ;;  %v6543_v40 = vshrl.u32 %v6350_v54, 16  ;;  %v9731_v34 = vpop.f32.mrf.mxu1 }
 0x5ae   : > { %7303 = vst [vmem:[#allocation4 + $0x210] sm:$0xf] %v7189_v52  ;;  %v7514_v4 = vrot.slane %v7512_v56, 6  ;;  %v7517_v26 = vrot.slane %v7515_v47, 7  ;;  %v7524_v27 = vrot.slane %v7522_v6, 6  ;;  %v6546_v58 = vshll.u32 %v6350_v54, 16 }
 0x5af   : > { %v6830_v61 = vld [vmem:[#allocation3 + $0x4c] sm:$0xf]  ;;  %v7192_v57 = vsel %vm17333_vm2, %v7190_v33, %v7191_v46  ;;  %v7527_v35 = vrot.slane %v7525_v55, 7  ;;  %v6553_v48 = vshrl.u32 %v6351_v24, 16  ;;  %v6545_v43 = vrot.slane %v6543_v40, 5 }
 0x5b0   : > { %7304 = vst [vmem:[#allocation4 + $0x234] sm:$0xf] %v7192_v57  ;;  %v7518_v41 = vor.u32 %v7517_v26, %v7514_v4  ;;  %v6556_v29 = vshll.u32 %v6351_v24, 16  ;;  %v17680_v36 = vld [vmem:[#allocation3 + $0x50] sm:$0xf]  ;;  %v6938_v3 = vrot.slane %v6936_v44, 4  ;;  %v17688_v54 = vadd.f32 %v9903_v25, %v9726_v23  ;;  %v9905_v44 = vpop.f32.mrf.mxu0 }
 0x5b1   : > { %v17682_v9 = vor.u32 %v7527_v35, %v7524_v27  ;;  %v6548_v59 = vrot.slane %v6546_v58, 6  ;;  %v6555_v14 = vrot.slane %v6553_v48, 5  ;;  %v6939_v15 = vrot.slane %v6830_v61, 6  ;;  %v7087_v32 = vld [vmem:[#allocation3 + $0x54] sm:$0xf] }
 0x5b2   : > { %v17684_v8 = vld [vmem:[#allocation3 + $0x58] sm:$0xf]  ;;  %v13528_v53 = vld [vmem:[#allocation4 + $0x1cc] ss:$36 sps:$4 sm:$0xff]   ;;  %v7519_v2 = vsel %vm16147_vm14, %v7510_v50, %v7518_v41  ;;  %v7520_v49 = vrot.slane %v7518_v41, 4  ;;  %v6541_v22 = vrot.slane %v17661_v1, 4  ;;  %v9906_v24 = vpop.f32.mrf.mxu0 }
 0x5b3   : > { %v7342_v63 = vld [vmem:[#allocation3 + $0x54] sm:$0xf]  ;;  %v7343_v5 = vld [vmem:[#allocation3 + $0x58] sm:$0xf]  ;;  %v13526_v19 = vld [vmem:[#allocation4 + $0x1c8] ss:$36 sps:$4 sm:$0xff]   ;;  %v6549_v21 = vor.u32 %v6548_v59, %v6545_v43  ;;  %v6940_v11 = vsel %vm17333_vm2, %v6938_v3, %v6939_v15  ;;  %10255 = vmatprep.mubr.bf16.mxu0 %v13528_v53 }
 0x5b4   : > { %7780 = vst [vmem:[#allocation4 + $0x214] sm:$0xf] %v7519_v2  ;;  %v6558_v62 = vrot.slane %v6556_v29, 6  ;;  %v13531_v56 = vld [vmem:[#allocation4 + $0x20c] ss:$36 sps:$4 sm:$0xff]   ;;  %v7529_v47 = vsel %vm16147_vm14, %v7520_v49, %v17682_v9  ;;  %v6941_v6 = vrot.slane %v6939_v15, 4  ;;  %10256 = vmatmul.mubr.bf16.gmra.mxu0 %v13526_v19  ;;  %v9908_v40 = vpop.f32.mrf.mxu0 }
 0x5b5   : > { %v6942_v23 = vrot.slane %v17680_v36, 6  ;;  %7050 = vst [vmem:[#allocation4 + $0x254] sm:$0xf] %v6940_v11  ;;  %v13529_v52 = vld [vmem:[#allocation4 + $0x208] ss:$36 sps:$4 sm:$0xff]   ;;  %v6550_v1 = vsel %vm17339_vm5, %v6541_v22, %v6549_v21  ;;  %v6551_v33 = vrot.slane %v6549_v21, 4  ;;  %10086 = vmatprep.mubr.bf16.mxu1 %v13531_v56  ;;  %v17724_v11 = vadd.f32 %v9906_v24, %v17678_v31 }
 0x5b6   : > { %7781 = vst [vmem:[#allocation4 + $0x238] sm:$0xf] %v7529_v47  ;;  %v17699_v50 = vor.u32 %v6558_v62, %v6555_v14  ;;  %6793 = vst [vmem:[#allocation4 + $0x250] sm:$0xf] %v6550_v1  ;;  %v7193_v13 = vrot.slane %v7191_v46, 4  ;;  %v7194_v4 = vrot.slane %v7087_v32, 6  ;;  %10087 = vmatmul.mubr.bf16.gmra.mxu1 %v13529_v52 }
 0x5b7   : > { %v6943_v55 = vsel %vm17333_vm2, %v6941_v6, %v6942_v23  ;;  %v7197_v26 = vrot.slane %v17684_v8, 6  ;;  %v6352_v27 = vld [vmem:[#allocation3 + $0x54] sm:$0xf]  ;;  %v7532_v57 = vshrl.u32 %v7342_v63, 16  ;;  %v7535_v35 = vshll.u32 %v7342_v63, 16 }
 0x5b8   : > { %v6560_v61 = vsel %vm17339_vm5, %v6551_v33, %v17699_v50  ;;  %7051 = vst [vmem:[#allocation4 + $0x278] sm:$0xf] %v6943_v55  ;;  %v7542_v58 = vshrl.u32 %v7343_v5, 16  ;;  %v6353_v48 = vld [vmem:[#allocation3 + $0x58] sm:$0xf]  ;;  %v7195_v12 = vsel %vm17333_vm2, %v7193_v13, %v7194_v4  ;;  %v7196_v46 = vrot.slane %v7194_v4, 4 }
 0x5b9   : > { %6794 = vst [vmem:[#allocation4 + $0x274] sm:$0xf] %v6560_v61  ;;  %v7545_v41 = vshll.u32 %v7343_v5, 16  ;;  %7305 = vst [vmem:[#allocation4 + $0x258] sm:$0xf] %v7195_v12  ;;  %v7534_v43 = vrot.slane %v7532_v57, 6  ;;  %v17716_v5 = vpop.f32.mrf.mxu1 }
 0x5ba   : > { %v7537_v29 = vrot.slane %v7535_v35, 7  ;;  %v7544_v36 = vrot.slane %v7542_v58, 6  ;;  %v6563_v3 = vshrl.u32 %v6352_v27, 16  ;;  %v6832_v25 = vld [vmem:[#allocation3 + $0x54] sm:$0xf]  ;;  %v7198_v59 = vsel %vm17333_vm2, %v7196_v46, %v7197_v26 }
 0x5bb   : > { %v7547_v14 = vrot.slane %v7545_v41, 7  ;;  %v6566_v15 = vshll.u32 %v6352_v27, 16  ;;  %v6573_v32 = vshrl.u32 %v6353_v48, 16  ;;  %v17713_v8 = vld [vmem:[#allocation3 + $0x58] sm:$0xf]  ;;  %v7530_v34 = vrot.slane %v17682_v9, 4  ;;  %v9736_v1 = vpop.f32.mrf.mxu1  ;;  %v9911_v41 = vpop.f32.mrf.mxu0 }
 0x5bc   : > { %7306 = vst [vmem:[#allocation4 + $0x27c] sm:$0xf] %v7198_v59  ;;  %v7538_v53 = vor.u32 %v7537_v29, %v7534_v43  ;;  %v6565_v2 = vrot.slane %v6563_v3, 5  ;;  %v6576_v49 = vshll.u32 %v6353_v48, 16  ;;  %v7089_v63 = vld [vmem:[#allocation3 + $0x5c] sm:$0xf] }
 0x5bd   : > { %v13535_v44 = vld [vmem:[#allocation4 + $0x214] ss:$36 sps:$4 sm:$0xff]   ;;  %v17718_v19 = vor.u32 %v7547_v14, %v7544_v36  ;;  %v6561_v22 = vrot.slane %v17699_v50, 4  ;;  %v6568_v21 = vrot.slane %v6566_v15, 6  ;;  %v17721_v62 = vld [vmem:[#allocation3 + $0x60] sm:$0xf]  ;;  %v9737_v57 = vpop.f32.mrf.mxu1 }
 0x5be   : > { %v13533_v56 = vld [vmem:[#allocation4 + $0x210] ss:$36 sps:$4 sm:$0xff]   ;;  %v7539_v9 = vsel %vm16147_vm14, %v7530_v34, %v7538_v53  ;;  %v7540_v47 = vrot.slane %v7538_v53, 4  ;;  %v6575_v6 = vrot.slane %v6573_v32, 5  ;;  %v6578_v52 = vrot.slane %v6576_v49, 6  ;;  %10263 = vmatprep.mubr.bf16.mxu0 %v13535_v44  ;;  %v9913_v34 = vpop.f32.mrf.mxu0 }
 0x5bf   : > { %7782 = vst [vmem:[#allocation4 + $0x25c] sm:$0xf] %v7539_v9  ;;  %v6569_v33 = vor.u32 %v6568_v21, %v6565_v2  ;;  %v6944_v55 = vrot.slane %v6942_v23, 4  ;;  %v6945_v13 = vrot.slane %v6832_v25, 6  ;;  %v6948_v50 = vrot.slane %v17713_v8, 6  ;;  %10264 = vmatmul.mubr.bf16.gmra.mxu0 %v13533_v56  ;;  %v9739_v25 = vpop.f32.mrf.mxu1 }
 0x5c0   : > { %v7344_v4 = vld [vmem:[#allocation3 + $0x5c] sm:$0xf]  ;;  %v7549_v31 = vsel %vm16147_vm14, %v7540_v47, %v17718_v19  ;;  %v17732_v24 = vor.u32 %v6578_v52, %v6575_v6  ;;  %v7199_v40 = vrot.slane %v7197_v26, 4  ;;  %v7200_v61 = vrot.slane %v7089_v63, 6  ;;  %v13536_v35 = vld [vmem:[#allocation4 + $0x250] ss:$36 sps:$4 sm:$0xff]   ;;  %v9914_v9 = vpop.f32.mrf.mxu0 }
 0x5c1   : > { %v13538_v27 = vld [vmem:[#allocation4 + $0x254] ss:$36 sps:$4 sm:$0xff]   ;;  %7783 = vst [vmem:[#allocation4 + $0x280] sm:$0xf] %v7549_v31  ;;  %v6570_v23 = vsel %vm17339_vm5, %v6561_v22, %v6569_v33  ;;  %v6571_v58 = vrot.slane %v6569_v33, 4  ;;  %v6946_v48 = vsel %vm17333_vm2, %v6944_v55, %v6945_v13  ;;  %v6947_v12 = vrot.slane %v6945_v13, 4 }
 0x5c2   : > { %v7345_v46 = vld [vmem:[#allocation3 + $0x60] sm:$0xf]  ;;  %10094 = vmatprep.mubr.bf16.mxu1 %v13538_v27  ;;  %6795 = vst [vmem:[#allocation4 + $0x298] sm:$0xf] %v6570_v23  ;;  %7052 = vst [vmem:[#allocation4 + $0x29c] sm:$0xf] %v6946_v48  ;;  %v7201_v26 = vsel %vm17333_vm2, %v7199_v40, %v7200_v61  ;;  %v9916_v31 = vpop.f32.mrf.mxu0  ;;  %v17757_v23 = vadd.f32 %v9911_v41, %v17716_v5 }
 0x5c3   : > { %v7202_v43 = vrot.slane %v7200_v61, 4  ;;  %v7203_v29 = vrot.slane %v17721_v62, 6  ;;  %v7550_v36 = vrot.slane %v17718_v19, 4  ;;  %v6354_v3 = vld [vmem:[#allocation3 + $0x5c] sm:$0xf]  ;;  %10095 = vmatmul.mubr.bf16.gmra.mxu1 %v13536_v35  ;;  %v6580_v59 = vsel %vm17339_vm5, %v6571_v58, %v17732_v24 }
 0x5c4   : > { %v6949_v14 = vsel %vm17333_vm2, %v6947_v12, %v6948_v50  ;;  %7307 = vst [vmem:[#allocation4 + $0x2a0] sm:$0xf] %v7201_v26  ;;  %v7552_v15 = vshrl.u32 %v7344_v4, 16  ;;  %v7555_v32 = vshll.u32 %v7344_v4, 16  ;;  %v6355_v8 = vld [vmem:[#allocation3 + $0x60] sm:$0xf]  ;;  %v17759_v58 = vadd.f32 %v9914_v9, %v9737_v57 }
 0x5c5   : > { %6796 = vst [vmem:[#allocation4 + $0x2bc] sm:$0xf] %v6580_v59  ;;  %7053 = vst [vmem:[#allocation4 + $0x2c0] sm:$0xf] %v6949_v14  ;;  %v7204_v53 = vsel %vm17333_vm2, %v7202_v43, %v7203_v29  ;;  %v7562_v2 = vshrl.u32 %v7345_v46, 16  ;;  %v7565_v49 = vshll.u32 %v7345_v46, 16 }
 0x5c6   : > { %v6581_v63 = vrot.slane %v17732_v24, 4  ;;  %7308 = vst [vmem:[#allocation4 + $0x2c4] sm:$0xf] %v7204_v53  ;;  %v7554_v44 = vrot.slane %v7552_v15, 6  ;;  %v7557_v19 = vrot.slane %v7555_v32, 7  ;;  %v6583_v22 = vshrl.u32 %v6354_v3, 16  ;;  %v9742_v15 = vpop.f32.mrf.mxu1 }
 0x5c7   : > { %v6586_v21 = vshll.u32 %v6354_v3, 16  ;;  %v6834_v62 = vld [vmem:[#allocation3 + $0x5c] sm:$0xf]  ;;  %v17750_v56 = vld [vmem:[#allocation3 + $0x60] sm:$0xf]  ;;  %v7564_v47 = vrot.slane %v7562_v2, 6 }
 0x5c8   : > { %v7567_v6 = vrot.slane %v7565_v49, 7  ;;  %v6593_v52 = vshrl.u32 %v6355_v8, 16  ;;  %v6596_v1 = vshll.u32 %v6355_v8, 16  ;;  %v7558_v33 = vor.u32 %v7557_v19, %v7554_v44  ;;  %v7091_v27 = vld [vmem:[#allocation3 + $0x64] sm:$0xf]  ;;  %v9744_v44 = vpop.f32.mrf.mxu1 }
 0x5c9   : > { %v6585_v55 = vrot.slane %v6583_v22, 5  ;;  %v6588_v13 = vrot.slane %v6586_v21, 6  ;;  %v6950_v4 = vrot.slane %v6948_v50, 4  ;;  %v13541_v24 = vld [vmem:[#allocation4 + $0x25c] ss:$36 sps:$4 sm:$0xff]   ;;  %v6951_v43 = vrot.slane %v6834_v62, 6 }
 0x5ca   : > { %v17752_v40 = vor.u32 %v7567_v6, %v7564_v47  ;;  %v6595_v61 = vrot.slane %v6593_v52, 5  ;;  %v17754_v35 = vld [vmem:[#allocation3 + $0x68] sm:$0xf]  ;;  %v13539_v48 = vld [vmem:[#allocation4 + $0x258] ss:$36 sps:$4 sm:$0xff]   ;;  %v7559_v12 = vsel %vm16147_vm14, %v7550_v36, %v7558_v33  ;;  %v7560_v46 = vrot.slane %v7558_v33, 4  ;;  %10271 = vmatprep.mubr.bf16.mxu0 %v13541_v24  ;;  %v17781_v52 = vpop.f32.mrf.mxu1 }
 0x5cb   : > { %v6589_v26 = vor.u32 %v6588_v13, %v6585_v55  ;;  %v6598_v50 = vrot.slane %v6596_v1, 6  ;;  %7784 = vst [vmem:[#allocation4 + $0x2a4] sm:$0xf] %v7559_v12  ;;  %v6954_v3 = vrot.slane %v17750_v56, 6  ;;  %v7205_v25 = vrot.slane %v7203_v29, 4  ;;  %10272 = vmatmul.mubr.bf16.gmra.mxu0 %v13539_v48 }
 0x5cc   : > { %v7206_v59 = vrot.slane %v7091_v27, 6  ;;  %v7346_v14 = vld [vmem:[#allocation3 + $0x64] sm:$0xf]  ;;  %v7569_v57 = vsel %vm16147_vm14, %v7560_v46, %v17752_v40  ;;  %v7347_v8 = vld [vmem:[#allocation3 + $0x68] sm:$0xf]  ;;  %v6952_v29 = vsel %vm17333_vm2, %v6950_v4, %v6951_v43  ;;  %v6953_v53 = vrot.slane %v6951_v43, 4  ;;  %v9747_v48 = vpop.f32.mrf.mxu1  ;;  %v9919_v43 = vpop.f32.mrf.mxu0 }
 0x5cd   : > { %v13544_v5 = vld [vmem:[#allocation4 + $0x29c] ss:$36 sps:$4 sm:$0xff]   ;;  %v6590_v41 = vsel %vm17339_vm5, %v6581_v63, %v6589_v26  ;;  %v6591_v36 = vrot.slane %v6589_v26, 4  ;;  %v17769_v32 = vor.u32 %v6598_v50, %v6595_v61  ;;  %7785 = vst [vmem:[#allocation4 + $0x2c8] sm:$0xf] %v7569_v57  ;;  %v7209_v22 = vrot.slane %v17754_v35, 6 }
 0x5ce   : > { %v13542_v34 = vld [vmem:[#allocation4 + $0x298] ss:$36 sps:$4 sm:$0xff]   ;;  %6797 = vst [vmem:[#allocation4 + $0x2e0] sm:$0xf] %v6590_v41  ;;  %v7207_v2 = vsel %vm17333_vm2, %v7205_v25, %v7206_v59  ;;  %v6356_v49 = vld [vmem:[#allocation3 + $0x64] sm:$0xf]  ;;  %10102 = vmatprep.mubr.bf16.mxu1 %v13544_v5  ;;  %v6955_v62 = vsel %vm17333_vm2, %v6953_v53, %v6954_v3  ;;  %v17795_v53 = vadd.f32 %v9919_v43, %v9742_v15 }
 0x5cf   : > { %v6600_v63 = vsel %vm17339_vm5, %v6591_v36, %v17769_v32  ;;  %7054 = vst [vmem:[#allocation4 + $0x2e4] sm:$0xf] %v6952_v29  ;;  %v7208_v19 = vrot.slane %v7206_v59, 4  ;;  %7309 = vst [vmem:[#allocation4 + $0x2e8] sm:$0xf] %v7207_v2  ;;  %v7572_v21 = vshrl.u32 %v7346_v14, 16  ;;  %10103 = vmatmul.mubr.bf16.gmra.mxu1 %v13542_v34 }
 0x5d0   : > { %6798 = vst [vmem:[#allocation4 + $0x304] sm:$0xf] %v6600_v63  ;;  %v7575_v56 = vshll.u32 %v7346_v14, 16  ;;  %v7582_v9 = vshrl.u32 %v7347_v8, 16  ;;  %v7585_v47 = vshll.u32 %v7347_v8, 16  ;;  %v6603_v55 = vshrl.u32 %v6356_v49, 16 }
 0x5d1   : > { %v6357_v6 = vld [vmem:[#allocation3 + $0x68] sm:$0xf]  ;;  %7055 = vst [vmem:[#allocation4 + $0x308] sm:$0xf] %v6955_v62  ;;  %v7210_v1 = vsel %vm17333_vm2, %v7208_v19, %v7209_v22  ;;  %v7574_v33 = vrot.slane %v7572_v21, 6  ;;  %v6606_v24 = vshll.u32 %v6356_v49, 16 }
 0x5d2   : > { %v6836_v13 = vld [vmem:[#allocation3 + $0x64] sm:$0xf]  ;;  %7310 = vst [vmem:[#allocation4 + $0x30c] sm:$0xf] %v7210_v1  ;;  %v7577_v4 = vrot.slane %v7575_v56, 7  ;;  %v7584_v27 = vrot.slane %v7582_v9, 6 }
 0x5d3   : > { %v7587_v31 = vrot.slane %v7585_v47, 7  ;;  %v17787_v61 = vld [vmem:[#allocation3 + $0x68] sm:$0xf]  ;;  %v7570_v12 = vrot.slane %v17752_v40, 4  ;;  %v6605_v46 = vrot.slane %v6603_v55, 5  ;;  %v6613_v26 = vshrl.u32 %v6357_v6, 16  ;;  %v9921_v40 = vpop.f32.mrf.mxu0 }
 0x5d4   : > { %v6616_v50 = vshll.u32 %v6357_v6, 16  ;;  %v7578_v25 = vor.u32 %v7577_v4, %v7574_v33  ;;  %v6608_v14 = vrot.slane %v6606_v24, 6  ;;  %v6957_v5 = vrot.slane %v6836_v13, 6  ;;  %v7093_v57 = vld [vmem:[#allocation3 + $0x6c] sm:$0xf] }
 0x5d5   : > { %v17790_v59 = vor.u32 %v7587_v31, %v7584_v27  ;;  %v17792_v41 = vld [vmem:[#allocation3 + $0x70] sm:$0xf]  ;;  %v13547_v36 = vld [vmem:[#allocation4 + $0x2a4] ss:$36 sps:$4 sm:$0xff]   ;;  %v6601_v8 = vrot.slane %v17769_v32, 4  ;;  %v6615_v34 = vrot.slane %v6613_v26, 5  ;;  %v9922_v15 = vpop.f32.mrf.mxu0 }
 0x5d6   : > { %v6956_v29 = vrot.slane %v6954_v3, 4  ;;  %v13545_v2 = vld [vmem:[#allocation4 + $0x2a0] ss:$36 sps:$4 sm:$0xff]   ;;  %v7579_v49 = vsel %vm16147_vm14, %v7570_v12, %v7578_v25  ;;  %v7580_v44 = vrot.slane %v7578_v25, 4  ;;  %v6609_v63 = vor.u32 %v6608_v14, %v6605_v46  ;;  %10279 = vmatprep.mubr.bf16.mxu0 %v13547_v36  ;;  %v7348_v56 = vld [vmem:[#allocation3 + $0x6c] sm:$0xf]  ;;  %v9750_v14 = vpop.f32.mrf.mxu1 }
 0x5d7   : > { %v6618_v19 = vrot.slane %v6616_v50, 6  ;;  %7786 = vst [vmem:[#allocation4 + $0x2ec] sm:$0xf] %v7579_v49  ;;  %v6959_v62 = vrot.slane %v6957_v5, 4  ;;  %v6960_v32 = vrot.slane %v17787_v61, 6  ;;  %10280 = vmatmul.mubr.bf16.gmra.mxu0 %v13545_v2  ;;  %v7211_v27 = vrot.slane %v7209_v22, 4  ;;  %v9924_v61 = vpop.f32.mrf.mxu0 }
 0x5d8   : > { %v6958_v21 = vsel %vm17333_vm2, %v6956_v29, %v6957_v5  ;;  %v7349_v3 = vld [vmem:[#allocation3 + $0x70] sm:$0xf]  ;;  %v13551_v9 = vld [vmem:[#allocation4 + $0x2e4] ss:$36 sps:$4 sm:$0xff]   ;;  %v7589_v47 = vsel %vm16147_vm14, %v7580_v44, %v17790_v59  ;;  %v6610_v6 = vsel %vm17339_vm5, %v6601_v8, %v6609_v63  ;;  %v6611_v1 = vrot.slane %v6609_v63, 4  ;;  %v9752_v63 = vpop.f32.mrf.mxu1 }
 0x5d9   : > { %v17807_v33 = vor.u32 %v6618_v19, %v6615_v34  ;;  %7056 = vst [vmem:[#allocation4 + $0x32c] sm:$0xf] %v6958_v21  ;;  %v6358_v55 = vld [vmem:[#allocation3 + $0x6c] sm:$0xf]  ;;  %v13549_v13 = vld [vmem:[#allocation4 + $0x2e0] ss:$36 sps:$4 sm:$0xff]   ;;  %v6961_v4 = vsel %vm17333_vm2, %v6959_v62, %v6960_v32  ;;  %10110 = vmatprep.mubr.bf16.mxu1 %v13551_v9 }
 0x5da   : > { %7787 = vst [vmem:[#allocation4 + $0x310] sm:$0xf] %v7589_v47  ;;  %6799 = vst [vmem:[#allocation4 + $0x328] sm:$0xf] %v6610_v6  ;;  %v7212_v31 = vrot.slane %v7093_v57, 6  ;;  %v7215_v24 = vrot.slane %v17792_v41, 6  ;;  %10111 = vmatmul.mubr.bf16.gmra.mxu1 %v13549_v13 }
 0x5db   : > { %v6620_v48 = vsel %vm17339_vm5, %v6611_v1, %v17807_v33  ;;  %7057 = vst [vmem:[#allocation4 + $0x350] sm:$0xf] %v6961_v4  ;;  %v7592_v12 = vshrl.u32 %v7348_v56, 16  ;;  %v7595_v46 = vshll.u32 %v7348_v56, 16  ;;  %v7602_v26 = vshrl.u32 %v7349_v3, 16 }
 0x5dc   : > { %v6359_v50 = vld [vmem:[#allocation3 + $0x70] sm:$0xf]  ;;  %6800 = vst [vmem:[#allocation4 + $0x34c] sm:$0xf] %v6620_v48  ;;  %v7213_v35 = vsel %vm17333_vm2, %v7211_v27, %v7212_v31  ;;  %v7214_v22 = vrot.slane %v7212_v31, 4  ;;  %v7590_v43 = vrot.slane %v17790_v59, 4  ;;  %v17832_v27 = vpop.f32.mrf.mxu1 }
 0x5dd   : > { %v7605_v25 = vshll.u32 %v7349_v3, 16  ;;  %7311 = vst [vmem:[#allocation4 + $0x330] sm:$0xf] %v7213_v35  ;;  %v7594_v5 = vrot.slane %v7592_v12, 6  ;;  %v7597_v57 = vrot.slane %v7595_v46, 7  ;;  %v7604_v36 = vrot.slane %v7602_v26, 6  ;;  %v9927_v3 = vpop.f32.mrf.mxu0 }
 0x5de   : > { %v6623_v8 = vshrl.u32 %v6358_v55, 16  ;;  %v6838_v34 = vld [vmem:[#allocation3 + $0x6c] sm:$0xf]  ;;  %v17820_v29 = vld [vmem:[#allocation3 + $0x1c] sm:$0xf]  ;;  %v7216_v40 = vsel %vm17333_vm2, %v7214_v22, %v7215_v24  ;;  %v6626_v49 = vshll.u32 %v6358_v55, 16  ;;  %v17839_v46 = vadd.f32 %v9927_v3, %v9750_v14 }
 0x5df   : > { %v7607_v2 = vrot.slane %v7605_v25, 7  ;;  %v6633_v44 = vshrl.u32 %v6359_v50, 16  ;;  %7312 = vst [vmem:[#allocation4 + $0x354] sm:$0xf] %v7216_v40  ;;  %v7598_v59 = vor.u32 %v7597_v57, %v7594_v5  ;;  %v6636_v21 = vshll.u32 %v6359_v50, 16  ;;  %v9929_v26 = vpop.f32.mrf.mxu0  ;;  %v9755_v57 = vpop.f32.mrf.mxu1 }
 0x5e0   : > { %v6625_v19 = vrot.slane %v6623_v8, 5  ;;  %v17826_v62 = vld [vmem:[#allocation3 + $0x70] sm:$0xf]  ;;  %v6962_v56 = vrot.slane %v6960_v32, 4  ;;  %v6628_v47 = vrot.slane %v6626_v49, 6  ;;  %v6963_v1 = vrot.slane %v6838_v34, 6 }
 0x5e1   : > { %v17828_v9 = vor.u32 %v7607_v2, %v7604_v36  ;;  %v6635_v6 = vrot.slane %v6633_v44, 5  ;;  %v7095_v13 = vld [vmem:[#allocation3 + $0x74] sm:$0xf]  ;;  %v17830_v4 = vld [vmem:[#allocation3 + $0x78] sm:$0xf]  ;;  %v7599_v31 = vsel %vm16147_vm14, %v7590_v43, %v7598_v59  ;;  %v7600_v61 = vrot.slane %v7598_v59, 4  ;;  %v9930_v8 = vpop.f32.mrf.mxu0 }
 0x5e2   : > { %v13554_v55 = vld [vmem:[#allocation4 + $0x2ec] ss:$36 sps:$4 sm:$0xff]   ;;  %v7351_v12 = vld [vmem:[#allocation3 + $0x78] sm:$0xf]  ;;  %v17837_v32 = vadd.f32 %v9922_v15, %v17781_v52  ;;  %7788 = vst [vmem:[#allocation4 + $0x334] sm:$0xf] %v7599_v31  ;;  %v6629_v22 = vor.u32 %v6628_v47, %v6625_v19  ;;  %v6964_v5 = vsel %vm17333_vm2, %v6962_v56, %v6963_v1 }
 0x5e3   : > { %v7350_v48 = vld [vmem:[#allocation3 + $0x74] sm:$0xf]  ;;  %v13552_v50 = vld [vmem:[#allocation4 + $0x2e8] ss:$36 sps:$4 sm:$0xff]   ;;  %v6621_v35 = vrot.slane %v17807_v33, 4  ;;  %v6638_v25 = vrot.slane %v6636_v21, 6  ;;  %10287 = vmatprep.mubr.bf16.mxu0 %v13554_v55  ;;  %v7609_v52 = vsel %vm16147_vm14, %v7600_v61, %v17828_v9  ;;  %v9932_v21 = vpop.f32.mrf.mxu0 }
 0x5e4   : > { %v19005_v43 = vrot.slane %v17820_v29, 7  ;;  %v13557_v36 = vld [vmem:[#allocation4 + $0x32c] ss:$36 sps:$4 sm:$0xff]   ;;  %v6965_v15 = vrot.slane %v6963_v1, 4  ;;  %v6966_v14 = vrot.slane %v17826_v62, 6  ;;  %10288 = vmatmul.mubr.bf16.gmra.mxu0 %v13552_v50  ;;  %v6631_v40 = vrot.slane %v6629_v22, 4 }
 0x5e5   : > { %7058 = vst [vmem:[#allocation4 + $0x374] sm:$0xf] %v6964_v5  ;;  %v13555_v33 = vld [vmem:[#allocation4 + $0x328] ss:$36 sps:$4 sm:$0xff]   ;;  %7789 = vst [vmem:[#allocation4 + $0x358] sm:$0xf] %v7609_v52  ;;  %v6630_v34 = vsel %vm17339_vm5, %v6621_v35, %v6629_v22  ;;  %v17851_v2 = vor.u32 %v6638_v25, %v6635_v6  ;;  %10118 = vmatprep.mubr.bf16.mxu1 %v13557_v36  ;;  %v17869_v35 = vpop.f32.mrf.mxu1 }
 0x5e6   : > { %6801 = vst [vmem:[#allocation4 + $0x370] sm:$0xf] %v6630_v34  ;;  %v6967_v49 = vsel %vm17333_vm2, %v6965_v15, %v6966_v14  ;;  %v7217_v44 = vrot.slane %v7215_v24, 4  ;;  %v7218_v63 = vrot.slane %v7095_v13, 6  ;;  %v7221_v59 = vrot.slane %v17830_v4, 6  ;;  %10119 = vmatmul.mubr.bf16.gmra.mxu1 %v13555_v33 }
 0x5e7   : > { %v6360_v19 = vld [vmem:[#allocation3 + $0x74] sm:$0xf]  ;;  %v6640_v56 = vsel %vm17339_vm5, %v6631_v40, %v17851_v2  ;;  %7059 = vst [vmem:[#allocation4 + $0x398] sm:$0xf] %v6967_v49  ;;  %v7612_v3 = vshrl.u32 %v7350_v48, 16  ;;  %v7615_v47 = vshll.u32 %v7350_v48, 16  ;;  %v9760_v34 = vpop.f32.mrf.mxu1 }
 0x5e8   : > { %v7622_v6 = vshrl.u32 %v7351_v12, 16  ;;  %v6361_v1 = vld [vmem:[#allocation3 + $0x78] sm:$0xf]  ;;  %v17865_v55 = vrot.slane %v19005_v43, 4  ;;  %6802 = vst [vmem:[#allocation4 + $0x394] sm:$0xf] %v6640_v56  ;;  %v7219_v41 = vsel %vm17333_vm2, %v7217_v44, %v7218_v63 }
 0x5e9   : > { %v7220_v24 = vrot.slane %v7218_v63, 4  ;;  %v7625_v13 = vshll.u32 %v7351_v12, 16  ;;  %7313 = vst [vmem:[#allocation4 + $0x378] sm:$0xf] %v7219_v41  ;;  %v7614_v4 = vrot.slane %v7612_v3, 6  ;;  %v7617_v31 = vrot.slane %v7615_v47, 7 }
 0x5ea   : > { %v7624_v61 = vrot.slane %v7622_v6, 6  ;;  %v6643_v26 = vshrl.u32 %v6360_v19, 16  ;;  %v6840_v50 = vld [vmem:[#allocation3 + $0x74] sm:$0xf]  ;;  %v6646_v25 = vshll.u32 %v6360_v19, 16  ;;  %v6653_v5 = vshrl.u32 %v6361_v1, 16 }
 0x5eb   : > { %v7222_v48 = vsel %vm17333_vm2, %v7220_v24, %v7221_v59  ;;  %v7627_v22 = vrot.slane %v7625_v13, 7  ;;  %v17873_v57 = vld [vmem:[#allocation3 + $0x78] sm:$0xf]  ;;  %v7610_v36 = vrot.slane %v17828_v9, 4  ;;  %v7618_v12 = vor.u32 %v7617_v31, %v7614_v4  ;;  %v7097_v33 = vld [vmem:[#allocation3 + $0x7c] sm:$0xf] }
 0x5ec   : > { %7314 = vst [vmem:[#allocation4 + $0x39c] sm:$0xf] %v7222_v48  ;;  %v6645_v52 = vrot.slane %v6643_v26, 5  ;;  %v6656_v15 = vshll.u32 %v6361_v1, 16  ;;  %v13560_v40 = vld [vmem:[#allocation4 + $0x334] ss:$36 sps:$4 sm:$0xff]   ;;  %v17882_v19 = vadd.f32 %v9930_v8, %v17832_v27  ;;  %v17886_v1 = vpop.f32.mrf.mxu1 }
 0x5ed   : > { %v17876_v49 = vor.u32 %v7627_v22, %v7624_v61  ;;  %v6641_v44 = vrot.slane %v17851_v2, 4  ;;  %v6648_v63 = vrot.slane %v6646_v25, 6  ;;  %v17879_v21 = vld [vmem:[#allocation3 + $0x80] sm:$0xf]  ;;  %v13558_v56 = vld [vmem:[#allocation4 + $0x330] ss:$36 sps:$4 sm:$0xff]   ;;  %v7619_v9 = vsel %vm16147_vm14, %v7610_v36, %v7618_v12  ;;  %10295 = vmatprep.mubr.bf16.mxu0 %v13560_v40  ;;  %v9935_v22 = vpop.f32.mrf.mxu0 }
 0x5ee   : > { %v7620_v3 = vrot.slane %v7618_v12, 4  ;;  %v6655_v47 = vrot.slane %v6653_v5, 5  ;;  %v6658_v6 = vrot.slane %v6656_v15, 6  ;;  %7790 = vst [vmem:[#allocation4 + $0x37c] sm:$0xf] %v7619_v9  ;;  %v6968_v2 = vrot.slane %v6966_v14, 4  ;;  %10296 = vmatmul.mubr.bf16.gmra.mxu0 %v13558_v56  ;;  %v9763_v48 = vpop.f32.mrf.mxu1 }
 0x5ef   : > { %v6649_v41 = vor.u32 %v6648_v63, %v6645_v52  ;;  %v6969_v24 = vrot.slane %v6840_v50, 6  ;;  %v6972_v13 = vrot.slane %v17873_v57, 6  ;;  %v7352_v27 = vld [vmem:[#allocation3 + $0x7c] sm:$0xf]  ;;  %v7223_v61 = vrot.slane %v7221_v59, 4 }
 0x5f0   : > { %v13563_v8 = vld [vmem:[#allocation4 + $0x374] ss:$36 sps:$4 sm:$0xff]   ;;  %v7629_v4 = vsel %vm16147_vm14, %v7620_v3, %v17876_v49  ;;  %v17894_v31 = vor.u32 %v6658_v6, %v6655_v47  ;;  %v7224_v26 = vrot.slane %v7097_v33, 6  ;;  %v7353_v57 = vld [vmem:[#allocation3 + $0x80] sm:$0xf]  ;;  %v7227_v12 = vrot.slane %v17879_v21, 6  ;;  %v9937_v33 = vpop.f32.mrf.mxu0 }
 0x5f1   : > { %v13561_v25 = vld [vmem:[#allocation4 + $0x370] ss:$36 sps:$4 sm:$0xff]   ;;  %7791 = vst [vmem:[#allocation4 + $0x3a0] sm:$0xf] %v7629_v4  ;;  %v6650_v62 = vsel %vm17339_vm5, %v6641_v44, %v6649_v41  ;;  %v6651_v14 = vrot.slane %v6649_v41, 4  ;;  %v6970_v50 = vsel %vm17333_vm2, %v6968_v2, %v6969_v24  ;;  %v6971_v5 = vrot.slane %v6969_v24, 4  ;;  %10126 = vmatprep.mubr.bf16.mxu1 %v13563_v8 }
 0x5f2   : > { %6803 = vst [vmem:[#allocation4 + $0x3b8] sm:$0xf] %v6650_v62  ;;  %7060 = vst [vmem:[#allocation4 + $0x3bc] sm:$0xf] %v6970_v50  ;;  %v7225_v59 = vsel %vm17333_vm2, %v7223_v61, %v7224_v26  ;;  %v7226_v36 = vrot.slane %v7224_v26, 4  ;;  %v7630_v52 = vrot.slane %v17876_v49, 4  ;;  %10127 = vmatmul.mubr.bf16.gmra.mxu1 %v13561_v25  ;;  %v9938_v47 = vpop.f32.mrf.mxu0 }
 0x5f3   : > { %v6362_v15 = vld [vmem:[#allocation3 + $0x7c] sm:$0xf]  ;;  %v6660_v34 = vsel %vm17339_vm5, %v6651_v14, %v17894_v31  ;;  %v6973_v40 = vsel %vm17333_vm2, %v6971_v5, %v6972_v13  ;;  %7315 = vst [vmem:[#allocation4 + $0x3c0] sm:$0xf] %v7225_v59  ;;  %v7632_v44 = vshrl.u32 %v7352_v27, 16  ;;  %v7635_v63 = vshll.u32 %v7352_v27, 16  ;;  %v17914_v27 = vpop.f32.mrf.mxu1 }
 0x5f4   : > { %v6363_v56 = vld [vmem:[#allocation3 + $0x80] sm:$0xf]  ;;  %6804 = vst [vmem:[#allocation4 + $0x3dc] sm:$0xf] %v6660_v34  ;;  %7061 = vst [vmem:[#allocation4 + $0x3e0] sm:$0xf] %v6973_v40  ;;  %v7228_v21 = vsel %vm17333_vm2, %v7226_v36, %v7227_v12  ;;  %v9940_v62 = vpop.f32.mrf.mxu0 }
 0x5f5   : > { %v7642_v49 = vshrl.u32 %v7353_v57, 16  ;;  %v7645_v9 = vshll.u32 %v7353_v57, 16  ;;  %v6661_v3 = vrot.slane %v17894_v31, 4  ;;  %7316 = vst [vmem:[#allocation4 + $0x3e4] sm:$0xf] %v7228_v21  ;;  %v7634_v6 = vrot.slane %v7632_v44, 6  ;;  %v9768_v36 = vpop.f32.mrf.mxu1 }
 0x5f6   : > { %v7637_v41 = vrot.slane %v7635_v63, 7  ;;  %v6663_v2 = vshrl.u32 %v6362_v15, 16  ;;  %v6666_v24 = vshll.u32 %v6362_v15, 16  ;;  %v6842_v8 = vld [vmem:[#allocation3 + $0x7c] sm:$0xf]  ;;  %v6673_v48 = vshrl.u32 %v6363_v56, 16 }
 0x5f7   : > { %v17912_v4 = vld [vmem:[#allocation3 + $0x80] sm:$0xf]  ;;  %v7644_v61 = vrot.slane %v7642_v49, 6  ;;  %v7647_v26 = vrot.slane %v7645_v9, 7  ;;  %v6676_v25 = vshll.u32 %v6363_v56, 16  ;;  %v6974_v57 = vrot.slane %v6972_v13, 4  ;;  %v17928_v56 = vpop.f32.mrf.mxu0 }
 0x5f8   : > { %v17916_v14 = vld [vmem:[#allocation3 + $0x20] sm:$0xf]  ;;  %v7638_v50 = vor.u32 %v7637_v41, %v7634_v6  ;;  %v6665_v31 = vrot.slane %v6663_v2, 5  ;;  %v6668_v5 = vrot.slane %v6666_v24, 6  ;;  %v7099_v59 = vld [vmem:[#allocation3 + $0x84] sm:$0xf]  ;;  %v17923_v44 = vadd.f32 %v9935_v22, %v17869_v35  ;;  %v17932_v41 = vpop.f32.mrf.mxu1 }
 0x5f9   : > { %v13567_v33 = vld [vmem:[#allocation4 + $0x37c] ss:$36 sps:$4 sm:$0xff]   ;;  %v17918_v15 = vor.u32 %v7647_v26, %v7644_v61  ;;  %v6675_v34 = vrot.slane %v6673_v48, 5  ;;  %v17920_v40 = vld [vmem:[#allocation3 + $0x88] sm:$0xf]  ;;  %v17926_v63 = vadd.f32 %v9938_v47, %v17886_v1  ;;  %v6678_v6 = vrot.slane %v6676_v25, 6  ;;  %v9945_v47 = vpop.f32.mrf.mxu0 }
 0x5fa   : > { %v13565_v21 = vld [vmem:[#allocation4 + $0x378] ss:$36 sps:$4 sm:$0xff]   ;;  %v7639_v13 = vsel %vm16147_vm14, %v7630_v52, %v7638_v50  ;;  %v7640_v49 = vrot.slane %v7638_v50, 4  ;;  %v6669_v9 = vor.u32 %v6668_v5, %v6665_v31  ;;  %10303 = vmatprep.mubr.bf16.mxu0 %v13567_v33  ;;  %v6975_v2 = vrot.slane %v6842_v8, 6  ;;  %v7354_v1 = vld [vmem:[#allocation3 + $0x84] sm:$0xf]  ;;  %v9771_v8 = vpop.f32.mrf.mxu1 }
 0x5fb   : > { %7792 = vst [vmem:[#allocation4 + $0x3c4] sm:$0xf] %v7639_v13  ;;  %v6978_v35 = vrot.slane %v17912_v4, 6  ;;  %v7229_v22 = vrot.slane %v7227_v12, 4  ;;  %v7230_v24 = vrot.slane %v7099_v59, 6  ;;  %10304 = vmatmul.mubr.bf16.gmra.mxu0 %v13565_v21  ;;  %v17940_v25 = vor.u32 %v6678_v6, %v6675_v34  ;;  %v9946_v36 = vpop.f32.mrf.mxu0 }
 0x5fc   : > { %v13570_v61 = vld [vmem:[#allocation4 + $0x3bc] ss:$36 sps:$4 sm:$0xff]   ;;  %v7649_v52 = vsel %vm16147_vm14, %v7640_v49, %v17918_v15  ;;  %v6670_v26 = vsel %vm17339_vm5, %v6661_v3, %v6669_v9  ;;  %v6671_v48 = vrot.slane %v6669_v9, 4  ;;  %v7355_v62 = vld [vmem:[#allocation3 + $0x88] sm:$0xf]  ;;  %v6976_v50 = vsel %vm17333_vm2, %v6974_v57, %v6975_v2 }
 0x5fd   : > { %v13568_v12 = vld [vmem:[#allocation4 + $0x3b8] ss:$36 sps:$4 sm:$0xff]   ;;  %7793 = vst [vmem:[#allocation4 + $0x3e8] sm:$0xf] %v7649_v52  ;;  %6805 = vst [vmem:[#allocation4 + $0x400] sm:$0xf] %v6670_v26  ;;  %v7231_v5 = vsel %vm17333_vm2, %v7229_v22, %v7230_v24  ;;  %10134 = vmatprep.mubr.bf16.mxu1 %v13570_v61  ;;  %v17958_v26 = vpop.f32.mrf.mxu1 }
 0x5fe   : > { %v6977_v31 = vrot.slane %v6975_v2, 4  ;;  %v6364_v59 = vld [vmem:[#allocation3 + $0x84] sm:$0xf]  ;;  %v6680_v3 = vsel %vm17339_vm5, %v6671_v48, %v17940_v25  ;;  %7062 = vst [vmem:[#allocation4 + $0x404] sm:$0xf] %v6976_v50  ;;  %v7232_v33 = vrot.slane %v7230_v24, 4  ;;  %10135 = vmatmul.mubr.bf16.gmra.mxu1 %v13568_v12  ;;  %v9948_v2 = vpop.f32.mrf.mxu0 }
 0x5ff   : > { %v7233_v34 = vrot.slane %v17920_v40, 6  ;;  %7317 = vst [vmem:[#allocation4 + $0x408] sm:$0xf] %v7231_v5  ;;  %v7652_v21 = vshrl.u32 %v7354_v1, 16  ;;  %6806 = vst [vmem:[#allocation4 + $0x424] sm:$0xf] %v6680_v3 }
 0x600   : > { %v6979_v57 = vsel %vm17333_vm2, %v6977_v31, %v6978_v35  ;;  %v7655_v13 = vshll.u32 %v7354_v1, 16  ;;  %v7662_v49 = vshrl.u32 %v7355_v62, 16  ;;  %v7665_v9 = vshll.u32 %v7355_v62, 16  ;;  %v6365_v6 = vld [vmem:[#allocation3 + $0x88] sm:$0xf] }
 0x601   : > { %7063 = vst [vmem:[#allocation4 + $0x428] sm:$0xf] %v6979_v57  ;;  %v7234_v22 = vsel %vm17333_vm2, %v7232_v33, %v7233_v34  ;;  %v7650_v24 = vrot.slane %v17918_v15, 4  ;;  %v7654_v47 = vrot.slane %v7652_v21, 6  ;;  %v6683_v61 = vshrl.u32 %v6364_v59, 16  ;;  %v9776_v33 = vpop.f32.mrf.mxu1 }
 0x602   : > { %v6844_v52 = vld [vmem:[#allocation3 + $0x84] sm:$0xf]  ;;  %7318 = vst [vmem:[#allocation4 + $0x42c] sm:$0xf] %v7234_v22  ;;  %v7657_v48 = vrot.slane %v7655_v13, 7  ;;  %v7664_v1 = vrot.slane %v7662_v49, 6  ;;  %v17976_v22 = vpop.f32.mrf.mxu0 }
 0x603   : > { %v7667_v8 = vrot.slane %v7665_v9, 7  ;;  %v6686_v62 = vshll.u32 %v6364_v59, 16  ;;  %v17960_v12 = vld [vmem:[#allocation3 + $0x88] sm:$0xf]  ;;  %v6681_v50 = vrot.slane %v17940_v25, 4  ;;  %v6685_v31 = vrot.slane %v6683_v61, 5 }
 0x604   : > { %v6693_v5 = vshrl.u32 %v6365_v6, 16  ;;  %v6696_v3 = vshll.u32 %v6365_v6, 16  ;;  %v7658_v57 = vor.u32 %v7657_v48, %v7654_v47  ;;  %v6981_v2 = vrot.slane %v6844_v52, 6  ;;  %v7101_v43 = vld [vmem:[#allocation3 + $0x8c] sm:$0xf]  ;;  %v17974_v6 = vpop.f32.mrf.mxu1 }
 0x605   : > { %v17963_v15 = vor.u32 %v7667_v8, %v7664_v1  ;;  %v6688_v21 = vrot.slane %v6686_v62, 6  ;;  %v17965_v4 = vld [vmem:[#allocation3 + $0x90] sm:$0xf]  ;;  %v13573_v13 = vld [vmem:[#allocation4 + $0x3c4] ss:$36 sps:$4 sm:$0xff]   ;;  %v6980_v9 = vrot.slane %v6978_v35, 4  ;;  %v17969_v59 = vadd.f32 %v17928_v56, %v17914_v27  ;;  %v9953_v62 = vpop.f32.mrf.mxu0 }
 0x606   : > { %v6695_v49 = vrot.slane %v6693_v5, 5  ;;  %v17972_v25 = vadd.f32 %v9946_v36, %v17932_v41  ;;  %v13571_v47 = vld [vmem:[#allocation4 + $0x3c0] ss:$36 sps:$4 sm:$0xff]   ;;  %v7659_v61 = vsel %vm16147_vm14, %v7650_v24, %v7658_v57  ;;  %v7660_v52 = vrot.slane %v7658_v57, 4  ;;  %10311 = vmatprep.mubr.bf16.mxu0 %v13573_v13  ;;  %v7356_v35 = vld [vmem:[#allocation3 + $0x8c] sm:$0xf]  ;;  %v9779_v8 = vpop.f32.mrf.mxu1 }
 0x607   : > { %19035 = vst [vmem:[#allocation6_spill] sm:$0xff] %v17969_v59  ;;  %v6689_v48 = vor.u32 %v6688_v21, %v6685_v31  ;;  %v6698_v1 = vrot.slane %v6696_v3, 6  ;;  %7794 = vst [vmem:[#allocation4 + $0x40c] sm:$0xf] %v7659_v61  ;;  %v6982_v27 = vsel %vm17333_vm2, %v6980_v9, %v6981_v2  ;;  %v6983_v56 = vrot.slane %v6981_v2, 4  ;;  %10312 = vmatmul.mubr.bf16.gmra.mxu0 %v13571_v47  ;;  %v9954_v47 = vpop.f32.mrf.mxu0 }
 0x608   : > { %19036 = vst [vmem:[#allocation7_spill] sm:$0xff] %v17972_v25  ;;  %v6984_v41 = vrot.slane %v17960_v12, 6  ;;  %v7357_v36 = vld [vmem:[#allocation3 + $0x90] sm:$0xf]  ;;  %v13576_v5 = vld [vmem:[#allocation4 + $0x404] ss:$36 sps:$4 sm:$0xff]   ;;  %v7669_v24 = vsel %vm16147_vm14, %v7660_v52, %v17963_v15 }
 0x609   : > { %v6690_v31 = vsel %vm17339_vm5, %v6681_v50, %v6689_v48  ;;  %v6691_v3 = vrot.slane %v6689_v48, 4  ;;  %v17988_v33 = vor.u32 %v6698_v1, %v6695_v49  ;;  %7064 = vst [vmem:[#allocation4 + $0x44c] sm:$0xf] %v6982_v27  ;;  %v6366_v57 = vld [vmem:[#allocation3 + $0x8c] sm:$0xf]  ;;  %v7235_v2 = vrot.slane %v7233_v34, 4  ;;  %10142 = vmatprep.mubr.bf16.mxu1 %v13576_v5  ;;  %v9956_v27 = vpop.f32.mrf.mxu0 }
 0x60a   : > { %v13574_v21 = vld [vmem:[#allocation4 + $0x400] ss:$36 sps:$4 sm:$0xff]   ;;  %7795 = vst [vmem:[#allocation4 + $0x430] sm:$0xf] %v7669_v24  ;;  %6807 = vst [vmem:[#allocation4 + $0x448] sm:$0xf] %v6690_v31  ;;  %v6985_v12 = vsel %vm17333_vm2, %v6983_v56, %v6984_v41  ;;  %v9782_v31 = vpop.f32.mrf.mxu1 }
 0x60b   : > { %v7236_v13 = vrot.slane %v7101_v43, 6  ;;  %v7239_v9 = vrot.slane %v17965_v4, 6  ;;  %v6700_v50 = vsel %vm17339_vm5, %v6691_v3, %v17988_v33  ;;  %7065 = vst [vmem:[#allocation4 + $0x470] sm:$0xf] %v6985_v12  ;;  %v7672_v49 = vshrl.u32 %v7356_v35, 16  ;;  %10143 = vmatmul.mubr.bf16.gmra.mxu1 %v13574_v21 }
 0x60c   : > { %v7675_v61 = vshll.u32 %v7356_v35, 16  ;;  %v7682_v52 = vshrl.u32 %v7357_v36, 16  ;;  %v6367_v48 = vld [vmem:[#allocation3 + $0x90] sm:$0xf]  ;;  %6808 = vst [vmem:[#allocation4 + $0x46c] sm:$0xf] %v6700_v50 }
 0x60d   : > { %v7237_v40 = vsel %vm17333_vm2, %v7235_v2, %v7236_v13  ;;  %v7238_v34 = vrot.slane %v7236_v13, 4  ;;  %v7670_v43 = vrot.slane %v17963_v15, 4  ;;  %v7685_v1 = vshll.u32 %v7357_v36, 16  ;;  %v6846_v24 = vld [vmem:[#allocation3 + $0x8c] sm:$0xf] }
 0x60e   : > { %7319 = vst [vmem:[#allocation4 + $0x450] sm:$0xf] %v7237_v40  ;;  %v7674_v56 = vrot.slane %v7672_v49, 6  ;;  %v7677_v8 = vrot.slane %v7675_v61, 7  ;;  %v7684_v62 = vrot.slane %v7682_v52, 6  ;;  %v6703_v5 = vshrl.u32 %v6366_v57, 16  ;;  %v9784_v49 = vpop.f32.mrf.mxu1  ;;  %v9959_v61 = vpop.f32.mrf.mxu0 }
 0x60f   : > { %v7240_v35 = vsel %vm17333_vm2, %v7238_v34, %v7239_v9  ;;  %v7687_v3 = vrot.slane %v7685_v1, 7  ;;  %v6706_v21 = vshll.u32 %v6366_v57, 16  ;;  %v6713_v12 = vshrl.u32 %v6367_v48, 16  ;;  %v18005_v13 = vld [vmem:[#allocation3 + $0x90] sm:$0xf] }
 0x610   : > { %7320 = vst [vmem:[#allocation4 + $0x474] sm:$0xf] %v7240_v35  ;;  %v7678_v2 = vor.u32 %v7677_v8, %v7674_v56  ;;  %v6705_v15 = vrot.slane %v6703_v5, 5  ;;  %v6716_v36 = vshll.u32 %v6367_v48, 16  ;;  %v6986_v50 = vrot.slane %v6984_v41, 4  ;;  %v9961_v5 = vpop.f32.mrf.mxu0 }
 0x611   : > { %v18007_v52 = vor.u32 %v7687_v3, %v7684_v62  ;;  %v6708_v40 = vrot.slane %v6706_v21, 6  ;;  %v6715_v27 = vrot.slane %v6713_v12, 5  ;;  %v6987_v16 = vrot.slane %v6846_v24, 6  ;;  %v7103_v25 = vld [vmem:[#allocation3 + $0x94] sm:$0xf]  ;;  %v18020_v62 = vpop.f32.mrf.mxu1 }
 0x612   : > { %v18009_v59 = vld [vmem:[#allocation3 + $0x98] sm:$0xf]  ;;  %v13580_v34 = vld [vmem:[#allocation4 + $0x40c] ss:$36 sps:$4 sm:$0xff]   ;;  %v7679_v57 = vsel %vm16147_vm14, %v7670_v43, %v7678_v2  ;;  %v7680_v1 = vrot.slane %v7678_v2, 4  ;;  %v18015_v41 = vadd.f32 %v17976_v22, %v17958_v26  ;;  %v18018_v8 = vadd.f32 %v9954_v47, %v17974_v6  ;;  %v9962_v49 = vpop.f32.mrf.mxu0 }
 0x613   : > { %v7358_v56 = vld [vmem:[#allocation3 + $0x94] sm:$0xf]  ;;  %v7359_v48 = vld [vmem:[#allocation3 + $0x98] sm:$0xf]  ;;  %v13578_v24 = vld [vmem:[#allocation4 + $0x408] ss:$36 sps:$4 sm:$0xff]   ;;  %v6709_v3 = vor.u32 %v6708_v40, %v6705_v15  ;;  %v6988_v43 = vsel %vm17333_vm2, %v6986_v50, %v6987_v16  ;;  %10319 = vmatprep.mubr.bf16.mxu0 %v13580_v34  ;;  %v9787_v47 = vpop.f32.mrf.mxu1  ;;  %v18029_v2 = vadd.f32 %v9959_v61, %v9782_v31 }
 0x614   : > { %7796 = vst [vmem:[#allocation4 + $0x454] sm:$0xf] %v7679_v57  ;;  %v6701_v35 = vrot.slane %v17988_v33, 4  ;;  %v6718_v21 = vrot.slane %v6716_v36, 6  ;;  %v13583_v12 = vld [vmem:[#allocation4 + $0x44c] ss:$36 sps:$4 sm:$0xff]   ;;  %v7689_v26 = vsel %vm16147_vm14, %v7680_v1, %v18007_v52  ;;  %10320 = vmatmul.mubr.bf16.gmra.mxu0 %v13578_v24  ;;  %v9964_v57 = vpop.f32.mrf.mxu0 }
 0x615   : > { %v6989_v6 = vrot.slane %v6987_v16, 4  ;;  %v6990_v22 = vrot.slane %v18005_v13, 6  ;;  %7066 = vst [vmem:[#allocation4 + $0x494] sm:$0xf] %v6988_v43  ;;  %v13581_v33 = vld [vmem:[#allocation4 + $0x448] ss:$36 sps:$4 sm:$0xff]   ;;  %10150 = vmatprep.mubr.bf16.mxu1 %v13583_v12  ;;  %v9790_v24 = vpop.f32.mrf.mxu1 }
 0x616   : > { %7797 = vst [vmem:[#allocation4 + $0x478] sm:$0xf] %v7689_v26  ;;  %v6710_v15 = vsel %vm17339_vm5, %v6701_v35, %v6709_v3  ;;  %v6711_v36 = vrot.slane %v6709_v3, 4  ;;  %v18033_v50 = vor.u32 %v6718_v21, %v6715_v27  ;;  %v7241_v40 = vrot.slane %v7239_v9, 4  ;;  %v6368_v34 = vld [vmem:[#allocation3 + $0x94] sm:$0xf]  ;;  %10151 = vmatmul.mubr.bf16.gmra.mxu1 %v13581_v33  ;;  %v9967_v3 = vpop.f32.mrf.mxu0 }
 0x617   : > { %6809 = vst [vmem:[#allocation4 + $0x490] sm:$0xf] %v6710_v15  ;;  %v6991_v16 = vsel %vm17333_vm2, %v6989_v6, %v6990_v22  ;;  %v7242_v31 = vrot.slane %v7103_v25, 6  ;;  %v7245_v13 = vrot.slane %v18009_v59, 6  ;;  %v7690_v61 = vrot.slane %v18007_v52, 4  ;;  %v9792_v6 = vpop.f32.mrf.mxu1 }
 0x618   : > { %v6720_v27 = vsel %vm17339_vm5, %v6711_v36, %v18033_v50  ;;  %7067 = vst [vmem:[#allocation4 + $0x4b8] sm:$0xf] %v6991_v16  ;;  %v7692_v4 = vshrl.u32 %v7358_v56, 16  ;;  %v7695_v9 = vshll.u32 %v7358_v56, 16  ;;  %v7702_v1 = vshrl.u32 %v7359_v48, 16  ;;  %v9969_v16 = vpop.f32.mrf.mxu0 }
 0x619   : > { %v6369_v5 = vld [vmem:[#allocation3 + $0x98] sm:$0x3]  ;;  %6810 = vst [vmem:[#allocation4 + $0x4b4] sm:$0xf] %v6720_v27  ;;  %v7243_v25 = vsel %vm17333_vm2, %v7241_v40, %v7242_v31  ;;  %v7244_v59 = vrot.slane %v7242_v31, 4  ;;  %v7705_v35 = vshll.u32 %v7359_v48, 16  ;;  %v9793_v27 = vpop.f32.mrf.mxu1  ;;  %v18052_v6 = vadd.f32 %v9962_v49, %v18020_v62 }
 0x61a   : > { %v6721_v52 = vrot.slane %v18033_v50, 4  ;;  %7321 = vst [vmem:[#allocation4 + $0x498] sm:$0xf] %v7243_v25  ;;  %v7694_v21 = vrot.slane %v7692_v4, 6  ;;  %v7697_v43 = vrot.slane %v7695_v9, 7  ;;  %v7704_v12 = vrot.slane %v7702_v1, 6 }
 0x61b   : > { %v6723_v26 = vshrl.u32 %v6368_v34, 16  ;;  %v7246_v56 = vsel %vm17333_vm2, %v7244_v59, %v7245_v13  ;;  %v7707_v47 = vrot.slane %v7705_v35, 7  ;;  %v6726_v33 = vshll.u32 %v6368_v34, 16  ;;  %v6848_v36 = vld [vmem:[#allocation3 + $0x94] sm:$0xf]  ;;  %v9970_v34 = vpop.f32.mrf.mxu0 }
 0x61c   : > { %v6733_v15 = vshrl.u32 %v6369_v5, 16  ;;  %7322 = vst [vmem:[#allocation4 + $0x4bc] sm:$0xf] %v7246_v56  ;;  %v7698_v40 = vor.u32 %v7697_v43, %v7694_v21  ;;  %v6736_v31 = vshll.u32 %v6369_v5, 16  ;;  %v6849_v50 = vld [vmem:[#allocation3 + $0x98] sm:$0x3]  ;;  %v18054_v59 = vadd.f32 %v9967_v3, %v9790_v24 }
 0x61d   : > { %v6725_v48 = vrot.slane %v6723_v26, 5  ;;  %v6992_v57 = vrot.slane %v6990_v22, 4  ;;  %v13586_v4 = vld [vmem:[#allocation4 + $0x454] ss:$36 sps:$4 sm:$0xff]   ;;  %v18049_v9 = vor.u32 %v7707_v47, %v7704_v12  ;;  %v6728_v1 = vrot.slane %v6726_v33, 6  ;;  %v9795_v22 = vpop.f32.mrf.mxu1  ;;  %v9972_v62 = vpop.f32.mrf.mxu0 }
 0x61e   : > { %v7105_v25 = vld [vmem:[#allocation3 + $0x9c] sm:$0xf]  ;;  %v13584_v35 = vld [vmem:[#allocation4 + $0x450] ss:$36 sps:$4 sm:$0xff]   ;;  %v7699_v21 = vsel %vm16147_vm14, %v7690_v61, %v7698_v40  ;;  %v7700_v43 = vrot.slane %v7698_v40, 4  ;;  %v6735_v5 = vrot.slane %v6733_v15, 5  ;;  %10327 = vmatprep.mubr.bf16.mxu0 %v13586_v4 }
 0x61f   : > { %v6738_v26 = vrot.slane %v6736_v31, 6  ;;  %7798 = vst [vmem:[#allocation4 + $0x49c] sm:$0xf] %v7699_v21  ;;  %v6729_v12 = vor.u32 %v6728_v1, %v6725_v48  ;;  %v6993_v56 = vrot.slane %v6848_v36, 6  ;;  %v6996_v47 = vrot.slane %v6849_v50, 6  ;;  %10328 = vmatmul.mubr.bf16.gmra.mxu0 %v13584_v35  ;;  %v18061_v15 = vpop.f32.mrf.mxu1  ;;  %v9975_v35 = vpop.f32.mrf.mxu0 }
 0x620   : > { %v7106_v33 = vld [vmem:[#allocation3 + $0xa0] sm:$0x3]  ;;  %v7247_v16 = vrot.slane %v7245_v13, 4  ;;  %v13589_v49 = vld [vmem:[#allocation4 + $0x494] ss:$36 sps:$4 sm:$0xff]   ;;  %v7709_v24 = vsel %vm16147_vm14, %v7700_v43, %v18049_v9  ;;  %v7248_v61 = vrot.slane %v7105_v25, 6  ;;  %v18063_v31 = vadd.f32 %v9970_v34, %v9793_v27 }
 0x621   : > { %v6739_v3 = vor.u32 %v6738_v26, %v6735_v5  ;;  %v7360_v40 = vld [vmem:[#allocation3 + $0x9c] sm:$0xf]  ;;  %v13587_v4 = vld [vmem:[#allocation4 + $0x490] ss:$36 sps:$4 sm:$0xff]   ;;  %7799 = vst [vmem:[#allocation4 + $0x4c0] sm:$0xf] %v7709_v24  ;;  %v6730_v36 = vsel %vm17339_vm5, %v6721_v52, %v6729_v12  ;;  %v6994_v48 = vsel %vm17333_vm2, %v6992_v57, %v6993_v56  ;;  %10158 = vmatprep.mubr.bf16.mxu1 %v13589_v49  ;;  %v9800_v5 = vpop.f32.mrf.mxu1  ;;  %v9977_v62 = vpop.f32.mrf.mxu0 }
 0x622   : > { %v6731_v13 = vrot.slane %v6729_v12, 4  ;;  %v6995_v50 = vrot.slane %v6993_v56, 4  ;;  %v7361_v1 = vld [vmem:[#allocation3 + $0xa0] sm:$0x7]  ;;  %6811 = vst [vmem:[#allocation4 + $0x4d8] sm:$0xf] %v6730_v36  ;;  %v7249_v25 = vsel %vm17333_vm2, %v7247_v16, %v7248_v61  ;;  %10159 = vmatmul.mubr.bf16.gmra.mxu1 %v13587_v4 }
 0x623   : > { %7068 = vst [vmem:[#allocation4 + $0x4dc] sm:$0xf] %v6994_v48  ;;  %v7250_v27 = vrot.slane %v7248_v61, 4  ;;  %v7251_v34 = vrot.slane %v7106_v33, 6  ;;  %v7710_v21 = vrot.slane %v18049_v9, 4  ;;  %v7712_v26 = vshrl.u32 %v7360_v40, 16  ;;  %v9801_v30 = vpop.f32.mrf.mxu1  ;;  %v9978_v4 = vpop.f32.mrf.mxu0 }
 0x624   : > { %v7802_v43 = vld [vmem:[#allocation3 + $0x10] sm:$0x8]  ;;  %v6740_v52 = vsel %vm17339_vm5, %v6731_v13, %v6739_v3  ;;  %v6997_v57 = vsel %vm17333_vm2, %v6995_v50, %v6996_v47  ;;  %7323 = vst [vmem:[#allocation4 + $0x4e0] sm:$0xf] %v7249_v25  ;;  %v7715_v22 = vshll.u32 %v7360_v40, 16  ;;  %v7722_v33 = vshrl.u32 %v7361_v1, 16 }
 0x625   : > { %v7803_v12 = vld [vmem:[#allocation3 + $0x14] sm:$0xf]  ;;  %v7804_v56 = vld [vmem:[#allocation3 + $0x18] sm:$0xf]  ;;  %6812 = vst [vmem:[#allocation4 + $0x4fc] sm:$0xf] %v6740_v52  ;;  %v7252_v9 = vsel %vm17333_vm2, %v7250_v27, %v7251_v34 }
 0x626   : > { %7069 = vst [vmem:[#allocation4 + $0x500] sm:$0xf] %v6997_v57  ;;  %v7725_v16 = vshll.u32 %v7361_v1, 16  ;;  %vm7876_vm7 = vcmask 1040384   ;;  %v7807_v49 = vld [vmem:[#allocation3 + $0x24] sm:$0xf]  ;;  %v9803_v1 = vpop.f32.mrf.mxu1 }
 0x627   : > { %7324 = vst [vmem:[#allocation4 + $0x504] sm:$0xf] %v7252_v9  ;;  %v7714_v24 = vrot.slane %v7712_v26, 6  ;;  %v7717_v3 = vrot.slane %v7715_v22, 7  ;;  %vm7877_vm0 = vcmask 1044484   ;;  %v12418_v47 = vrot.slane %v7802_v43, 11  ;;  %v9980_v22 = vpop.f32.mrf.mxu0 }
 0x628   : > { %v7808_v61 = vld [vmem:[#allocation3 + $0x28] sm:$0xf]  ;;  %v18078_v40 = vld [vmem:[#allocation3 + $0x2c] sm:$0xf]  ;;  %v7724_v36 = vrot.slane %v7722_v33, 6  ;;  %v7727_v13 = vrot.slane %v7725_v16, 7  ;;  %vm18080_vm4 = vmor %vm7876_vm7, %vm7877_vm0 }
 0x629   : > { %v7881_v42 = vrot.slane %v7803_v12, 7  ;;  %v7884_v50 = vrot.slane %v7804_v56, 7  ;;  %v7718_v25 = vor.u32 %v7717_v3, %v7714_v24  ;;  %v19039_v27 = vrot.slane %v17916_v14, 7  ;;  %v7810_v57 = vld [vmem:[#allocation3 + $0x30] sm:$0xf]  ;;  %v18102_v14 = vpop.f32.mrf.mxu1 }
 0x62a   : > { %v7893_v52 = vrot.slane %v7807_v49, 7  ;;  %v18091_v26 = vld [vmem:[#allocation3 + $0x34] sm:$0xf]  ;;  %v13593_v62 = vld [vmem:[#allocation4 + $0x49c] ss:$36 sps:$4 sm:$0xff]   ;;  %v7728_v9 = vor.u32 %v7727_v13, %v7724_v36  ;;  %v7896_v1 = vrot.slane %v7808_v61, 7 }
 0x62b   : > { %v7891_v34 = vsel %vm18080_vm4, %v17865_v55, %v19039_v27  ;;  %v19040_v43 = vmov %v19039_v27  ;;  %v7882_v12 = vsel %vm18080_vm4, %v12418_v47, %v7881_v42  ;;  %v7883_v56 = vrot.slane %v7881_v42, 4  ;;  %v7812_v33 = vld [vmem:[#allocation3 + $0x38] sm:$0xf]  ;;  %v18095_v16 = vld [vmem:[#allocation3 + $0x3c] sm:$0xf]  ;;  %v18108_v42 = vpop.f32.mrf.mxu0  ;;  %10335 = vmatprep.mubr.bf16.mxu0 %v13593_v62 }
 0x62c   : > { %v7892_v5 = vrot.slane %v19040_v43, 4  ;;  %8027 = vst [vmem:[#allocation4 + $0x8c] sm:$0xf] %v7891_v34  ;;  %v18097_v24 = vld [vmem:[#allocation3 + $0x40] sm:$0xf]  ;;  %v18100_v55 = vadd.f32 %v9975_v35, %v18061_v15  ;;  %v7719_v3 = vsel %vm16147_vm14, %v7710_v21, %v7718_v25  ;;  %v7720_v36 = vrot.slane %v7718_v25, 4  ;;  %v9808_v21 = vpop.f32.mrf.mxu1 }
 0x62d   : > { %v13591_v49 = vld [vmem:[#allocation4 + $0x498] ss:$36 sps:$4 sm:$0xff]   ;;  %v7886_v13 = vrot.slane %v7884_v50, 4  ;;  %8024 = vst [vmem:[#allocation4 + $0x20] sm:$0xf] %v7882_v12  ;;  %v7885_v15 = vsel %vm18080_vm4, %v7883_v56, %v7884_v50  ;;  %v7895_v35 = vrot.slane %v7893_v52, 4  ;;  %v9985_v61 = vpop.f32.mrf.mxu0 }
 0x62e   : > { %v7894_v47 = vsel %vm18080_vm4, %v7892_v5, %v7893_v52  ;;  %7800 = vst [vmem:[#allocation4 + $0x4e4] sm:$0xf] %v7719_v3  ;;  %v7899_v27 = vrot.slane %v18078_v40, 7  ;;  %v7815_v34 = vld [vmem:[#allocation3 + $0x44] sm:$0xf]  ;;  %10336 = vmatmul.mubr.bf16.gmra.mxu0 %v13591_v49  ;;  %v7729_v43 = vsel %vm16147_vm14, %v7720_v36, %v7728_v9  ;;  %v19041_v5 = vrot.slane %v17820_v29, 7  ;;  %v9809_v29 = vpop.f32.mrf.mxu1 }
 0x62f   : > { %8028 = vst [vmem:[#allocation4 + $0xb0] sm:$0xf] %v7894_v47  ;;  %v13596_v25 = vld [vmem:[#allocation4 + $0x4dc] ss:$36 sps:$4 sm:$0xff]   ;;  %8025 = vst [vmem:[#allocation4 + $0x44] sm:$0xf] %v7885_v15  ;;  %v18119_v52 = vadd.f32 %v9978_v4, %v9801_v30  ;;  %v7897_v40 = vsel %vm18080_vm4, %v7895_v35, %v7896_v1  ;;  %v9986_v36 = vpop.f32.mrf.mxu0 }
 0x630   : > { %v7888_v22 = vsel %vm18080_vm4, %v7886_v13, %v19041_v5  ;;  %v7902_v62 = vrot.slane %v7810_v57, 7  ;;  %v7816_v50 = vld [vmem:[#allocation3 + $0x48] sm:$0xf]  ;;  %v13594_v12 = vld [vmem:[#allocation4 + $0x4d8] ss:$36 sps:$4 sm:$0xff]   ;;  %v7898_v56 = vrot.slane %v7896_v1, 4  ;;  %10166 = vmatprep.mubr.bf16.mxu1 %v13596_v25  ;;  %v9811_v1 = vpop.f32.mrf.mxu1 }
 0x631   : > { %7801 = vst [vmem:[#allocation4 + $0x508] sm:$0xf] %v7729_v43  ;;  %8026 = vst [vmem:[#allocation4 + $0x68] sm:$0xf] %v7888_v22  ;;  %v7901_v7 = vrot.slane %v7899_v27, 4  ;;  %v7905_v9 = vrot.slane %v18091_v26, 7  ;;  %10167 = vmatmul.mubr.bf16.gmra.mxu1 %v13594_v12  ;;  %v9988_v25 = vpop.f32.mrf.mxu0  ;;  %v18146_v1 = vadd.f32 %v9986_v36, %v9809_v29 }
 0x632   : > { %8029 = vst [vmem:[#allocation4 + $0xd4] sm:$0xf] %v7897_v40  ;;  %v7904_v49 = vrot.slane %v7902_v62, 4  ;;  %v7908_v3 = vrot.slane %v7812_v33, 7  ;;  %v7911_v57 = vrot.slane %v18095_v16, 7  ;;  %v7914_v30 = vrot.slane %v18097_v24, 7  ;;  %v9814_v12 = vpop.f32.mrf.mxu1 }
 0x633   : > { %v7817_v4 = vld [vmem:[#allocation3 + $0x4c] sm:$0xf]  ;;  %v7900_v13 = vsel %vm18080_vm4, %v7898_v56, %v7899_v27  ;;  %v7903_v47 = vsel %vm18080_vm4, %v7901_v7, %v7902_v62  ;;  %v7907_v15 = vrot.slane %v7905_v9, 4  ;;  %v7917_v26 = vrot.slane %v7815_v34, 7  ;;  %v7818_v35 = vld [vmem:[#allocation3 + $0x50] sm:$0xf] }
 0x634   : > { %8030 = vst [vmem:[#allocation4 + $0xf8] sm:$0xf] %v7900_v13  ;;  %8031 = vst [vmem:[#allocation4 + $0x11c] sm:$0xf] %v7903_v47  ;;  %v7906_v33 = vsel %vm18080_vm4, %v7904_v49, %v7905_v9  ;;  %v7910_v16 = vrot.slane %v7908_v3, 4  ;;  %v7913_v24 = vrot.slane %v7911_v57, 4  ;;  %v9816_v47 = vpop.f32.mrf.mxu1 }
 0x635   : > { %v7916_v21 = vrot.slane %v7914_v30, 4  ;;  %v7909_v43 = vsel %vm18080_vm4, %v7907_v15, %v7908_v3  ;;  %8032 = vst [vmem:[#allocation4 + $0x140] sm:$0xf] %v7906_v33  ;;  %v7919_v27 = vrot.slane %v7917_v26, 4  ;;  %v7920_v5 = vrot.slane %v7816_v50, 7 }
 0x636   : > { %v7923_v22 = vrot.slane %v7817_v4, 7  ;;  %v7819_v62 = vld [vmem:[#allocation3 + $0x54] sm:$0xf]  ;;  %v7820_v34 = vld [vmem:[#allocation3 + $0x58] sm:$0xf]  ;;  %v7912_v40 = vsel %vm18080_vm4, %v7910_v16, %v7911_v57  ;;  %v7915_v56 = vsel %vm18080_vm4, %v7913_v24, %v7914_v30  ;;  %v7926_v9 = vrot.slane %v7818_v35, 7 }
 0x637   : > { %v7821_v61 = vld [vmem:[#allocation3 + $0x5c] sm:$0xf]  ;;  %8033 = vst [vmem:[#allocation4 + $0x164] sm:$0xf] %v7909_v43  ;;  %v7918_v7 = vsel %vm18080_vm4, %v7916_v21, %v7917_v26  ;;  %v7822_v49 = vld [vmem:[#allocation3 + $0x60] sm:$0xf]  ;;  %v7921_v50 = vsel %vm18080_vm4, %v7919_v27, %v7920_v5  ;;  %v18144_v57 = vadd.f32 %v18108_v42, %v18102_v14  ;;  %v9817_v21 = vpop.f32.mrf.mxu1 }
 0x638   : > { %v13600_v3 = vld [vmem:[#allocation4 + $0x20] ss:$36 sps:$4 sm:$0xff]   ;;  %8034 = vst [vmem:[#allocation4 + $0x188] sm:$0xf] %v7912_v40  ;;  %8035 = vst [vmem:[#allocation4 + $0x1ac] sm:$0xf] %v7915_v56 }
 0x639   : > { %v7922_v4 = vrot.slane %v7920_v5, 4  ;;  %8036 = vst [vmem:[#allocation4 + $0x1d0] sm:$0xf] %v7918_v7  ;;  %v7925_v13 = vrot.slane %v7923_v22, 4  ;;  %v13597_v30 = vld [vmem:[#allocation4 + $0x4e0] ss:$36 sps:$4 sm:$0xff]   ;;  %13191 = vmatprep.mubr.bf16.mxu1 %v13600_v3  ;;  %v9991_v5 = vpop.f32.mrf.mxu0  ;;  %v9819_v40 = vpop.f32.mrf.mxu1 }
 0x63a   : > { %v13599_v15 = vld [vmem:[#allocation4 + $0x4e4] ss:$36 sps:$4 sm:$0xff]   ;;  %8037 = vst [vmem:[#allocation4 + $0x1f4] sm:$0xf] %v7921_v50  ;;  %v7928_v26 = vrot.slane %v7926_v9, 4  ;;  %v7929_v42 = vrot.slane %v7819_v62, 7  ;;  %v18152_v56 = vadd.f32 %v9991_v5, %v9814_v12 }
 0x63b   : > { %v7823_v35 = vld [vmem:[#allocation3 + $0x64] sm:$0xf]  ;;  %v13601_v33 = vld [vmem:[#allocation4 + $0x68] ss:$36 sps:$4 sm:$0xff]   ;;  %v7924_v16 = vsel %vm18080_vm4, %v7922_v4, %v7923_v22  ;;  %v7927_v24 = vsel %vm18080_vm4, %v7925_v13, %v7926_v9  ;;  %10343 = vmatprep.mubr.bf16.mxu0 %v13599_v15  ;;  %v13602_v14 = vld [vmem:[#allocation4 + $0xb0] ss:$36 sps:$4 sm:$0xff]   ;;  %v9993_v50 = vpop.f32.mrf.mxu0 }
 0x63c   : > { %8038 = vst [vmem:[#allocation4 + $0x218] sm:$0xf] %v7924_v16  ;;  %8039 = vst [vmem:[#allocation4 + $0x23c] sm:$0xf] %v7927_v24  ;;  %v7932_v25 = vrot.slane %v7820_v34, 7  ;;  %v7935_v43 = vrot.slane %v7821_v61, 7  ;;  %10344 = vmatmul.mubr.bf16.gmra.mxu0 %v13597_v30  ;;  %13192 = vmatmul.mubr.bf16.vlgmr.msra.gmra.mxu1 %v13601_v33  ;;  %v7930_v22 = vsel %vm18080_vm4, %v7928_v26, %v7929_v42 }
 0x63d   : > { %v7938_v27 = vrot.slane %v7822_v49, 7  ;;  %v7824_v29 = vld [vmem:[#allocation3 + $0x68] sm:$0xf]  ;;  %v7825_v36 = vld [vmem:[#allocation3 + $0x6c] sm:$0xf]  ;;  %13195 = vmatprep.mubr.bf16.mxu1 %v13602_v14  ;;  %v7931_v7 = vrot.slane %v7929_v42, 4  ;;  %v10032_v49 = vpop.f32.mrf.mxu1  ;;  %v9994_v16 = vpop.f32.mrf.mxu0 }
 0x63e   : > { %v7934_v9 = vrot.slane %v7932_v25, 4  ;;  %v7937_v3 = vrot.slane %v7935_v43, 4  ;;  %8040 = vst [vmem:[#allocation4 + $0x260] sm:$0xf] %v7930_v22  ;;  %v7941_v34 = vrot.slane %v7823_v35, 7  ;;  %v10033_v15 = vadd.f32 %v10032_v49, %v17304_v38 }
 0x63f   : > { %v7940_v62 = vrot.slane %v7938_v27, 4  ;;  %v7826_v61 = vld [vmem:[#allocation3 + $0x70] sm:$0xf]  ;;  %v7933_v4 = vsel %vm18080_vm4, %v7931_v7, %v7932_v25  ;;  %v7827_v47 = vld [vmem:[#allocation3 + $0x74] sm:$0xf]  ;;  %v18167_v14 = vadd.f32 %v9994_v16, %v9817_v21  ;;  %v10034_v42 = vpop.f32.mrf.mxu1  ;;  %v9996_v40 = vpop.f32.mrf.mxu0  ;;  %vm3150_vm14 = vcmask 254976  }
 0x640   : > { %v7936_v12 = vsel %vm18080_vm4, %v7934_v9, %v7935_v43  ;;  %v7939_v13 = vsel %vm18080_vm4, %v7937_v3, %v7938_v27  ;;  %v7828_v30 = vld [vmem:[#allocation3 + $0x78] sm:$0xf]  ;;  %v7829_v26 = vld [vmem:[#allocation3 + $0x7c] sm:$0xf]  ;;  %v7830_v33 = vld [vmem:[#allocation3 + $0x80] sm:$0xf] }
 0x641   : > { %8041 = vst [vmem:[#allocation4 + $0x284] sm:$0xf] %v7933_v4  ;;  %8042 = vst [vmem:[#allocation4 + $0x2a8] sm:$0xf] %v7936_v12  ;;  %v7942_v35 = vsel %vm18080_vm4, %v7940_v62, %v7941_v34  ;;  %v18165_v24 = vld [vmem:[#allocation3 + $0x84] sm:$0xf]  ;;  %v10035_v7 = vpop.f32.mrf.mxu1  ;;  %v10209_v42 = vpop.f32.mrf.mxu0 }
 0x642   : > { %8043 = vst [vmem:[#allocation4 + $0x2cc] sm:$0xf] %v7939_v13  ;;  %v7943_v25 = vrot.slane %v7941_v34, 4  ;;  %v7944_v43 = vrot.slane %v7824_v29, 7  ;;  %8044 = vst [vmem:[#allocation4 + $0x2f0] sm:$0xf] %v7942_v35  ;;  %v18179_v40 = vadd.f32 %v10209_v42, %v10033_v15 }
 0x643   : > { %v7947_v27 = vrot.slane %v7825_v36, 7  ;;  %v7950_v5 = vrot.slane %v7826_v61, 7  ;;  %v7832_v38 = vld [vmem:[#allocation3 + $0x88] sm:$0xf]  ;;  %v13603_v22 = vld [vmem:[#allocation4 + $0xf8] ss:$36 sps:$4 sm:$0xff]   ;;  %v10037_v12 = vpop.f32.mrf.mxu1 }
 0x644   : > { %v13604_v9 = vld [vmem:[#allocation4 + $0x140] ss:$36 sps:$4 sm:$0xff]   ;;  %v7945_v3 = vsel %vm18080_vm4, %v7943_v25, %v7944_v43  ;;  %v7946_v50 = vrot.slane %v7944_v43, 4  ;;  %13196 = vmatmul.mubr.bf16.gmra.mxu1 %v13603_v22  ;;  %v7953_v21 = vrot.slane %v7827_v47, 7  ;;  %v7956_v4 = vrot.slane %v7828_v30, 7 }
 0x645   : > { %v7949_v62 = vrot.slane %v7947_v27, 4  ;;  %v7952_v49 = vrot.slane %v7950_v5, 4  ;;  %8045 = vst [vmem:[#allocation4 + $0x314] sm:$0xf] %v7945_v3  ;;  %v7959_v34 = vrot.slane %v7829_v26, 7  ;;  %v7962_v29 = vrot.slane %v7830_v33, 7  ;;  %13199 = vmatprep.mubr.bf16.mxu1 %v13604_v9 }
 0x646   : > { %v7833_v36 = vld [vmem:[#allocation3 + $0x8c] sm:$0xf]  ;;  %v7948_v61 = vsel %vm18080_vm4, %v7946_v50, %v7947_v27  ;;  %v7965_v16 = vrot.slane %v18165_v24, 7  ;;  %v7968_v35 = vrot.slane %v7832_v38, 7  ;;  %v7834_v25 = vld [vmem:[#allocation3 + $0x90] sm:$0xf]  ;;  %v10036_v27 = vadd.f32 %v10035_v7, %v17321_v60  ;;  %v10040_v60 = vpop.f32.mrf.mxu1 }
 0x647   : > { %v7951_v13 = vsel %vm18080_vm4, %v7949_v62, %v7950_v5  ;;  %8046 = vst [vmem:[#allocation4 + $0x338] sm:$0xf] %v7948_v61  ;;  %v7954_v47 = vsel %vm18080_vm4, %v7952_v49, %v7953_v21  ;;  %v7955_v30 = vrot.slane %v7953_v21, 4  ;;  %v7958_v26 = vrot.slane %v7956_v4, 4  ;;  %v7835_v43 = vld [vmem:[#allocation3 + $0x94] sm:$0xf]  ;;  %v10211_v5 = vpop.f32.mrf.mxu0 }
 0x648   : > { %8047 = vst [vmem:[#allocation4 + $0x35c] sm:$0xf] %v7951_v13  ;;  %v7961_v33 = vrot.slane %v7959_v34, 4  ;;  %8048 = vst [vmem:[#allocation4 + $0x380] sm:$0xf] %v7954_v47  ;;  %v7964_v3 = vrot.slane %v7962_v29, 4  ;;  %v10041_v12 = vadd.f32 %v10040_v60, %v17383_v0 }
 0x649   : > { %v7836_v22 = vld [vmem:[#allocation3 + $0x98] sm:$0xf]  ;;  %v7957_v24 = vsel %vm18080_vm4, %v7955_v30, %v7956_v4  ;;  %v7960_v38 = vsel %vm18080_vm4, %v7958_v26, %v7959_v34  ;;  %v7967_v50 = vrot.slane %v7965_v16, 4  ;;  %v7970_v62 = vrot.slane %v7968_v35, 4  ;;  %v10212_v7 = vpop.f32.mrf.mxu0  ;;  %v7837_v49 = vld [vmem:[#allocation3 + $0x9c] sm:$0xf] }
 0x64a   : > { %v7963_v9 = vsel %vm18080_vm4, %v7961_v33, %v7962_v29  ;;  %8049 = vst [vmem:[#allocation4 + $0x3a4] sm:$0xf] %v7957_v24  ;;  %8050 = vst [vmem:[#allocation4 + $0x3c8] sm:$0xf] %v7960_v38  ;;  %v7971_v15 = vrot.slane %v7833_v36, 7  ;;  %v7974_v4 = vrot.slane %v7834_v25, 7  ;;  %v7966_v42 = vsel %vm18080_vm4, %v7964_v3, %v7965_v16  ;;  %v10042_v36 = vpop.f32.mrf.mxu1 }
 0x64b   : > { %8051 = vst [vmem:[#allocation4 + $0x3ec] sm:$0xf] %v7963_v9  ;;  %v13605_v21 = vld [vmem:[#allocation4 + $0x188] ss:$36 sps:$4 sm:$0xff]   ;;  %v7977_v61 = vrot.slane %v7835_v43, 7  ;;  %v7980_v13 = vrot.slane %v7836_v22, 7  ;;  %v7969_v47 = vsel %vm18080_vm4, %v7967_v50, %v7968_v35  ;;  %v10214_v26 = vpop.f32.mrf.mxu0  ;;  %v18194_v43 = vadd.f32 %v10212_v7, %v10036_v27 }
 0x64c   : > { %v13606_v34 = vld [vmem:[#allocation4 + $0x1d0] ss:$36 sps:$4 sm:$0xff]   ;;  %v7972_v29 = vsel %vm18080_vm4, %v7970_v62, %v7971_v15  ;;  %v7973_v30 = vrot.slane %v7971_v15, 4  ;;  %13200 = vmatmul.mubr.bf16.gmra.mxu1 %v13605_v21  ;;  %8052 = vst [vmem:[#allocation4 + $0x410] sm:$0xf] %v7966_v42  ;;  %v7976_v0 = vrot.slane %v7974_v4, 4  ;;  %v10043_v35 = vpop.f32.mrf.mxu1 }
 0x64d   : > { %8053 = vst [vmem:[#allocation4 + $0x434] sm:$0xf] %v7969_v47  ;;  %8054 = vst [vmem:[#allocation4 + $0x458] sm:$0xf] %v7972_v29  ;;  %v7979_v25 = vrot.slane %v7977_v61, 4  ;;  %v7982_v33 = vrot.slane %v7980_v13, 4  ;;  %13203 = vmatprep.mubr.bf16.mxu1 %v13606_v34  ;;  %v10044_v38 = vadd.f32 %v10043_v35, %v17393_v51  ;;  %v10217_v50 = vpop.f32.mrf.mxu0 }
 0x64e   : > { %v7838_v5 = vld [vmem:[#allocation3 + $0xa0] sm:$0x7]  ;;  %v7975_v16 = vsel %vm18080_vm4, %v7973_v30, %v7974_v4  ;;  %v7978_v22 = vsel %vm18080_vm4, %v7976_v0, %v7977_v61  ;;  %v7983_v9 = vrot.slane %v7837_v49, 7  ;;  %v10045_v27 = vpop.f32.mrf.mxu1  ;;  %v18205_v60 = vadd.f32 %v10217_v50, %v10041_v12  ;;  %v13608_v4 = vld [vmem:[#allocation4 + $0x260] ss:$36 sps:$4 sm:$0xff]  }
 0x64f   : > { %8055 = vst [vmem:[#allocation4 + $0x47c] sm:$0xf] %v7975_v16  ;;  %v7981_v24 = vsel %vm18080_vm4, %v7979_v25, %v7980_v13  ;;  %8056 = vst [vmem:[#allocation4 + $0x4a0] sm:$0xf] %v7978_v22  ;;  %v7986_v3 = vrot.slane %v7838_v5, 7  ;;  %v10219_v21 = vpop.f32.mrf.mxu0  ;;  %vm11805_vm6 = vcmask 7168  }
 0x650   : > { %8057 = vst [vmem:[#allocation4 + $0x4c4] sm:$0xf] %v7981_v24  ;;  %v7984_v62 = vsel %vm18080_vm4, %v7982_v33, %v7983_v9  ;;  %v7985_v15 = vrot.slane %v7983_v9, 4  ;;  %v13607_v7 = vld [vmem:[#allocation4 + $0x218] ss:$36 sps:$4 sm:$0xff]   ;;  %v10048_v61 = vpop.f32.mrf.mxu1 }
 0x651   : > { %8058 = vst [vmem:[#allocation4 + $0x4e8] sm:$0xf] %v7984_v62  ;;  %v10049_v49 = vadd.f32 %v10048_v61, %v17434_v17  ;;  %v10220_v13 = vpop.f32.mrf.mxu0  ;;  %v13609_v36 = vld [vmem:[#allocation4 + $0x2a8] ss:$36 sps:$4 sm:$0xff]   ;;  %v13610_v26 = vld [vmem:[#allocation4 + $0x2f0] ss:$36 sps:$4 sm:$0xff]  }
 0x652   : > { %v7987_v51 = vsel %vm18080_vm4, %v7985_v15, %v7986_v3  ;;  %v10050_v34 = vpop.f32.mrf.mxu1  ;;  %v18210_v42 = vadd.f32 %v10220_v13, %v10044_v38  ;;  %v13611_v38 = vld [vmem:[#allocation4 + $0x338] ss:$36 sps:$4 sm:$0xff]   ;;  %v13612_v9 = vld [vmem:[#allocation4 + $0x380] ss:$36 sps:$4 sm:$0xff]   ;;  %v13613_v21 = vld [vmem:[#allocation4 + $0x3c8] ss:$36 sps:$4 sm:$0xff]  }
 0x653   : > { %8059 = vst [vmem:[#allocation4 + $0x50c] sm:$0xf] %v7987_v51  ;;  %v10222_v12 = vpop.f32.mrf.mxu0 }
 0x654   : > { %13204 = vmatmul.mubr.bf16.gmra.mxu1 %v13607_v7  ;;  %v10051_v47 = vpop.f32.mrf.mxu1  ;;  %v13614_v51 = vld [vmem:[#allocation4 + $0x410] ss:$36 sps:$4 sm:$0xff]  }
 0x655   : > { %13207 = vmatprep.mubr.bf16.mxu1 %v13608_v4  ;;  %v10052_v29 = vadd.f32 %v10051_v47, %v17459_v28  ;;  %v10225_v0 = vpop.f32.mrf.mxu0 }
 0x656   : > { %v10053_v30 = vpop.f32.mrf.mxu1  ;;  %v18213_v48 = vadd.f32 %v10225_v0, %v10049_v49 }
 0x657   : > { %v10227_v17 = vpop.f32.mrf.mxu0 }
 0x658   : > { %v10056_v25 = vpop.f32.mrf.mxu1 }
 0x659   : > { %v10057_v33 = vadd.f32 %v10056_v25, %v17533_v45  ;;  %v10228_v16 = vpop.f32.mrf.mxu0 }
 0x65a   : > { %v10058_v5 = vpop.f32.mrf.mxu1  ;;  %v18216_v35 = vadd.f32 %v10228_v16, %v10052_v29  ;;  %v13615_v29 = vld [vmem:[#allocation4 + $0x458] ss:$36 sps:$4 sm:$0xff]  }
 0x65b   : > { %v10230_v24 = vpop.f32.mrf.mxu0 }
 0x65c   : > { %13208 = vmatmul.mubr.bf16.gmra.mxu1 %v13609_v36  ;;  %v10059_v22 = vpop.f32.mrf.mxu1  ;;  %v13616_v36 = vld [vmem:[#allocation4 + $0x4a0] ss:$36 sps:$4 sm:$0xff]  }
 0x65d   : > { %13211 = vmatprep.mubr.bf16.mxu1 %v13610_v26  ;;  %v10060_v28 = vadd.f32 %v10059_v22, %v17538_v39  ;;  %v10233_v3 = vpop.f32.mrf.mxu0  ;;  %v13617_v22 = vld [vmem:[#allocation4 + $0x4e8] ss:$36 sps:$4 sm:$0xff]  }
 0x65e   : > { %v10061_v27 = vpop.f32.mrf.mxu1  ;;  %v18219_v50 = vadd.f32 %v10233_v3, %v10057_v33 }
 0x65f   : > { %v10235_v62 = vpop.f32.mrf.mxu0 }
 0x660   : > { %v10064_v15 = vpop.f32.mrf.mxu1 }
 0x661   : > { %v10065_v45 = vadd.f32 %v10064_v15, %v17582_v18  ;;  %v10236_v7 = vpop.f32.mrf.mxu0 }
 0x662   : > { %v10066_v4 = vpop.f32.mrf.mxu1  ;;  %v18222_v61 = vadd.f32 %v10236_v7, %v10060_v28 }
 0x663   : > { %v10238_v49 = vpop.f32.mrf.mxu0 }
 0x664   : > { %13212 = vmatmul.mubr.bf16.gmra.mxu1 %v13611_v38  ;;  %v10067_v39 = vpop.f32.mrf.mxu1 }
 0x665   : > { %13215 = vmatprep.mubr.bf16.mxu1 %v13612_v9  ;;  %v10068_v13 = vadd.f32 %v10067_v39, %v17612_v37  ;;  %v10241_v12 = vpop.f32.mrf.mxu0 }
 0x666   : > { %v10069_v34 = vpop.f32.mrf.mxu1  ;;  %v18225_v47 = vadd.f32 %v10241_v12, %v10065_v45 }
 0x667   : > { %v10243_v30 = vpop.f32.mrf.mxu0 }
 0x668   : > { %v10072_v18 = vpop.f32.mrf.mxu1 }
 0x669   : > { %v10073_v26 = vadd.f32 %v10072_v18, %v17647_v10  ;;  %v10244_v0 = vpop.f32.mrf.mxu0 }
 0x66a   : > { %v10074_v25 = vpop.f32.mrf.mxu1  ;;  %v18228_v17 = vadd.f32 %v10244_v0, %v10068_v13 }
 0x66b   : > { %v10246_v33 = vpop.f32.mrf.mxu0 }
 0x66c   : > { %13216 = vmatmul.mubr.bf16.gmra.mxu1 %v13613_v21  ;;  %v10075_v5 = vpop.f32.mrf.mxu1 }
 0x66d   : > { %13219 = vmatprep.mubr.bf16.mxu1 %v13614_v51  ;;  %v10076_v37 = vadd.f32 %v10075_v5, %v17649_v20  ;;  %v10249_v24 = vpop.f32.mrf.mxu0 }
 0x66e   : > { %v10077_v16 = vpop.f32.mrf.mxu1  ;;  %v18231_v38 = vadd.f32 %v10249_v24, %v10073_v26 }
 0x66f   : > { %v10251_v28 = vpop.f32.mrf.mxu0 }
 0x670   : > { %v10080_v9 = vpop.f32.mrf.mxu1 }
 0x671   : > { %v10081_v27 = vadd.f32 %v10080_v9, %v17688_v54  ;;  %v10252_v10 = vpop.f32.mrf.mxu0 }
 0x672   : > { %v10082_v3 = vpop.f32.mrf.mxu1  ;;  %v18234_v62 = vadd.f32 %v10252_v10, %v10076_v37 }
 0x673   : > { %v10254_v15 = vpop.f32.mrf.mxu0 }
 0x674   : > { %13220 = vmatmul.mubr.bf16.gmra.mxu1 %v13615_v29  ;;  %v10083_v45 = vpop.f32.mrf.mxu1 }
 0x675   : > { %13223 = vmatprep.mubr.bf16.mxu1 %v13616_v36  ;;  %v10084_v7 = vadd.f32 %v10083_v45, %v17724_v11  ;;  %v10257_v20 = vpop.f32.mrf.mxu0 }
 0x676   : > { %v10085_v21 = vpop.f32.mrf.mxu1  ;;  %v18237_v4 = vadd.f32 %v10257_v20, %v10081_v27 }
 0x677   : > { %v10259_v49 = vpop.f32.mrf.mxu0 }
 0x678   : > { %v10088_v51 = vpop.f32.mrf.mxu1 }
 0x679   : > { %v10089_v39 = vadd.f32 %v10088_v51, %v17757_v23  ;;  %v10260_v34 = vpop.f32.mrf.mxu0 }
 0x67a   : > { %v10090_v13 = vpop.f32.mrf.mxu1  ;;  %v18240_v12 = vadd.f32 %v10260_v34, %v10084_v7 }
 0x67b   : > { %v10262_v29 = vpop.f32.mrf.mxu0 }
 0x67c   : > { %13224 = vmatmul.mubr.bf16.gmra.mxu1 %v13617_v22  ;;  %v10091_v54 = vpop.f32.mrf.mxu1 }
 0x67d   : > { %v10092_v30 = vadd.f32 %v10091_v54, %v17759_v58 }
 0x67e   : > { %v10093_v36 = vpop.f32.mrf.mxu1 }
 0x67f   : > { %v10265_v18 = vpop.f32.mrf.mxu0 }
 0x680   : > { %v18243_v26 = vadd.f32 %v10265_v18, %v10089_v39 }
 0x681   : > { %v10267_v11 = vpop.f32.mrf.mxu0 }
 0x683   : > { %v10096_v0 = vpop.f32.mrf.mxu1  ;;  %v10268_v33 = vpop.f32.mrf.mxu0 }
 0x684   : > { %v10097_v25 = vadd.f32 %v10096_v0, %v17795_v53  ;;  %v18246_v37 = vadd.f32 %v10268_v33, %v10092_v30  ;;  %v19042_v33 = vld [vmem:[#allocation6_spill] sm:$0xff] }
 0x685   : > { %v10098_v5 = vpop.f32.mrf.mxu1  ;;  %v10270_v23 = vpop.f32.mrf.mxu0 }
 0x687   : > { %v10099_v16 = vpop.f32.mrf.mxu1 }
 0x688   : > { %v10100_v22 = vadd.f32 %v10099_v16, %v17837_v32 }
 0x689   : > { %v10101_v24 = vpop.f32.mrf.mxu1 }
 0x68b   : > { %v10273_v28 = vpop.f32.mrf.mxu0 }
 0x68c   : > { %v18249_v9 = vadd.f32 %v10273_v28, %v10097_v25  ;;  %v19043_v28 = vld [vmem:[#allocation7_spill] sm:$0xff] }
 0x68d   : > { %v10275_v58 = vpop.f32.mrf.mxu0 }
 0x68f   : > { %v10104_v27 = vpop.f32.mrf.mxu1  ;;  %v10276_v3 = vpop.f32.mrf.mxu0 }
 0x690   : > { %v10105_v10 = vadd.f32 %v10104_v27, %v17839_v46  ;;  %v18252_v45 = vadd.f32 %v10276_v3, %v10100_v22 }
 0x691   : > { %v10106_v15 = vpop.f32.mrf.mxu1  ;;  %v10278_v53 = vpop.f32.mrf.mxu0 }
 0x693   : > { %v10107_v7 = vpop.f32.mrf.mxu1 }
 0x694   : > { %v10108_v21 = vadd.f32 %v10107_v7, %v17882_v19 }
 0x695   : > { %v10109_v20 = vpop.f32.mrf.mxu1 }
 0x697   : > { %v10281_v51 = vpop.f32.mrf.mxu0 }
 0x698   : > { %v18255_v49 = vadd.f32 %v10281_v51, %v10105_v10 }
 0x699   : > { %v10283_v32 = vpop.f32.mrf.mxu0 }
 0x69a   : > { %v10112_v39 = vpop.f32.mrf.mxu1 }
 0x69b   : > { %v10113_v13 = vadd.f32 %v10112_v39, %v17923_v44  ;;  %v10284_v34 = vpop.f32.mrf.mxu0 }
 0x69c   : > { %v10114_v54 = vpop.f32.mrf.mxu1  ;;  %v18258_v29 = vadd.f32 %v10284_v34, %v10108_v21 }
 0x69d   : > { %v10286_v46 = vpop.f32.mrf.mxu0 }
 0x69e   : > { %v10115_v30 = vpop.f32.mrf.mxu1 }
 0x69f   : > { %v10116_v36 = vadd.f32 %v10115_v30, %v17926_v63  ;;  %v14029_v63 = vmov 32  }
 0x6a0   : > { %v10117_v18 = vpop.f32.mrf.mxu1  ;;  %13254 = vset.pattern.permute.xlu1 %v14029_v63  ;;  %13255 = vset.pattern.permute.xlu0 %v14029_v63 }
 0x6a4   : > { %v10289_v11 = vpop.f32.mrf.mxu0 }
 0x6a5   : > { %v18261_v0 = vadd.f32 %v10289_v11, %v10113_v13 }
 0x6a6   : > { %v10120_v19 = vpop.f32.mrf.mxu1  ;;  %v10291_v25 = vpop.f32.mrf.mxu0 }
 0x6a7   : > { %v10121_v5 = vadd.f32 %v10120_v19, %v19042_v33 }
 0x6a8   : > { %v10122_v23 = vpop.f32.mrf.mxu1  ;;  %v10292_v16 = vpop.f32.mrf.mxu0 }
 0x6a9   : > { %v18264_v22 = vadd.f32 %v10292_v16, %v10116_v36 }
 0x6aa   : > { %v10123_v44 = vpop.f32.mrf.mxu1  ;;  %v10294_v24 = vpop.f32.mrf.mxu0 }
 0x6ab   : > { %v10124_v58 = vadd.f32 %v10123_v44, %v19043_v28 }
 0x6ac   : > { %v10125_v27 = vpop.f32.mrf.mxu1 }
 0x6ae   : > { %v10297_v10 = vpop.f32.mrf.mxu0 }
 0x6af   : > { %v18267_v3 = vadd.f32 %v10297_v10, %v10121_v5 }
 0x6b0   : > { %v10299_v15 = vpop.f32.mrf.mxu0 }
 0x6b2   : > { %v10128_v53 = vpop.f32.mrf.mxu1  ;;  %v10300_v21 = vpop.f32.mrf.mxu0 }
 0x6b3   : > { %v10129_v7 = vadd.f32 %v10128_v53, %v18015_v41  ;;  %v18270_v51 = vadd.f32 %v10300_v21, %v10124_v58 }
 0x6b4   : > { %v10130_v20 = vpop.f32.mrf.mxu1  ;;  %v10302_v32 = vpop.f32.mrf.mxu0 }
 0x6b6   : > { %v10131_v39 = vpop.f32.mrf.mxu1 }
 0x6b7   : > { %v10132_v13 = vadd.f32 %v10131_v39, %v18018_v8 }
 0x6b8   : > { %v10133_v34 = vpop.f32.mrf.mxu1 }
 0x6bb   : > { %v10305_v54 = vpop.f32.mrf.mxu0 }
 0x6bc   : > { %v18273_v46 = vadd.f32 %v10305_v54, %v10129_v7 }
 0x6bd   : > { %v10307_v30 = vpop.f32.mrf.mxu0 }
 0x6be   : > { %v10136_v36 = vpop.f32.mrf.mxu1 }
 0x6bf   : > { %v10137_v18 = vadd.f32 %v10136_v36, %v18029_v2  ;;  %v10308_v11 = vpop.f32.mrf.mxu0 }
 0x6c0   : > { %v10138_v19 = vpop.f32.mrf.mxu1  ;;  %v18276_v25 = vadd.f32 %v10308_v11, %v10132_v13 }
 0x6c1   : > { %v10310_v41 = vpop.f32.mrf.mxu0 }
 0x6c2   : > { %v10139_v33 = vpop.f32.mrf.mxu1 }
 0x6c3   : > { %v10140_v5 = vadd.f32 %v10139_v33, %v18052_v6 }
 0x6c4   : > { %v10141_v23 = vpop.f32.mrf.mxu1 }
 0x6c7   : > { %v10313_v16 = vpop.f32.mrf.mxu0 }
 0x6c8   : > { %v18279_v44 = vadd.f32 %v10313_v16, %v10137_v18 }
 0x6c9   : > { %v10315_v8 = vpop.f32.mrf.mxu0 }
 0x6cb   : > { %v10144_v24 = vpop.f32.mrf.mxu1  ;;  %v10316_v58 = vpop.f32.mrf.mxu0 }
 0x6cc   : > { %v10145_v28 = vadd.f32 %v10144_v24, %v18054_v59  ;;  %v18282_v10 = vadd.f32 %v10316_v58, %v10140_v5 }
 0x6cd   : > { %v10146_v27 = vpop.f32.mrf.mxu1  ;;  %v10318_v2 = vpop.f32.mrf.mxu0 }
 0x6cf   : > { %v10147_v63 = vpop.f32.mrf.mxu1 }
 0x6d0   : > { %v10148_v15 = vadd.f32 %v10147_v63, %v18063_v31 }
 0x6d1   : > { %v10149_v53 = vpop.f32.mrf.mxu1 }
 0x6d4   : > { %v10321_v7 = vpop.f32.mrf.mxu0 }
 0x6d5   : > { %v18285_v21 = vadd.f32 %v10321_v7, %v10145_v28 }
 0x6d6   : > { %v10152_v6 = vpop.f32.mrf.mxu1  ;;  %v10323_v20 = vpop.f32.mrf.mxu0 }
 0x6d7   : > { %v10153_v32 = vadd.f32 %v10152_v6, %v18100_v55 }
 0x6d8   : > { %v10154_v39 = vpop.f32.mrf.mxu1  ;;  %v10324_v13 = vpop.f32.mrf.mxu0 }
 0x6d9   : > { %v18288_v34 = vadd.f32 %v10324_v13, %v10148_v15 }
 0x6da   : > { %v10155_v59 = vpop.f32.mrf.mxu1  ;;  %v10326_v54 = vpop.f32.mrf.mxu0 }
 0x6db   : > { %v10156_v30 = vadd.f32 %v10155_v59, %v18119_v52  ;;  %v18314_v54 = vld [vmem:[%s18996_s4 + $0x30] ss:$0 sm:$0xff] }
 0x6dc   : > { %v10157_v36 = vpop.f32.mrf.mxu1 }
 0x6df   : > { %v10329_v18 = vpop.f32.mrf.mxu0 }
 0x6e0   : > { %v18291_v11 = vadd.f32 %v10329_v18, %v10153_v32 }
 0x6e1   : > { %v10331_v31 = vpop.f32.mrf.mxu0 }
 0x6e2   : > { %v10160_v19 = vpop.f32.mrf.mxu1 }
 0x6e3   : > { %v10161_v41 = vadd.f32 %v10160_v19, %v18144_v57  ;;  %v10332_v33 = vpop.f32.mrf.mxu0 }
 0x6e4   : > { %v10162_v5 = vpop.f32.mrf.mxu1  ;;  %v18294_v23 = vadd.f32 %v10332_v33, %v10156_v30 }
 0x6e5   : > { %v10334_v55 = vpop.f32.mrf.mxu0 }
 0x6e6   : > { %v10163_v16 = vpop.f32.mrf.mxu1 }
 0x6e7   : > { %v10164_v8 = vadd.f32 %v10163_v16, %v18146_v1  ;;  %v18306_v1 = vld [vmem:[%s18996_s4 + $0x2f] ss:$0 sm:$0xff] }
 0x6e8   : > { %v10165_v24 = vpop.f32.mrf.mxu1 }
 0x6ee   : > { %v10337_v28 = vpop.f32.mrf.mxu0 }
 0x6ef   : > { %v18297_v58 = vadd.f32 %v10337_v28, %v10161_v41 }
 0x6f0   : > { %v10339_v52 = vpop.f32.mrf.mxu0 }
 0x6f1   : > { %v10168_v27 = vpop.f32.mrf.mxu1 }
 0x6f2   : > { %v10169_v2 = vadd.f32 %v10168_v27, %v18152_v56  ;;  %v10340_v63 = vpop.f32.mrf.mxu0 }
 0x6f3   : > { %v10170_v15 = vpop.f32.mrf.mxu1  ;;  %v18300_v53 = vadd.f32 %v10340_v63, %v10164_v8 }
 0x6f4   : > { %v10342_v57 = vpop.f32.mrf.mxu0 }
 0x6f5   : > { %v10171_v7 = vpop.f32.mrf.mxu1 }
 0x6f6   : > { %v10172_v6 = vadd.f32 %v10171_v7, %v18167_v14 }
 0x6f7   : > { %v10173_v20 = vpop.f32.mrf.mxu1 }
 0x6fc   : > { %v10345_v32 = vpop.f32.mrf.mxu0  ;;  %v13193_v39 = vpop.f32.mrf.mxu1 }
 0x6fd   : > { %v18308_v13 = vadd.f32 %v10345_v32, %v10169_v2  ;;  %v10395_v56 = vadd.f32 %v13193_v39, %v18205_v60 }
 0x6fe   : > { %v10347_v59 = vpop.f32.mrf.mxu0  ;;  %v10386_v30 = vpop.f32.mrf.mxu1 }
 0x6ff   : > { %v10535_v14 = vmul.f32 %v18306_v1, %v10395_v56  ;;  %v10387_v36 = vadd.f32 %v10386_v30, %v18179_v40 }
 0x700   : > { %v10348_v18 = vpop.f32.mrf.mxu0  ;;  %v13194_v31 = vpop.f32.mrf.mxu1 }
 0x701   : > { %v18319_v19 = vadd.f32 %v18314_v54, %v10535_v14  ;;  %v18321_v41 = vadd.f32 %v10348_v18, %v10172_v6  ;;  %v10533_v60 = vmul.f32 %v18306_v1, %v10387_v36  ;;  %v10398_v33 = vadd.f32 %v13194_v31, %v18210_v42 }
 0x702   : > { %v10350_v5 = vpop.f32.mrf.mxu0  ;;  %v10389_v55 = vpop.f32.mrf.mxu1 }
 0x703   : > { %v12693_v16 = vmul.f32 -1.442695, %v18319_v19  ;;  %v18327_v8 = vadd.f32 %v18314_v54, %v10533_v60  ;;  %v10536_v40 = vmul.f32 %v18306_v1, %v10398_v33  ;;  %v10390_v24 = vadd.f32 %v10389_v55, %v18194_v43 }
 0x704   : > { %v13197_v28 = vpop.f32.mrf.mxu1  ;;  %vm10611_vm8 = vcmp.gt.f32.partialorder %v18319_v19, 0.0 }
 0x705   : > { %13706 = vpow2.f32 %v12693_v16  ;;  %v12691_v52 = vmul.f32 -1.442695, %v18327_v8  ;;  %v18333_v27 = vadd.f32 %v18314_v54, %v10536_v40  ;;  %v10534_v42 = vmul.f32 %v18306_v1, %v10390_v24 }
 0x706   : > { %v10402_v2 = vpop.f32.mrf.mxu1  ;;  %v10411_v57 = vadd.f32 %v13197_v28, %v18219_v50  ;;  %vm10609_vm10 = vcmp.gt.f32.partialorder %v18327_v8, 0.0 }
 0x707   : > { %13708 = vpow2.f32 %v12691_v52  ;;  %v12694_v63 = vmul.f32 -1.442695, %v18333_v27  ;;  %v18338_v15 = vadd.f32 %v18314_v54, %v10534_v42  ;;  %v10403_v14 = vadd.f32 %v10402_v2, %v18213_v48 }
 0x708   : > { %v13198_v43 = vpop.f32.mrf.mxu1  ;;  %v10539_v6 = vmul.f32 %v18306_v1, %v10411_v57  ;;  %vm10612_vm12 = vcmp.gt.f32.partialorder %v18333_v27, 0.0 }
 0x709   : > { %13710 = vpow2.f32 %v12694_v63  ;;  %v12692_v7 = vmul.f32 -1.442695, %v18338_v15  ;;  %v10414_v20 = vadd.f32 %v13198_v43, %v18222_v61  ;;  %v10537_v60 = vmul.f32 %v18306_v1, %v10403_v14 }
 0x70a   : > { %v18345_v32 = vadd.f32 %v18314_v54, %v10539_v6  ;;  %v10405_v61 = vpop.f32.mrf.mxu1  ;;  %vm10610_vm9 = vcmp.gt.f32.partialorder %v18338_v15, 0.0 }
 0x70b   : > { %13712 = vpow2.f32 %v12692_v7  ;;  %v10540_v39 = vmul.f32 %v18306_v1, %v10414_v20  ;;  %v10406_v55 = vadd.f32 %v10405_v61, %v18216_v35  ;;  %v18357_v48 = vadd.f32 %v18314_v54, %v10537_v60 }
 0x70c   : > { %v12697_v36 = vmul.f32 -1.442695, %v18345_v32  ;;  %v13201_v16 = vpop.f32.mrf.mxu1  ;;  %vm10615_vm13 = vcmp.gt.f32.partialorder %v18345_v32, 0.0 }
 0x70d   : > { %v18351_v18 = vadd.f32 %v18314_v54, %v10540_v39  ;;  %v10538_v24 = vmul.f32 %v18306_v1, %v10406_v55  ;;  %v12695_v52 = vmul.f32 -1.442695, %v18357_v48  ;;  %v10427_v2 = vadd.f32 %v13201_v16, %v18231_v38 }
 0x70e   : > { %v10418_v28 = vpop.f32.mrf.mxu1  ;;  %vm10613_vm15 = vcmp.gt.f32.partialorder %v18357_v48, 0.0 }
 0x70f   : > { %v12698_v33 = vmul.f32 -1.442695, %v18351_v18  ;;  %v18363_v57 = vadd.f32 %v18314_v54, %v10538_v24  ;;  %v10543_v7 = vmul.f32 %v18306_v1, %v10427_v2  ;;  %vm10616_vm11 = vcmp.gt.f32.partialorder %v18351_v18, 0.0 }
 0x710   : > { %v13202_v35 = vpop.f32.mrf.mxu1 }
 0x711   : > { %v12696_v20 = vmul.f32 -1.442695, %v18363_v57  ;;  %v10430_v39 = vadd.f32 %v13202_v35, %v18234_v62  ;;  %v10419_v62 = vadd.f32 %v10418_v28, %v18225_v47  ;;  %vm10614_vm1 = vcmp.gt.f32.partialorder %v18363_v57, 0.0 }
 0x712   : > { %v13707_v56 = vpop.eup %13706 }
 0x713   : > { %v10935_v59 = vadd.f32 1.0, %v13707_v56  ;;  %v10541_v55 = vmul.f32 %v18306_v1, %v10419_v62 }
 0x714   : > { %v13709_v30 = vpop.eup %13708 }
 0x715   : > { %13714 = vrcp.f32 %v10935_v59  ;;  %v10933_v50 = vadd.f32 1.0, %v13709_v30  ;;  %v18370_v59 = vadd.f32 %v18314_v54, %v10543_v7 }
 0x716   : > { %v13711_v31 = vpop.eup %13710 }
 0x717   : > { %13716 = vrcp.f32 %v10933_v50  ;;  %v10936_v5 = vadd.f32 1.0, %v13711_v31  ;;  %v10544_v50 = vmul.f32 %v18306_v1, %v10430_v39  ;;  %v12701_v31 = vmul.f32 -1.442695, %v18370_v59 }
 0x718   : > { %13718 = vpow2.f32 %v12697_v36  ;;  %v13713_v40 = vpop.eup %13712  ;;  %vm10619_vm2 = vcmp.gt.f32.partialorder %v18370_v59, 0.0 }
 0x719   : > { %13720 = vpow2.f32 %v12698_v33  ;;  %v10934_v42 = vadd.f32 1.0, %v13713_v40  ;;  %v18376_v60 = vadd.f32 %v18314_v54, %v10544_v50  ;;  %v10421_v33 = vpop.f32.mrf.mxu1 }
 0x71a   : > { %13722 = vrcp.f32 %v10936_v5  ;;  %v10422_v24 = vadd.f32 %v10421_v33, %v18228_v17 }
 0x71b   : > { %13724 = vpow2.f32 %v12695_v52  ;;  %v12702_v40 = vmul.f32 -1.442695, %v18376_v60  ;;  %v13205_v47 = vpop.f32.mrf.mxu1  ;;  %vm10620_vm5 = vcmp.gt.f32.partialorder %v18376_v60, 0.0 }
 0x71c   : > { %13726 = vrcp.f32 %v10934_v42  ;;  %v18384_v42 = vadd.f32 %v18314_v54, %v10541_v55 }
 0x71d   : > { %13728 = vpow2.f32 %v12696_v20  ;;  %v10434_v7 = vpop.f32.mrf.mxu1 }
 0x71e   : > { %v12699_v17 = vmul.f32 -1.442695, %v18384_v42  ;;  %vm10617_vm7 = vcmp.gt.f32.partialorder %v18384_v42, 0.0 }
 0x722   : > { %v13715_v63 = vpop.eup %13714 }
 0x723   : > { %11421 = vperm.xlu1 %13254, %v13715_v63   ;;  %v11083_v30 = vsub.f32 1.0, %v13715_v63 }
 0x724   : > { %v13717_v43 = vpop.eup %13716 }
 0x725   : > { %v13719_v6 = vpop.eup %13718  ;;  %v11081_v56 = vsub.f32 1.0, %v13717_v43 }
 0x726   : > { %v10939_v38 = vadd.f32 1.0, %v13719_v6  ;;  %v13721_v14 = vpop.eup %13720  ;;  %v10443_v6 = vadd.f32 %v13205_v47, %v18243_v26  ;;  %v3166_v47 = vld [vmem:[%s18996_s4 + $0x8] sm:$0x3] }
 0x727   : > { %11701 = vrot.lane.b32.xlu1 %v13715_v63, %s14021_s12  ;;  %11119 = vperm.xlu0 %13255, %v11081_v56   ;;  %v13723_v36 = vpop.eup %13722  ;;  %v10940_v61 = vadd.f32 1.0, %v13721_v14  ;;  %v10542_v63 = vmul.f32 %v18306_v1, %v10422_v24  ;;  %v13206_v56 = vpop.f32.mrf.mxu1 }
 0x728   : > { %13730 = vrcp.f32 %v10939_v38  ;;  %v13725_v5 = vpop.eup %13724  ;;  %v11084_v52 = vsub.f32 1.0, %v13723_v36  ;;  %v10547_v38 = vmul.f32 %v18306_v1, %v10443_v6  ;;  %v10446_v50 = vadd.f32 %v13206_v56, %v18246_v37  ;;  %v3147_v6 = vpop.permute.xlu1 %3146 }
 0x729   : > { %13732 = vpow2.f32 %v12701_v31  ;;  %v13727_v16 = vpop.eup %13726  ;;  %v10937_v28 = vadd.f32 1.0, %v13725_v5  ;;  %v18390_v39 = vadd.f32 %v18314_v54, %v10542_v63  ;;  %v10435_v37 = vadd.f32 %v10434_v7, %v18237_v4 }
 0x72a   : > { %13734 = vrcp.f32 %v10940_v61  ;;  %v11082_v2 = vsub.f32 1.0, %v13727_v16  ;;  %v13729_v35 = vpop.eup %13728  ;;  %v18398_v31 = vadd.f32 %v18314_v54, %v10547_v38  ;;  %v10548_v61 = vmul.f32 %v18306_v1, %v10446_v50  ;;  %v3143_v38 = vld [vmem:[%s18996_s4 + $0x6] sm:$0x3] }
 0x72b   : > { %11129 = vperm.xlu1 %13254, %v11083_v30   ;;  %11426 = vperm.xlu0 %13255, %v13723_v36   ;;  %13736 = vpow2.f32 %v12702_v40  ;;  %v12700_v14 = vmul.f32 -1.442695, %v18390_v39  ;;  %vm10618_vm0 = vcmp.gt.f32.partialorder %v18390_v39, 0.0 }
 0x72c   : > { %13738 = vrcp.f32 %v10937_v28  ;;  %v12705_v5 = vmul.f32 -1.442695, %v18398_v31  ;;  %v18405_v40 = vadd.f32 %v18314_v54, %v10548_v61  ;;  %v10545_v28 = vmul.f32 %v18306_v1, %v10435_v37 }
 0x72d   : > { %13740 = vpow2.f32 %v12699_v17  ;;  %v3168_v17 = vrot.slane %v3166_v47, 6  ;;  %vm10623_vm4 = vcmp.gt.f32.partialorder %v18398_v31, 0.0 }
 0x72e   : > { %v12706_v4 = vmul.f32 -1.442695, %v18405_v40 }
 0x72f   : > { %11411 = vperm.xlu1 %13254, %v13717_v43   ;;  %11703 = vrot.lane.b32.xlu0 %v13723_v36, %s14021_s12  ;;  %v3170_v50 = vmul.f32 %v3168_v17, %v3147_v6 }
 0x733   : > { %11697 = vrot.lane.b32.xlu1 %v13717_v43, %s14021_s12  ;;  %11134 = vperm.xlu0 %13255, %v11084_v52   ;;  %v10938_v43 = vadd.f32 1.0, %v13729_v35  ;;  %v10437_v52 = vpop.f32.mrf.mxu1 }
 0x734   : > { %v10438_v63 = vadd.f32 %v10437_v52, %v18240_v12 }
 0x735   : > { %v13731_v20 = vpop.eup %13730  ;;  %13742 = vrcp.f32 %v10938_v43  ;;  %v13209_v7 = vpop.f32.mrf.mxu1  ;;  %v18415_v43 = vadd.f32 %v18314_v54, %v10545_v28 }
 0x736   : > { %v13733_v30 = vpop.eup %13732  ;;  %v11087_v62 = vsub.f32 1.0, %v13731_v20  ;;  %13744 = vpow2.f32 %v12700_v14 }
 0x737   : > { %11124 = vperm.xlu1 %13254, %v11082_v2   ;;  %11416 = vperm.xlu0 %13255, %v13727_v16   ;;  %v13735_v36 = vpop.eup %13734  ;;  %v10943_v26 = vadd.f32 1.0, %v13733_v30  ;;  %v10546_v30 = vmul.f32 %v18306_v1, %v10438_v63  ;;  %v10450_v14 = vpop.f32.mrf.mxu1 }
 0x738   : > { %v13737_v33 = vpop.eup %13736  ;;  %v11088_v24 = vsub.f32 1.0, %v13735_v36 }
 0x739   : > { %13746 = vrcp.f32 %v10943_v26  ;;  %v13739_v55 = vpop.eup %13738  ;;  %v12703_v26 = vmul.f32 -1.442695, %v18415_v43 }
 0x73a   : > { %13748 = vpow2.f32 %v12705_v5  ;;  %v13741_v2 = vpop.eup %13740  ;;  %v11085_v56 = vsub.f32 1.0, %v13739_v55  ;;  %v18425_v5 = vadd.f32 %v18314_v54, %v10546_v30  ;;  %v10451_v30 = vadd.f32 %v10450_v14, %v18249_v9 }
 0x73b   : > { %11441 = vperm.xlu1 %13254, %v13731_v20   ;;  %11699 = vrot.lane.b32.xlu0 %v13727_v16, %s14021_s12  ;;  %v10944_v16 = vadd.f32 1.0, %v13737_v33 }
 0x73d   : > { %13750 = vrcp.f32 %v10944_v16  ;;  %v3172_v16 = vrot.slane %v3170_v50, 2 }
 0x73e   : > { %13752 = vpow2.f32 %v12706_v4 }
 0x73f   : > { %11709 = vrot.lane.b32.xlu1 %v13731_v20, %s14021_s12  ;;  %11446 = vperm.xlu0 %13255, %v13735_v36   ;;  %v10941_v20 = vadd.f32 1.0, %v13741_v2  ;;  %v3174_v63 = vsel %vm3150_vm14, %v3172_v16, 0.0 }
 0x741   : > { %13754 = vrcp.f32 %v10941_v20 }
 0x742   : > { %v13743_v35 = vpop.eup %13742  ;;  %13756 = vpow2.f32 %v12703_v26 }
 0x743   : > { %11149 = vperm.xlu1 %13254, %v11087_v62   ;;  %11711 = vrot.lane.b32.xlu0 %v13735_v36, %s14021_s12  ;;  %v13745_v12 = vpop.eup %13744  ;;  %v3149_v36 = vmul.f32 %v3147_v6, %v3143_v38  ;;  %v10459_v62 = vadd.f32 %v13209_v7, %v18255_v49  ;;  %v11086_v37 = vsub.f32 1.0, %v13743_v35  ;;  %v12704_v49 = vmul.f32 -1.442695, %v18425_v5 }
 0x744   : > { %v10942_v33 = vadd.f32 1.0, %v13745_v12 }
 0x745   : > { %v10551_v52 = vmul.f32 %v18306_v1, %v10459_v62 }
 0x746   : > { %v13747_v61 = vpop.eup %13746  ;;  %13758 = vrcp.f32 %v10942_v33 }
 0x747   : > { %11431 = vperm.xlu1 %13254, %v13739_v55   ;;  %11154 = vperm.xlu0 %13255, %v11088_v24   ;;  %v3151_v24 = vsel %vm3150_vm14, %v3149_v36, 0.0  ;;  %v13749_v47 = vpop.eup %13748  ;;  %v18434_v7 = vadd.f32 %v18314_v54, %v10551_v52  ;;  %v11091_v17 = vsub.f32 1.0, %v13747_v61  ;;  %13760 = vpow2.f32 %v12704_v49 }
 0x748   : > { %v3152_v4 = vrot.slane %v3151_v24, 4  ;;  %vm10624_vm14 = vcmp.gt.f32.partialorder %v18405_v40, 0.0 }
 0x74a   : > { %v13751_v2 = vpop.eup %13750  ;;  %v3153_v38 = vadd.f32 %v3152_v4, %v3151_v24 }
 0x74b   : > { %11705 = vrot.lane.b32.xlu1 %v13739_v55, %s14021_s12  ;;  %11436 = vperm.xlu0 %13255, %v13743_v35   ;;  %v13210_v55 = vpop.f32.mrf.mxu1  ;;  %v13753_v20 = vpop.eup %13752  ;;  %v11092_v62 = vsub.f32 1.0, %v13751_v2 }
 0x74c   : > { %v10462_v28 = vadd.f32 %v13210_v55, %v18258_v29  ;;  %v12709_v29 = vmul.f32 -1.442695, %v18434_v7  ;;  %v10948_v50 = vadd.f32 1.0, %v13753_v20  ;;  %v3154_v33 = vrot.slane %v3153_v38, 2 }
 0x74d   : > { %v10453_v26 = vpop.f32.mrf.mxu1 }
 0x74e   : > { %v10552_v6 = vmul.f32 %v18306_v1, %v10462_v28  ;;  %v13755_v12 = vpop.eup %13754  ;;  %v10454_v9 = vadd.f32 %v10453_v26, %v18252_v45 }
 0x74f   : > { %11139 = vperm.xlu1 %13254, %v11085_v56   ;;  %11707 = vrot.lane.b32.xlu0 %v13743_v35, %s14021_s12  ;;  %v10947_v35 = vadd.f32 1.0, %v13749_v47  ;;  %v3175_v56 = vrot.slane %v3174_v63, 4  ;;  %v13757_v55 = vpop.eup %13756  ;;  %v13213_v14 = vpop.f32.mrf.mxu1  ;;  %v3155_v47 = vadd.f32 %v3154_v33, %v3153_v38 }
 0x750   : > { %v18441_v36 = vadd.f32 %v18314_v54, %v10552_v6  ;;  %v10945_v49 = vadd.f32 1.0, %v13757_v55  ;;  %v10550_v4 = vmul.f32 %v18306_v1, %v10454_v9  ;;  %v10475_v20 = vadd.f32 %v13213_v14, %v18267_v3  ;;  %v3181_v9 = vld [vmem:[%s18996_s4 + $0xb] sm:$0x1] }
 0x751   : > { %13762 = vrcp.f32 %v10947_v35  ;;  %v3156_v45 = vrot.slane %v3155_v47, 1 }
 0x752   : > { %13764 = vpow2.f32 %v12709_v29  ;;  %v12710_v16 = vmul.f32 -1.442695, %v18441_v36  ;;  %v18455_v29 = vadd.f32 %v18314_v54, %v10550_v4 }
 0x753   : > { %11461 = vperm.xlu1 %13254, %v13747_v61   ;;  %11144 = vperm.xlu0 %13255, %v11086_v37   ;;  %v10549_v37 = vmul.f32 %v18306_v1, %v10451_v30  ;;  %13766 = vrcp.f32 %v10948_v50  ;;  %v13759_v24 = vpop.eup %13758  ;;  %v3157_v26 = vadd.f32 %v3156_v45, %v3155_v47 }
 0x754   : > { %13768 = vpow2.f32 %v12710_v16  ;;  %v13761_v35 = vpop.eup %13760 }
 0x755   : > { %v18448_v28 = vadd.f32 %v18314_v54, %v10549_v37  ;;  %13770 = vrcp.f32 %v10945_v49  ;;  %v10946_v38 = vadd.f32 1.0, %v13761_v35  ;;  %v12708_v37 = vmul.f32 -1.442695, %v18455_v29 }
 0x757   : > { %11717 = vrot.lane.b32.xlu1 %v13747_v61, %s14021_s12  ;;  %11466 = vperm.xlu0 %13255, %v13751_v2   ;;  %v3176_v61 = vadd.f32 %v3175_v56, %v3174_v63  ;;  %v10466_v63 = vpop.f32.mrf.mxu1  ;;  %v12707_v6 = vmul.f32 -1.442695, %v18448_v28 }
 0x759   : > { %v3177_v52 = vrot.slane %v3176_v61, 2  ;;  %v13214_v30 = vpop.f32.mrf.mxu1  ;;  %13772 = vpow2.f32 %v12707_v6 }
 0x75a   : > { %v10478_v3 = vadd.f32 %v13214_v30, %v18270_v51  ;;  %13774 = vrcp.f32 %v10946_v38 }
 0x75b   : > { %11169 = vperm.xlu1 %13254, %v11091_v17   ;;  %11719 = vrot.lane.b32.xlu0 %v13751_v2, %s14021_s12  ;;  %v11089_v2 = vsub.f32 1.0, %v13755_v12  ;;  %v3178_v17 = vadd.f32 %v3177_v52, %v3176_v61  ;;  %v10555_v61 = vmul.f32 %v18306_v1, %v10475_v20  ;;  %13776 = vpow2.f32 %v12708_v37  ;;  %v10469_v38 = vpop.f32.mrf.mxu1 }
 0x75c   : > { %v10556_v51 = vmul.f32 %v18306_v1, %v10478_v3 }
 0x75d   : > { %v3179_v50 = vrot.slane %v3178_v17, 1  ;;  %v18468_v52 = vadd.f32 %v18314_v54, %v10555_v61 }
 0x75e   : > { %v13763_v56 = vpop.eup %13762  ;;  %v18475_v45 = vadd.f32 %v18314_v54, %v10556_v51 }
 0x75f   : > { %11451 = vperm.xlu1 %13254, %v13755_v12   ;;  %11174 = vperm.xlu0 %13255, %v11092_v62   ;;  %v3158_v62 = vld [vmem:[%s18996_s4 + $0xa] sm:$0x1]  ;;  %v13765_v33 = vpop.eup %13764  ;;  %v3180_v16 = vadd.f32 %v3179_v50, %v3178_v17  ;;  %v11095_v47 = vsub.f32 1.0, %v13763_v56  ;;  %v12713_v35 = vmul.f32 -1.442695, %v18468_v52  ;;  %v10467_v17 = vadd.f32 %v10466_v63, %v18261_v0  ;;  %v13217_v63 = vpop.f32.mrf.mxu1 }
 0x760   : > { %v13767_v55 = vpop.eup %13766  ;;  %v3159_v14 = vadd.f32 %v3158_v62, %v3157_v26  ;;  %v12714_v50 = vmul.f32 -1.442695, %v18475_v45  ;;  %v10470_v0 = vadd.f32 %v10469_v38, %v18264_v22 }
 0x761   : > { %v13769_v49 = vpop.eup %13768  ;;  %v11096_v30 = vsub.f32 1.0, %v13767_v55 }
 0x762   : > { %v12262_v4 = vmul.f32 -1.442695, %v3159_v14  ;;  %v13771_v6 = vpop.eup %13770  ;;  %v10952_v20 = vadd.f32 1.0, %v13769_v49  ;;  %v10554_v37 = vmul.f32 %v18306_v1, %v10470_v0 }
 0x763   : > { %11713 = vrot.lane.b32.xlu1 %v13755_v12, %s14021_s12  ;;  %11456 = vperm.xlu0 %13255, %v13759_v24   ;;  %v11090_v12 = vsub.f32 1.0, %v13759_v24 }
 0x764   : > { %v18489_v51 = vadd.f32 %v18314_v54, %v10554_v37 }
 0x766   : > { %v13773_v26 = vpop.eup %13772 }
 0x767   : > { %11159 = vperm.xlu1 %13254, %v11089_v2   ;;  %11715 = vrot.lane.b32.xlu0 %v13759_v24, %s14021_s12  ;;  %v10951_v24 = vadd.f32 1.0, %v13765_v33  ;;  %v3182_v2 = vadd.f32 %v3181_v9, %v3180_v16  ;;  %v13775_v62 = vpop.eup %13774  ;;  %v10949_v61 = vadd.f32 1.0, %v13773_v26  ;;  %v11093_v33 = vsub.f32 1.0, %v13771_v6 }
 0x768   : > { %v13777_v16 = vpop.eup %13776  ;;  %v10491_v9 = vadd.f32 %v13217_v63, %v18279_v44  ;;  %v11094_v49 = vsub.f32 1.0, %v13775_v62  ;;  %v10645_v63 = vmin.f32 %v18327_v8, 0.0 }
 0x769   : > { %13778 = vrcp.f32 %v10951_v24  ;;  %v10950_v24 = vadd.f32 1.0, %v13777_v16 }
 0x76a   : > { %13780 = vpow2.f32 %v12262_v4 }
 0x76b   : > { %11481 = vperm.xlu1 %13254, %v13763_v56   ;;  %11164 = vperm.xlu0 %13255, %v11090_v12   ;;  %13782 = vpow2.f32 %v12713_v35  ;;  %v10553_v12 = vmul.f32 %v18306_v1, %v10467_v17  ;;  %v10647_v17 = vmin.f32 %v18319_v19, 0.0 }
 0x76c   : > { %13784 = vrcp.f32 %v10952_v20 }
 0x76d   : > { %v18482_v3 = vadd.f32 %v18314_v54, %v10553_v12  ;;  %v10685_v0 = vmul.f32 1.442695, %v10647_v17  ;;  %v10646_v17 = vmin.f32 %v18338_v15, 0.0 }
 0x76f   : > { %11725 = vrot.lane.b32.xlu1 %v13763_v56, %s14021_s12  ;;  %11486 = vperm.xlu0 %13255, %v13767_v55   ;;  %v12263_v56 = vmul.f32 -1.442695, %v3182_v2  ;;  %v12711_v22 = vmul.f32 -1.442695, %v18482_v3  ;;  %v10559_v2 = vmul.f32 %v18306_v1, %v10491_v9 }
 0x771   : > { %13786 = vpow2.f32 %v12263_v56  ;;  %v18497_v56 = vadd.f32 %v18314_v54, %v10559_v2 }
 0x772   : > { %13788 = vpow2.f32 %v12714_v50 }
 0x773   : > { %11189 = vperm.xlu1 %13254, %v11095_v47   ;;  %11727 = vrot.lane.b32.xlu0 %v13767_v55, %s14021_s12  ;;  %v10482_v55 = vpop.f32.mrf.mxu1  ;;  %13790 = vrcp.f32 %v10949_v61  ;;  %v12717_v61 = vmul.f32 -1.442695, %v18497_v56 }
 0x774   : > { %13792 = vpow2.f32 %v12711_v22 }
 0x775   : > { %v13218_v47 = vpop.f32.mrf.mxu1  ;;  %13794 = vrcp.f32 %v10950_v24 }
 0x776   : > { %v13779_v14 = vpop.eup %13778  ;;  %v10494_v44 = vadd.f32 %v13218_v47, %v18282_v10  ;;  %v10648_v47 = vmin.f32 %v18333_v27, 0.0 }
 0x777   : > { %11471 = vperm.xlu1 %13254, %v13771_v6   ;;  %11194 = vperm.xlu0 %13255, %v11096_v30   ;;  %v13781_v4 = vpop.eup %13780  ;;  %v11099_v26 = vsub.f32 1.0, %v13779_v14  ;;  %v10485_v9 = vpop.f32.mrf.mxu1 }
 0x778   : > { %v13783_v35 = vpop.eup %13782  ;;  %v3163_v30 = vadd.f32 1.0, %v13781_v4  ;;  %v10560_v50 = vmul.f32 %v18306_v1, %v10494_v44 }
 0x779   : > { %v13785_v20 = vpop.eup %13784  ;;  %v10955_v12 = vadd.f32 1.0, %v13783_v35  ;;  %v13221_v2 = vpop.f32.mrf.mxu1  ;;  %v10687_v35 = vmul.f32 1.442695, %v10648_v47 }
 0x77a   : > { %v18505_v16 = vadd.f32 %v18314_v54, %v10560_v50  ;;  %v11100_v24 = vsub.f32 1.0, %v13785_v20  ;;  %v10683_v50 = vmul.f32 1.442695, %v10646_v17 }
 0x77b   : > { %11721 = vrot.lane.b32.xlu1 %v13771_v6, %s14021_s12  ;;  %11476 = vperm.xlu0 %13255, %v13775_v62   ;;  %v12712_v6 = vmul.f32 -1.442695, %v18489_v51 }
 0x77d   : > { %13796 = vpow2.f32 %v12712_v6 }
 0x77e   : > { %v13787_v38 = vpop.eup %13786  ;;  %13798 = vrcp.f32 %v3163_v30  ;;  %v10498_v30 = vpop.f32.mrf.mxu1 }
 0x77f   : > { %11179 = vperm.xlu1 %13254, %v11093_v33   ;;  %11723 = vrot.lane.b32.xlu0 %v13775_v62, %s14021_s12  ;;  %v13789_v10 = vpop.eup %13788  ;;  %v3186_v62 = vadd.f32 1.0, %v13787_v38  ;;  %v10483_v33 = vadd.f32 %v10482_v55, %v18273_v46  ;;  %13800 = vrcp.f32 %v10955_v12  ;;  %v12718_v46 = vmul.f32 -1.442695, %v18505_v16 }
 0x780   : > { %v10956_v37 = vadd.f32 1.0, %v13789_v10  ;;  %v13791_v22 = vpop.eup %13790  ;;  %13802 = vpow2.f32 %v10685_v0  ;;  %v10486_v55 = vadd.f32 %v10485_v9, %v18276_v25 }
 0x781   : > { %13804 = vrcp.f32 %v3186_v62  ;;  %v13793_v4 = vpop.eup %13792  ;;  %v11097_v12 = vsub.f32 1.0, %v13791_v22  ;;  %v13222_v62 = vpop.f32.mrf.mxu1 }
 0x782   : > { %13806 = vpow2.f32 %v12717_v61  ;;  %v13795_v44 = vpop.eup %13794  ;;  %v10558_v38 = vmul.f32 %v18306_v1, %v10486_v55 }
 0x783   : > { %11501 = vperm.xlu1 %13254, %v13779_v14   ;;  %11184 = vperm.xlu0 %13255, %v11094_v49   ;;  %v10557_v49 = vmul.f32 %v18306_v1, %v10483_v33  ;;  %13808 = vrcp.f32 %v10956_v37  ;;  %v11098_v37 = vsub.f32 1.0, %v13795_v44 }
 0x785   : > { %v18514_v6 = vadd.f32 %v18314_v54, %v10557_v49 }
 0x787   : > { %11733 = vrot.lane.b32.xlu1 %v13779_v14, %s14021_s12  ;;  %11506 = vperm.xlu0 %13255, %v13785_v20   ;;  %v10681_v14 = vmul.f32 1.442695, %v10645_v63  ;;  %v12715_v0 = vmul.f32 -1.442695, %v18514_v6  ;;  %v18521_v63 = vadd.f32 %v18314_v54, %v10558_v38 }
 0x789   : > { %13810 = vpow2.f32 %v10681_v14  ;;  %v10510_v14 = vadd.f32 %v13222_v62, %v18294_v23  ;;  %v12716_v47 = vmul.f32 -1.442695, %v18521_v63  ;;  %v10652_v62 = vmin.f32 %v18351_v18, 0.0 }
 0x78a   : > { %13812 = vpow2.f32 %v12718_v46  ;;  %v13797_v25 = vpop.eup %13796 }
 0x78b   : > { %11209 = vperm.xlu1 %13254, %v11099_v26   ;;  %11735 = vrot.lane.b32.xlu0 %v13785_v20, %s14021_s12  ;;  %v10953_v20 = vadd.f32 1.0, %v13793_v4  ;;  %13814 = vpow2.f32 %v10687_v35  ;;  %v10507_v26 = vadd.f32 %v13221_v2, %v18291_v11  ;;  %v13799_v10 = vpop.eup %13798  ;;  %v10954_v33 = vadd.f32 1.0, %v13797_v25  ;;  %v10501_v25 = vpop.f32.mrf.mxu1 }
 0x78c   : > { %v13801_v61 = vpop.eup %13800  ;;  %v10651_v2 = vmin.f32 %v18345_v32, 0.0  ;;  %v10564_v38 = vmul.f32 %v18306_v1, %v10510_v14 }
 0x78d   : > { %13816 = vrcp.f32 %v10953_v20  ;;  %v13803_v9 = vpop.eup %13802  ;;  %v10563_v11 = vmul.f32 %v18306_v1, %v10507_v26  ;;  %v10499_v20 = vadd.f32 %v10498_v30, %v18285_v21 }
 0x78e   : > { %13818 = vpow2.f32 %v10683_v50  ;;  %v12657_v55 = vadd.f32 -1.0, %v13803_v9  ;;  %v11103_v50 = vsub.f32 1.0, %v13801_v61 }
 0x78f   : > { %11491 = vperm.xlu1 %13254, %v13791_v22   ;;  %11214 = vperm.xlu0 %13255, %v11100_v24   ;;  %13820 = vpow2.f32 %v12715_v0  ;;  %v18536_v23 = vadd.f32 %v18314_v54, %v10563_v11  ;;  %v10693_v0 = vmul.f32 1.442695, %v10651_v2  ;;  %v10561_v14 = vmul.f32 %v18306_v1, %v10499_v20 }
 0x790   : > { %13822 = vrcp.f32 %v10954_v33  ;;  %v10791_v21 = vsel %vm10611_vm8, %v18319_v19, %v12657_v55  ;;  %v13973_v33 = vld [vmem:[%s14203_s13 + $0x23] sm:$0xff]  ;;  %v18558_v19 = vadd.f32 %v18314_v54, %v10564_v38  ;;  %v10695_v20 = vmul.f32 1.442695, %v10652_v62 }
 0x791   : > { %13824 = vpow2.f32 %v12716_v47  ;;  %vm10621_vm8 = vcmp.gt.f32.partialorder %v18415_v43, 0.0 }
 0x792   : > { %v12722_v62 = vmul.f32 -1.442695, %v18558_v19 }
 0x793   : > { %11729 = vrot.lane.b32.xlu1 %v13791_v22, %s14021_s12  ;;  %11496 = vperm.xlu0 %13255, %v13795_v44   ;;  %v13805_v22 = vpop.eup %13804 }
 0x794   : > { %v13807_v24 = vpop.eup %13806 }
 0x795   : > { %v13809_v49 = vpop.eup %13808 }
 0x796   : > { %v13811_v4 = vpop.eup %13810 }
 0x797   : > { %11199 = vperm.xlu1 %13254, %v11097_v12   ;;  %11731 = vrot.lane.b32.xlu0 %v13795_v44, %s14021_s12  ;;  %v19044_v44 = vld [vmem:[#allocation5_spill] sm:$0xff]  ;;  %v10959_v12 = vadd.f32 1.0, %v13807_v24  ;;  %v13813_v26 = vpop.eup %13812  ;;  %v10502_v24 = vadd.f32 %v10501_v25, %v18288_v34  ;;  %v13974_v25 = vld [vmem:[%s14203_s13 + $0x13] sm:$0xff] }
 0x798   : > { %v18529_v35 = vrot.slane %v13799_v10, %v19044_v44  ;;  %v18532_v17 = vrot.slane %v13805_v22, %v19044_v44  ;;  %v12655_v10 = vadd.f32 -1.0, %v13811_v4  ;;  %v13815_v11 = vpop.eup %13814  ;;  %v10960_v47 = vadd.f32 1.0, %v13813_v26 }
 0x799   : > { %13826 = vrcp.f32 %v10959_v12  ;;  %v11104_v44 = vsub.f32 1.0, %v13809_v49 }
 0x79a   : > { %v11047_v22 = vmul.f32 %v13973_v33, %v18529_v35  ;;  %v13817_v2 = vpop.eup %13816  ;;  %13828 = vpow2.f32 %v10693_v0  ;;  %v11337_v12 = vmul.f32 %v13974_v25, %v18532_v17 }
 0x79b   : > { %11521 = vperm.xlu1 %13254, %v13801_v61   ;;  %11204 = vperm.xlu0 %13255, %v11098_v37   ;;  %v11339_v37 = vmul.f32 %v13973_v33, %v18532_v17  ;;  %v12658_v33 = vadd.f32 -1.0, %v13815_v11  ;;  %v13819_v26 = vpop.eup %13818  ;;  %v10649_v11 = vmin.f32 %v18357_v48, 0.0 }
 0x79c   : > { %v13821_v0 = vpop.eup %13820 }
 0x79d   : > { %v11375_v55 = vadd.f32 %v11339_v37, %v10791_v21  ;;  %v18567_v21 = vadd.f32 %v18314_v54, %v10561_v14  ;;  %v11045_v37 = vmul.f32 %v13974_v25, %v18529_v35  ;;  %v11101_v25 = vsub.f32 1.0, %v13817_v2 }
 0x79e   : > { %v11422_v46 = vpop.permute.xlu1 %11421 }
 0x79f   : > { %11741 = vrot.lane.b32.xlu1 %v13801_v61, %s14021_s12  ;;  %11526 = vperm.xlu0 %13255, %v13809_v49   ;;  %v12721_v61 = vmul.f32 -1.442695, %v18536_v23  ;;  %v11591_v38 = vmul.f32 %v11422_v46, %v11375_v55 }
 0x7a1   : > { %13830 = vpow2.f32 %v12721_v61  ;;  %v13823_v61 = vpop.eup %13822 }
 0x7a2   : > { %v11702_v30 = vpop.permute.xlu1 %11701  ;;  %v11120_v9 = vpop.permute.xlu0 %11119  ;;  %13832 = vrcp.f32 %v10960_v47 }
 0x7a3   : > { %11808 = vst.msk [vmem:[%s18545_s18 + $0x10] sm:$0xff] %vm11805_vm6, %v11702_v30  ;;  %11229 = vperm.xlu1 %13254, %v11103_v50   ;;  %11743 = vrot.lane.b32.xlu0 %v13809_v49, %s14021_s12  ;;  %v10789_v50 = vsel %vm10609_vm10, %v18327_v8, %v12655_v10  ;;  %v10562_v8 = vmul.f32 %v18306_v1, %v10502_v24  ;;  %v13225_v49 = vpop.f32.mrf.mxu1  ;;  %13834 = vpow2.f32 %v10695_v20  ;;  %vm10622_vm10 = vcmp.gt.f32.partialorder %v18425_v5, 0.0 }
 0x7a4   : > { %v11373_v10 = vadd.f32 %v11337_v12, %v10789_v50  ;;  %v11297_v14 = vmul.f32 %v11120_v9, %v11045_v37  ;;  %v10792_v24 = vsel %vm10612_vm12, %v18333_v27, %v12658_v33  ;;  %v10523_v50 = vadd.f32 %v13225_v49, %v18308_v13  ;;  %v13825_v12 = vpop.eup %13824 }
 0x7a5   : > { %v10957_v27 = vadd.f32 1.0, %v13821_v0  ;;  %13836 = vpow2.f32 %v12722_v62  ;;  %v10514_v13 = vpop.f32.mrf.mxu1  ;;  %v10689_v49 = vmul.f32 1.442695, %v10649_v11  ;;  %v10958_v11 = vadd.f32 1.0, %v13825_v12 }
 0x7a6   : > { %v11130_v4 = vpop.permute.xlu1 %11129  ;;  %v11427_v34 = vpop.permute.xlu0 %11426  ;;  %v10567_v0 = vmul.f32 %v18306_v1, %v10523_v50  ;;  %vm10627_vm12 = vcmp.gt.f32.partialorder %v18434_v7, 0.0 }
 0x7a7   : > { %v11299_v30 = vmul.f32 %v11130_v4, %v11047_v22  ;;  %11511 = vperm.xlu1 %13254, %v13817_v2   ;;  %11234 = vperm.xlu0 %13255, %v11104_v44   ;;  %v12656_v4 = vadd.f32 -1.0, %v13819_v26  ;;  %v12719_v44 = vmul.f32 -1.442695, %v18567_v21 }
 0x7a9   : > { %v11627_v46 = vadd.f32 %v11591_v38, %v11299_v30  ;;  %v13975_v38 = vld [vmem:[%s14203_s13 + $0x2b] sm:$0xff]  ;;  %v18593_v30 = vadd.f32 %v18314_v54, %v10562_v8  ;;  %v13976_v54 = vld [vmem:[%s14203_s13 + $0x1b] sm:$0xff]  ;;  %13838 = vpow2.f32 %v12719_v44 }
 0x7aa   : > { %v11412_v22 = vpop.permute.xlu1 %11411  ;;  %v11704_v55 = vpop.permute.xlu0 %11703  ;;  %v11340_v20 = vmul.f32 %v13975_v38, %v18532_v17  ;;  %v11048_v9 = vmul.f32 %v13975_v38, %v18529_v35  ;;  %v11338_v8 = vmul.f32 %v13976_v54, %v18532_v17  ;;  %13840 = vrcp.f32 %v10957_v27 }
 0x7ab   : > { %11663 = vst.msk [vmem:[%s18575_s23 + $0x10] sm:$0xff] %vm2718_vm3, %v11627_v46  ;;  %v11589_v47 = vmul.f32 %v11412_v22, %v11373_v10  ;;  %11737 = vrot.lane.b32.xlu1 %v13817_v2, %s14021_s12  ;;  %11516 = vperm.xlu0 %13255, %v13823_v61   ;;  %v10790_v10 = vsel %vm10610_vm9, %v18338_v15, %v12656_v4  ;;  %v10650_v2 = vmin.f32 %v18363_v57, 0.0  ;;  %v13827_v15 = vpop.eup %13826  ;;  %13842 = vpow2.f32 %v10689_v49 }
 0x7ac   : > { %11809 = vst.msk [vmem:[%s18545_s18 + $0x18] sm:$0xff] %vm11805_vm6, %v11704_v55  ;;  %v11376_v26 = vadd.f32 %v11340_v20, %v10792_v24  ;;  %v11046_v24 = vmul.f32 %v13976_v54, %v18529_v35  ;;  %v11374_v38 = vadd.f32 %v11338_v8, %v10790_v10  ;;  %v11102_v20 = vsub.f32 1.0, %v13823_v61  ;;  %v13829_v44 = vpop.eup %13828 }
 0x7ad   : > { %v11625_v33 = vadd.f32 %v11589_v47, %v11297_v14  ;;  %v12720_v14 = vmul.f32 -1.442695, %v18593_v30  ;;  %v13226_v47 = vpop.f32.mrf.mxu1  ;;  %v10691_v50 = vmul.f32 1.442695, %v10650_v2  ;;  %v12661_v49 = vadd.f32 -1.0, %v13829_v44 }
 0x7ae   : > { %v11698_v37 = vpop.permute.xlu1 %11697  ;;  %v11135_v46 = vpop.permute.xlu0 %11134  ;;  %v11592_v62 = vmul.f32 %v11427_v34, %v11376_v26  ;;  %v10526_v12 = vadd.f32 %v13226_v47, %v18321_v41  ;;  %v10655_v10 = vmin.f32 %v18370_v59, 0.0  ;;  %v10656_v44 = vmin.f32 %v18376_v60, 0.0 }
 0x7af   : > { %11661 = vst.msk [vmem:[%s18575_s23] sm:$0xff] %vm2718_vm3, %v11625_v33  ;;  %11219 = vperm.xlu1 %13254, %v11101_v25   ;;  %v11300_v22 = vmul.f32 %v11135_v46, %v11048_v9  ;;  %11739 = vrot.lane.b32.xlu0 %v13823_v61, %s14021_s12  ;;  %v18611_v9 = vld [vmem:[%s18996_s4 + $0x30] ss:$0 sm:$0xff]  ;;  %v10515_v33 = vadd.f32 %v10514_v13, %v18297_v58  ;;  %v13831_v61 = vpop.eup %13830  ;;  %13844 = vpow2.f32 %v12720_v14  ;;  %v13978_v13 = vld [vmem:[%s18996_s4 + $0x2f] ss:$0 sm:$0xff]  ;;  %vm10628_vm9 = vcmp.gt.f32.partialorder %v18441_v36, 0.0 }
 0x7b0   : > { %11806 = vst.msk [vmem:[%s18545_s18] sm:$0xff] %vm11805_vm6, %v11698_v37  ;;  %v18614_v27 = vadd.f32 %v18611_v9, %v10567_v0  ;;  %v13833_v26 = vpop.eup %13832  ;;  %13846 = vrcp.f32 %v10958_v11  ;;  %v10963_v2 = vadd.f32 1.0, %v13831_v61  ;;  %v10568_v0 = vmul.f32 %v13978_v13, %v10526_v12 }
 0x7b1   : > { %v11628_v55 = vadd.f32 %v11592_v62, %v11300_v22  ;;  %v13835_v54 = vpop.eup %13834  ;;  %13848 = vpow2.f32 %v10691_v50  ;;  %v10565_v41 = vmul.f32 %v13978_v13, %v10515_v33  ;;  %v10517_v62 = vpop.f32.mrf.mxu1  ;;  %v11107_v22 = vsub.f32 1.0, %v13827_v15 }
 0x7b2   : > { %v11125_v4 = vpop.permute.xlu1 %11124  ;;  %v11417_v34 = vpop.permute.xlu0 %11416  ;;  %v12725_v58 = vmul.f32 -1.442695, %v18614_v27  ;;  %v10795_v11 = vsel %vm10615_vm13, %v18345_v32, %v12661_v49  ;;  %vm10625_vm13 = vcmp.gt.f32.partialorder %v18448_v28, 0.0 }
 0x7b3   : > { %v11298_v1 = vmul.f32 %v11125_v4, %v11046_v24  ;;  %11541 = vperm.xlu1 %13254, %v13827_v15   ;;  %11664 = vst.msk [vmem:[%s18575_s23 + $0x18] sm:$0xff] %vm2718_vm3, %v11628_v55  ;;  %v11590_v25 = vmul.f32 %v11417_v34, %v11374_v38  ;;  %11224 = vperm.xlu0 %13255, %v11102_v20   ;;  %v10701_v24 = vmul.f32 1.442695, %v10655_v10  ;;  %v13837_v47 = vpop.eup %13836  ;;  %v13979_v55 = vld [vmem:[%s14203_s13 + $0x43] sm:$0xff]  ;;  %v12662_v38 = vadd.f32 -1.0, %v13835_v54 }
 0x7b4   : > { %v11343_v4 = vmul.f32 %v13979_v55, %v18532_v17  ;;  %13850 = vpow2.f32 %v12725_v58  ;;  %v18643_v34 = vadd.f32 %v18611_v9, %v10568_v0  ;;  %v11051_v33 = vmul.f32 %v13979_v55, %v18529_v35  ;;  %v13980_v0 = vld [vmem:[%s14203_s13 + $0x4b] sm:$0xff] }
 0x7b5   : > { %v11626_v37 = vadd.f32 %v11590_v25, %v11298_v1  ;;  %v18638_v1 = vadd.f32 %v18611_v9, %v10565_v41  ;;  %13852 = vrcp.f32 %v10963_v2  ;;  %v10964_v61 = vadd.f32 1.0, %v13837_v47 }
 0x7b6   : > { %v11442_v46 = vpop.permute.xlu1 %11441  ;;  %v11700_v8 = vpop.permute.xlu0 %11699  ;;  %v11379_v50 = vadd.f32 %v11343_v4, %v10795_v11  ;;  %13854 = vpow2.f32 %v10701_v24  ;;  %v10796_v10 = vsel %vm10616_vm11, %v18351_v18, %v12662_v38  ;;  %v10703_v58 = vmul.f32 1.442695, %v10656_v44 }
 0x7b7   : > { %11749 = vrot.lane.b32.xlu1 %v13827_v15, %s14021_s12  ;;  %11662 = vst.msk [vmem:[%s18575_s23 + $0x8] sm:$0xff] %vm2718_vm3, %v11626_v37  ;;  %11546 = vperm.xlu0 %13255, %v13833_v26   ;;  %v10518_v15 = vadd.f32 %v10517_v62, %v18300_v53  ;;  %v13839_v32 = vpop.eup %13838  ;;  %v11108_v37 = vsub.f32 1.0, %v13833_v26  ;;  %v12723_v41 = vmul.f32 -1.442695, %v18638_v1  ;;  %v11344_v62 = vmul.f32 %v13980_v0, %v18532_v17 }
 0x7b8   : > { %11807 = vst.msk [vmem:[%s18545_s18 + $0x8] sm:$0xff] %vm11805_vm6, %v11700_v8  ;;  %v13841_v25 = vpop.eup %13840  ;;  %v11595_v49 = vmul.f32 %v11442_v46, %v11379_v50  ;;  %v11052_v18 = vmul.f32 %v13980_v0, %v18529_v35  ;;  %13856 = vrcp.f32 %v10964_v61  ;;  %vm10626_vm11 = vcmp.gt.f32.partialorder %v18455_v29, 0.0 }
 0x7b9   : > { %v13843_v53 = vpop.eup %13842  ;;  %v10566_v2 = vmul.f32 %v13978_v13, %v10518_v15  ;;  %v10653_v13 = vmin.f32 %v18384_v42, 0.0  ;;  %13858 = vpow2.f32 %v10703_v58 }
 0x7ba   : > { %v11710_v14 = vpop.permute.xlu1 %11709  ;;  %v11447_v20 = vpop.permute.xlu0 %11446  ;;  %v12659_v24 = vadd.f32 -1.0, %v13843_v53  ;;  %13860 = vpow2.f32 %v12723_v41 }
 0x7bb   : > { %11812 = vst.msk [vmem:[%s18545_s18 + $0x30] sm:$0xff] %vm11805_vm6, %v11710_v14  ;;  %11249 = vperm.xlu1 %13254, %v11107_v22   ;;  %11751 = vrot.lane.b32.xlu0 %v13833_v26, %s14021_s12  ;;  %v10961_v26 = vadd.f32 1.0, %v13839_v32  ;;  %v12726_v22 = vmul.f32 -1.442695, %v18643_v34  ;;  %v11380_v14 = vadd.f32 %v11344_v62, %v10796_v10  ;;  %v18660_v44 = vadd.f32 %v18611_v9, %v10566_v2 }
 0x7bc   : > { %v13845_v11 = vpop.eup %13844  ;;  %v10793_v61 = vsel %vm10613_vm15, %v18357_v48, %v12659_v24  ;;  %v10697_v53 = vmul.f32 1.442695, %v10653_v13  ;;  %vm10631_vm15 = vcmp.gt.f32.partialorder %v18468_v52, 0.0 }
 0x7bd   : > { %v13847_v55 = vpop.eup %13846  ;;  %v11596_v15 = vmul.f32 %v11447_v20, %v11380_v14  ;;  %13862 = vrcp.f32 %v10961_v26  ;;  %v10962_v50 = vadd.f32 1.0, %v13845_v11  ;;  %v12724_v48 = vmul.f32 -1.442695, %v18660_v44  ;;  %v13982_v14 = vld [vmem:[%s14203_s13 + $0x3b] sm:$0xff] }
 0x7be   : > { %v11150_v12 = vpop.permute.xlu1 %11149  ;;  %v11712_v8 = vpop.permute.xlu0 %11711  ;;  %13864 = vpow2.f32 %v12726_v22  ;;  %v11106_v0 = vsub.f32 1.0, %v13847_v55  ;;  %v11342_v24 = vmul.f32 %v13982_v14, %v18532_v17 }
 0x7bf   : > { %v11303_v54 = vmul.f32 %v11150_v12, %v11051_v33  ;;  %11531 = vperm.xlu1 %13254, %v13841_v25   ;;  %11813 = vst.msk [vmem:[%s18545_s18 + $0x38] sm:$0xff] %vm11805_vm6, %v11712_v8  ;;  %11254 = vperm.xlu0 %13255, %v11108_v37   ;;  %v13849_v38 = vpop.eup %13848  ;;  %v11105_v33 = vsub.f32 1.0, %v13841_v25  ;;  %13866 = vrcp.f32 %v10962_v50 }
 0x7c0   : > { %v12660_v9 = vadd.f32 -1.0, %v13849_v38  ;;  %13868 = vpow2.f32 %v10697_v53 }
 0x7c1   : > { %v11631_v46 = vadd.f32 %v11595_v49, %v11303_v54  ;;  %v13981_v49 = vld [vmem:[%s14203_s13 + $0x33] sm:$0xff]  ;;  %v10654_v54 = vmin.f32 %v18390_v39, 0.0  ;;  %13870 = vpow2.f32 %v12724_v48 }
 0x7c2   : > { %v11432_v47 = vpop.permute.xlu1 %11431  ;;  %v11155_v4 = vpop.permute.xlu0 %11154  ;;  %v11341_v10 = vmul.f32 %v13981_v49, %v18532_v17  ;;  %v11049_v58 = vmul.f32 %v13981_v49, %v18529_v35  ;;  %v10794_v22 = vsel %vm10614_vm1, %v18363_v57, %v12660_v9  ;;  %vm10632_vm1 = vcmp.gt.f32.partialorder %v18475_v45, 0.0 }
 0x7c3   : > { %11667 = vst.msk [vmem:[%s18575_s23 + $0x30] sm:$0xff] %vm2718_vm3, %v11631_v46  ;;  %11745 = vrot.lane.b32.xlu1 %v13841_v25, %s14021_s12  ;;  %v11304_v32 = vmul.f32 %v11155_v4, %v11052_v18  ;;  %11536 = vperm.xlu0 %13255, %v13847_v55   ;;  %v13851_v25 = vpop.eup %13850  ;;  %v10699_v11 = vmul.f32 1.442695, %v10654_v54 }
 0x7c4   : > { %v11377_v8 = vadd.f32 %v11341_v10, %v10793_v61  ;;  %v18674_v41 = vpop.eup %13852  ;;  %v10967_v13 = vadd.f32 1.0, %v13851_v25 }
 0x7c5   : > { %v11632_v12 = vadd.f32 %v11596_v15, %v11304_v32  ;;  %v13855_v62 = vpop.eup %13854  ;;  %v11111_v4 = vsub.f32 1.0, %v18674_v41  ;;  %v11050_v15 = vmul.f32 %v13982_v14, %v18529_v35  ;;  %v10659_v32 = vmin.f32 %v18398_v31, 0.0 }
 0x7c6   : > { %v11706_v37 = vpop.permute.xlu1 %11705  ;;  %v11437_v20 = vpop.permute.xlu0 %11436  ;;  %v11593_v26 = vmul.f32 %v11432_v47, %v11377_v8  ;;  %v11378_v47 = vadd.f32 %v11342_v24, %v10794_v22  ;;  %v12665_v38 = vadd.f32 -1.0, %v13855_v62  ;;  %13872 = vpow2.f32 %v10699_v11 }
 0x7c7   : > { %11810 = vst.msk [vmem:[%s18545_s18 + $0x20] sm:$0xff] %vm11805_vm6, %v11706_v37  ;;  %11239 = vperm.xlu1 %13254, %v11105_v33   ;;  %11747 = vrot.lane.b32.xlu0 %v13847_v55, %s14021_s12  ;;  %v18686_v50 = vpop.eup %13856  ;;  %13874 = vrcp.f32 %v10967_v13  ;;  %v10709_v48 = vmul.f32 1.442695, %v10659_v32  ;;  %v10660_v62 = vmin.f32 %v18405_v40, 0.0 }
 0x7c8   : > { %11668 = vst.msk [vmem:[%s18575_s23 + $0x38] sm:$0xff] %vm2718_vm3, %v11632_v12  ;;  %v13859_v61 = vpop.eup %13858  ;;  %v11594_v12 = vmul.f32 %v11437_v20, %v11378_v47  ;;  %v10799_v10 = vsel %vm10619_vm2, %v18370_v59, %v12665_v38  ;;  %v11112_v25 = vsub.f32 1.0, %v18686_v50  ;;  %v13984_v38 = vld [vmem:[%s14203_s13 + $0x6b] sm:$0xff]  ;;  %vm10629_vm2 = vcmp.gt.f32.partialorder %v18482_v3, 0.0 }
 0x7c9   : > { %v13861_v53 = vpop.eup %13860  ;;  %13876 = vpow2.f32 %v10709_v48  ;;  %v10711_v47 = vmul.f32 1.442695, %v10660_v62 }
 0x7ca   : > { %v11140_v2 = vpop.permute.xlu1 %11139  ;;  %v11708_v18 = vpop.permute.xlu0 %11707  ;;  %v10965_v59 = vadd.f32 1.0, %v13861_v53  ;;  %v10657_v53 = vmin.f32 %v18415_v43, 0.0 }
 0x7cb   : > { %v11301_v46 = vmul.f32 %v11140_v2, %v11049_v58  ;;  %11561 = vperm.xlu1 %13254, %v18674_v41   ;;  %11811 = vst.msk [vmem:[%s18545_s18 + $0x28] sm:$0xff] %vm11805_vm6, %v11708_v18  ;;  %11244 = vperm.xlu0 %13255, %v11106_v0   ;;  %v13863_v49 = vpop.eup %13862  ;;  %v13983_v58 = vld [vmem:[%s14203_s13 + $0x63] sm:$0xff]  ;;  %v12666_v2 = vadd.f32 -1.0, %v13859_v61 }
 0x7cc   : > { %v13865_v8 = vpop.eup %13864  ;;  %v11347_v20 = vmul.f32 %v13983_v58, %v18532_v17  ;;  %v11055_v22 = vmul.f32 %v13983_v58, %v18529_v35  ;;  %13878 = vrcp.f32 %v10965_v59  ;;  %v11109_v61 = vsub.f32 1.0, %v13863_v49  ;;  %v13985_v59 = vld [vmem:[%s14203_s13 + $0x53] sm:$0xff] }
 0x7cd   : > { %v11629_v55 = vadd.f32 %v11593_v26, %v11301_v46  ;;  %v13867_v46 = vpop.eup %13866  ;;  %v10968_v18 = vadd.f32 1.0, %v13865_v8  ;;  %v10800_v13 = vsel %vm10620_vm5, %v18376_v60, %v12666_v2  ;;  %v10705_v62 = vmul.f32 1.442695, %v10657_v53 }
 0x7ce   : > { %v11462_v57 = vpop.permute.xlu1 %11461  ;;  %v11145_v33 = vpop.permute.xlu0 %11144  ;;  %v11383_v26 = vadd.f32 %v11347_v20, %v10799_v10  ;;  %v11110_v2 = vsub.f32 1.0, %v13867_v46  ;;  %vm10630_vm5 = vcmp.gt.f32.partialorder %v18489_v51, 0.0 }
 0x7cf   : > { %11665 = vst.msk [vmem:[%s18575_s23 + $0x20] sm:$0xff] %vm2718_vm3, %v11629_v55  ;;  %11269 = vperm.xlu1 %13254, %v11111_v4   ;;  %v11302_v37 = vmul.f32 %v11145_v33, %v11050_v15  ;;  %11566 = vperm.xlu0 %13255, %v18686_v50   ;;  %v13869_v14 = vpop.eup %13868  ;;  %v11348_v15 = vmul.f32 %v13984_v38, %v18532_v17  ;;  %13880 = vrcp.f32 %v10968_v18  ;;  %v10658_v18 = vmin.f32 %v18425_v5, 0.0 }
 0x7d0   : > { %v11599_v24 = vmul.f32 %v11462_v57, %v11383_v26  ;;  %v11056_v33 = vmul.f32 %v13984_v38, %v18529_v35  ;;  %v13871_v57 = vpop.eup %13870  ;;  %13882 = vpow2.f32 %v10711_v47  ;;  %v11345_v26 = vmul.f32 %v13985_v59, %v18532_v17 }
 0x7d1   : > { %v11630_v9 = vadd.f32 %v11594_v12, %v11302_v37  ;;  %v11384_v60 = vadd.f32 %v11348_v15, %v10800_v13  ;;  %v12663_v12 = vadd.f32 -1.0, %v13869_v14  ;;  %v10707_v38 = vmul.f32 1.442695, %v10658_v18  ;;  %v13986_v15 = vld [vmem:[%s14203_s13 + $0x5b] sm:$0xff] }
 0x7d2   : > { %v11718_v54 = vpop.permute.xlu1 %11717  ;;  %v11467_v0 = vpop.permute.xlu0 %11466 }
 0x7d3   : > { %11816 = vst.msk [vmem:[%s18545_s18 + $0x50] sm:$0xff] %vm11805_vm6, %v11718_v54  ;;  %11551 = vperm.xlu1 %13254, %v13863_v49   ;;  %11274 = vperm.xlu0 %13255, %v11112_v25   ;;  %v11600_v54 = vmul.f32 %v11467_v0, %v11384_v60  ;;  %v10797_v8 = vsel %vm10617_vm7, %v18384_v42, %v12663_v12  ;;  %vm10635_vm7 = vcmp.gt.f32.partialorder %v18497_v56, 0.0 }
 0x7d4   : > { %11666 = vst.msk [vmem:[%s18575_s23 + $0x28] sm:$0xff] %vm2718_vm3, %v11630_v9  ;;  %v13873_v9 = vpop.eup %13872  ;;  %v11381_v42 = vadd.f32 %v11345_v26, %v10797_v8 }
 0x7d5   : > { %v18715_v48 = vpop.eup %13874  ;;  %v12664_v0 = vadd.f32 -1.0, %v13873_v9 }
 0x7d6   : > { %v11170_v11 = vpop.permute.xlu1 %11169  ;;  %v11720_v4 = vpop.permute.xlu0 %11719 }
 0x7d7   : > { %v11307_v55 = vmul.f32 %v11170_v11, %v11055_v22  ;;  %11753 = vrot.lane.b32.xlu1 %v13863_v49, %s14021_s12  ;;  %11817 = vst.msk [vmem:[%s18545_s18 + $0x58] sm:$0xff] %vm11805_vm6, %v11720_v4  ;;  %11556 = vperm.xlu0 %13255, %v13867_v46   ;;  %v10966_v49 = vadd.f32 1.0, %v13871_v57  ;;  %v11115_v11 = vsub.f32 1.0, %v18715_v48 }
 0x7d9   : > { %v11635_v32 = vadd.f32 %v11599_v24, %v11307_v55  ;;  %13884 = vrcp.f32 %v10966_v49  ;;  %v13877_v24 = vpop.eup %13876  ;;  %v10798_v55 = vsel %vm10618_vm0, %v18390_v39, %v12664_v0  ;;  %v11054_v39 = vmul.f32 %v13986_v15, %v18529_v35 }
 0x7da   : > { %v11452_v37 = vpop.permute.xlu1 %11451  ;;  %v11175_v10 = vpop.permute.xlu0 %11174  ;;  %13886 = vpow2.f32 %v10705_v62  ;;  %v12669_v60 = vadd.f32 -1.0, %v13877_v24  ;;  %v13987_v62 = vld [vmem:[%s14203_s13 + $0x83] sm:$0xff]  ;;  %vm10636_vm0 = vcmp.gt.f32.partialorder %v18505_v16, 0.0 }
 0x7db   : > { %11671 = vst.msk [vmem:[%s18575_s23 + $0x50] sm:$0xff] %vm2718_vm3, %v11635_v32  ;;  %11259 = vperm.xlu1 %13254, %v11109_v61   ;;  %v11308_v25 = vmul.f32 %v11175_v10, %v11056_v33  ;;  %11755 = vrot.lane.b32.xlu0 %v13867_v46, %s14021_s12  ;;  %v11053_v46 = vmul.f32 %v13985_v59, %v18529_v35  ;;  %v13879_v61 = vpop.eup %13878  ;;  %13888 = vpow2.f32 %v10707_v38 }
 0x7dc   : > { %v11597_v13 = vmul.f32 %v11452_v37, %v11381_v42  ;;  %v11346_v32 = vmul.f32 %v13986_v15, %v18532_v17  ;;  %v10663_v37 = vmin.f32 %v18434_v7, 0.0  ;;  %v18738_v53 = vpop.eup %13880  ;;  %v10803_v49 = vsel %vm10623_vm4, %v18398_v31, %v12669_v60 }
 0x7dd   : > { %v11636_v58 = vadd.f32 %v11600_v54, %v11308_v25  ;;  %v13883_v9 = vpop.eup %13882  ;;  %v11113_v25 = vsub.f32 1.0, %v13879_v61  ;;  %v11351_v59 = vmul.f32 %v13987_v62, %v18532_v17  ;;  %v11059_v18 = vmul.f32 %v13987_v62, %v18529_v35 }
 0x7de   : > { %v11714_v20 = vpop.permute.xlu1 %11713  ;;  %v11457_v22 = vpop.permute.xlu0 %11456  ;;  %v11382_v57 = vadd.f32 %v11346_v32, %v10798_v55  ;;  %v12670_v26 = vadd.f32 -1.0, %v13883_v9  ;;  %vm10633_vm4 = vcmp.gt.f32.partialorder %v18514_v6, 0.0 }
 0x7df   : > { %11814 = vst.msk [vmem:[%s18545_s18 + $0x40] sm:$0xff] %vm11805_vm6, %v11714_v20  ;;  %11581 = vperm.xlu1 %13254, %v18715_v48   ;;  %11264 = vperm.xlu0 %13255, %v11110_v2   ;;  %v11116_v20 = vsub.f32 1.0, %v18738_v53  ;;  %v10717_v2 = vmul.f32 1.442695, %v10663_v37  ;;  %v11387_v31 = vadd.f32 %v11351_v59, %v10803_v49  ;;  %v13989_v49 = vld [vmem:[%s14203_s13 + $0x73] sm:$0xff] }
 0x7e0   : > { %11672 = vst.msk [vmem:[%s18575_s23 + $0x58] sm:$0xff] %vm2718_vm3, %v11636_v58  ;;  %v10804_v24 = vsel %vm10624_vm14, %v18405_v40, %v12670_v26  ;;  %vm10634_vm14 = vcmp.gt.f32.partialorder %v18521_v63, 0.0 }
 0x7e1   : > { %13890 = vpow2.f32 %v10717_v2  ;;  %v11057_v2 = vmul.f32 %v13989_v49, %v18529_v35 }
 0x7e2   : > { %v11160_v14 = vpop.permute.xlu1 %11159  ;;  %v11716_v47 = vpop.permute.xlu0 %11715 }
 0x7e3   : > { %v11305_v4 = vmul.f32 %v11160_v14, %v11053_v46  ;;  %11289 = vperm.xlu1 %13254, %v11115_v11   ;;  %11815 = vst.msk [vmem:[%s18545_s18 + $0x48] sm:$0xff] %vm11805_vm6, %v11716_v47  ;;  %11759 = vrot.lane.b32.xlu0 %v18686_v50, %s14021_s12  ;;  %v11598_v50 = vmul.f32 %v11457_v22, %v11382_v57  ;;  %v10664_v22 = vmin.f32 %v18441_v36, 0.0  ;;  %v13988_v47 = vld [vmem:[%s14203_s13 + $0x8b] sm:$0xff] }
 0x7e4   : > { %v11352_v38 = vmul.f32 %v13988_v47, %v18532_v17  ;;  %v11060_v32 = vmul.f32 %v13988_v47, %v18529_v35 }
 0x7e5   : > { %v11633_v33 = vadd.f32 %v11597_v13, %v11305_v4  ;;  %v10719_v4 = vmul.f32 1.442695, %v10664_v22 }
 0x7e6   : > { %v11482_v12 = vpop.permute.xlu1 %11481  ;;  %v11165_v10 = vpop.permute.xlu0 %11164 }
 0x7e7   : > { %11669 = vst.msk [vmem:[%s18575_s23 + $0x40] sm:$0xff] %vm2718_vm3, %v11633_v33  ;;  %11571 = vperm.xlu1 %13254, %v13879_v61   ;;  %v11306_v54 = vmul.f32 %v11165_v10, %v11054_v39  ;;  %11586 = vperm.xlu0 %13255, %v18738_v53   ;;  %v13885_v42 = vpop.eup %13884  ;;  %v11603_v14 = vmul.f32 %v11482_v12, %v11387_v31  ;;  %v10661_v12 = vmin.f32 %v18448_v28, 0.0  ;;  %13892 = vpow2.f32 %v10719_v4 }
 0x7e8   : > { %v13887_v11 = vpop.eup %13886  ;;  %v11388_v33 = vadd.f32 %v11352_v38, %v10804_v24  ;;  %v11114_v40 = vsub.f32 1.0, %v13885_v42 }
 0x7e9   : > { %v11634_v8 = vadd.f32 %v11598_v50, %v11306_v54  ;;  %v12667_v57 = vadd.f32 -1.0, %v13887_v11  ;;  %v13889_v39 = vpop.eup %13888 }
 0x7ea   : > { %v11726_v58 = vpop.permute.xlu1 %11725  ;;  %v11487_v0 = vpop.permute.xlu0 %11486 }
 0x7eb   : > { %11820 = vst.msk [vmem:[%s18545_s18 + $0x70] sm:$0xff] %vm11805_vm6, %v11726_v58  ;;  %11279 = vperm.xlu1 %13254, %v11113_v25   ;;  %11294 = vperm.xlu0 %13255, %v11116_v20   ;;  %v11604_v37 = vmul.f32 %v11487_v0, %v11388_v33  ;;  %v10801_v9 = vsel %vm10621_vm8, %v18415_v43, %v12667_v57  ;;  %v10713_v25 = vmul.f32 1.442695, %v10661_v12  ;;  %v12668_v58 = vadd.f32 -1.0, %v13889_v39  ;;  %v13991_v57 = vld [vmem:[%s14203_s13 + $0xa3] sm:$0xff] }
 0x7ec   : > { %11670 = vst.msk [vmem:[%s18575_s23 + $0x48] sm:$0xff] %vm2718_vm3, %v11634_v8  ;;  %v11349_v8 = vmul.f32 %v13989_v49, %v18532_v17  ;;  %v10662_v20 = vmin.f32 %v18455_v29, 0.0  ;;  %vm10639_vm8 = vcmp.gt.f32.partialorder %v18536_v23, 0.0 }
 0x7ed   : > { %13894 = vpow2.f32 %v10713_v25  ;;  %v10802_v0 = vsel %vm10622_vm10, %v18425_v5, %v12668_v58  ;;  %v10667_v5 = vmin.f32 %v18468_v52, 0.0  ;;  %vm10640_vm10 = vcmp.gt.f32.partialorder %v18558_v19, 0.0 }
 0x7ee   : > { %v11190_v46 = vpop.permute.xlu1 %11189  ;;  %v11728_v55 = vpop.permute.xlu0 %11727  ;;  %v11385_v43 = vadd.f32 %v11349_v8, %v10801_v9  ;;  %v10715_v31 = vmul.f32 1.442695, %v10662_v20  ;;  %v13992_v8 = vld [vmem:[%s14203_s13 + $0xab] sm:$0xff] }
 0x7ef   : > { %v11311_v13 = vmul.f32 %v11190_v46, %v11059_v18  ;;  %11757 = vrot.lane.b32.xlu1 %v18674_v41, %s14021_s12  ;;  %11821 = vst.msk [vmem:[%s18545_s18 + $0x78] sm:$0xff] %vm11805_vm6, %v11728_v55  ;;  %11576 = vperm.xlu0 %13255, %v13885_v42   ;;  %v13891_v59 = vpop.eup %13890  ;;  %v13990_v18 = vld [vmem:[%s14203_s13 + $0x7b] sm:$0xff]  ;;  %v10725_v33 = vmul.f32 1.442695, %v10667_v5  ;;  %v11356_v58 = vmul.f32 %v13992_v8, %v18532_v17 }
 0x7f0   : > { %v11350_v46 = vmul.f32 %v13990_v18, %v18532_v17  ;;  %13896 = vpow2.f32 %v10715_v31 }
 0x7f1   : > { %v11639_v15 = vadd.f32 %v11603_v14, %v11311_v13  ;;  %v12673_v14 = vadd.f32 -1.0, %v13891_v59  ;;  %v11058_v13 = vmul.f32 %v13990_v18, %v18529_v35  ;;  %13898 = vpow2.f32 %v10725_v33  ;;  %v13994_v33 = vld [vmem:[%s14203_s13 + $0x9b] sm:$0xff] }
 0x7f2   : > { %v11472_v60 = vpop.permute.xlu1 %11471  ;;  %v11195_v41 = vpop.permute.xlu0 %11194  ;;  %v11386_v11 = vadd.f32 %v11350_v46, %v10802_v0  ;;  %v10665_v59 = vmin.f32 %v18482_v3, 0.0 }
 0x7f3   : > { %11675 = vst.msk [vmem:[%s18575_s23 + $0x70] sm:$0xff] %vm2718_vm3, %v11639_v15  ;;  %11761 = vrot.lane.b32.xlu1 %v13879_v61, %s14021_s12  ;;  %v11312_v10 = vmul.f32 %v11195_v41, %v11060_v32  ;;  %11284 = vperm.xlu0 %13255, %v11114_v40   ;;  %v11601_v26 = vmul.f32 %v11472_v60, %v11385_v43  ;;  %v10668_v41 = vmin.f32 %v18475_v45, 0.0 }
 0x7f4   : > { %v13893_v4 = vpop.eup %13892  ;;  %v11355_v60 = vmul.f32 %v13991_v57, %v18532_v17  ;;  %v10721_v46 = vmul.f32 1.442695, %v10665_v59 }
 0x7f5   : > { %v11640_v50 = vadd.f32 %v11604_v37, %v11312_v10  ;;  %v12674_v40 = vadd.f32 -1.0, %v13893_v4  ;;  %v11063_v37 = vmul.f32 %v13991_v57, %v18529_v35  ;;  %v10727_v49 = vmul.f32 1.442695, %v10668_v41 }
 0x7f6   : > { %v11722_v54 = vpop.permute.xlu1 %11721  ;;  %v11477_v61 = vpop.permute.xlu0 %11476  ;;  %v11354_v57 = vmul.f32 %v13994_v33, %v18532_v17 }
 0x7f7   : > { %11818 = vst.msk [vmem:[%s18545_s18 + $0x60] sm:$0xff] %vm11805_vm6, %v11722_v54  ;;  %11765 = vrot.lane.b32.xlu1 %v18715_v48, %s14021_s12  ;;  %11763 = vrot.lane.b32.xlu0 %v13885_v42, %s14021_s12  ;;  %v11602_v47 = vmul.f32 %v11477_v61, %v11386_v11  ;;  %13900 = vpow2.f32 %v10727_v49 }
 0x7f8   : > { %11676 = vst.msk [vmem:[%s18575_s23 + $0x78] sm:$0xff] %vm2718_vm3, %v11640_v50  ;;  %v10808_v50 = vsel %vm10628_vm9, %v18441_v36, %v12674_v40  ;;  %13902 = vpow2.f32 %v10721_v46  ;;  %vm10638_vm9 = vcmp.gt.f32.partialorder %v18593_v30, 0.0 }
 0x7f9   : > { %v11392_v20 = vadd.f32 %v11356_v58, %v10808_v50 }
 0x7fa   : > { %v11180_v62 = vpop.permute.xlu1 %11179  ;;  %v11724_v22 = vpop.permute.xlu0 %11723 }
 0x7fb   : > { %v11309_v48 = vmul.f32 %v11180_v62, %v11057_v2  ;;  %11819 = vst.msk [vmem:[%s18545_s18 + $0x68] sm:$0xff] %vm11805_vm6, %v11724_v22  ;;  %11767 = vrot.lane.b32.xlu0 %v18738_v53, %s14021_s12  ;;  %v10807_v53 = vsel %vm10627_vm12, %v18434_v7, %v12673_v14  ;;  %v13895_v10 = vpop.eup %13894  ;;  %v11064_v62 = vmul.f32 %v13992_v8, %v18529_v35  ;;  %v13995_v8 = vld [vmem:[%s14203_s13 + $0xc3] sm:$0xff]  ;;  %vm10637_vm12 = vcmp.gt.f32.partialorder %v18567_v21, 0.0 }
 0x7fc   : > { %v11391_v39 = vadd.f32 %v11355_v60, %v10807_v53  ;;  %v12671_v43 = vadd.f32 -1.0, %v13895_v10  ;;  %v11359_v58 = vmul.f32 %v13995_v8, %v18532_v17 }
 0x7fd   : > { %v11637_v42 = vadd.f32 %v11601_v26, %v11309_v48  ;;  %v13897_v26 = vpop.eup %13896 }
 0x7fe   : > { %v11502_v24 = vpop.permute.xlu1 %11501  ;;  %v11185_v55 = vpop.permute.xlu0 %11184  ;;  %v10805_v22 = vsel %vm10625_vm13, %v18448_v28, %v12671_v43  ;;  %v12672_v14 = vadd.f32 -1.0, %v13897_v26  ;;  %v10672_v43 = vmin.f32 %v18505_v16, 0.0  ;;  %vm10643_vm13 = vcmp.gt.f32.partialorder %v18614_v27, 0.0 }
 0x7ff   : > { %11673 = vst.msk [vmem:[%s18575_s23 + $0x60] sm:$0xff] %vm2718_vm3, %v11637_v42  ;;  %v11310_v38 = vmul.f32 %v11185_v55, %v11058_v13  ;;  %v11607_v9 = vmul.f32 %v11502_v24, %v11391_v39  ;;  %v13993_v42 = vld [vmem:[%s14203_s13 + $0x93] sm:$0xff]  ;;  %v10666_v13 = vmin.f32 %v18489_v51, 0.0  ;;  %v13899_v4 = vpop.eup %13898  ;;  %v11062_v39 = vmul.f32 %v13994_v33, %v18529_v35 }
 0x800   : > { %v11353_v11 = vmul.f32 %v13993_v42, %v18532_v17  ;;  %v11061_v55 = vmul.f32 %v13993_v42, %v18529_v35 }
 0x801   : > { %v11638_v15 = vadd.f32 %v11602_v47, %v11310_v38  ;;  %v10806_v38 = vsel %vm10626_vm11, %v18455_v29, %v12672_v14  ;;  %vm10641_vm11 = vcmp.gt.f32.partialorder %v18638_v1, 0.0 }
 0x802   : > { %v11734_v32 = vpop.permute.xlu1 %11733  ;;  %v11507_v12 = vpop.permute.xlu0 %11506  ;;  %v11389_v5 = vadd.f32 %v11353_v11, %v10805_v22  ;;  %v11390_v40 = vadd.f32 %v11354_v57, %v10806_v38  ;;  %v10735_v22 = vmul.f32 1.442695, %v10672_v43  ;;  %v10676_v43 = vmin.f32 %v18558_v19, 0.0 }
 0x803   : > { %11824 = vst.msk [vmem:[%s18545_s18 + $0x90] sm:$0xff] %vm11805_vm6, %v11734_v32  ;;  %v11608_v0 = vmul.f32 %v11507_v12, %v11392_v20  ;;  %v10723_v32 = vmul.f32 1.442695, %v10666_v13  ;;  %v12677_v12 = vadd.f32 -1.0, %v13899_v4  ;;  %v10669_v13 = vmin.f32 %v18514_v6, 0.0 }
 0x804   : > { %11674 = vst.msk [vmem:[%s18575_s23 + $0x68] sm:$0xff] %vm2718_vm3, %v11638_v15 }
 0x805   : > { %13904 = vpow2.f32 %v10723_v32  ;;  %v10811_v50 = vsel %vm10631_vm15, %v18468_v52, %v12677_v12  ;;  %vm10644_vm15 = vcmp.gt.f32.partialorder %v18643_v34, 0.0 }
 0x806   : > { %v11210_v7 = vpop.permute.xlu1 %11209  ;;  %v11736_v25 = vpop.permute.xlu0 %11735 }
 0x807   : > { %v11315_v54 = vmul.f32 %v11210_v7, %v11063_v37  ;;  %11825 = vst.msk [vmem:[%s18545_s18 + $0x98] sm:$0xff] %vm11805_vm6, %v11736_v25  ;;  %v10671_v37 = vmin.f32 %v18497_v56, 0.0  ;;  %v13901_v7 = vpop.eup %13900 }
 0x808   : > { %v13903_v59 = vpop.eup %13902 }
 0x809   : > { %v11643_v61 = vadd.f32 %v11607_v9, %v11315_v54  ;;  %v10733_v49 = vmul.f32 1.442695, %v10671_v37  ;;  %v12675_v11 = vadd.f32 -1.0, %v13903_v59 }
 0x80a   : > { %v11492_v2 = vpop.permute.xlu1 %11491  ;;  %v11215_v36 = vpop.permute.xlu0 %11214 }
 0x80b   : > { %11679 = vst.msk [vmem:[%s18575_s23 + $0x90] sm:$0xff] %vm2718_vm3, %v11643_v61  ;;  %v11316_v48 = vmul.f32 %v11215_v36, %v11064_v62  ;;  %v11605_v47 = vmul.f32 %v11492_v2, %v11389_v5  ;;  %v12678_v61 = vadd.f32 -1.0, %v13901_v7  ;;  %v11395_v2 = vadd.f32 %v11359_v58, %v10811_v50  ;;  %v13998_v50 = vld [vmem:[%s14203_s13 + $0xbb] sm:$0xff] }
 0x80c   : > { %v11067_v62 = vmul.f32 %v13995_v8, %v18529_v35  ;;  %13906 = vpow2.f32 %v10733_v49  ;;  %v10809_v4 = vsel %vm10629_vm2, %v18482_v3, %v12675_v11  ;;  %v10673_v11 = vmin.f32 %v18567_v21, 0.0 }
 0x80d   : > { %v11644_v31 = vadd.f32 %v11608_v0, %v11316_v48  ;;  %v10812_v26 = vsel %vm10632_vm1, %v18475_v45, %v12678_v61  ;;  %13908 = vpow2.f32 %v10735_v22  ;;  %v11066_v61 = vmul.f32 %v13998_v50, %v18529_v35 }
 0x80e   : > { %v11730_v18 = vpop.permute.xlu1 %11729  ;;  %v11497_v24 = vpop.permute.xlu0 %11496  ;;  %vm10642_vm1 = vcmp.gt.f32.partialorder %v18660_v44, 0.0 }
 0x80f   : > { %11822 = vst.msk [vmem:[%s18545_s18 + $0x80] sm:$0xff] %vm11805_vm6, %v11730_v18  ;;  %v11606_v10 = vmul.f32 %v11497_v24, %v11390_v40 }
 0x810   : > { %11680 = vst.msk [vmem:[%s18575_s23 + $0x98] sm:$0xff] %vm2718_vm3, %v11644_v31  ;;  %v13996_v31 = vld [vmem:[%s14203_s13 + $0xcb] sm:$0xff] }
 0x811   : > { %v11360_v18 = vmul.f32 %v13996_v31, %v18532_v17  ;;  %v11068_v24 = vmul.f32 %v13996_v31, %v18529_v35 }
 0x812   : > { %v11200_v28 = vpop.permute.xlu1 %11199  ;;  %v11732_v15 = vpop.permute.xlu0 %11731 }
 0x813   : > { %v11313_v53 = vmul.f32 %v11200_v28, %v11061_v55  ;;  %11823 = vst.msk [vmem:[%s18545_s18 + $0x88] sm:$0xff] %vm11805_vm6, %v11732_v15  ;;  %v11396_v42 = vadd.f32 %v11360_v18, %v10812_v26  ;;  %v13905_v5 = vpop.eup %13904  ;;  %v13997_v15 = vld [vmem:[%s14203_s13 + $0xb3] sm:$0xff]  ;;  %v10743_v18 = vmul.f32 1.442695, %v10676_v43 }
 0x814   : > { %v11357_v32 = vmul.f32 %v13997_v15, %v18532_v17  ;;  %v12676_v33 = vadd.f32 -1.0, %v13905_v5  ;;  %v11065_v12 = vmul.f32 %v13997_v15, %v18529_v35 }
 0x815   : > { %v11641_v60 = vadd.f32 %v11605_v47, %v11313_v53  ;;  %v10729_v53 = vmul.f32 1.442695, %v10669_v13 }
 0x816   : > { %v11522_v41 = vpop.permute.xlu1 %11521  ;;  %v11205_v29 = vpop.permute.xlu0 %11204  ;;  %v11393_v40 = vadd.f32 %v11357_v32, %v10809_v4  ;;  %v10737_v32 = vmul.f32 1.442695, %v10673_v11 }
 0x817   : > { %11677 = vst.msk [vmem:[%s18575_s23 + $0x80] sm:$0xff] %vm2718_vm3, %v11641_v60  ;;  %v11314_v9 = vmul.f32 %v11205_v29, %v11062_v39  ;;  %v11611_v36 = vmul.f32 %v11522_v41, %v11395_v2  ;;  %v10670_v60 = vmin.f32 %v18521_v63, 0.0  ;;  %13910 = vpow2.f32 %v10729_v53 }
 0x818   : > { %v10675_v41 = vmin.f32 %v18536_v23, 0.0  ;;  %v10810_v29 = vsel %vm10630_vm5, %v18489_v51, %v12676_v33  ;;  %v10674_v33 = vmin.f32 %v18593_v30, 0.0 }
 0x819   : > { %v11642_v54 = vadd.f32 %v11606_v10, %v11314_v9  ;;  %v13907_v39 = vpop.eup %13906  ;;  %v10731_v9 = vmul.f32 1.442695, %v10670_v60 }
 0x81a   : > { %v11742_v25 = vpop.permute.xlu1 %11741  ;;  %v11527_v20 = vpop.permute.xlu0 %11526  ;;  %v12681_v8 = vadd.f32 -1.0, %v13907_v39  ;;  %v10679_v39 = vmin.f32 %v18614_v27, 0.0 }
 0x81b   : > { %11828 = vst.msk [vmem:[%s18545_s18 + $0xb0] sm:$0xff] %vm11805_vm6, %v11742_v25  ;;  %v11612_v55 = vmul.f32 %v11527_v20, %v11396_v42  ;;  %v10741_v20 = vmul.f32 1.442695, %v10675_v41  ;;  %13912 = vpow2.f32 %v10731_v9  ;;  %v13909_v2 = vpop.eup %13908 }
 0x81c   : > { %11678 = vst.msk [vmem:[%s18575_s23 + $0x88] sm:$0xff] %vm2718_vm3, %v11642_v54  ;;  %v11358_v54 = vmul.f32 %v13998_v50, %v18532_v17  ;;  %v10815_v59 = vsel %vm10635_vm7, %v18497_v56, %v12681_v8  ;;  %v12682_v22 = vadd.f32 -1.0, %v13909_v2  ;;  %v10739_v50 = vmul.f32 1.442695, %v10674_v33  ;;  %v14002_v2 = vld [vmem:[%s14203_s13 + $0xdb] sm:$0xff] }
 0x81d   : > { %13914 = vpow2.f32 %v10741_v20  ;;  %v10749_v8 = vmul.f32 1.442695, %v10679_v39 }
 0x81e   : > { %v11230_v52 = vpop.permute.xlu1 %11229  ;;  %v11744_v48 = vpop.permute.xlu0 %11743  ;;  %v11394_v49 = vadd.f32 %v11358_v54, %v10810_v29  ;;  %v10816_v13 = vsel %vm10636_vm0, %v18505_v16, %v12682_v22  ;;  %13916 = vpow2.f32 %v10743_v18  ;;  %v14001_v29 = vld [vmem:[%s14203_s13 + $0xd3] sm:$0xff] }
 0x81f   : > { %v11319_v0 = vmul.f32 %v11230_v52, %v11067_v62  ;;  %11829 = vst.msk [vmem:[%s18545_s18 + $0xb8] sm:$0xff] %vm11805_vm6, %v11744_v48  ;;  %13918 = vpow2.f32 %v10737_v32 }
 0x820   : > { %13920 = vpow2.f32 %v10739_v50 }
 0x821   : > { %v11647_v46 = vadd.f32 %v11611_v36, %v11319_v0  ;;  %v13999_v0 = vld [vmem:[%s14203_s13 + $0xe3] sm:$0xff]  ;;  %13922 = vpow2.f32 %v10749_v8 }
 0x822   : > { %v11512_v14 = vpop.permute.xlu1 %11511  ;;  %v11235_v45 = vpop.permute.xlu0 %11234  ;;  %v11363_v48 = vmul.f32 %v13999_v0, %v18532_v17  ;;  %v11071_v42 = vmul.f32 %v13999_v0, %v18529_v35  ;;  %v10677_v0 = vmin.f32 %v18638_v1, 0.0 }
 0x823   : > { %11683 = vst.msk [vmem:[%s18575_s23 + $0xb0] sm:$0xff] %vm2718_vm3, %v11647_v46  ;;  %v11320_v28 = vmul.f32 %v11235_v45, %v11068_v24  ;;  %v11609_v37 = vmul.f32 %v11512_v14, %v11393_v40 }
 0x824   : > { %v11399_v46 = vadd.f32 %v11363_v48, %v10815_v59  ;;  %v13911_v14 = vpop.eup %13910  ;;  %v11070_v59 = vmul.f32 %v14002_v2, %v18529_v35  ;;  %v14003_v48 = vld [vmem:[%s14203_s13 + $0x103] sm:$0xff] }
 0x825   : > { %v11648_v47 = vadd.f32 %v11612_v55, %v11320_v28  ;;  %v14000_v55 = vld [vmem:[%s14203_s13 + $0xeb] sm:$0xff]  ;;  %v11367_v22 = vmul.f32 %v14003_v48, %v18532_v17 }
 0x826   : > { %v11738_v38 = vpop.permute.xlu1 %11737  ;;  %v11517_v57 = vpop.permute.xlu0 %11516  ;;  %v11364_v28 = vmul.f32 %v14000_v55, %v18532_v17  ;;  %v11072_v15 = vmul.f32 %v14000_v55, %v18529_v35 }
 0x827   : > { %11826 = vst.msk [vmem:[%s18545_s18 + $0xa0] sm:$0xff] %vm11805_vm6, %v11738_v38  ;;  %v11610_v62 = vmul.f32 %v11517_v57, %v11394_v49  ;;  %v12679_v38 = vadd.f32 -1.0, %v13911_v14 }
 0x828   : > { %11684 = vst.msk [vmem:[%s18575_s23 + $0xb8] sm:$0xff] %vm2718_vm3, %v11648_v47  ;;  %v11400_v47 = vadd.f32 %v11364_v28, %v10816_v13  ;;  %v13913_v57 = vpop.eup %13912  ;;  %v10745_v13 = vmul.f32 1.442695, %v10677_v0 }
 0x82a   : > { %v11220_v3 = vpop.permute.xlu1 %11219  ;;  %v11740_v10 = vpop.permute.xlu0 %11739  ;;  %13924 = vpow2.f32 %v10745_v13 }
 0x82b   : > { %v11317_v7 = vmul.f32 %v11220_v3, %v11065_v12  ;;  %11827 = vst.msk [vmem:[%s18545_s18 + $0xa8] sm:$0xff] %vm11805_vm6, %v11740_v10  ;;  %v10813_v12 = vsel %vm10633_vm4, %v18514_v6, %v12679_v38  ;;  %v12680_v10 = vadd.f32 -1.0, %v13913_v57  ;;  %v11069_v6 = vmul.f32 %v14001_v29, %v18529_v35  ;;  %v14004_v38 = vld [vmem:[%s14203_s13 + $0x10b] sm:$0xff] }
 0x82c   : > { %v11076_v57 = vmul.f32 %v14004_v38, %v18529_v35 }
 0x82d   : > { %v11645_v25 = vadd.f32 %v11609_v37, %v11317_v7  ;;  %v13915_v37 = vpop.eup %13914  ;;  %v11361_v7 = vmul.f32 %v14001_v29, %v18532_v17 }
 0x82e   : > { %v11542_v58 = vpop.permute.xlu1 %11541  ;;  %v11225_v51 = vpop.permute.xlu0 %11224  ;;  %v12685_v49 = vadd.f32 -1.0, %v13915_v37 }
 0x82f   : > { %11681 = vst.msk [vmem:[%s18575_s23 + $0xa0] sm:$0xff] %vm2718_vm3, %v11645_v25  ;;  %v11318_v52 = vmul.f32 %v11225_v51, %v11066_v61  ;;  %v11615_v24 = vmul.f32 %v11542_v58, %v11399_v46  ;;  %v11397_v54 = vadd.f32 %v11361_v7, %v10813_v12  ;;  %v10814_v61 = vsel %vm10634_vm14, %v18521_v63, %v12680_v10  ;;  %v13917_v43 = vpop.eup %13916  ;;  %v14005_v7 = vld [vmem:[%s14203_s13 + $0xf3] sm:$0xff] }
 0x830   : > { %v12686_v18 = vadd.f32 -1.0, %v13917_v43  ;;  %v10680_v46 = vmin.f32 %v18643_v34, 0.0  ;;  %v11365_v10 = vmul.f32 %v14005_v7, %v18532_v17 }
 0x831   : > { %v11646_v36 = vadd.f32 %v11610_v62, %v11318_v52  ;;  %v11362_v62 = vmul.f32 %v14002_v2, %v18532_v17 }
 0x832   : > { %v11750_v26 = vpop.permute.xlu1 %11749  ;;  %v11547_v31 = vpop.permute.xlu0 %11546  ;;  %v10820_v28 = vsel %vm10640_vm10, %v18558_v19, %v12686_v18  ;;  %v10678_v19 = vmin.f32 %v18660_v44, 0.0 }
 0x833   : > { %11832 = vst.msk [vmem:[%s18545_s18 + $0xd0] sm:$0xff] %vm11805_vm6, %v11750_v26  ;;  %v11616_v60 = vmul.f32 %v11547_v31, %v11400_v47  ;;  %v10819_v26 = vsel %vm10639_vm8, %v18536_v23, %v12685_v49  ;;  %v11075_v23 = vmul.f32 %v14003_v48, %v18529_v35  ;;  %v10751_v47 = vmul.f32 1.442695, %v10680_v46 }
 0x834   : > { %11682 = vst.msk [vmem:[%s18575_s23 + $0xa8] sm:$0xff] %vm2718_vm3, %v11646_v36  ;;  %v11398_v36 = vadd.f32 %v11362_v62, %v10814_v61  ;;  %v11403_v11 = vadd.f32 %v11367_v22, %v10819_v26 }
 0x835   : > { %13926 = vpow2.f32 %v10751_v47 }
 0x836   : > { %v11250_v56 = vpop.permute.xlu1 %11249  ;;  %v11752_v5 = vpop.permute.xlu0 %11751 }
 0x837   : > { %v11323_v45 = vmul.f32 %v11250_v56, %v11071_v42  ;;  %11833 = vst.msk [vmem:[%s18545_s18 + $0xd8] sm:$0xff] %vm11805_vm6, %v11752_v5 }
 0x839   : > { %v11651_v4 = vadd.f32 %v11615_v24, %v11323_v45  ;;  %v13919_v45 = vpop.eup %13918 }
 0x83a   : > { %v11532_v53 = vpop.permute.xlu1 %11531  ;;  %v11255_v16 = vpop.permute.xlu0 %11254 }
 0x83b   : > { %11687 = vst.msk [vmem:[%s18575_s23 + $0xd0] sm:$0xff] %vm2718_vm3, %v11651_v4  ;;  %v11324_v40 = vmul.f32 %v11255_v16, %v11072_v15  ;;  %v11613_v58 = vmul.f32 %v11532_v53, %v11397_v54  ;;  %v11368_v53 = vmul.f32 %v14004_v38, %v18532_v17  ;;  %v12683_v16 = vadd.f32 -1.0, %v13919_v45 }
 0x83c   : > { %v10747_v54 = vmul.f32 1.442695, %v10678_v19 }
 0x83d   : > { %v11652_v3 = vadd.f32 %v11616_v60, %v11324_v40  ;;  %v11404_v32 = vadd.f32 %v11368_v53, %v10820_v28  ;;  %v13921_v40 = vpop.eup %13920  ;;  %v14009_v53 = vld [vmem:[%s14203_s13 + $0x12b] sm:$0xff] }
 0x83e   : > { %v11746_v41 = vpop.permute.xlu1 %11745  ;;  %v11537_v9 = vpop.permute.xlu0 %11536  ;;  %13928 = vpow2.f32 %v10747_v54 }
 0x83f   : > { %11830 = vst.msk [vmem:[%s18545_s18 + $0xc0] sm:$0xff] %vm11805_vm6, %v11746_v41  ;;  %v11614_v42 = vmul.f32 %v11537_v9, %v11398_v36  ;;  %v10817_v41 = vsel %vm10637_vm12, %v18567_v21, %v12683_v16  ;;  %v13923_v29 = vpop.eup %13922  ;;  %v12684_v9 = vadd.f32 -1.0, %v13921_v40 }
 0x840   : > { %11688 = vst.msk [vmem:[%s18575_s23 + $0xd8] sm:$0xff] %vm2718_vm3, %v11652_v3  ;;  %v12689_v49 = vadd.f32 -1.0, %v13923_v29  ;;  %v13925_v26 = vpop.eup %13924 }
 0x842   : > { %v11240_v25 = vpop.permute.xlu1 %11239  ;;  %v11748_v51 = vpop.permute.xlu0 %11747 }
 0x843   : > { %v11321_v20 = vmul.f32 %v11240_v25, %v11069_v6  ;;  %11831 = vst.msk [vmem:[%s18545_s18 + $0xc8] sm:$0xff] %vm11805_vm6, %v11748_v51  ;;  %v11401_v6 = vadd.f32 %v11365_v10, %v10817_v41  ;;  %v11073_v25 = vmul.f32 %v14005_v7, %v18529_v35  ;;  %v14006_v51 = vld [vmem:[%s14203_s13 + $0xfb] sm:$0xff]  ;;  %v13927_v48 = vpop.eup %13926 }
 0x844   : > { %v11366_v43 = vmul.f32 %v14006_v51, %v18532_v17  ;;  %v11074_v36 = vmul.f32 %v14006_v51, %v18529_v35  ;;  %v14010_v10 = vld [vmem:[%s14203_s13 + $0x11b] sm:$0xff] }
 0x845   : > { %v11649_v52 = vadd.f32 %v11613_v58, %v11321_v20  ;;  %v10818_v58 = vsel %vm10638_vm9, %v18593_v30, %v12684_v9  ;;  %v14007_v30 = vld [vmem:[%s14203_s13 + $0x123] sm:$0xff]  ;;  %v11370_v9 = vmul.f32 %v14010_v10, %v18532_v17 }
 0x846   : > { %v11562_v63 = vpop.permute.xlu1 %11561  ;;  %v11245_v31 = vpop.permute.xlu0 %11244  ;;  %v11402_v62 = vadd.f32 %v11366_v43, %v10818_v58  ;;  %v11079_v46 = vmul.f32 %v14007_v30, %v18529_v35 }
 0x847   : > { %11685 = vst.msk [vmem:[%s18575_s23 + $0xc0] sm:$0xff] %vm2718_vm3, %v11649_v52  ;;  %v11322_v56 = vmul.f32 %v11245_v31, %v11070_v59  ;;  %v11619_v5 = vmul.f32 %v11562_v63, %v11403_v11  ;;  %v10823_v52 = vsel %vm10643_vm13, %v18614_v27, %v12689_v49  ;;  %v11371_v63 = vmul.f32 %v14007_v30, %v18532_v17 }
 0x849   : > { %v11650_v14 = vadd.f32 %v11614_v42, %v11322_v56  ;;  %v11407_v18 = vadd.f32 %v11371_v63, %v10823_v52  ;;  %v12687_v56 = vadd.f32 -1.0, %v13925_v26 }
 0x84a   : > { %v11270_v24 = vpop.permute.xlu1 %11269  ;;  %v11567_v4 = vpop.permute.xlu0 %11566 }
 0x84b   : > { %v11327_v55 = vmul.f32 %v11270_v24, %v11075_v23  ;;  %11686 = vst.msk [vmem:[%s18575_s23 + $0xc8] sm:$0xff] %vm2718_vm3, %v11650_v14  ;;  %v11620_v12 = vmul.f32 %v11567_v4, %v11404_v32  ;;  %v12690_v24 = vadd.f32 -1.0, %v13927_v48  ;;  %v10821_v45 = vsel %vm10641_vm11, %v18638_v1, %v12687_v56  ;;  %v13929_v38 = vpop.eup %13928 }
 0x84d   : > { %v11655_v15 = vadd.f32 %v11619_v5, %v11327_v55  ;;  %v14008_v55 = vld [vmem:[%s14203_s13 + $0x113] sm:$0xff]  ;;  %v10824_v4 = vsel %vm10644_vm15, %v18643_v34, %v12690_v24  ;;  %v12688_v34 = vadd.f32 -1.0, %v13929_v38 }
 0x84e   : > { %v11552_v33 = vpop.permute.xlu1 %11551  ;;  %v11275_v60 = vpop.permute.xlu0 %11274  ;;  %v11369_v28 = vmul.f32 %v14008_v55, %v18532_v17  ;;  %v11077_v1 = vmul.f32 %v14008_v55, %v18529_v35 }
 0x84f   : > { %11691 = vst.msk [vmem:[%s18575_s23 + $0xf0] sm:$0xff] %vm2718_vm3, %v11655_v15  ;;  %v11328_v3 = vmul.f32 %v11275_v60, %v11076_v57  ;;  %v11617_v8 = vmul.f32 %v11552_v33, %v11401_v6  ;;  %v11372_v15 = vmul.f32 %v14009_v53, %v18532_v17  ;;  %v11080_v57 = vmul.f32 %v14009_v53, %v18529_v35 }
 0x850   : > { %v11405_v32 = vadd.f32 %v11369_v28, %v10821_v45  ;;  %v10822_v29 = vsel %vm10642_vm1, %v18660_v44, %v12688_v34  ;;  %v11078_v6 = vmul.f32 %v14010_v10, %v18529_v35 }
 0x851   : > { %v11656_v39 = vadd.f32 %v11620_v12, %v11328_v3  ;;  %v11408_v16 = vadd.f32 %v11372_v15, %v10824_v4 }
 0x852   : > { %v11754_v37 = vpop.permute.xlu1 %11753  ;;  %v11557_v50 = vpop.permute.xlu0 %11556 }
 0x853   : > { %11834 = vst.msk [vmem:[%s18545_s18 + $0xe0] sm:$0xff] %vm11805_vm6, %v11754_v37  ;;  %v11618_v22 = vmul.f32 %v11557_v50, %v11402_v62  ;;  %v11406_v50 = vadd.f32 %v11370_v9, %v10822_v29 }
 0x854   : > { %11692 = vst.msk [vmem:[%s18575_s23 + $0xf8] sm:$0xff] %vm2718_vm3, %v11656_v39 }
 0x856   : > { %v11260_v21 = vpop.permute.xlu1 %11259  ;;  %v11756_v20 = vpop.permute.xlu0 %11755 }
 0x857   : > { %v11325_v61 = vmul.f32 %v11260_v21, %v11073_v25  ;;  %11835 = vst.msk [vmem:[%s18545_s18 + $0xe8] sm:$0xff] %vm11805_vm6, %v11756_v20 }
 0x859   : > { %v11653_v2 = vadd.f32 %v11617_v8, %v11325_v61 }
 0x85a   : > { %v11582_v59 = vpop.permute.xlu1 %11581  ;;  %v11265_v0 = vpop.permute.xlu0 %11264 }
 0x85b   : > { %11689 = vst.msk [vmem:[%s18575_s23 + $0xe0] sm:$0xff] %vm2718_vm3, %v11653_v2  ;;  %v11326_v31 = vmul.f32 %v11265_v0, %v11074_v36  ;;  %v11623_v11 = vmul.f32 %v11582_v59, %v11407_v18 }
 0x85d   : > { %v11654_v27 = vadd.f32 %v11618_v22, %v11326_v31 }
 0x85e   : > { %v11290_v42 = vpop.permute.xlu1 %11289  ;;  %v11760_v14 = vpop.permute.xlu0 %11759 }
 0x85f   : > { %v11331_v23 = vmul.f32 %v11290_v42, %v11079_v46  ;;  %11690 = vst.msk [vmem:[%s18575_s23 + $0xe8] sm:$0xff] %vm2718_vm3, %v11654_v27 }
 0x860   : > { %11837 = vst.msk [vmem:[%s18545_s18 + $0xf8] sm:$0xff] %vm11805_vm6, %v11760_v14 }
 0x861   : > { %v11659_v13 = vadd.f32 %v11623_v11, %v11331_v23 }
 0x862   : > { %v11572_v5 = vpop.permute.xlu1 %11571  ;;  %v11587_v47 = vpop.permute.xlu0 %11586 }
 0x863   : > { %11695 = vst.msk [vmem:[%s18575_s23 + $0x110] sm:$0xff] %vm2718_vm3, %v11659_v13  ;;  %v11621_v60 = vmul.f32 %v11572_v5, %v11405_v32  ;;  %v11624_v12 = vmul.f32 %v11587_v47, %v11408_v16 }
 0x866   : > { %v11280_v33 = vpop.permute.xlu1 %11279  ;;  %v11295_v40 = vpop.permute.xlu0 %11294 }
 0x867   : > { %v11329_v19 = vmul.f32 %v11280_v33, %v11077_v1  ;;  %v11332_v3 = vmul.f32 %v11295_v40, %v11080_v57 }
 0x869   : > { %v11657_v41 = vadd.f32 %v11621_v60, %v11329_v19  ;;  %v11660_v39 = vadd.f32 %v11624_v12, %v11332_v3 }
 0x86a   : > { %v11758_v37 = vpop.permute.xlu1 %11757  ;;  %v11577_v7 = vpop.permute.xlu0 %11576 }
 0x86b   : > { %11693 = vst.msk [vmem:[%s18575_s23 + $0x100] sm:$0xff] %vm2718_vm3, %v11657_v41  ;;  %11696 = vst.msk [vmem:[%s18575_s23 + $0x118] sm:$0xff] %vm2718_vm3, %v11660_v39  ;;  %v11622_v21 = vmul.f32 %v11577_v7, %v11406_v50 }
 0x86c   : > { %11836 = vst.msk [vmem:[%s18545_s18 + $0xf0] sm:$0xff] %vm11805_vm6, %v11758_v37 }
 0x86e   : > { %v11762_v54 = vpop.permute.xlu1 %11761  ;;  %v11285_v25 = vpop.permute.xlu0 %11284 }
 0x86f   : > { %11838 = vst.msk [vmem:[%s18545_s18 + $0x100] sm:$0xff] %vm11805_vm6, %v11762_v54  ;;  %v11330_v49 = vmul.f32 %v11285_v25, %v11078_v6 }
 0x871   : > { %v11658_v8 = vadd.f32 %v11622_v21, %v11330_v49 }
 0x872   : > { %v11766_v44 = vpop.permute.xlu1 %11765  ;;  %v11764_v58 = vpop.permute.xlu0 %11763 }
 0x873   : > { %11840 = vst.msk [vmem:[%s18545_s18 + $0x110] sm:$0xff] %vm11805_vm6, %v11766_v44  ;;  %11839 = vst.msk [vmem:[%s18545_s18 + $0x108] sm:$0xff] %vm11805_vm6, %v11764_v58 }
 0x874   : > { %11694 = vst.msk [vmem:[%s18575_s23 + $0x108] sm:$0xff] %vm2718_vm3, %v11658_v8 }
 0x876   : > { %v11768_v61 = vpop.permute.xlu0 %11767 }
 0x877   : > { %11841 = vst.msk [vmem:[%s18545_s18 + $0x118] sm:$0xff] %vm11805_vm6, %v11768_v61 }
 0x878 PF: > { %s17_s21 = sadd.s32 1, %s14018_s21  }
 0x879   : > { %p14_p4 = scmp.ge.s32.totalorder %s17_s21, 4  }
 0x87b   :  { %16 = sbr.rel (!%p14_p4) target bundleno = 1 (0x1), region = 82 }

</bundles_post_ra>
